<compile_context>
chip_gen: v7x
topology: tpu7x:2x2x1
jax: 0.10.0
libtpu: 0.0.40
codegen_flags: <defaults>
</compile_context>

<pallas_src>
import jax
import jax.numpy as jnp
from jax.experimental import pallas as pl
from jax.experimental.pallas import tpu as pltpu


# ---------------------------------------------------------------------------
# Kernel 1: conv1 + pool + ReLU + conv2 + pool + ReLU   (one image per step)
# ---------------------------------------------------------------------------
def _conv_stage_kernel(x_ref, w1_ref, b1_ref, w2_ref, b2_ref, o_ref,
                       xpad_sc, hm1_sc, p1_sc, hm2_sc):
    f32 = jnp.float32

    # Zero-padded 30x30 input built in VMEM (padding=1 done in-kernel), lane-
    # replicated once across the 32 conv1 output channels so every tap below
    # is a plain shifted load.
    xpad_sc[...] = jnp.zeros(xpad_sc.shape, f32)
    xpad_sc[1:29, 1:29, :] = jnp.broadcast_to(x_ref[...], (28, 28, 32))

    # conv1: Cin=1, Cout=32.  K=1 would leave the MXU idle, so compute the 9
    # shifted taps as VPU broadcast-FMAs (channels live on the lane axis).
    acc1 = None
    for dh in range(3):
        for dw in range(3):
            tap = xpad_sc[dh:dh + 28, dw:dw + 28, :]            # [28,28,32]
            term = tap * w1_ref[dh, dw, :]                      # [28,28,32]
            acc1 = term if acc1 is None else acc1 + term

    # pool1 (2x2/2): rows via pairwise max, columns via stride-2 VMEM reads.
    # bias + ReLU are monotone per-channel -> exact when applied post-pool.
    for i in range(14):
        hm1_sc[i] = jnp.maximum(acc1[2 * i], acc1[2 * i + 1])   # [28,32]
    p1 = jnp.maximum(hm1_sc[:, pl.ds(0, 14, stride=2), :],
                     hm1_sc[:, pl.ds(1, 14, stride=2), :])      # [14,14,32]
    p1 = jnp.maximum(p1 + b1_ref[0, :], 0.0)                    # bias + ReLU

    # conv2 input in a flattened (h*16 + w), zero-padded layout so every one
    # of the 9 taps is a single contiguous [224,32] slice -> one clean MXU
    # matmul per tap (im2col never touches HBM, no awkward reshapes).
    p1_sc[...] = jnp.zeros(p1_sc.shape, f32)                    # [272,32]
    for h in range(14):
        base = (h + 1) * 16 + 1
        p1_sc[base:base + 14, :] = p1[h]

    # conv2: Cin=32, Cout=64, bf16 operands on the MXU, f32 accumulation.
    acc2 = jnp.zeros((224, 64), f32)
    for dh in range(3):
        for dw in range(3):
            s = dh * 16 + dw
            tap = p1_sc[s:s + 224, :].astype(jnp.bfloat16)      # [224,32]
            acc2 = acc2 + jnp.dot(tap, w2_ref[dh, dw],
                                  preferred_element_type=f32)

    # pool2 (2x2/2): valid outputs live at flat rows h*16 + w with w < 14.
    for i in range(7):
        hm2_sc[i] = jnp.maximum(acc2[32 * i:32 * i + 16, :],
                                acc2[32 * i + 16:32 * i + 32, :])   # [16,64]
    p2 = jnp.maximum(hm2_sc[:, pl.ds(0, 7, stride=2), :],
                     hm2_sc[:, pl.ds(1, 7, stride=2), :])           # [7,7,64]
    p2 = jnp.maximum(p2 + b2_ref[0, :], 0.0)                        # bias+ReLU
    o_ref[...] = p2.astype(o_ref.dtype)


def conv_stage(x_nhwc, w1k, b1k, w2k, b2k):
    """x_nhwc: [B,28,28,1] f32 -> pooled conv features [B,7,7,64] bf16."""
    B = x_nhwc.shape[0]
    return pl.pallas_call(
        _conv_stage_kernel,
        out_shape=jax.ShapeDtypeStruct((B, 7, 7, 64), jnp.bfloat16),
        grid_spec=pltpu.PrefetchScalarGridSpec(
            num_scalar_prefetch=0,
            grid=(B,),
            in_specs=[
                pl.BlockSpec((None, 28, 28, 1), lambda b: (b, 0, 0, 0)),
                pl.BlockSpec((3, 3, 32), lambda b: (0, 0, 0)),
                pl.BlockSpec((1, 32), lambda b: (0, 0)),
                pl.BlockSpec((3, 3, 32, 64), lambda b: (0, 0, 0, 0)),
                pl.BlockSpec((1, 64), lambda b: (0, 0)),
            ],
            out_specs=pl.BlockSpec((None, 7, 7, 64), lambda b: (b, 0, 0, 0)),
            scratch_shapes=[
                pltpu.VMEM((30, 30, 32), jnp.float32),   # padded, lane-replicated input
                pltpu.VMEM((14, 28, 32), jnp.float32),   # row-pooled conv1
                pltpu.VMEM((272, 32), jnp.float32),      # flat padded conv2 in
                pltpu.VMEM((7, 16, 64), jnp.float32),    # row-pooled conv2
            ],
        ),
        compiler_params=pltpu.CompilerParams(
            dimension_semantics=("parallel",)),
    )(x_nhwc, w1k, b1k, w2k, b2k)


# ---------------------------------------------------------------------------
# Kernel 2: fused fc1 (+ReLU) + fc2
# ---------------------------------------------------------------------------
def _fc_fused_kernel(x_ref, w1_ref, b1_ref, w2_ref, b2_ref, o_ref):
    h = jnp.dot(x_ref[...], w1_ref[...], preferred_element_type=jnp.float32)
    h = jnp.maximum(h + b1_ref[...], 0.0)                       # [bt,128]
    o = jnp.dot(h.astype(jnp.bfloat16), w2_ref[...],
                preferred_element_type=jnp.float32) + b2_ref[...]
    o_ref[...] = o


def fc_stage(x, wfc1k, bfc1k, wfc2k, bfc2k):
    """x: [B, 3136] bf16 (NHWC flatten) -> logits [B, 10] f32."""
    B, K = x.shape
    N1 = wfc1k.shape[1]
    N2 = wfc2k.shape[1]
    bt = B if B <= 128 else 128           # no explicit pad/slice glue
    return pl.pallas_call(
        _fc_fused_kernel,
        out_shape=jax.ShapeDtypeStruct((B, N2), jnp.float32),
        grid_spec=pltpu.PrefetchScalarGridSpec(
            num_scalar_prefetch=0,
            grid=(pl.cdiv(B, bt),),
            in_specs=[
                pl.BlockSpec((bt, K), lambda i: (i, 0)),
                pl.BlockSpec((K, N1), lambda i: (0, 0)),
                pl.BlockSpec((1, N1), lambda i: (0, 0)),
                pl.BlockSpec((N1, N2), lambda i: (0, 0)),
                pl.BlockSpec((1, N2), lambda i: (0, 0)),
            ],
            out_specs=pl.BlockSpec((bt, N2), lambda i: (i, 0)),
        ),
        compiler_params=pltpu.CompilerParams(
            dimension_semantics=("parallel",)),
    )(x, wfc1k, bfc1k, wfc2k, bfc2k)


# ---------------------------------------------------------------------------
# One-time parameter re-layout (host-side / outside the jitted forward)
# ---------------------------------------------------------------------------
def prepare_params(params):
    w1 = params["w1"]                                   # [32, 1, 3, 3] OIHW
    w2 = params["w2"]                                   # [64, 32, 3, 3] OIHW
    w1k = jnp.transpose(w1[:, 0], (1, 2, 0))            # [3, 3, 32]     f32
    w2k = jnp.transpose(w2, (2, 3, 1, 0)).astype(jnp.bfloat16)   # [3,3,32,64]
    # fc1 rows: NCHW-flatten order (c*49 + h*7 + w) -> NHWC-flatten order
    # ((h*7 + w)*64 + c), so the forward needs no NHWC->NCHW transpose.
    i = jnp.arange(64 * 7 * 7)
    perm = (i % 64) * 49 + (i // 64)
    wfc1k = params["wfc1"][perm].astype(jnp.bfloat16)   # [3136, 128]
    wfc2k = params["wfc2"].astype(jnp.bfloat16)         # [128, 10]
    return {
        "w1k": w1k,
        "b1k": params["b1"].reshape(1, 32).astype(jnp.float32),
        "w2k": w2k,
        "b2k": params["b2"].reshape(1, 64).astype(jnp.float32),
        "wfc1k": wfc1k,
        "bfc1k": params["bfc1"].reshape(1, 128).astype(jnp.float32),
        "wfc2k": wfc2k,
        "bfc2k": params["bfc2"].reshape(1, 10).astype(jnp.float32),
    }


# ---------------------------------------------------------------------------
# Conv_Net forward (2 Pallas kernels, only free reshapes in between)
# ---------------------------------------------------------------------------
def conv_net_forward(kp, x_nchw):
    B = x_nchw.shape[0]
    x = x_nchw.reshape(B, 28, 28, 1)        # free: C == 1
    feat = conv_stage(x, kp["w1k"], kp["b1k"], kp["w2k"], kp["b2k"])
    feat = feat.reshape(B, 7 * 7 * 64)      # free NHWC flatten (row-major)
    return fc_stage(feat, kp["wfc1k"], kp["bfc1k"], kp["wfc2k"], kp["bfc2k"])


# Pure-JAX f32 reference, mirrors the PyTorch module exactly (NCHW throughout).
def reference_forward(params, x):
    def conv(x, w, b):
        y = jax.lax.conv_general_dilated(
            x, w, (1, 1), ((1, 1), (1, 1)),
            dimension_numbers=("NCHW", "OIHW", "NCHW"))
        return y + b[None, :, None, None]

    def pool(x):
        return jax.lax.reduce_window(x, -jnp.inf, jax.lax.max,
                                     (1, 1, 2, 2), (1, 1, 2, 2), "VALID")

    x = pool(jax.nn.relu(conv(x, params["w1"], params["b1"])))
    x = pool(jax.nn.relu(conv(x, params["w2"], params["b2"])))
    x = x.reshape(x.shape[0], -1)
    x = jax.nn.relu(x @ params["wfc1"] + params["bfc1"])
    return x @ params["wfc2"] + params["bfc2"]


def init_params(key):
    ks = jax.random.split(key, 8)

    def rnd(k, shape, scale):
        return jax.random.normal(k, shape, jnp.float32) * scale

    # FC weights stored as [in_features, out_features] (PyTorch weight.T).
    return {
        "w1":   rnd(ks[0], (32, 1, 3, 3), 0.10),
        "b1":   rnd(ks[1], (32,), 0.10),
        "w2":   rnd(ks[2], (64, 32, 3, 3), 0.05),
        "b2":   rnd(ks[3], (64,), 0.05),
        "wfc1": rnd(ks[4], (64 * 7 * 7, 128), 0.02),
        "bfc1": rnd(ks[5], (128,), 0.02),
        "wfc2": rnd(ks[6], (128, 10), 0.05),
        "bfc2": rnd(ks[7], (10,), 0.05),
    }


if __name__ == "__main__":
    key = jax.random.PRNGKey(0)
    pkey, xkey = jax.random.split(key)
    params = init_params(pkey)
    kparams = prepare_params(params)        # one-time weight re-layout

    # 28x28 single-channel input is implied by fc1's 64*7*7 input features.
    x = jax.random.normal(xkey, (2, 1, 28, 28), jnp.float32)

    fwd = jax.jit(conv_net_forward)
    out = jax.block_until_ready(fwd(kparams, x))
    assert out.shape == (2, 10)

    ref = jax.block_until_ready(reference_forward(params, x))
    # bf16 MXU operands (f32 accumulation) -> allow a small numeric tolerance.
    assert jnp.allclose(out, ref, atol=5e-2, rtol=5e-2), (out, ref)

    print("KERNEL_OK")
</pallas_src>

<mosaic_0001>
module attributes {stable_mosaic.version = 11 : i64} {
  func.func @_conv_stage_kernel(%arg0: i32, %arg1: memref<1x28x28x1xf32, #tpu.memory_space<vmem>>, %arg2: memref<3x3x32xf32, #tpu.memory_space<vmem>>, %arg3: memref<1x32xf32, #tpu.memory_space<vmem>>, %arg4: memref<3x3x32x64xbf16, #tpu.memory_space<vmem>>, %arg5: memref<1x64xf32, #tpu.memory_space<vmem>>, %arg6: memref<1x7x7x64xbf16, #tpu.memory_space<vmem>>, %arg7: memref<30x30x32xf32, #tpu.memory_space<vmem>>, %arg8: memref<14x28x32xf32, #tpu.memory_space<vmem>>, %arg9: memref<272x32xf32, #tpu.memory_space<vmem>>, %arg10: memref<7x16x64xf32, #tpu.memory_space<vmem>>) attributes {dimension_semantics = [#tpu.dimension_semantics<parallel>], iteration_bounds = array<i64: 2>, scalar_prefetch = 0 : i64, scratch_operands = 4 : i64, tpu.core_type = #tpu.core_type<tc>, window_params = [{transform_indices = @transform_0, window_bounds = array<i64: 1, 28, 28, 1>}, {pipeline_mode = #tpu.pipeline_mode<synchronous>, transform_indices = @transform_1, window_bounds = array<i64: 3, 3, 32>}, {pipeline_mode = #tpu.pipeline_mode<synchronous>, transform_indices = @transform_2, window_bounds = array<i64: 1, 32>}, {pipeline_mode = #tpu.pipeline_mode<synchronous>, transform_indices = @transform_3, window_bounds = array<i64: 3, 3, 32, 64>}, {pipeline_mode = #tpu.pipeline_mode<synchronous>, transform_indices = @transform_4, window_bounds = array<i64: 1, 64>}, {transform_indices = @transform_5, window_bounds = array<i64: 1, 7, 7, 64>}]} {
    %cst = arith.constant 0.000000e+00 : f32
    %0 = vector.broadcast %cst : f32 to vector<30x30x32xf32>
    %c0 = arith.constant 0 : index
    %c0_0 = arith.constant 0 : index
    %c0_1 = arith.constant 0 : index
    %1 = vector.load %arg7[%c0, %c0_0, %c0_1] : memref<30x30x32xf32, #tpu.memory_space<vmem>>, vector<30x30x32xf32>
    tpu.vector_store %arg7[%c0, %c0_0, %c0_1], %0 {strides = array<i32>} : memref<30x30x32xf32, #tpu.memory_space<vmem>>, vector<30x30x32xf32>,
    %c0_2 = arith.constant 0 : index
    %c0_3 = arith.constant 0 : index
    %c0_4 = arith.constant 0 : index
    %c0_5 = arith.constant 0 : index
    %2 = vector.load %arg1[%c0_2, %c0_3, %c0_4, %c0_5] : memref<1x28x28x1xf32, #tpu.memory_space<vmem>>, vector<1x28x28x1xf32>
    %3 = vector.shape_cast %2 : vector<1x28x28x1xf32> to vector<28x28x1xf32>
    %4 = vector.shape_cast %3 : vector<28x28x1xf32> to vector<28x28x1xf32>
    %5 = vector.broadcast %4 : vector<28x28x1xf32> to vector<28x28x32xf32>
    %c1 = arith.constant 1 : index
    %c1_6 = arith.constant 1 : index
    %c0_7 = arith.constant 0 : index
    %6 = vector.load %arg7[%c1, %c1_6, %c0_7] : memref<30x30x32xf32, #tpu.memory_space<vmem>>, vector<28x28x32xf32>
    tpu.vector_store %arg7[%c1, %c1_6, %c0_7], %5 {strides = array<i32>} : memref<30x30x32xf32, #tpu.memory_space<vmem>>, vector<28x28x32xf32>,
    %c0_8 = arith.constant 0 : index
    %c0_9 = arith.constant 0 : index
    %c0_10 = arith.constant 0 : index
    %7 = vector.load %arg7[%c0_8, %c0_9, %c0_10] : memref<30x30x32xf32, #tpu.memory_space<vmem>>, vector<28x28x32xf32>
    %c0_11 = arith.constant 0 : index
    %c0_12 = arith.constant 0 : index
    %c0_13 = arith.constant 0 : index
    %8 = vector.load %arg2[%c0_11, %c0_12, %c0_13] : memref<3x3x32xf32, #tpu.memory_space<vmem>>, vector<1x1x32xf32>
    %9 = vector.shape_cast %8 : vector<1x1x32xf32> to vector<32xf32>
    %10 = vector.shape_cast %9 : vector<32xf32> to vector<1x1x32xf32>
    %11 = vector.broadcast %10 : vector<1x1x32xf32> to vector<28x28x32xf32>
    %12 = arith.mulf %7, %11 : vector<28x28x32xf32>
    %c0_14 = arith.constant 0 : index
    %c1_15 = arith.constant 1 : index
    %c0_16 = arith.constant 0 : index
    %13 = vector.load %arg7[%c0_14, %c1_15, %c0_16] : memref<30x30x32xf32, #tpu.memory_space<vmem>>, vector<28x28x32xf32>
    %c0_17 = arith.constant 0 : index
    %c1_18 = arith.constant 1 : index
    %c0_19 = arith.constant 0 : index
    %14 = vector.load %arg2[%c0_17, %c1_18, %c0_19] : memref<3x3x32xf32, #tpu.memory_space<vmem>>, vector<1x1x32xf32>
    %15 = vector.shape_cast %14 : vector<1x1x32xf32> to vector<32xf32>
    %16 = vector.shape_cast %15 : vector<32xf32> to vector<1x1x32xf32>
    %17 = vector.broadcast %16 : vector<1x1x32xf32> to vector<28x28x32xf32>
    %18 = arith.mulf %13, %17 : vector<28x28x32xf32>
    %19 = arith.addf %12, %18 : vector<28x28x32xf32>
    %c0_20 = arith.constant 0 : index
    %c2 = arith.constant 2 : index
    %c0_21 = arith.constant 0 : index
    %20 = vector.load %arg7[%c0_20, %c2, %c0_21] : memref<30x30x32xf32, #tpu.memory_space<vmem>>, vector<28x28x32xf32>
    %c0_22 = arith.constant 0 : index
    %c2_23 = arith.constant 2 : index
    %c0_24 = arith.constant 0 : index
    %21 = vector.load %arg2[%c0_22, %c2_23, %c0_24] : memref<3x3x32xf32, #tpu.memory_space<vmem>>, vector<1x1x32xf32>
    %22 = vector.shape_cast %21 : vector<1x1x32xf32> to vector<32xf32>
    %23 = vector.shape_cast %22 : vector<32xf32> to vector<1x1x32xf32>
    %24 = vector.broadcast %23 : vector<1x1x32xf32> to vector<28x28x32xf32>
    %25 = arith.mulf %20, %24 : vector<28x28x32xf32>
    %26 = arith.addf %19, %25 : vector<28x28x32xf32>
    %c1_25 = arith.constant 1 : index
    %c0_26 = arith.constant 0 : index
    %c0_27 = arith.constant 0 : index
    %27 = vector.load %arg7[%c1_25, %c0_26, %c0_27] : memref<30x30x32xf32, #tpu.memory_space<vmem>>, vector<28x28x32xf32>
    %c1_28 = arith.constant 1 : index
    %c0_29 = arith.constant 0 : index
    %c0_30 = arith.constant 0 : index
    %28 = vector.load %arg2[%c1_28, %c0_29, %c0_30] : memref<3x3x32xf32, #tpu.memory_space<vmem>>, vector<1x1x32xf32>
    %29 = vector.shape_cast %28 : vector<1x1x32xf32> to vector<32xf32>
    %30 = vector.shape_cast %29 : vector<32xf32> to vector<1x1x32xf32>
    %31 = vector.broadcast %30 : vector<1x1x32xf32> to vector<28x28x32xf32>
    %32 = arith.mulf %27, %31 : vector<28x28x32xf32>
    %33 = arith.addf %26, %32 : vector<28x28x32xf32>
    %c1_31 = arith.constant 1 : index
    %c1_32 = arith.constant 1 : index
    %c0_33 = arith.constant 0 : index
    %34 = vector.load %arg7[%c1_31, %c1_32, %c0_33] : memref<30x30x32xf32, #tpu.memory_space<vmem>>, vector<28x28x32xf32>
    %c1_34 = arith.constant 1 : index
    %c1_35 = arith.constant 1 : index
    %c0_36 = arith.constant 0 : index
    %35 = vector.load %arg2[%c1_34, %c1_35, %c0_36] : memref<3x3x32xf32, #tpu.memory_space<vmem>>, vector<1x1x32xf32>
    %36 = vector.shape_cast %35 : vector<1x1x32xf32> to vector<32xf32>
    %37 = vector.shape_cast %36 : vector<32xf32> to vector<1x1x32xf32>
    %38 = vector.broadcast %37 : vector<1x1x32xf32> to vector<28x28x32xf32>
    %39 = arith.mulf %34, %38 : vector<28x28x32xf32>
    %40 = arith.addf %33, %39 : vector<28x28x32xf32>
    %c1_37 = arith.constant 1 : index
    %c2_38 = arith.constant 2 : index
    %c0_39 = arith.constant 0 : index
    %41 = vector.load %arg7[%c1_37, %c2_38, %c0_39] : memref<30x30x32xf32, #tpu.memory_space<vmem>>, vector<28x28x32xf32>
    %c1_40 = arith.constant 1 : index
    %c2_41 = arith.constant 2 : index
    %c0_42 = arith.constant 0 : index
    %42 = vector.load %arg2[%c1_40, %c2_41, %c0_42] : memref<3x3x32xf32, #tpu.memory_space<vmem>>, vector<1x1x32xf32>
    %43 = vector.shape_cast %42 : vector<1x1x32xf32> to vector<32xf32>
    %44 = vector.shape_cast %43 : vector<32xf32> to vector<1x1x32xf32>
    %45 = vector.broadcast %44 : vector<1x1x32xf32> to vector<28x28x32xf32>
    %46 = arith.mulf %41, %45 : vector<28x28x32xf32>
    %47 = arith.addf %40, %46 : vector<28x28x32xf32>
    %c2_43 = arith.constant 2 : index
    %c0_44 = arith.constant 0 : index
    %c0_45 = arith.constant 0 : index
    %48 = vector.load %arg7[%c2_43, %c0_44, %c0_45] : memref<30x30x32xf32, #tpu.memory_space<vmem>>, vector<28x28x32xf32>
    %c2_46 = arith.constant 2 : index
    %c0_47 = arith.constant 0 : index
    %c0_48 = arith.constant 0 : index
    %49 = vector.load %arg2[%c2_46, %c0_47, %c0_48] : memref<3x3x32xf32, #tpu.memory_space<vmem>>, vector<1x1x32xf32>
    %50 = vector.shape_cast %49 : vector<1x1x32xf32> to vector<32xf32>
    %51 = vector.shape_cast %50 : vector<32xf32> to vector<1x1x32xf32>
    %52 = vector.broadcast %51 : vector<1x1x32xf32> to vector<28x28x32xf32>
    %53 = arith.mulf %48, %52 : vector<28x28x32xf32>
    %54 = arith.addf %47, %53 : vector<28x28x32xf32>
    %c2_49 = arith.constant 2 : index
    %c1_50 = arith.constant 1 : index
    %c0_51 = arith.constant 0 : index
    %55 = vector.load %arg7[%c2_49, %c1_50, %c0_51] : memref<30x30x32xf32, #tpu.memory_space<vmem>>, vector<28x28x32xf32>
    %c2_52 = arith.constant 2 : index
    %c1_53 = arith.constant 1 : index
    %c0_54 = arith.constant 0 : index
    %56 = vector.load %arg2[%c2_52, %c1_53, %c0_54] : memref<3x3x32xf32, #tpu.memory_space<vmem>>, vector<1x1x32xf32>
    %57 = vector.shape_cast %56 : vector<1x1x32xf32> to vector<32xf32>
    %58 = vector.shape_cast %57 : vector<32xf32> to vector<1x1x32xf32>
    %59 = vector.broadcast %58 : vector<1x1x32xf32> to vector<28x28x32xf32>
    %60 = arith.mulf %55, %59 : vector<28x28x32xf32>
    %61 = arith.addf %54, %60 : vector<28x28x32xf32>
    %c2_55 = arith.constant 2 : index
    %c2_56 = arith.constant 2 : index
    %c0_57 = arith.constant 0 : index
    %62 = vector.load %arg7[%c2_55, %c2_56, %c0_57] : memref<30x30x32xf32, #tpu.memory_space<vmem>>, vector<28x28x32xf32>
    %c2_58 = arith.constant 2 : index
    %c2_59 = arith.constant 2 : index
    %c0_60 = arith.constant 0 : index
    %63 = vector.load %arg2[%c2_58, %c2_59, %c0_60] : memref<3x3x32xf32, #tpu.memory_space<vmem>>, vector<1x1x32xf32>
    %64 = vector.shape_cast %63 : vector<1x1x32xf32> to vector<32xf32>
    %65 = vector.shape_cast %64 : vector<32xf32> to vector<1x1x32xf32>
    %66 = vector.broadcast %65 : vector<1x1x32xf32> to vector<28x28x32xf32>
    %67 = arith.mulf %62, %66 : vector<28x28x32xf32>
    %68 = arith.addf %61, %67 : vector<28x28x32xf32>
    %69 = vector.extract_strided_slice %68 {offsets = [0, 0, 0], sizes = [1, 28, 32], strides = [1, 1, 1]} : vector<28x28x32xf32> to vector<1x28x32xf32>
    %70 = vector.shape_cast %69 : vector<1x28x32xf32> to vector<28x32xf32>
    %71 = vector.extract_strided_slice %68 {offsets = [1, 0, 0], sizes = [1, 28, 32], strides = [1, 1, 1]} : vector<28x28x32xf32> to vector<1x28x32xf32>
    %72 = vector.shape_cast %71 : vector<1x28x32xf32> to vector<28x32xf32>
    %73 = arith.maximumf %70, %72 : vector<28x32xf32>
    %c0_61 = arith.constant 0 : index
    %c0_62 = arith.constant 0 : index
    %c0_63 = arith.constant 0 : index
    %74 = vector.load %arg8[%c0_61, %c0_62, %c0_63] : memref<14x28x32xf32, #tpu.memory_space<vmem>>, vector<1x28x32xf32>
    %75 = vector.shape_cast %74 : vector<1x28x32xf32> to vector<28x32xf32>
    %76 = vector.shape_cast %73 : vector<28x32xf32> to vector<1x28x32xf32>
    tpu.vector_store %arg8[%c0_61, %c0_62, %c0_63], %76 {strides = array<i32>} : memref<14x28x32xf32, #tpu.memory_space<vmem>>, vector<1x28x32xf32>,
    %77 = vector.extract_strided_slice %68 {offsets = [2, 0, 0], sizes = [1, 28, 32], strides = [1, 1, 1]} : vector<28x28x32xf32> to vector<1x28x32xf32>
    %78 = vector.shape_cast %77 : vector<1x28x32xf32> to vector<28x32xf32>
    %79 = vector.extract_strided_slice %68 {offsets = [3, 0, 0], sizes = [1, 28, 32], strides = [1, 1, 1]} : vector<28x28x32xf32> to vector<1x28x32xf32>
    %80 = vector.shape_cast %79 : vector<1x28x32xf32> to vector<28x32xf32>
    %81 = arith.maximumf %78, %80 : vector<28x32xf32>
    %c1_64 = arith.constant 1 : index
    %c0_65 = arith.constant 0 : index
    %c0_66 = arith.constant 0 : index
    %82 = vector.load %arg8[%c1_64, %c0_65, %c0_66] : memref<14x28x32xf32, #tpu.memory_space<vmem>>, vector<1x28x32xf32>
    %83 = vector.shape_cast %82 : vector<1x28x32xf32> to vector<28x32xf32>
    %84 = vector.shape_cast %81 : vector<28x32xf32> to vector<1x28x32xf32>
    tpu.vector_store %arg8[%c1_64, %c0_65, %c0_66], %84 {strides = array<i32>} : memref<14x28x32xf32, #tpu.memory_space<vmem>>, vector<1x28x32xf32>,
    %85 = vector.extract_strided_slice %68 {offsets = [4, 0, 0], sizes = [1, 28, 32], strides = [1, 1, 1]} : vector<28x28x32xf32> to vector<1x28x32xf32>
    %86 = vector.shape_cast %85 : vector<1x28x32xf32> to vector<28x32xf32>
    %87 = vector.extract_strided_slice %68 {offsets = [5, 0, 0], sizes = [1, 28, 32], strides = [1, 1, 1]} : vector<28x28x32xf32> to vector<1x28x32xf32>
    %88 = vector.shape_cast %87 : vector<1x28x32xf32> to vector<28x32xf32>
    %89 = arith.maximumf %86, %88 : vector<28x32xf32>
    %c2_67 = arith.constant 2 : index
    %c0_68 = arith.constant 0 : index
    %c0_69 = arith.constant 0 : index
    %90 = vector.load %arg8[%c2_67, %c0_68, %c0_69] : memref<14x28x32xf32, #tpu.memory_space<vmem>>, vector<1x28x32xf32>
    %91 = vector.shape_cast %90 : vector<1x28x32xf32> to vector<28x32xf32>
    %92 = vector.shape_cast %89 : vector<28x32xf32> to vector<1x28x32xf32>
    tpu.vector_store %arg8[%c2_67, %c0_68, %c0_69], %92 {strides = array<i32>} : memref<14x28x32xf32, #tpu.memory_space<vmem>>, vector<1x28x32xf32>,
    %93 = vector.extract_strided_slice %68 {offsets = [6, 0, 0], sizes = [1, 28, 32], strides = [1, 1, 1]} : vector<28x28x32xf32> to vector<1x28x32xf32>
    %94 = vector.shape_cast %93 : vector<1x28x32xf32> to vector<28x32xf32>
    %95 = vector.extract_strided_slice %68 {offsets = [7, 0, 0], sizes = [1, 28, 32], strides = [1, 1, 1]} : vector<28x28x32xf32> to vector<1x28x32xf32>
    %96 = vector.shape_cast %95 : vector<1x28x32xf32> to vector<28x32xf32>
    %97 = arith.maximumf %94, %96 : vector<28x32xf32>
    %c3 = arith.constant 3 : index
    %c0_70 = arith.constant 0 : index
    %c0_71 = arith.constant 0 : index
    %98 = vector.load %arg8[%c3, %c0_70, %c0_71] : memref<14x28x32xf32, #tpu.memory_space<vmem>>, vector<1x28x32xf32>
    %99 = vector.shape_cast %98 : vector<1x28x32xf32> to vector<28x32xf32>
    %100 = vector.shape_cast %97 : vector<28x32xf32> to vector<1x28x32xf32>
    tpu.vector_store %arg8[%c3, %c0_70, %c0_71], %100 {strides = array<i32>} : memref<14x28x32xf32, #tpu.memory_space<vmem>>, vector<1x28x32xf32>,
    %101 = vector.extract_strided_slice %68 {offsets = [8, 0, 0], sizes = [1, 28, 32], strides = [1, 1, 1]} : vector<28x28x32xf32> to vector<1x28x32xf32>
    %102 = vector.shape_cast %101 : vector<1x28x32xf32> to vector<28x32xf32>
    %103 = vector.extract_strided_slice %68 {offsets = [9, 0, 0], sizes = [1, 28, 32], strides = [1, 1, 1]} : vector<28x28x32xf32> to vector<1x28x32xf32>
    %104 = vector.shape_cast %103 : vector<1x28x32xf32> to vector<28x32xf32>
    %105 = arith.maximumf %102, %104 : vector<28x32xf32>
    %c4 = arith.constant 4 : index
    %c0_72 = arith.constant 0 : index
    %c0_73 = arith.constant 0 : index
    %106 = vector.load %arg8[%c4, %c0_72, %c0_73] : memref<14x28x32xf32, #tpu.memory_space<vmem>>, vector<1x28x32xf32>
    %107 = vector.shape_cast %106 : vector<1x28x32xf32> to vector<28x32xf32>
    %108 = vector.shape_cast %105 : vector<28x32xf32> to vector<1x28x32xf32>
    tpu.vector_store %arg8[%c4, %c0_72, %c0_73], %108 {strides = array<i32>} : memref<14x28x32xf32, #tpu.memory_space<vmem>>, vector<1x28x32xf32>,
    %109 = vector.extract_strided_slice %68 {offsets = [10, 0, 0], sizes = [1, 28, 32], strides = [1, 1, 1]} : vector<28x28x32xf32> to vector<1x28x32xf32>
    %110 = vector.shape_cast %109 : vector<1x28x32xf32> to vector<28x32xf32>
    %111 = vector.extract_strided_slice %68 {offsets = [11, 0, 0], sizes = [1, 28, 32], strides = [1, 1, 1]} : vector<28x28x32xf32> to vector<1x28x32xf32>
    %112 = vector.shape_cast %111 : vector<1x28x32xf32> to vector<28x32xf32>
    %113 = arith.maximumf %110, %112 : vector<28x32xf32>
    %c5 = arith.constant 5 : index
    %c0_74 = arith.constant 0 : index
    %c0_75 = arith.constant 0 : index
    %114 = vector.load %arg8[%c5, %c0_74, %c0_75] : memref<14x28x32xf32, #tpu.memory_space<vmem>>, vector<1x28x32xf32>
    %115 = vector.shape_cast %114 : vector<1x28x32xf32> to vector<28x32xf32>
    %116 = vector.shape_cast %113 : vector<28x32xf32> to vector<1x28x32xf32>
    tpu.vector_store %arg8[%c5, %c0_74, %c0_75], %116 {strides = array<i32>} : memref<14x28x32xf32, #tpu.memory_space<vmem>>, vector<1x28x32xf32>,
    %117 = vector.extract_strided_slice %68 {offsets = [12, 0, 0], sizes = [1, 28, 32], strides = [1, 1, 1]} : vector<28x28x32xf32> to vector<1x28x32xf32>
    %118 = vector.shape_cast %117 : vector<1x28x32xf32> to vector<28x32xf32>
    %119 = vector.extract_strided_slice %68 {offsets = [13, 0, 0], sizes = [1, 28, 32], strides = [1, 1, 1]} : vector<28x28x32xf32> to vector<1x28x32xf32>
    %120 = vector.shape_cast %119 : vector<1x28x32xf32> to vector<28x32xf32>
    %121 = arith.maximumf %118, %120 : vector<28x32xf32>
    %c6 = arith.constant 6 : index
    %c0_76 = arith.constant 0 : index
    %c0_77 = arith.constant 0 : index
    %122 = vector.load %arg8[%c6, %c0_76, %c0_77] : memref<14x28x32xf32, #tpu.memory_space<vmem>>, vector<1x28x32xf32>
    %123 = vector.shape_cast %122 : vector<1x28x32xf32> to vector<28x32xf32>
    %124 = vector.shape_cast %121 : vector<28x32xf32> to vector<1x28x32xf32>
    tpu.vector_store %arg8[%c6, %c0_76, %c0_77], %124 {strides = array<i32>} : memref<14x28x32xf32, #tpu.memory_space<vmem>>, vector<1x28x32xf32>,
    %125 = vector.extract_strided_slice %68 {offsets = [14, 0, 0], sizes = [1, 28, 32], strides = [1, 1, 1]} : vector<28x28x32xf32> to vector<1x28x32xf32>
    %126 = vector.shape_cast %125 : vector<1x28x32xf32> to vector<28x32xf32>
    %127 = vector.extract_strided_slice %68 {offsets = [15, 0, 0], sizes = [1, 28, 32], strides = [1, 1, 1]} : vector<28x28x32xf32> to vector<1x28x32xf32>
    %128 = vector.shape_cast %127 : vector<1x28x32xf32> to vector<28x32xf32>
    %129 = arith.maximumf %126, %128 : vector<28x32xf32>
    %c7 = arith.constant 7 : index
    %c0_78 = arith.constant 0 : index
    %c0_79 = arith.constant 0 : index
    %130 = vector.load %arg8[%c7, %c0_78, %c0_79] : memref<14x28x32xf32, #tpu.memory_space<vmem>>, vector<1x28x32xf32>
    %131 = vector.shape_cast %130 : vector<1x28x32xf32> to vector<28x32xf32>
    %132 = vector.shape_cast %129 : vector<28x32xf32> to vector<1x28x32xf32>
    tpu.vector_store %arg8[%c7, %c0_78, %c0_79], %132 {strides = array<i32>} : memref<14x28x32xf32, #tpu.memory_space<vmem>>, vector<1x28x32xf32>,
    %133 = vector.extract_strided_slice %68 {offsets = [16, 0, 0], sizes = [1, 28, 32], strides = [1, 1, 1]} : vector<28x28x32xf32> to vector<1x28x32xf32>
    %134 = vector.shape_cast %133 : vector<1x28x32xf32> to vector<28x32xf32>
    %135 = vector.extract_strided_slice %68 {offsets = [17, 0, 0], sizes = [1, 28, 32], strides = [1, 1, 1]} : vector<28x28x32xf32> to vector<1x28x32xf32>
    %136 = vector.shape_cast %135 : vector<1x28x32xf32> to vector<28x32xf32>
    %137 = arith.maximumf %134, %136 : vector<28x32xf32>
    %c8 = arith.constant 8 : index
    %c0_80 = arith.constant 0 : index
    %c0_81 = arith.constant 0 : index
    %138 = vector.load %arg8[%c8, %c0_80, %c0_81] : memref<14x28x32xf32, #tpu.memory_space<vmem>>, vector<1x28x32xf32>
    %139 = vector.shape_cast %138 : vector<1x28x32xf32> to vector<28x32xf32>
    %140 = vector.shape_cast %137 : vector<28x32xf32> to vector<1x28x32xf32>
    tpu.vector_store %arg8[%c8, %c0_80, %c0_81], %140 {strides = array<i32>} : memref<14x28x32xf32, #tpu.memory_space<vmem>>, vector<1x28x32xf32>,
    %141 = vector.extract_strided_slice %68 {offsets = [18, 0, 0], sizes = [1, 28, 32], strides = [1, 1, 1]} : vector<28x28x32xf32> to vector<1x28x32xf32>
    %142 = vector.shape_cast %141 : vector<1x28x32xf32> to vector<28x32xf32>
    %143 = vector.extract_strided_slice %68 {offsets = [19, 0, 0], sizes = [1, 28, 32], strides = [1, 1, 1]} : vector<28x28x32xf32> to vector<1x28x32xf32>
    %144 = vector.shape_cast %143 : vector<1x28x32xf32> to vector<28x32xf32>
    %145 = arith.maximumf %142, %144 : vector<28x32xf32>
    %c9 = arith.constant 9 : index
    %c0_82 = arith.constant 0 : index
    %c0_83 = arith.constant 0 : index
    %146 = vector.load %arg8[%c9, %c0_82, %c0_83] : memref<14x28x32xf32, #tpu.memory_space<vmem>>, vector<1x28x32xf32>
    %147 = vector.shape_cast %146 : vector<1x28x32xf32> to vector<28x32xf32>
    %148 = vector.shape_cast %145 : vector<28x32xf32> to vector<1x28x32xf32>
    tpu.vector_store %arg8[%c9, %c0_82, %c0_83], %148 {strides = array<i32>} : memref<14x28x32xf32, #tpu.memory_space<vmem>>, vector<1x28x32xf32>,
    %149 = vector.extract_strided_slice %68 {offsets = [20, 0, 0], sizes = [1, 28, 32], strides = [1, 1, 1]} : vector<28x28x32xf32> to vector<1x28x32xf32>
    %150 = vector.shape_cast %149 : vector<1x28x32xf32> to vector<28x32xf32>
    %151 = vector.extract_strided_slice %68 {offsets = [21, 0, 0], sizes = [1, 28, 32], strides = [1, 1, 1]} : vector<28x28x32xf32> to vector<1x28x32xf32>
    %152 = vector.shape_cast %151 : vector<1x28x32xf32> to vector<28x32xf32>
    %153 = arith.maximumf %150, %152 : vector<28x32xf32>
    %c10 = arith.constant 10 : index
    %c0_84 = arith.constant 0 : index
    %c0_85 = arith.constant 0 : index
    %154 = vector.load %arg8[%c10, %c0_84, %c0_85] : memref<14x28x32xf32, #tpu.memory_space<vmem>>, vector<1x28x32xf32>
    %155 = vector.shape_cast %154 : vector<1x28x32xf32> to vector<28x32xf32>
    %156 = vector.shape_cast %153 : vector<28x32xf32> to vector<1x28x32xf32>
    tpu.vector_store %arg8[%c10, %c0_84, %c0_85], %156 {strides = array<i32>} : memref<14x28x32xf32, #tpu.memory_space<vmem>>, vector<1x28x32xf32>,
    %157 = vector.extract_strided_slice %68 {offsets = [22, 0, 0], sizes = [1, 28, 32], strides = [1, 1, 1]} : vector<28x28x32xf32> to vector<1x28x32xf32>
    %158 = vector.shape_cast %157 : vector<1x28x32xf32> to vector<28x32xf32>
    %159 = vector.extract_strided_slice %68 {offsets = [23, 0, 0], sizes = [1, 28, 32], strides = [1, 1, 1]} : vector<28x28x32xf32> to vector<1x28x32xf32>
    %160 = vector.shape_cast %159 : vector<1x28x32xf32> to vector<28x32xf32>
    %161 = arith.maximumf %158, %160 : vector<28x32xf32>
    %c11 = arith.constant 11 : index
    %c0_86 = arith.constant 0 : index
    %c0_87 = arith.constant 0 : index
    %162 = vector.load %arg8[%c11, %c0_86, %c0_87] : memref<14x28x32xf32, #tpu.memory_space<vmem>>, vector<1x28x32xf32>
    %163 = vector.shape_cast %162 : vector<1x28x32xf32> to vector<28x32xf32>
    %164 = vector.shape_cast %161 : vector<28x32xf32> to vector<1x28x32xf32>
    tpu.vector_store %arg8[%c11, %c0_86, %c0_87], %164 {strides = array<i32>} : memref<14x28x32xf32, #tpu.memory_space<vmem>>, vector<1x28x32xf32>,
    %165 = vector.extract_strided_slice %68 {offsets = [24, 0, 0], sizes = [1, 28, 32], strides = [1, 1, 1]} : vector<28x28x32xf32> to vector<1x28x32xf32>
    %166 = vector.shape_cast %165 : vector<1x28x32xf32> to vector<28x32xf32>
    %167 = vector.extract_strided_slice %68 {offsets = [25, 0, 0], sizes = [1, 28, 32], strides = [1, 1, 1]} : vector<28x28x32xf32> to vector<1x28x32xf32>
    %168 = vector.shape_cast %167 : vector<1x28x32xf32> to vector<28x32xf32>
    %169 = arith.maximumf %166, %168 : vector<28x32xf32>
    %c12 = arith.constant 12 : index
    %c0_88 = arith.constant 0 : index
    %c0_89 = arith.constant 0 : index
    %170 = vector.load %arg8[%c12, %c0_88, %c0_89] : memref<14x28x32xf32, #tpu.memory_space<vmem>>, vector<1x28x32xf32>
    %171 = vector.shape_cast %170 : vector<1x28x32xf32> to vector<28x32xf32>
    %172 = vector.shape_cast %169 : vector<28x32xf32> to vector<1x28x32xf32>
    tpu.vector_store %arg8[%c12, %c0_88, %c0_89], %172 {strides = array<i32>} : memref<14x28x32xf32, #tpu.memory_space<vmem>>, vector<1x28x32xf32>,
    %173 = vector.extract_strided_slice %68 {offsets = [26, 0, 0], sizes = [1, 28, 32], strides = [1, 1, 1]} : vector<28x28x32xf32> to vector<1x28x32xf32>
    %174 = vector.shape_cast %173 : vector<1x28x32xf32> to vector<28x32xf32>
    %175 = vector.extract_strided_slice %68 {offsets = [27, 0, 0], sizes = [1, 28, 32], strides = [1, 1, 1]} : vector<28x28x32xf32> to vector<1x28x32xf32>
    %176 = vector.shape_cast %175 : vector<1x28x32xf32> to vector<28x32xf32>
    %177 = arith.maximumf %174, %176 : vector<28x32xf32>
    %c13 = arith.constant 13 : index
    %c0_90 = arith.constant 0 : index
    %c0_91 = arith.constant 0 : index
    %178 = vector.load %arg8[%c13, %c0_90, %c0_91] : memref<14x28x32xf32, #tpu.memory_space<vmem>>, vector<1x28x32xf32>
    %179 = vector.shape_cast %178 : vector<1x28x32xf32> to vector<28x32xf32>
    %180 = vector.shape_cast %177 : vector<28x32xf32> to vector<1x28x32xf32>
    tpu.vector_store %arg8[%c13, %c0_90, %c0_91], %180 {strides = array<i32>} : memref<14x28x32xf32, #tpu.memory_space<vmem>>, vector<1x28x32xf32>,
    %c0_92 = arith.constant 0 : index
    %c0_93 = arith.constant 0 : index
    %c0_94 = arith.constant 0 : index
    %181 = tpu.strided_load %arg8[%c0_92, %c0_93, %c0_94] {strides = array<i32: 1, 2, 1>} : memref<14x28x32xf32, #tpu.memory_space<vmem>>, vector<14x14x32xf32>
    %c0_95 = arith.constant 0 : index
    %c1_96 = arith.constant 1 : index
    %c0_97 = arith.constant 0 : index
    %182 = tpu.strided_load %arg8[%c0_95, %c1_96, %c0_97] {strides = array<i32: 1, 2, 1>} : memref<14x28x32xf32, #tpu.memory_space<vmem>>, vector<14x14x32xf32>
    %183 = arith.maximumf %181, %182 : vector<14x14x32xf32>
    %c0_98 = arith.constant 0 : index
    %c0_99 = arith.constant 0 : index
    %184 = vector.load %arg3[%c0_98, %c0_99] : memref<1x32xf32, #tpu.memory_space<vmem>>, vector<1x32xf32>
    %185 = vector.shape_cast %184 : vector<1x32xf32> to vector<32xf32>
    %186 = vector.shape_cast %185 : vector<32xf32> to vector<1x1x32xf32>
    %187 = vector.broadcast %186 : vector<1x1x32xf32> to vector<14x14x32xf32>
    %188 = arith.addf %183, %187 : vector<14x14x32xf32>
    %cst_100 = arith.constant 0.000000e+00 : f32
    %189 = vector.broadcast %cst_100 : f32 to vector<14x14x32xf32>
    %190 = arith.maximumf %188, %189 : vector<14x14x32xf32>
    %cst_101 = arith.constant 0.000000e+00 : f32
    %191 = vector.broadcast %cst_101 : f32 to vector<272x32xf32>
    %c0_102 = arith.constant 0 : index
    %c0_103 = arith.constant 0 : index
    %192 = vector.load %arg9[%c0_102, %c0_103] : memref<272x32xf32, #tpu.memory_space<vmem>>, vector<272x32xf32>
    tpu.vector_store %arg9[%c0_102, %c0_103], %191 {strides = array<i32>} : memref<272x32xf32, #tpu.memory_space<vmem>>, vector<272x32xf32>,
    %193 = vector.extract_strided_slice %190 {offsets = [0, 0, 0], sizes = [1, 14, 32], strides = [1, 1, 1]} : vector<14x14x32xf32> to vector<1x14x32xf32>
    %194 = vector.shape_cast %193 : vector<1x14x32xf32> to vector<14x32xf32>
    %c17 = arith.constant 17 : index
    %c0_104 = arith.constant 0 : index
    %195 = vector.load %arg9[%c17, %c0_104] : memref<272x32xf32, #tpu.memory_space<vmem>>, vector<14x32xf32>
    tpu.vector_store %arg9[%c17, %c0_104], %194 {strides = array<i32>} : memref<272x32xf32, #tpu.memory_space<vmem>>, vector<14x32xf32>,
    %196 = vector.extract_strided_slice %190 {offsets = [1, 0, 0], sizes = [1, 14, 32], strides = [1, 1, 1]} : vector<14x14x32xf32> to vector<1x14x32xf32>
    %197 = vector.shape_cast %196 : vector<1x14x32xf32> to vector<14x32xf32>
    %c33 = arith.constant 33 : index
    %c0_105 = arith.constant 0 : index
    %198 = vector.load %arg9[%c33, %c0_105] : memref<272x32xf32, #tpu.memory_space<vmem>>, vector<14x32xf32>
    tpu.vector_store %arg9[%c33, %c0_105], %197 {strides = array<i32>} : memref<272x32xf32, #tpu.memory_space<vmem>>, vector<14x32xf32>,
    %199 = vector.extract_strided_slice %190 {offsets = [2, 0, 0], sizes = [1, 14, 32], strides = [1, 1, 1]} : vector<14x14x32xf32> to vector<1x14x32xf32>
    %200 = vector.shape_cast %199 : vector<1x14x32xf32> to vector<14x32xf32>
    %c49 = arith.constant 49 : index
    %c0_106 = arith.constant 0 : index
    %201 = vector.load %arg9[%c49, %c0_106] : memref<272x32xf32, #tpu.memory_space<vmem>>, vector<14x32xf32>
    tpu.vector_store %arg9[%c49, %c0_106], %200 {strides = array<i32>} : memref<272x32xf32, #tpu.memory_space<vmem>>, vector<14x32xf32>,
    %202 = vector.extract_strided_slice %190 {offsets = [3, 0, 0], sizes = [1, 14, 32], strides = [1, 1, 1]} : vector<14x14x32xf32> to vector<1x14x32xf32>
    %203 = vector.shape_cast %202 : vector<1x14x32xf32> to vector<14x32xf32>
    %c65 = arith.constant 65 : index
    %c0_107 = arith.constant 0 : index
    %204 = vector.load %arg9[%c65, %c0_107] : memref<272x32xf32, #tpu.memory_space<vmem>>, vector<14x32xf32>
    tpu.vector_store %arg9[%c65, %c0_107], %203 {strides = array<i32>} : memref<272x32xf32, #tpu.memory_space<vmem>>, vector<14x32xf32>,
    %205 = vector.extract_strided_slice %190 {offsets = [4, 0, 0], sizes = [1, 14, 32], strides = [1, 1, 1]} : vector<14x14x32xf32> to vector<1x14x32xf32>
    %206 = vector.shape_cast %205 : vector<1x14x32xf32> to vector<14x32xf32>
    %c81 = arith.constant 81 : index
    %c0_108 = arith.constant 0 : index
    %207 = vector.load %arg9[%c81, %c0_108] : memref<272x32xf32, #tpu.memory_space<vmem>>, vector<14x32xf32>
    tpu.vector_store %arg9[%c81, %c0_108], %206 {strides = array<i32>} : memref<272x32xf32, #tpu.memory_space<vmem>>, vector<14x32xf32>,
    %208 = vector.extract_strided_slice %190 {offsets = [5, 0, 0], sizes = [1, 14, 32], strides = [1, 1, 1]} : vector<14x14x32xf32> to vector<1x14x32xf32>
    %209 = vector.shape_cast %208 : vector<1x14x32xf32> to vector<14x32xf32>
    %c97 = arith.constant 97 : index
    %c0_109 = arith.constant 0 : index
    %210 = vector.load %arg9[%c97, %c0_109] : memref<272x32xf32, #tpu.memory_space<vmem>>, vector<14x32xf32>
    tpu.vector_store %arg9[%c97, %c0_109], %209 {strides = array<i32>} : memref<272x32xf32, #tpu.memory_space<vmem>>, vector<14x32xf32>,
    %211 = vector.extract_strided_slice %190 {offsets = [6, 0, 0], sizes = [1, 14, 32], strides = [1, 1, 1]} : vector<14x14x32xf32> to vector<1x14x32xf32>
    %212 = vector.shape_cast %211 : vector<1x14x32xf32> to vector<14x32xf32>
    %c113 = arith.constant 113 : index
    %c0_110 = arith.constant 0 : index
    %213 = vector.load %arg9[%c113, %c0_110] : memref<272x32xf32, #tpu.memory_space<vmem>>, vector<14x32xf32>
    tpu.vector_store %arg9[%c113, %c0_110], %212 {strides = array<i32>} : memref<272x32xf32, #tpu.memory_space<vmem>>, vector<14x32xf32>,
    %214 = vector.extract_strided_slice %190 {offsets = [7, 0, 0], sizes = [1, 14, 32], strides = [1, 1, 1]} : vector<14x14x32xf32> to vector<1x14x32xf32>
    %215 = vector.shape_cast %214 : vector<1x14x32xf32> to vector<14x32xf32>
    %c129 = arith.constant 129 : index
    %c0_111 = arith.constant 0 : index
    %216 = vector.load %arg9[%c129, %c0_111] : memref<272x32xf32, #tpu.memory_space<vmem>>, vector<14x32xf32>
    tpu.vector_store %arg9[%c129, %c0_111], %215 {strides = array<i32>} : memref<272x32xf32, #tpu.memory_space<vmem>>, vector<14x32xf32>,
    %217 = vector.extract_strided_slice %190 {offsets = [8, 0, 0], sizes = [1, 14, 32], strides = [1, 1, 1]} : vector<14x14x32xf32> to vector<1x14x32xf32>
    %218 = vector.shape_cast %217 : vector<1x14x32xf32> to vector<14x32xf32>
    %c145 = arith.constant 145 : index
    %c0_112 = arith.constant 0 : index
    %219 = vector.load %arg9[%c145, %c0_112] : memref<272x32xf32, #tpu.memory_space<vmem>>, vector<14x32xf32>
    tpu.vector_store %arg9[%c145, %c0_112], %218 {strides = array<i32>} : memref<272x32xf32, #tpu.memory_space<vmem>>, vector<14x32xf32>,
    %220 = vector.extract_strided_slice %190 {offsets = [9, 0, 0], sizes = [1, 14, 32], strides = [1, 1, 1]} : vector<14x14x32xf32> to vector<1x14x32xf32>
    %221 = vector.shape_cast %220 : vector<1x14x32xf32> to vector<14x32xf32>
    %c161 = arith.constant 161 : index
    %c0_113 = arith.constant 0 : index
    %222 = vector.load %arg9[%c161, %c0_113] : memref<272x32xf32, #tpu.memory_space<vmem>>, vector<14x32xf32>
    tpu.vector_store %arg9[%c161, %c0_113], %221 {strides = array<i32>} : memref<272x32xf32, #tpu.memory_space<vmem>>, vector<14x32xf32>,
    %223 = vector.extract_strided_slice %190 {offsets = [10, 0, 0], sizes = [1, 14, 32], strides = [1, 1, 1]} : vector<14x14x32xf32> to vector<1x14x32xf32>
    %224 = vector.shape_cast %223 : vector<1x14x32xf32> to vector<14x32xf32>
    %c177 = arith.constant 177 : index
    %c0_114 = arith.constant 0 : index
    %225 = vector.load %arg9[%c177, %c0_114] : memref<272x32xf32, #tpu.memory_space<vmem>>, vector<14x32xf32>
    tpu.vector_store %arg9[%c177, %c0_114], %224 {strides = array<i32>} : memref<272x32xf32, #tpu.memory_space<vmem>>, vector<14x32xf32>,
    %226 = vector.extract_strided_slice %190 {offsets = [11, 0, 0], sizes = [1, 14, 32], strides = [1, 1, 1]} : vector<14x14x32xf32> to vector<1x14x32xf32>
    %227 = vector.shape_cast %226 : vector<1x14x32xf32> to vector<14x32xf32>
    %c193 = arith.constant 193 : index
    %c0_115 = arith.constant 0 : index
    %228 = vector.load %arg9[%c193, %c0_115] : memref<272x32xf32, #tpu.memory_space<vmem>>, vector<14x32xf32>
    tpu.vector_store %arg9[%c193, %c0_115], %227 {strides = array<i32>} : memref<272x32xf32, #tpu.memory_space<vmem>>, vector<14x32xf32>,
    %229 = vector.extract_strided_slice %190 {offsets = [12, 0, 0], sizes = [1, 14, 32], strides = [1, 1, 1]} : vector<14x14x32xf32> to vector<1x14x32xf32>
    %230 = vector.shape_cast %229 : vector<1x14x32xf32> to vector<14x32xf32>
    %c209 = arith.constant 209 : index
    %c0_116 = arith.constant 0 : index
    %231 = vector.load %arg9[%c209, %c0_116] : memref<272x32xf32, #tpu.memory_space<vmem>>, vector<14x32xf32>
    tpu.vector_store %arg9[%c209, %c0_116], %230 {strides = array<i32>} : memref<272x32xf32, #tpu.memory_space<vmem>>, vector<14x32xf32>,
    %232 = vector.extract_strided_slice %190 {offsets = [13, 0, 0], sizes = [1, 14, 32], strides = [1, 1, 1]} : vector<14x14x32xf32> to vector<1x14x32xf32>
    %233 = vector.shape_cast %232 : vector<1x14x32xf32> to vector<14x32xf32>
    %c225 = arith.constant 225 : index
    %c0_117 = arith.constant 0 : index
    %234 = vector.load %arg9[%c225, %c0_117] : memref<272x32xf32, #tpu.memory_space<vmem>>, vector<14x32xf32>
    tpu.vector_store %arg9[%c225, %c0_117], %233 {strides = array<i32>} : memref<272x32xf32, #tpu.memory_space<vmem>>, vector<14x32xf32>,
    %cst_118 = arith.constant 0.000000e+00 : f32
    %235 = vector.broadcast %cst_118 : f32 to vector<224x64xf32>
    %c0_119 = arith.constant 0 : index
    %c0_120 = arith.constant 0 : index
    %236 = vector.load %arg9[%c0_119, %c0_120] : memref<272x32xf32, #tpu.memory_space<vmem>>, vector<224x32xf32>
    %237 = arith.truncf %236 : vector<224x32xf32> to vector<224x32xbf16>
    %c0_121 = arith.constant 0 : index
    %c0_122 = arith.constant 0 : index
    %c0_123 = arith.constant 0 : index
    %c0_124 = arith.constant 0 : index
    %238 = vector.load %arg4[%c0_121, %c0_122, %c0_123, %c0_124] : memref<3x3x32x64xbf16, #tpu.memory_space<vmem>>, vector<1x1x32x64xbf16>
    %239 = vector.shape_cast %238 : vector<1x1x32x64xbf16> to vector<32x64xbf16>
    %cst_125 = arith.constant dense<0.000000e+00> : vector<224x64xf32>
    %240 = tpu.matmul %237, %239, %cst_125 {dimension_numbers = #tpu.dot_dimension_numbers<[1], [0], [0], [1], [0, 0, 1, 1], [], []>} : vector<224x32xbf16>, vector<32x64xbf16>, vector<224x64xf32> -> vector<224x64xf32>
    %241 = arith.addf %235, %240 : vector<224x64xf32>
    %c1_126 = arith.constant 1 : index
    %c0_127 = arith.constant 0 : index
    %242 = vector.load %arg9[%c1_126, %c0_127] : memref<272x32xf32, #tpu.memory_space<vmem>>, vector<224x32xf32>
    %243 = arith.truncf %242 : vector<224x32xf32> to vector<224x32xbf16>
    %c0_128 = arith.constant 0 : index
    %c1_129 = arith.constant 1 : index
    %c0_130 = arith.constant 0 : index
    %c0_131 = arith.constant 0 : index
    %244 = vector.load %arg4[%c0_128, %c1_129, %c0_130, %c0_131] : memref<3x3x32x64xbf16, #tpu.memory_space<vmem>>, vector<1x1x32x64xbf16>
    %245 = vector.shape_cast %244 : vector<1x1x32x64xbf16> to vector<32x64xbf16>
    %cst_132 = arith.constant dense<0.000000e+00> : vector<224x64xf32>
    %246 = tpu.matmul %243, %245, %cst_132 {dimension_numbers = #tpu.dot_dimension_numbers<[1], [0], [0], [1], [0, 0, 1, 1], [], []>} : vector<224x32xbf16>, vector<32x64xbf16>, vector<224x64xf32> -> vector<224x64xf32>
    %247 = arith.addf %241, %246 : vector<224x64xf32>
    %c2_133 = arith.constant 2 : index
    %c0_134 = arith.constant 0 : index
    %248 = vector.load %arg9[%c2_133, %c0_134] : memref<272x32xf32, #tpu.memory_space<vmem>>, vector<224x32xf32>
    %249 = arith.truncf %248 : vector<224x32xf32> to vector<224x32xbf16>
    %c0_135 = arith.constant 0 : index
    %c2_136 = arith.constant 2 : index
    %c0_137 = arith.constant 0 : index
    %c0_138 = arith.constant 0 : index
    %250 = vector.load %arg4[%c0_135, %c2_136, %c0_137, %c0_138] : memref<3x3x32x64xbf16, #tpu.memory_space<vmem>>, vector<1x1x32x64xbf16>
    %251 = vector.shape_cast %250 : vector<1x1x32x64xbf16> to vector<32x64xbf16>
    %cst_139 = arith.constant dense<0.000000e+00> : vector<224x64xf32>
    %252 = tpu.matmul %249, %251, %cst_139 {dimension_numbers = #tpu.dot_dimension_numbers<[1], [0], [0], [1], [0, 0, 1, 1], [], []>} : vector<224x32xbf16>, vector<32x64xbf16>, vector<224x64xf32> -> vector<224x64xf32>
    %253 = arith.addf %247, %252 : vector<224x64xf32>
    %c16 = arith.constant 16 : index
    %c0_140 = arith.constant 0 : index
    %254 = vector.load %arg9[%c16, %c0_140] : memref<272x32xf32, #tpu.memory_space<vmem>>, vector<224x32xf32>
    %255 = arith.truncf %254 : vector<224x32xf32> to vector<224x32xbf16>
    %c1_141 = arith.constant 1 : index
    %c0_142 = arith.constant 0 : index
    %c0_143 = arith.constant 0 : index
    %c0_144 = arith.constant 0 : index
    %256 = vector.load %arg4[%c1_141, %c0_142, %c0_143, %c0_144] : memref<3x3x32x64xbf16, #tpu.memory_space<vmem>>, vector<1x1x32x64xbf16>
    %257 = vector.shape_cast %256 : vector<1x1x32x64xbf16> to vector<32x64xbf16>
    %cst_145 = arith.constant dense<0.000000e+00> : vector<224x64xf32>
    %258 = tpu.matmul %255, %257, %cst_145 {dimension_numbers = #tpu.dot_dimension_numbers<[1], [0], [0], [1], [0, 0, 1, 1], [], []>} : vector<224x32xbf16>, vector<32x64xbf16>, vector<224x64xf32> -> vector<224x64xf32>
    %259 = arith.addf %253, %258 : vector<224x64xf32>
    %c17_146 = arith.constant 17 : index
    %c0_147 = arith.constant 0 : index
    %260 = vector.load %arg9[%c17_146, %c0_147] : memref<272x32xf32, #tpu.memory_space<vmem>>, vector<224x32xf32>
    %261 = arith.truncf %260 : vector<224x32xf32> to vector<224x32xbf16>
    %c1_148 = arith.constant 1 : index
    %c1_149 = arith.constant 1 : index
    %c0_150 = arith.constant 0 : index
    %c0_151 = arith.constant 0 : index
    %262 = vector.load %arg4[%c1_148, %c1_149, %c0_150, %c0_151] : memref<3x3x32x64xbf16, #tpu.memory_space<vmem>>, vector<1x1x32x64xbf16>
    %263 = vector.shape_cast %262 : vector<1x1x32x64xbf16> to vector<32x64xbf16>
    %cst_152 = arith.constant dense<0.000000e+00> : vector<224x64xf32>
    %264 = tpu.matmul %261, %263, %cst_152 {dimension_numbers = #tpu.dot_dimension_numbers<[1], [0], [0], [1], [0, 0, 1, 1], [], []>} : vector<224x32xbf16>, vector<32x64xbf16>, vector<224x64xf32> -> vector<224x64xf32>
    %265 = arith.addf %259, %264 : vector<224x64xf32>
    %c18 = arith.constant 18 : index
    %c0_153 = arith.constant 0 : index
    %266 = vector.load %arg9[%c18, %c0_153] : memref<272x32xf32, #tpu.memory_space<vmem>>, vector<224x32xf32>
    %267 = arith.truncf %266 : vector<224x32xf32> to vector<224x32xbf16>
    %c1_154 = arith.constant 1 : index
    %c2_155 = arith.constant 2 : index
    %c0_156 = arith.constant 0 : index
    %c0_157 = arith.constant 0 : index
    %268 = vector.load %arg4[%c1_154, %c2_155, %c0_156, %c0_157] : memref<3x3x32x64xbf16, #tpu.memory_space<vmem>>, vector<1x1x32x64xbf16>
    %269 = vector.shape_cast %268 : vector<1x1x32x64xbf16> to vector<32x64xbf16>
    %cst_158 = arith.constant dense<0.000000e+00> : vector<224x64xf32>
    %270 = tpu.matmul %267, %269, %cst_158 {dimension_numbers = #tpu.dot_dimension_numbers<[1], [0], [0], [1], [0, 0, 1, 1], [], []>} : vector<224x32xbf16>, vector<32x64xbf16>, vector<224x64xf32> -> vector<224x64xf32>
    %271 = arith.addf %265, %270 : vector<224x64xf32>
    %c32 = arith.constant 32 : index
    %c0_159 = arith.constant 0 : index
    %272 = vector.load %arg9[%c32, %c0_159] : memref<272x32xf32, #tpu.memory_space<vmem>>, vector<224x32xf32>
    %273 = arith.truncf %272 : vector<224x32xf32> to vector<224x32xbf16>
    %c2_160 = arith.constant 2 : index
    %c0_161 = arith.constant 0 : index
    %c0_162 = arith.constant 0 : index
    %c0_163 = arith.constant 0 : index
    %274 = vector.load %arg4[%c2_160, %c0_161, %c0_162, %c0_163] : memref<3x3x32x64xbf16, #tpu.memory_space<vmem>>, vector<1x1x32x64xbf16>
    %275 = vector.shape_cast %274 : vector<1x1x32x64xbf16> to vector<32x64xbf16>
    %cst_164 = arith.constant dense<0.000000e+00> : vector<224x64xf32>
    %276 = tpu.matmul %273, %275, %cst_164 {dimension_numbers = #tpu.dot_dimension_numbers<[1], [0], [0], [1], [0, 0, 1, 1], [], []>} : vector<224x32xbf16>, vector<32x64xbf16>, vector<224x64xf32> -> vector<224x64xf32>
    %277 = arith.addf %271, %276 : vector<224x64xf32>
    %c33_165 = arith.constant 33 : index
    %c0_166 = arith.constant 0 : index
    %278 = vector.load %arg9[%c33_165, %c0_166] : memref<272x32xf32, #tpu.memory_space<vmem>>, vector<224x32xf32>
    %279 = arith.truncf %278 : vector<224x32xf32> to vector<224x32xbf16>
    %c2_167 = arith.constant 2 : index
    %c1_168 = arith.constant 1 : index
    %c0_169 = arith.constant 0 : index
    %c0_170 = arith.constant 0 : index
    %280 = vector.load %arg4[%c2_167, %c1_168, %c0_169, %c0_170] : memref<3x3x32x64xbf16, #tpu.memory_space<vmem>>, vector<1x1x32x64xbf16>
    %281 = vector.shape_cast %280 : vector<1x1x32x64xbf16> to vector<32x64xbf16>
    %cst_171 = arith.constant dense<0.000000e+00> : vector<224x64xf32>
    %282 = tpu.matmul %279, %281, %cst_171 {dimension_numbers = #tpu.dot_dimension_numbers<[1], [0], [0], [1], [0, 0, 1, 1], [], []>} : vector<224x32xbf16>, vector<32x64xbf16>, vector<224x64xf32> -> vector<224x64xf32>
    %283 = arith.addf %277, %282 : vector<224x64xf32>
    %c34 = arith.constant 34 : index
    %c0_172 = arith.constant 0 : index
    %284 = vector.load %arg9[%c34, %c0_172] : memref<272x32xf32, #tpu.memory_space<vmem>>, vector<224x32xf32>
    %285 = arith.truncf %284 : vector<224x32xf32> to vector<224x32xbf16>
    %c2_173 = arith.constant 2 : index
    %c2_174 = arith.constant 2 : index
    %c0_175 = arith.constant 0 : index
    %c0_176 = arith.constant 0 : index
    %286 = vector.load %arg4[%c2_173, %c2_174, %c0_175, %c0_176] : memref<3x3x32x64xbf16, #tpu.memory_space<vmem>>, vector<1x1x32x64xbf16>
    %287 = vector.shape_cast %286 : vector<1x1x32x64xbf16> to vector<32x64xbf16>
    %cst_177 = arith.constant dense<0.000000e+00> : vector<224x64xf32>
    %288 = tpu.matmul %285, %287, %cst_177 {dimension_numbers = #tpu.dot_dimension_numbers<[1], [0], [0], [1], [0, 0, 1, 1], [], []>} : vector<224x32xbf16>, vector<32x64xbf16>, vector<224x64xf32> -> vector<224x64xf32>
    %289 = arith.addf %283, %288 : vector<224x64xf32>
    %290 = vector.extract_strided_slice %289 {offsets = [0, 0], sizes = [16, 64], strides = [1, 1]} : vector<224x64xf32> to vector<16x64xf32>
    %291 = vector.extract_strided_slice %289 {offsets = [16, 0], sizes = [16, 64], strides = [1, 1]} : vector<224x64xf32> to vector<16x64xf32>
    %292 = arith.maximumf %290, %291 : vector<16x64xf32>
    %c0_178 = arith.constant 0 : index
    %c0_179 = arith.constant 0 : index
    %c0_180 = arith.constant 0 : index
    %293 = vector.load %arg10[%c0_178, %c0_179, %c0_180] : memref<7x16x64xf32, #tpu.memory_space<vmem>>, vector<1x16x64xf32>
    %294 = vector.shape_cast %293 : vector<1x16x64xf32> to vector<16x64xf32>
    %295 = vector.shape_cast %292 : vector<16x64xf32> to vector<1x16x64xf32>
    tpu.vector_store %arg10[%c0_178, %c0_179, %c0_180], %295 {strides = array<i32>} : memref<7x16x64xf32, #tpu.memory_space<vmem>>, vector<1x16x64xf32>,
    %296 = vector.extract_strided_slice %289 {offsets = [32, 0], sizes = [16, 64], strides = [1, 1]} : vector<224x64xf32> to vector<16x64xf32>
    %297 = vector.extract_strided_slice %289 {offsets = [48, 0], sizes = [16, 64], strides = [1, 1]} : vector<224x64xf32> to vector<16x64xf32>
    %298 = arith.maximumf %296, %297 : vector<16x64xf32>
    %c1_181 = arith.constant 1 : index
    %c0_182 = arith.constant 0 : index
    %c0_183 = arith.constant 0 : index
    %299 = vector.load %arg10[%c1_181, %c0_182, %c0_183] : memref<7x16x64xf32, #tpu.memory_space<vmem>>, vector<1x16x64xf32>
    %300 = vector.shape_cast %299 : vector<1x16x64xf32> to vector<16x64xf32>
    %301 = vector.shape_cast %298 : vector<16x64xf32> to vector<1x16x64xf32>
    tpu.vector_store %arg10[%c1_181, %c0_182, %c0_183], %301 {strides = array<i32>} : memref<7x16x64xf32, #tpu.memory_space<vmem>>, vector<1x16x64xf32>,
    %302 = vector.extract_strided_slice %289 {offsets = [64, 0], sizes = [16, 64], strides = [1, 1]} : vector<224x64xf32> to vector<16x64xf32>
    %303 = vector.extract_strided_slice %289 {offsets = [80, 0], sizes = [16, 64], strides = [1, 1]} : vector<224x64xf32> to vector<16x64xf32>
    %304 = arith.maximumf %302, %303 : vector<16x64xf32>
    %c2_184 = arith.constant 2 : index
    %c0_185 = arith.constant 0 : index
    %c0_186 = arith.constant 0 : index
    %305 = vector.load %arg10[%c2_184, %c0_185, %c0_186] : memref<7x16x64xf32, #tpu.memory_space<vmem>>, vector<1x16x64xf32>
    %306 = vector.shape_cast %305 : vector<1x16x64xf32> to vector<16x64xf32>
    %307 = vector.shape_cast %304 : vector<16x64xf32> to vector<1x16x64xf32>
    tpu.vector_store %arg10[%c2_184, %c0_185, %c0_186], %307 {strides = array<i32>} : memref<7x16x64xf32, #tpu.memory_space<vmem>>, vector<1x16x64xf32>,
    %308 = vector.extract_strided_slice %289 {offsets = [96, 0], sizes = [16, 64], strides = [1, 1]} : vector<224x64xf32> to vector<16x64xf32>
    %309 = vector.extract_strided_slice %289 {offsets = [112, 0], sizes = [16, 64], strides = [1, 1]} : vector<224x64xf32> to vector<16x64xf32>
    %310 = arith.maximumf %308, %309 : vector<16x64xf32>
    %c3_187 = arith.constant 3 : index
    %c0_188 = arith.constant 0 : index
    %c0_189 = arith.constant 0 : index
    %311 = vector.load %arg10[%c3_187, %c0_188, %c0_189] : memref<7x16x64xf32, #tpu.memory_space<vmem>>, vector<1x16x64xf32>
    %312 = vector.shape_cast %311 : vector<1x16x64xf32> to vector<16x64xf32>
    %313 = vector.shape_cast %310 : vector<16x64xf32> to vector<1x16x64xf32>
    tpu.vector_store %arg10[%c3_187, %c0_188, %c0_189], %313 {strides = array<i32>} : memref<7x16x64xf32, #tpu.memory_space<vmem>>, vector<1x16x64xf32>,
    %314 = vector.extract_strided_slice %289 {offsets = [128, 0], sizes = [16, 64], strides = [1, 1]} : vector<224x64xf32> to vector<16x64xf32>
    %315 = vector.extract_strided_slice %289 {offsets = [144, 0], sizes = [16, 64], strides = [1, 1]} : vector<224x64xf32> to vector<16x64xf32>
    %316 = arith.maximumf %314, %315 : vector<16x64xf32>
    %c4_190 = arith.constant 4 : index
    %c0_191 = arith.constant 0 : index
    %c0_192 = arith.constant 0 : index
    %317 = vector.load %arg10[%c4_190, %c0_191, %c0_192] : memref<7x16x64xf32, #tpu.memory_space<vmem>>, vector<1x16x64xf32>
    %318 = vector.shape_cast %317 : vector<1x16x64xf32> to vector<16x64xf32>
    %319 = vector.shape_cast %316 : vector<16x64xf32> to vector<1x16x64xf32>
    tpu.vector_store %arg10[%c4_190, %c0_191, %c0_192], %319 {strides = array<i32>} : memref<7x16x64xf32, #tpu.memory_space<vmem>>, vector<1x16x64xf32>,
    %320 = vector.extract_strided_slice %289 {offsets = [160, 0], sizes = [16, 64], strides = [1, 1]} : vector<224x64xf32> to vector<16x64xf32>
    %321 = vector.extract_strided_slice %289 {offsets = [176, 0], sizes = [16, 64], strides = [1, 1]} : vector<224x64xf32> to vector<16x64xf32>
    %322 = arith.maximumf %320, %321 : vector<16x64xf32>
    %c5_193 = arith.constant 5 : index
    %c0_194 = arith.constant 0 : index
    %c0_195 = arith.constant 0 : index
    %323 = vector.load %arg10[%c5_193, %c0_194, %c0_195] : memref<7x16x64xf32, #tpu.memory_space<vmem>>, vector<1x16x64xf32>
    %324 = vector.shape_cast %323 : vector<1x16x64xf32> to vector<16x64xf32>
    %325 = vector.shape_cast %322 : vector<16x64xf32> to vector<1x16x64xf32>
    tpu.vector_store %arg10[%c5_193, %c0_194, %c0_195], %325 {strides = array<i32>} : memref<7x16x64xf32, #tpu.memory_space<vmem>>, vector<1x16x64xf32>,
    %326 = vector.extract_strided_slice %289 {offsets = [192, 0], sizes = [16, 64], strides = [1, 1]} : vector<224x64xf32> to vector<16x64xf32>
    %327 = vector.extract_strided_slice %289 {offsets = [208, 0], sizes = [16, 64], strides = [1, 1]} : vector<224x64xf32> to vector<16x64xf32>
    %328 = arith.maximumf %326, %327 : vector<16x64xf32>
    %c6_196 = arith.constant 6 : index
    %c0_197 = arith.constant 0 : index
    %c0_198 = arith.constant 0 : index
    %329 = vector.load %arg10[%c6_196, %c0_197, %c0_198] : memref<7x16x64xf32, #tpu.memory_space<vmem>>, vector<1x16x64xf32>
    %330 = vector.shape_cast %329 : vector<1x16x64xf32> to vector<16x64xf32>
    %331 = vector.shape_cast %328 : vector<16x64xf32> to vector<1x16x64xf32>
    tpu.vector_store %arg10[%c6_196, %c0_197, %c0_198], %331 {strides = array<i32>} : memref<7x16x64xf32, #tpu.memory_space<vmem>>, vector<1x16x64xf32>,
    %c0_199 = arith.constant 0 : index
    %c0_200 = arith.constant 0 : index
    %c0_201 = arith.constant 0 : index
    %332 = tpu.strided_load %arg10[%c0_199, %c0_200, %c0_201] {strides = array<i32: 1, 2, 1>} : memref<7x16x64xf32, #tpu.memory_space<vmem>>, vector<7x7x64xf32>
    %c0_202 = arith.constant 0 : index
    %c1_203 = arith.constant 1 : index
    %c0_204 = arith.constant 0 : index
    %333 = tpu.strided_load %arg10[%c0_202, %c1_203, %c0_204] {strides = array<i32: 1, 2, 1>} : memref<7x16x64xf32, #tpu.memory_space<vmem>>, vector<7x7x64xf32>
    %334 = arith.maximumf %332, %333 : vector<7x7x64xf32>
    %c0_205 = arith.constant 0 : index
    %c0_206 = arith.constant 0 : index
    %335 = vector.load %arg5[%c0_205, %c0_206] : memref<1x64xf32, #tpu.memory_space<vmem>>, vector<1x64xf32>
    %336 = vector.shape_cast %335 : vector<1x64xf32> to vector<64xf32>
    %337 = vector.shape_cast %336 : vector<64xf32> to vector<1x1x64xf32>
    %338 = vector.broadcast %337 : vector<1x1x64xf32> to vector<7x7x64xf32>
    %339 = arith.addf %334, %338 : vector<7x7x64xf32>
    %cst_207 = arith.constant 0.000000e+00 : f32
    %340 = vector.broadcast %cst_207 : f32 to vector<7x7x64xf32>
    %341 = arith.maximumf %339, %340 : vector<7x7x64xf32>
    %342 = arith.truncf %341 : vector<7x7x64xf32> to vector<7x7x64xbf16>
    %c0_208 = arith.constant 0 : index
    %c0_209 = arith.constant 0 : index
    %c0_210 = arith.constant 0 : index
    %c0_211 = arith.constant 0 : index
    %343 = vector.load %arg6[%c0_208, %c0_209, %c0_210, %c0_211] : memref<1x7x7x64xbf16, #tpu.memory_space<vmem>>, vector<1x7x7x64xbf16>
    %344 = vector.shape_cast %343 : vector<1x7x7x64xbf16> to vector<7x7x64xbf16>
    %345 = vector.shape_cast %342 : vector<7x7x64xbf16> to vector<1x7x7x64xbf16>
    tpu.vector_store %arg6[%c0_208, %c0_209, %c0_210, %c0_211], %345 {strides = array<i32>} : memref<1x7x7x64xbf16, #tpu.memory_space<vmem>>, vector<1x7x7x64xbf16>,
    return
  }
  func.func @transform_0(%arg0: i32) -> (i32, i32, i32, i32) {
    %c0_i32 = arith.constant 0 : i32
    %c0_i32_0 = arith.constant 0 : i32
    %c0_i32_1 = arith.constant 0 : i32
    %c0_i32_2 = arith.constant 0 : i32
    return %arg0, %c0_i32, %c0_i32_0, %c0_i32_1 : i32, i32, i32, i32
  }
  func.func @transform_1(%arg0: i32) -> (i32, i32, i32) {
    %c0_i32 = arith.constant 0 : i32
    %c0_i32_0 = arith.constant 0 : i32
    %c0_i32_1 = arith.constant 0 : i32
    %c0_i32_2 = arith.constant 0 : i32
    return %c0_i32, %c0_i32_0, %c0_i32_1 : i32, i32, i32
  }
  func.func @transform_2(%arg0: i32) -> (i32, i32) {
    %c0_i32 = arith.constant 0 : i32
    %c0_i32_0 = arith.constant 0 : i32
    %c0_i32_1 = arith.constant 0 : i32
    return %c0_i32, %c0_i32_0 : i32, i32
  }
  func.func @transform_3(%arg0: i32) -> (i32, i32, i32, i32) {
    %c0_i32 = arith.constant 0 : i32
    %c0_i32_0 = arith.constant 0 : i32
    %c0_i32_1 = arith.constant 0 : i32
    %c0_i32_2 = arith.constant 0 : i32
    %c0_i32_3 = arith.constant 0 : i32
    return %c0_i32, %c0_i32_0, %c0_i32_1, %c0_i32_2 : i32, i32, i32, i32
  }
  func.func @transform_4(%arg0: i32) -> (i32, i32) {
    %c0_i32 = arith.constant 0 : i32
    %c0_i32_0 = arith.constant 0 : i32
    %c0_i32_1 = arith.constant 0 : i32
    return %c0_i32, %c0_i32_0 : i32, i32
  }
  func.func @transform_5(%arg0: i32) -> (i32, i32, i32, i32) {
    %c0_i32 = arith.constant 0 : i32
    %c0_i32_0 = arith.constant 0 : i32
    %c0_i32_1 = arith.constant 0 : i32
    %c0_i32_2 = arith.constant 0 : i32
    return %arg0, %c0_i32, %c0_i32_0, %c0_i32_1 : i32, i32, i32, i32
  }
}

module attributes {stable_mosaic.version = 11 : i64} {
  func.func @_fc_fused_kernel(%arg0: i32, %arg1: memref<2x3136xbf16, #tpu.memory_space<vmem>>, %arg2: memref<3136x128xbf16, #tpu.memory_space<vmem>>, %arg3: memref<1x128xf32, #tpu.memory_space<vmem>>, %arg4: memref<128x10xbf16, #tpu.memory_space<vmem>>, %arg5: memref<1x10xf32, #tpu.memory_space<vmem>>, %arg6: memref<2x10xf32, #tpu.memory_space<vmem>>) attributes {dimension_semantics = [#tpu.dimension_semantics<parallel>], iteration_bounds = array<i64: 1>, scalar_prefetch = 0 : i64, scratch_operands = 0 : i64, tpu.core_type = #tpu.core_type<tc>, window_params = [{transform_indices = @transform_0, window_bounds = array<i64: 2, 3136>}, {pipeline_mode = #tpu.pipeline_mode<synchronous>, transform_indices = @transform_1, window_bounds = array<i64: 3136, 128>}, {pipeline_mode = #tpu.pipeline_mode<synchronous>, transform_indices = @transform_2, window_bounds = array<i64: 1, 128>}, {pipeline_mode = #tpu.pipeline_mode<synchronous>, transform_indices = @transform_3, window_bounds = array<i64: 128, 10>}, {pipeline_mode = #tpu.pipeline_mode<synchronous>, transform_indices = @transform_4, window_bounds = array<i64: 1, 10>}, {transform_indices = @transform_5, window_bounds = array<i64: 2, 10>}]} {
    %c0 = arith.constant 0 : index
    %c0_0 = arith.constant 0 : index
    %0 = vector.load %arg1[%c0, %c0_0] : memref<2x3136xbf16, #tpu.memory_space<vmem>>, vector<2x3136xbf16>
    %c0_1 = arith.constant 0 : index
    %c0_2 = arith.constant 0 : index
    %1 = vector.load %arg2[%c0_1, %c0_2] : memref<3136x128xbf16, #tpu.memory_space<vmem>>, vector<3136x128xbf16>
    %cst = arith.constant dense<0.000000e+00> : vector<2x128xf32>
    %2 = tpu.matmul %0, %1, %cst {dimension_numbers = #tpu.dot_dimension_numbers<[1], [0], [0], [1], [0, 0, 1, 1], [], []>} : vector<2x3136xbf16>, vector<3136x128xbf16>, vector<2x128xf32> -> vector<2x128xf32>
    %c0_3 = arith.constant 0 : index
    %c0_4 = arith.constant 0 : index
    %3 = vector.load %arg3[%c0_3, %c0_4] : memref<1x128xf32, #tpu.memory_space<vmem>>, vector<1x128xf32>
    %4 = vector.broadcast %3 : vector<1x128xf32> to vector<2x128xf32>
    %5 = arith.addf %2, %4 : vector<2x128xf32>
    %cst_5 = arith.constant 0.000000e+00 : f32
    %6 = vector.broadcast %cst_5 : f32 to vector<2x128xf32>
    %7 = arith.maximumf %5, %6 : vector<2x128xf32>
    %8 = arith.truncf %7 : vector<2x128xf32> to vector<2x128xbf16>
    %c0_6 = arith.constant 0 : index
    %c0_7 = arith.constant 0 : index
    %9 = vector.load %arg4[%c0_6, %c0_7] : memref<128x10xbf16, #tpu.memory_space<vmem>>, vector<128x10xbf16>
    %cst_8 = arith.constant dense<0.000000e+00> : vector<2x10xf32>
    %10 = tpu.matmul %8, %9, %cst_8 {dimension_numbers = #tpu.dot_dimension_numbers<[1], [0], [0], [1], [0, 0, 1, 1], [], []>} : vector<2x128xbf16>, vector<128x10xbf16>, vector<2x10xf32> -> vector<2x10xf32>
    %c0_9 = arith.constant 0 : index
    %c0_10 = arith.constant 0 : index
    %11 = vector.load %arg5[%c0_9, %c0_10] : memref<1x10xf32, #tpu.memory_space<vmem>>, vector<1x10xf32>
    %12 = vector.broadcast %11 : vector<1x10xf32> to vector<2x10xf32>
    %13 = arith.addf %10, %12 : vector<2x10xf32>
    %c0_11 = arith.constant 0 : index
    %c0_12 = arith.constant 0 : index
    %14 = vector.load %arg6[%c0_11, %c0_12] : memref<2x10xf32, #tpu.memory_space<vmem>>, vector<2x10xf32>
    tpu.vector_store %arg6[%c0_11, %c0_12], %13 {strides = array<i32>} : memref<2x10xf32, #tpu.memory_space<vmem>>, vector<2x10xf32>,
    return
  }
  func.func @transform_0(%arg0: i32) -> (i32, i32) {
    %c0_i32 = arith.constant 0 : i32
    %c0_i32_0 = arith.constant 0 : i32
    return %arg0, %c0_i32 : i32, i32
  }
  func.func @transform_1(%arg0: i32) -> (i32, i32) {
    %c0_i32 = arith.constant 0 : i32
    %c0_i32_0 = arith.constant 0 : i32
    %c0_i32_1 = arith.constant 0 : i32
    return %c0_i32, %c0_i32_0 : i32, i32
  }
  func.func @transform_2(%arg0: i32) -> (i32, i32) {
    %c0_i32 = arith.constant 0 : i32
    %c0_i32_0 = arith.constant 0 : i32
    %c0_i32_1 = arith.constant 0 : i32
    return %c0_i32, %c0_i32_0 : i32, i32
  }
  func.func @transform_3(%arg0: i32) -> (i32, i32) {
    %c0_i32 = arith.constant 0 : i32
    %c0_i32_0 = arith.constant 0 : i32
    %c0_i32_1 = arith.constant 0 : i32
    return %c0_i32, %c0_i32_0 : i32, i32
  }
  func.func @transform_4(%arg0: i32) -> (i32, i32) {
    %c0_i32 = arith.constant 0 : i32
    %c0_i32_0 = arith.constant 0 : i32
    %c0_i32_1 = arith.constant 0 : i32
    return %c0_i32, %c0_i32_0 : i32, i32
  }
  func.func @transform_5(%arg0: i32) -> (i32, i32) {
    %c0_i32 = arith.constant 0 : i32
    %c0_i32_0 = arith.constant 0 : i32
    return %arg0, %c0_i32 : i32, i32
  }
}

</mosaic_0001>

<bundles_post_ra>
// kernel: conv_net_forward.3
= control target key start
LH: loop header
LB: loop body
LE: loop exit
PB: predicated region body
PF: predicated region fallthrough
CT: control target
= control target key end

     0   :  { %v433_v27 = vlaneseq  ;;  %v3196_v35 = vmov 1966171168   ;;  %s3922_s0 = inlined_call_operand.vmem [shape: bf16[2,3136], index: 0, kind: input, shape index: {}]   ;;  %s3923_s1 = inlined_call_operand.vmem [shape: bf16[3136,128], index: 1, kind: input, shape index: {}]   ;;  %s3924_s2 = inlined_call_operand.vmem [shape: f32[1,128], index: 2, kind: input, shape index: {}]   ;;  %s3925_s3 = inlined_call_operand.vmem [shape: bf16[128,10], index: 3, kind: input, shape index: {}]   ;;  %s3926_s4 = inlined_call_operand.vmem [shape: f32[1,10], index: 4, kind: input, shape index: {}]   ;;  %s3927_s5 = inlined_call_operand.hbm [shape: f32[2,10], index: 5, kind: output, shape index: {}]  }
   0x1   :  { %v2965_v0 = vld [vmem:[%s3923_s1 + $0x40] sm:$0xff]   ;;  %v2969_v4 = vld [vmem:[%s3923_s1 + $0x48] sm:$0xff]   ;;  %v2973_v8 = vld [vmem:[%s3923_s1 + $0x50] sm:$0xff]   ;;  %v431_v36 = vunpack.c.l.s4 %v3196_v35 }
   0x2   :  { %v2966_v1 = vld [vmem:[%s3923_s1] sm:$0xff]   ;;  %2651 = vmatprep.subr.bf16.mxu0 %v2965_v0  ;;  %v2970_v5 = vld [vmem:[%s3923_s1 + $0x8] sm:$0xff]   ;;  %v2974_v9 = vld [vmem:[%s3923_s1 + $0x10] sm:$0xff]   ;;  %v434_v32 = vshrl.u32 %v433_v27, 7 }
   0x3   :  { %v2967_v2 = vld [vmem:[%s3923_s1 + $0xc0] sm:$0xff]   ;;  %2652 = vmatpush3.bf16.msra.mxu0 %v2966_v1  ;;  %v2971_v6 = vld [vmem:[%s3923_s1 + $0xc8] sm:$0xff]   ;;  %v2975_v10 = vld [vmem:[%s3923_s1 + $0xd0] sm:$0xff]   ;;  %v432_v39 = vunpack.c.0.s8 %v431_v36 }
   0x4   :  { %v2968_v3 = vld [vmem:[%s3923_s1 + $0x80] sm:$0xff]   ;;  %2673 = vmatprep.subr.bf16.mxu1 %v2967_v2  ;;  %2653 = vmatprep.subr.bf16.mxu0 %v2969_v4  ;;  %v2972_v7 = vld [vmem:[%s3923_s1 + $0x88] sm:$0xff]   ;;  %v2976_v11 = vld [vmem:[%s3923_s1 + $0x90] sm:$0xff]  }
   0x5   :  { %2674 = vmatpush3.bf16.msra.mxu1 %v2968_v3  ;;  %v2977_v12 = vld [vmem:[%s3923_s1 + $0x58] sm:$0xff]   ;;  %v2981_v16 = vld [vmem:[%s3923_s1 + $0x60] sm:$0xff]   ;;  %v2985_v20 = vld [vmem:[%s3923_s1 + $0x68] sm:$0xff]   ;;  %v3335_v41 = vsub.s32 %v432_v39, %v434_v32 }
   0x6   :  { %2675 = vmatprep.subr.bf16.mxu1 %v2971_v6  ;;  %v2978_v13 = vld [vmem:[%s3923_s1 + $0x18] sm:$0xff]   ;;  %v2982_v17 = vld [vmem:[%s3923_s1 + $0x20] sm:$0xff]   ;;  %v2986_v21 = vld [vmem:[%s3923_s1 + $0x28] sm:$0xff]  }
   0x7   :  { %2654 = vmatpush3.bf16.msra.mxu0 %v2970_v5  ;;  %v2979_v14 = vld [vmem:[%s3923_s1 + $0xd8] sm:$0xff]   ;;  %v2983_v18 = vld [vmem:[%s3923_s1 + $0xe0] sm:$0xff]   ;;  %v2987_v22 = vld [vmem:[%s3923_s1 + $0xe8] sm:$0xff]  }
   0x8   :  { %2655 = vmatprep.subr.bf16.mxu0 %v2973_v8  ;;  %v2980_v15 = vld [vmem:[%s3923_s1 + $0x98] sm:$0xff]   ;;  %v2984_v19 = vld [vmem:[%s3923_s1 + $0xa0] sm:$0xff]   ;;  %v2988_v23 = vld [vmem:[%s3923_s1 + $0xa8] sm:$0xff]  }
   0x9   :  { %2676 = vmatpush3.bf16.msra.mxu1 %v2972_v7  ;;  %v2989_v24 = vld [vmem:[%s3923_s1 + $0x70] sm:$0xff]   ;;  %v2993_v29 = vld [vmem:[%s3923_s1 + $0x78] sm:$0xff]   ;;  %v22_v33 = vld [vmem:[%s3922_s0] sm:$0xff] }
   0xa   :  { %2677 = vmatprep.subr.bf16.mxu1 %v2975_v10  ;;  %v2990_v25 = vld [vmem:[%s3923_s1 + $0x30] sm:$0xff]   ;;  %v2994_v30 = vld [vmem:[%s3923_s1 + $0x38] sm:$0xff]   ;;  %v2998_v37 = vld [vmem:[%s3923_s1 + $0x140] sm:$0xff]   ;;  %v429_v38 = vcombine.high %v22_v33, %v22_v33  ;;  %v436_v42 = vrot.slane %v22_v33, %v3335_v41 }
   0xb   :  { %2656 = vmatpush3.bf16.msra.mxu0 %v2974_v9  ;;  %v2991_v26 = vld [vmem:[%s3923_s1 + $0xf0] sm:$0xff]   ;;  %v2995_v31 = vld [vmem:[%s3923_s1 + $0xf8] sm:$0xff]   ;;  %v3000_v40 = vld [vmem:[%s3923_s1 + $0x1c0] sm:$0xff]  }
   0xc   :  { %2657 = vmatprep.subr.bf16.mxu0 %v2977_v12  ;;  %v2992_v28 = vld [vmem:[%s3923_s1 + $0xb0] sm:$0xff]   ;;  %v2997_v34 = vld [vmem:[%s3923_s1 + $0xb8] sm:$0xff]   ;;  %v3339_v43 = vrot.slane %v429_v38, %v3335_v41  ;;  %v444_v44 = vcombine.high %v436_v42, %v436_v42  ;;  %v452_v45 = vrot.slane %v436_v42, %v3335_v41  ;;  %v2999_v48 = vld [vmem:[%s3923_s1 + $0x100] sm:$0xff]  }
   0xd   :  { %2678 = vmatpush3.bf16.msra.mxu1 %v2976_v11  ;;  %v3002_v51 = vld [vmem:[%s3923_s1 + $0x148] sm:$0xff]   ;;  %v3001_v53 = vld [vmem:[%s3923_s1 + $0x180] sm:$0xff]   ;;  %v3006_v57 = vld [vmem:[%s3923_s1 + $0x150] sm:$0xff]  }
   0xe   :  { %2679 = vmatprep.subr.bf16.mxu1 %v2979_v14  ;;  %v445_v46 = vcombine.high %v3339_v43, %v3339_v43  ;;  %v466_v47 = vrot.slane %v444_v44, %v3335_v41  ;;  %v474_v50 = vcombine.high %v452_v45, %v452_v45  ;;  %v3004_v54 = vld [vmem:[%s3923_s1 + $0x1c8] sm:$0xff]   ;;  %v3008_v59 = vld [vmem:[%s3923_s1 + $0x1d0] sm:$0xff]   ;;  %v3010_v61 = vld [vmem:[%s3923_s1 + $0x158] sm:$0xff]  }
   0xf   :  { %2658 = vmatpush3.bf16.msra.mxu0 %v2978_v13  ;;  %v3003_v56 = vld [vmem:[%s3923_s1 + $0x108] sm:$0xff]   ;;  %v3007_v60 = vld [vmem:[%s3923_s1 + $0x110] sm:$0xff]   ;;  %v3012_v63 = vld [vmem:[%s3923_s1 + $0x1d8] sm:$0xff]  }
  0x10   :  { %2659 = vmatprep.subr.bf16.mxu0 %v2981_v16  ;;  %v473_v49 = vrot.slane %v445_v46, %v3335_v41  ;;  %1826 = vmatprep.mubr.bf16.mxu0 %v466_v47  ;;  %v476_v52 = vcombine.high %v466_v47, %v466_v47  ;;  %v3005_v58 = vld [vmem:[%s3923_s1 + $0x188] sm:$0xff]   ;;  %v3009_v62 = vld [vmem:[%s3923_s1 + $0x190] sm:$0xff]   ;;  %v3011_v0 = vld [vmem:[%s3923_s1 + $0x118] sm:$0xff]  }
  0x11   :  { %2680 = vmatpush3.bf16.msra.mxu1 %v2980_v15  ;;  %v3014_v1 = vld [vmem:[%s3923_s1 + $0x160] sm:$0xff]   ;;  %v3013_v2 = vld [vmem:[%s3923_s1 + $0x198] sm:$0xff]   ;;  %v3018_v5 = vld [vmem:[%s3923_s1 + $0x168] sm:$0xff]  }
  0x12   :  { %2681 = vmatprep.subr.bf16.mxu1 %v2983_v18  ;;  %v477_v55 = vcombine.high %v473_v49, %v473_v49  ;;  %1866 = vmatprep.mubr.bf16.mxu1 %v476_v52  ;;  %v3016_v3 = vld [vmem:[%s3923_s1 + $0x1e0] sm:$0xff]   ;;  %v3020_v7 = vld [vmem:[%s3923_s1 + $0x1e8] sm:$0xff]   ;;  %v3022_v9 = vld [vmem:[%s3923_s1 + $0x170] sm:$0xff]  }
  0x13   :  { %2660 = vmatpush3.bf16.msra.mxu0 %v2982_v17  ;;  %v3015_v4 = vld [vmem:[%s3923_s1 + $0x120] sm:$0xff]   ;;  %v3019_v8 = vld [vmem:[%s3923_s1 + $0x128] sm:$0xff]   ;;  %v3024_v11 = vld [vmem:[%s3923_s1 + $0x1f0] sm:$0xff]   ;;  %v459_v17 = vrot.slane %v3339_v43, %v3335_v41 }
  0x14   :  { %2661 = vmatprep.subr.bf16.mxu0 %v2985_v20  ;;  %v3017_v6 = vld [vmem:[%s3923_s1 + $0x1a0] sm:$0xff]   ;;  %v3021_v10 = vld [vmem:[%s3923_s1 + $0x1a8] sm:$0xff]   ;;  %v3023_v12 = vld [vmem:[%s3923_s1 + $0x130] sm:$0xff]  }
  0x15   :  { %2682 = vmatpush3.bf16.msra.mxu1 %v2984_v19  ;;  %v3026_v13 = vld [vmem:[%s3923_s1 + $0x178] sm:$0xff]   ;;  %v3025_v14 = vld [vmem:[%s3923_s1 + $0x1b0] sm:$0xff]   ;;  %v3030_v18 = vld [vmem:[%s3923_s1 + $0x240] sm:$0xff]  }
  0x16   :  { %2683 = vmatprep.subr.bf16.mxu1 %v2987_v22  ;;  %v3028_v15 = vld [vmem:[%s3923_s1 + $0x1f8] sm:$0xff]   ;;  %v3032_v20 = vld [vmem:[%s3923_s1 + $0x2c0] sm:$0xff]   ;;  %v475_v22 = vcombine.high %v459_v17, %v459_v17  ;;  %v3038_v27 = vld [vmem:[%s3923_s1 + $0x250] sm:$0xff]  }
  0x17   :  { %2662 = vmatpush3.bf16.msra.mxu0 %v2986_v21  ;;  %v3027_v16 = vld [vmem:[%s3923_s1 + $0x138] sm:$0xff]   ;;  %v3031_v21 = vld [vmem:[%s3923_s1 + $0x200] sm:$0xff]   ;;  %v3041_v32 = vld [vmem:[%s3923_s1 + $0x290] sm:$0xff]  }
  0x18   :  { %2663 = vmatprep.subr.bf16.mxu0 %v2989_v24  ;;  %v3029_v19 = vld [vmem:[%s3923_s1 + $0x1b8] sm:$0xff]   ;;  %v3033_v24 = vld [vmem:[%s3923_s1 + $0x280] sm:$0xff]   ;;  %v3050_v39 = vld [vmem:[%s3923_s1 + $0x268] sm:$0xff]  }
  0x19   :  { %2684 = vmatpush3.bf16.msra.mxu1 %v2988_v23  ;;  %v3034_v23 = vld [vmem:[%s3923_s1 + $0x248] sm:$0xff]   ;;  %v3044_v33 = vld [vmem:[%s3923_s1 + $0x2d8] sm:$0xff]   ;;  %v3046_v35 = vld [vmem:[%s3923_s1 + $0x260] sm:$0xff]  }
  0x1a   :  { %2685 = vmatprep.subr.bf16.mxu1 %v2991_v26  ;;  %v3035_v26 = vld [vmem:[%s3923_s1 + $0x208] sm:$0xff]   ;;  %v3045_v36 = vld [vmem:[%s3923_s1 + $0x298] sm:$0xff]   ;;  %v3047_v38 = vld [vmem:[%s3923_s1 + $0x220] sm:$0xff]  }
  0x1b   :  { %2664 = vmatpush3.bf16.msra.mxu0 %v2990_v25  ;;  %v3036_v25 = vld [vmem:[%s3923_s1 + $0x2c8] sm:$0xff]   ;;  %v3054_v44 = vld [vmem:[%s3923_s1 + $0x270] sm:$0xff]  }
  0x1c   :  { %2665 = vmatprep.subr.bf16.mxu0 %v2993_v29  ;;  %v3040_v29 = vld [vmem:[%s3923_s1 + $0x2d0] sm:$0xff]   ;;  %v3052_v42 = vld [vmem:[%s3923_s1 + $0x2e8] sm:$0xff]  }
  0x1d   :  { %2686 = vmatpush3.bf16.msra.mxu1 %v2992_v28  ;;  %v3037_v28 = vld [vmem:[%s3923_s1 + $0x288] sm:$0xff]  }
  0x1e   :  { %2687 = vmatprep.subr.bf16.mxu1 %v2995_v31  ;;  %v3042_v31 = vld [vmem:[%s3923_s1 + $0x258] sm:$0xff]   ;;  %v3051_v43 = vld [vmem:[%s3923_s1 + $0x228] sm:$0xff]  }
  0x1f   :  { %2666 = vmatpush3.bf16.msra.mxu0 %v2994_v30  ;;  %v3039_v30 = vld [vmem:[%s3923_s1 + $0x210] sm:$0xff]   ;;  %v3053_v46 = vld [vmem:[%s3923_s1 + $0x2a8] sm:$0xff]  }
  0x20   :  { %2695 = vmatprep.subr.bf16.mxu0 %v2998_v37  ;;  %v3048_v37 = vld [vmem:[%s3923_s1 + $0x2e0] sm:$0xff]  }
  0x21   :  { %2688 = vmatpush3.bf16.msra.mxu1 %v2997_v34  ;;  %v3043_v34 = vld [vmem:[%s3923_s1 + $0x218] sm:$0xff]  }
  0x22   :  { %2717 = vmatprep.subr.bf16.mxu1 %v3000_v40  ;;  %1827 = vmatmul.mubr.bf16.vlgmr.msra.gmra.mrb[0].mxu0 %v452_v45  ;;  %v3049_v40 = vld [vmem:[%s3923_s1 + $0x2a0] sm:$0xff]   ;;  %v23_v45 = vld [vmem:[%s3922_s0 + $0x8] sm:$0xff] }
  0x23   :  { %2696 = vmatpush3.bf16.msra.mxu0 %v2999_v48  ;;  %1906 = vmatprep.mubr.bf16.mxu0 %v473_v49  ;;  %v485_v47 = vrot.slane %v23_v45, %v3335_v41  ;;  %v478_v48 = vcombine.high %v23_v45, %v23_v45  ;;  %v3056_v49 = vld [vmem:[%s3923_s1 + $0x2f0] sm:$0xff]  }
  0x24   :  { %1867 = vmatmul.mubr.bf16.vlgmr.msra.gmra.mrb[0].mxu1 %v474_v50  ;;  %2697 = vmatprep.subr.bf16.mxu0 %v3002_v51  ;;  %v3055_v50 = vld [vmem:[%s3923_s1 + $0x230] sm:$0xff]  }
  0x25   :  { %2718 = vmatpush3.bf16.msra.mxu1 %v3001_v53  ;;  %1946 = vmatprep.mubr.bf16.mxu1 %v477_v55  ;;  %v493_v51 = vcombine.high %v485_v47, %v485_v47  ;;  %v3524_v52 = vrot.slane %v478_v48, %v3335_v41  ;;  %v3058_v53 = vld [vmem:[%s3923_s1 + $0x278] sm:$0xff]   ;;  %v3105_v45 = vld [vmem:[%s3923_s1 + $0x4d0] sm:$0xff]  }
  0x26   :  { %2719 = vmatprep.subr.bf16.mxu1 %v3004_v54  ;;  %v3057_v54 = vld [vmem:[%s3923_s1 + $0x2b0] sm:$0xff]  }
  0x27   :  { %2698 = vmatpush3.bf16.msra.mxu0 %v3003_v56  ;;  %v515_v55 = vrot.slane %v493_v51, %v3335_v41  ;;  %v494_v56 = vcombine.high %v3524_v52, %v3524_v52  ;;  %v3106_v48 = vld [vmem:[%s3923_s1 + $0x490] sm:$0xff]   ;;  %v3111_v51 = vld [vmem:[%s3923_s1 + $0x460] sm:$0xff]  }
  0x28   :  { %2699 = vmatprep.subr.bf16.mxu0 %v3006_v57  ;;  %v3060_v57 = vld [vmem:[%s3923_s1 + $0x2f8] sm:$0xff]  }
  0x29   :  { %2720 = vmatpush3.bf16.msra.mxu1 %v3005_v58  ;;  %v3059_v58 = vld [vmem:[%s3923_s1 + $0x238] sm:$0xff]  }
  0x2a   :  { %2721 = vmatprep.subr.bf16.mxu1 %v3008_v59  ;;  %v525_v59 = vcombine.high %v515_v55, %v515_v55 }
  0x2b   :  { %2700 = vmatpush3.bf16.msra.mxu0 %v3007_v60  ;;  %v501_v60 = vrot.slane %v485_v47, %v3335_v41  ;;  %v3107_v47 = vld [vmem:[%s3923_s1 + $0x458] sm:$0xff]  }
  0x2c   :  { %2701 = vmatprep.subr.bf16.mxu0 %v3010_v61  ;;  %v3062_v61 = vld [vmem:[%s3923_s1 + $0x340] sm:$0xff]  }
  0x2d   :  { %2722 = vmatpush3.bf16.msra.mxu1 %v3009_v62  ;;  %v3061_v62 = vld [vmem:[%s3923_s1 + $0x2b8] sm:$0xff]  }
  0x2e   :  { %2723 = vmatprep.subr.bf16.mxu1 %v3012_v63  ;;  %v522_v63 = vrot.slane %v494_v56, %v3335_v41  ;;  %v3114_v56 = vld [vmem:[%s3923_s1 + $0x4a0] sm:$0xff]  }
  0x2f   :  { %2702 = vmatpush3.bf16.msra.mxu0 %v3011_v0  ;;  %v3064_v0 = vld [vmem:[%s3923_s1 + $0x3c0] sm:$0xff]  }
  0x30   :  { %2703 = vmatprep.subr.bf16.mxu0 %v3014_v1  ;;  %v3063_v1 = vld [vmem:[%s3923_s1 + $0x300] sm:$0xff]  }
  0x31   :  { %2724 = vmatpush3.bf16.msra.mxu1 %v3013_v2  ;;  %v523_v2 = vcombine.high %v501_v60, %v501_v60 }
  0x32   :  { %2725 = vmatprep.subr.bf16.mxu1 %v3016_v3  ;;  %v3066_v3 = vld [vmem:[%s3923_s1 + $0x348] sm:$0xff]  }
  0x33   :  { %2704 = vmatpush3.bf16.msra.mxu0 %v3015_v4  ;;  %v3065_v4 = vld [vmem:[%s3923_s1 + $0x380] sm:$0xff]  }
  0x34   :  { %2705 = vmatprep.subr.bf16.mxu0 %v3018_v5  ;;  %v526_v5 = vcombine.high %v522_v63, %v522_v63 }
  0x35   :  { %2726 = vmatpush3.bf16.msra.mxu1 %v3017_v6  ;;  %v3068_v6 = vld [vmem:[%s3923_s1 + $0x3c8] sm:$0xff]  }
  0x36   :  { %2727 = vmatprep.subr.bf16.mxu1 %v3020_v7  ;;  %v3067_v7 = vld [vmem:[%s3923_s1 + $0x308] sm:$0xff]  }
  0x37   :  { %2706 = vmatpush3.bf16.msra.mxu0 %v3019_v8  ;;  %v3070_v8 = vld [vmem:[%s3923_s1 + $0x350] sm:$0xff]  }
  0x38   :  { %2707 = vmatprep.subr.bf16.mxu0 %v3022_v9  ;;  %v3069_v9 = vld [vmem:[%s3923_s1 + $0x388] sm:$0xff]  }
  0x39   :  { %2728 = vmatpush3.bf16.msra.mxu1 %v3021_v10  ;;  %v3072_v10 = vld [vmem:[%s3923_s1 + $0x3d0] sm:$0xff]  }
  0x3a   :  { %2729 = vmatprep.subr.bf16.mxu1 %v3024_v11  ;;  %v3071_v11 = vld [vmem:[%s3923_s1 + $0x310] sm:$0xff]  }
  0x3b   :  { %2708 = vmatpush3.bf16.msra.mxu0 %v3023_v12  ;;  %v3074_v12 = vld [vmem:[%s3923_s1 + $0x358] sm:$0xff]  }
  0x3c   :  { %2709 = vmatprep.subr.bf16.mxu0 %v3026_v13  ;;  %v3073_v13 = vld [vmem:[%s3923_s1 + $0x390] sm:$0xff]  }
  0x3d   :  { %2730 = vmatpush3.bf16.msra.mxu1 %v3025_v14  ;;  %v3076_v14 = vld [vmem:[%s3923_s1 + $0x3d8] sm:$0xff]  }
  0x3e   :  { %2731 = vmatprep.subr.bf16.mxu1 %v3028_v15  ;;  %v3075_v15 = vld [vmem:[%s3923_s1 + $0x318] sm:$0xff]  }
  0x3f   :  { %2710 = vmatpush3.bf16.msra.mxu0 %v3027_v16  ;;  %v3078_v16 = vld [vmem:[%s3923_s1 + $0x360] sm:$0xff]  }
  0x40   :  { %2739 = vmatprep.subr.bf16.mxu0 %v3030_v18  ;;  %v3080_v18 = vld [vmem:[%s3923_s1 + $0x3e0] sm:$0xff]  }
  0x41   :  { %2732 = vmatpush3.bf16.msra.mxu1 %v3029_v19  ;;  %v3079_v19 = vld [vmem:[%s3923_s1 + $0x320] sm:$0xff]  }
  0x42   :  { %1907 = vmatmul.mubr.bf16.vlgmr.msra.gmra.mrb[4].mxu0 %v459_v17  ;;  %2761 = vmatprep.subr.bf16.mxu1 %v3032_v20  ;;  %v3077_v17 = vld [vmem:[%s3923_s1 + $0x398] sm:$0xff]   ;;  %v3082_v20 = vld [vmem:[%s3923_s1 + $0x368] sm:$0xff]  }
  0x43   :  { %2740 = vmatpush3.bf16.msra.mxu0 %v3031_v21  ;;  %1986 = vmatprep.mubr.bf16.mxu0 %v515_v55  ;;  %v3081_v21 = vld [vmem:[%s3923_s1 + $0x3a0] sm:$0xff]   ;;  %v3115_v55 = vld [vmem:[%s3923_s1 + $0x468] sm:$0xff]  }
  0x44   :  { %1947 = vmatmul.mubr.bf16.vlgmr.msra.gmra.mrb[4].mxu1 %v475_v22  ;;  %2741 = vmatprep.subr.bf16.mxu0 %v3034_v23  ;;  %v3084_v22 = vld [vmem:[%s3923_s1 + $0x3e8] sm:$0xff]  }
  0x45   :  { %2762 = vmatpush3.bf16.msra.mxu1 %v3033_v24  ;;  %2026 = vmatprep.mubr.bf16.mxu1 %v525_v59  ;;  %v3083_v23 = vld [vmem:[%s3923_s1 + $0x328] sm:$0xff]   ;;  %v3086_v24 = vld [vmem:[%s3923_s1 + $0x370] sm:$0xff]  }
  0x46   :  { %2763 = vmatprep.subr.bf16.mxu1 %v3036_v25  ;;  %v3085_v25 = vld [vmem:[%s3923_s1 + $0x3a8] sm:$0xff]   ;;  %v3119_v59 = vld [vmem:[%s3923_s1 + $0x470] sm:$0xff]  }
  0x47   :  { %2742 = vmatpush3.bf16.msra.mxu0 %v3035_v26  ;;  %v3088_v26 = vld [vmem:[%s3923_s1 + $0x3f0] sm:$0xff]  }
  0x48   :  { %2743 = vmatprep.subr.bf16.mxu0 %v3038_v27  ;;  %v3087_v27 = vld [vmem:[%s3923_s1 + $0x330] sm:$0xff]  }
  0x49   :  { %2764 = vmatpush3.bf16.msra.mxu1 %v3037_v28  ;;  %v3090_v28 = vld [vmem:[%s3923_s1 + $0x378] sm:$0xff]  }
  0x4a   :  { %2765 = vmatprep.subr.bf16.mxu1 %v3040_v29  ;;  %v3089_v29 = vld [vmem:[%s3923_s1 + $0x3b0] sm:$0xff]  }
  0x4b   :  { %2744 = vmatpush3.bf16.msra.mxu0 %v3039_v30  ;;  %v3092_v30 = vld [vmem:[%s3923_s1 + $0x3f8] sm:$0xff]  }
  0x4c   :  { %2745 = vmatprep.subr.bf16.mxu0 %v3042_v31  ;;  %v3091_v31 = vld [vmem:[%s3923_s1 + $0x338] sm:$0xff]  }
  0x4d   :  { %2766 = vmatpush3.bf16.msra.mxu1 %v3041_v32  ;;  %v508_v32 = vrot.slane %v3524_v52, %v3335_v41  ;;  %v3110_v52 = vld [vmem:[%s3923_s1 + $0x498] sm:$0xff]  }
  0x4e   :  { %2767 = vmatprep.subr.bf16.mxu1 %v3044_v33  ;;  %v3095_v33 = vld [vmem:[%s3923_s1 + $0x440] sm:$0xff]  }
  0x4f   :  { %2746 = vmatpush3.bf16.msra.mxu0 %v3043_v34  ;;  %v3094_v34 = vld [vmem:[%s3923_s1 + $0x3b8] sm:$0xff]  }
  0x50   :  { %2747 = vmatprep.subr.bf16.mxu0 %v3046_v35  ;;  %v3097_v35 = vld [vmem:[%s3923_s1 + $0x4c0] sm:$0xff]  }
  0x51   :  { %2768 = vmatpush3.bf16.msra.mxu1 %v3045_v36  ;;  %v3096_v36 = vld [vmem:[%s3923_s1 + $0x400] sm:$0xff]  }
  0x52   :  { %2769 = vmatprep.subr.bf16.mxu1 %v3048_v37  ;;  %v524_v37 = vcombine.high %v508_v32, %v508_v32 }
  0x53   :  { %2748 = vmatpush3.bf16.msra.mxu0 %v3047_v38  ;;  %v3099_v38 = vld [vmem:[%s3923_s1 + $0x448] sm:$0xff]  }
  0x54   :  { %2749 = vmatprep.subr.bf16.mxu0 %v3050_v39  ;;  %v3098_v39 = vld [vmem:[%s3923_s1 + $0x480] sm:$0xff]  }
  0x55   :  { %2770 = vmatpush3.bf16.msra.mxu1 %v3049_v40  ;;  %v3101_v40 = vld [vmem:[%s3923_s1 + $0x4c8] sm:$0xff]  }
  0x56   :  { %2771 = vmatprep.subr.bf16.mxu1 %v3052_v42  ;;  %v3100_v42 = vld [vmem:[%s3923_s1 + $0x408] sm:$0xff]  }
  0x57   :  { %2750 = vmatpush3.bf16.msra.mxu0 %v3051_v43  ;;  %v3103_v43 = vld [vmem:[%s3923_s1 + $0x450] sm:$0xff]  }
  0x58   :  { %2751 = vmatprep.subr.bf16.mxu0 %v3054_v44  ;;  %v3102_v44 = vld [vmem:[%s3923_s1 + $0x488] sm:$0xff]  }
  0x59   :  { %2772 = vmatpush3.bf16.msra.mxu1 %v3053_v46  ;;  %v3104_v46 = vld [vmem:[%s3923_s1 + $0x410] sm:$0xff]  }
  0x5a   :  { %2773 = vmatprep.subr.bf16.mxu1 %v3056_v49  ;;  %v3109_v49 = vld [vmem:[%s3923_s1 + $0x4d8] sm:$0xff]  }
  0x5b   :  { %2752 = vmatpush3.bf16.msra.mxu0 %v3055_v50  ;;  %v3108_v50 = vld [vmem:[%s3923_s1 + $0x418] sm:$0xff]  }
  0x5c   :  { %2753 = vmatprep.subr.bf16.mxu0 %v3058_v53  ;;  %v3113_v53 = vld [vmem:[%s3923_s1 + $0x4e0] sm:$0xff]  }
  0x5d   :  { %2774 = vmatpush3.bf16.msra.mxu1 %v3057_v54  ;;  %v3112_v54 = vld [vmem:[%s3923_s1 + $0x420] sm:$0xff]  }
  0x5e   :  { %2775 = vmatprep.subr.bf16.mxu1 %v3060_v57  ;;  %v3117_v57 = vld [vmem:[%s3923_s1 + $0x4e8] sm:$0xff]  }
  0x5f   :  { %2754 = vmatpush3.bf16.msra.mxu0 %v3059_v58  ;;  %v3116_v58 = vld [vmem:[%s3923_s1 + $0x428] sm:$0xff]  }
  0x60   :  { %2783 = vmatprep.subr.bf16.mxu0 %v3062_v61  ;;  %v3118_v61 = vld [vmem:[%s3923_s1 + $0x4a8] sm:$0xff]  }
  0x61   :  { %2776 = vmatpush3.bf16.msra.mxu1 %v3061_v62 }
  0x62   :  { %1987 = vmatmul.mubr.bf16.vlgmr.msra.gmra.mrb[8].mxu0 %v501_v60  ;;  %2805 = vmatprep.subr.bf16.mxu1 %v3064_v0  ;;  %v24_v60 = vld [vmem:[%s3922_s0 + $0x10] sm:$0xff] }
  0x63   :  { %2784 = vmatpush3.bf16.msra.mxu0 %v3063_v1  ;;  %2066 = vmatprep.mubr.bf16.mxu0 %v522_v63  ;;  %v534_v62 = vrot.slane %v24_v60, %v3335_v41  ;;  %v527_v63 = vcombine.high %v24_v60, %v24_v60  ;;  %v3121_v0 = vld [vmem:[%s3923_s1 + $0x4f0] sm:$0xff]  }
  0x64   :  { %2027 = vmatmul.mubr.bf16.vlgmr.msra.gmra.mrb[8].mxu1 %v523_v2  ;;  %2785 = vmatprep.subr.bf16.mxu0 %v3066_v3  ;;  %v3120_v1 = vld [vmem:[%s3923_s1 + $0x430] sm:$0xff]  }
  0x65   :  { %2806 = vmatpush3.bf16.msra.mxu1 %v3065_v4  ;;  %2106 = vmatprep.mubr.bf16.mxu1 %v526_v5  ;;  %v542_v2 = vcombine.high %v534_v62, %v534_v62  ;;  %v3730_v3 = vrot.slane %v527_v63, %v3335_v41  ;;  %v3123_v4 = vld [vmem:[%s3923_s1 + $0x478] sm:$0xff]   ;;  %v3122_v5 = vld [vmem:[%s3923_s1 + $0x4b0] sm:$0xff]  }
  0x66   :  { %2807 = vmatprep.subr.bf16.mxu1 %v3068_v6 }
  0x67   :  { %2786 = vmatpush3.bf16.msra.mxu0 %v3067_v7  ;;  %v564_v6 = vrot.slane %v542_v2, %v3335_v41  ;;  %v543_v7 = vcombine.high %v3730_v3, %v3730_v3 }
  0x68   :  { %2787 = vmatprep.subr.bf16.mxu0 %v3070_v8  ;;  %v3125_v8 = vld [vmem:[%s3923_s1 + $0x4f8] sm:$0xff]  }
  0x69   :  { %2808 = vmatpush3.bf16.msra.mxu1 %v3069_v9  ;;  %v3124_v9 = vld [vmem:[%s3923_s1 + $0x438] sm:$0xff]  }
  0x6a   :  { %2809 = vmatprep.subr.bf16.mxu1 %v3072_v10  ;;  %v574_v10 = vcombine.high %v564_v6, %v564_v6 }
  0x6b   :  { %2788 = vmatpush3.bf16.msra.mxu0 %v3071_v11  ;;  %v550_v11 = vrot.slane %v534_v62, %v3335_v41 }
  0x6c   :  { %2789 = vmatprep.subr.bf16.mxu0 %v3074_v12  ;;  %v3127_v12 = vld [vmem:[%s3923_s1 + $0x540] sm:$0xff]  }
  0x6d   :  { %2810 = vmatpush3.bf16.msra.mxu1 %v3073_v13  ;;  %v3126_v13 = vld [vmem:[%s3923_s1 + $0x4b8] sm:$0xff]  }
  0x6e   :  { %2811 = vmatprep.subr.bf16.mxu1 %v3076_v14  ;;  %v571_v14 = vrot.slane %v543_v7, %v3335_v41 }
  0x6f   :  { %2790 = vmatpush3.bf16.msra.mxu0 %v3075_v15  ;;  %v3129_v15 = vld [vmem:[%s3923_s1 + $0x5c0] sm:$0xff]  }
  0x70   :  { %2791 = vmatprep.subr.bf16.mxu0 %v3078_v16  ;;  %v3128_v16 = vld [vmem:[%s3923_s1 + $0x500] sm:$0xff]  }
  0x71   :  { %2812 = vmatpush3.bf16.msra.mxu1 %v3077_v17  ;;  %v572_v17 = vcombine.high %v550_v11, %v550_v11 }
  0x72   :  { %2813 = vmatprep.subr.bf16.mxu1 %v3080_v18  ;;  %v3131_v18 = vld [vmem:[%s3923_s1 + $0x548] sm:$0xff]  }
  0x73   :  { %2792 = vmatpush3.bf16.msra.mxu0 %v3079_v19  ;;  %v3130_v19 = vld [vmem:[%s3923_s1 + $0x580] sm:$0xff]  }
  0x74   :  { %2793 = vmatprep.subr.bf16.mxu0 %v3082_v20  ;;  %v575_v20 = vcombine.high %v571_v14, %v571_v14 }
  0x75   :  { %2814 = vmatpush3.bf16.msra.mxu1 %v3081_v21  ;;  %v3133_v21 = vld [vmem:[%s3923_s1 + $0x5c8] sm:$0xff]  }
  0x76   :  { %2815 = vmatprep.subr.bf16.mxu1 %v3084_v22  ;;  %v3132_v22 = vld [vmem:[%s3923_s1 + $0x508] sm:$0xff]  }
  0x77   :  { %2794 = vmatpush3.bf16.msra.mxu0 %v3083_v23  ;;  %v3135_v23 = vld [vmem:[%s3923_s1 + $0x550] sm:$0xff]  }
  0x78   :  { %2795 = vmatprep.subr.bf16.mxu0 %v3086_v24  ;;  %v3134_v24 = vld [vmem:[%s3923_s1 + $0x588] sm:$0xff]  }
  0x79   :  { %2816 = vmatpush3.bf16.msra.mxu1 %v3085_v25  ;;  %v3137_v25 = vld [vmem:[%s3923_s1 + $0x5d0] sm:$0xff]  }
  0x7a   :  { %2817 = vmatprep.subr.bf16.mxu1 %v3088_v26  ;;  %v3136_v26 = vld [vmem:[%s3923_s1 + $0x510] sm:$0xff]  }
  0x7b   :  { %2796 = vmatpush3.bf16.msra.mxu0 %v3087_v27  ;;  %v3139_v27 = vld [vmem:[%s3923_s1 + $0x558] sm:$0xff]  }
  0x7c   :  { %2797 = vmatprep.subr.bf16.mxu0 %v3090_v28  ;;  %v3138_v28 = vld [vmem:[%s3923_s1 + $0x590] sm:$0xff]  }
  0x7d   :  { %2818 = vmatpush3.bf16.msra.mxu1 %v3089_v29  ;;  %v3141_v29 = vld [vmem:[%s3923_s1 + $0x5d8] sm:$0xff]  }
  0x7e   :  { %2819 = vmatprep.subr.bf16.mxu1 %v3092_v30  ;;  %v3140_v30 = vld [vmem:[%s3923_s1 + $0x518] sm:$0xff]  }
  0x7f   :  { %2798 = vmatpush3.bf16.msra.mxu0 %v3091_v31  ;;  %v3143_v31 = vld [vmem:[%s3923_s1 + $0x560] sm:$0xff]  }
  0x80   :  { %2827 = vmatprep.subr.bf16.mxu0 %v3095_v33  ;;  %v3145_v33 = vld [vmem:[%s3923_s1 + $0x5e0] sm:$0xff]  }
  0x81   :  { %2820 = vmatpush3.bf16.msra.mxu1 %v3094_v34  ;;  %v3144_v34 = vld [vmem:[%s3923_s1 + $0x520] sm:$0xff]  }
  0x82   :  { %2067 = vmatmul.mubr.bf16.vlgmr.msra.gmra.mrb[12].mxu0 %v508_v32  ;;  %2849 = vmatprep.subr.bf16.mxu1 %v3097_v35  ;;  %v3142_v32 = vld [vmem:[%s3923_s1 + $0x598] sm:$0xff]   ;;  %v3147_v35 = vld [vmem:[%s3923_s1 + $0x568] sm:$0xff]  }
  0x83   :  { %2828 = vmatpush3.bf16.msra.mxu0 %v3096_v36  ;;  %2146 = vmatprep.mubr.bf16.mxu0 %v564_v6  ;;  %v3146_v36 = vld [vmem:[%s3923_s1 + $0x5a0] sm:$0xff]  }
  0x84   :  { %2107 = vmatmul.mubr.bf16.vlgmr.msra.gmra.mrb[12].mxu1 %v524_v37  ;;  %2829 = vmatprep.subr.bf16.mxu0 %v3099_v38  ;;  %v3149_v37 = vld [vmem:[%s3923_s1 + $0x5e8] sm:$0xff]  }
  0x85   :  { %2850 = vmatpush3.bf16.msra.mxu1 %v3098_v39  ;;  %2186 = vmatprep.mubr.bf16.mxu1 %v574_v10  ;;  %v3148_v38 = vld [vmem:[%s3923_s1 + $0x528] sm:$0xff]   ;;  %v3151_v39 = vld [vmem:[%s3923_s1 + $0x570] sm:$0xff]  }
  0x86   :  { %2851 = vmatprep.subr.bf16.mxu1 %v3101_v40  ;;  %v3150_v40 = vld [vmem:[%s3923_s1 + $0x5a8] sm:$0xff]  }
  0x87   :  { %2830 = vmatpush3.bf16.msra.mxu0 %v3100_v42  ;;  %v3153_v42 = vld [vmem:[%s3923_s1 + $0x5f0] sm:$0xff]  }
  0x88   :  { %2831 = vmatprep.subr.bf16.mxu0 %v3103_v43  ;;  %v3152_v43 = vld [vmem:[%s3923_s1 + $0x530] sm:$0xff]  }
  0x89   :  { %2852 = vmatpush3.bf16.msra.mxu1 %v3102_v44  ;;  %v3155_v44 = vld [vmem:[%s3923_s1 + $0x578] sm:$0xff]  }
  0x8a   :  { %2853 = vmatprep.subr.bf16.mxu1 %v3105_v45  ;;  %v3154_v45 = vld [vmem:[%s3923_s1 + $0x5b0] sm:$0xff]  }
  0x8b   :  { %2832 = vmatpush3.bf16.msra.mxu0 %v3104_v46  ;;  %v3156_v46 = vld [vmem:[%s3923_s1 + $0x538] sm:$0xff]  }
  0x8c   :  { %2833 = vmatprep.subr.bf16.mxu0 %v3107_v47  ;;  %v3157_v47 = vld [vmem:[%s3923_s1 + $0x5f8] sm:$0xff]  }
  0x8d   :  { %2854 = vmatpush3.bf16.msra.mxu1 %v3106_v48  ;;  %v3159_v48 = vld [vmem:[%s3923_s1 + $0x5b8] sm:$0xff]  }
  0x8e   :  { %2855 = vmatprep.subr.bf16.mxu1 %v3109_v49  ;;  %v557_v49 = vrot.slane %v3730_v3, %v3335_v41 }
  0x8f   :  { %2834 = vmatpush3.bf16.msra.mxu0 %v3108_v50  ;;  %v3160_v50 = vld [vmem:[%s3923_s1 + $0x600] sm:$0xff]  }
  0x90   :  { %2835 = vmatprep.subr.bf16.mxu0 %v3111_v51  ;;  %v3197_v51 = vmov 0.0  }
  0x91   :  { %2856 = vmatpush3.bf16.msra.mxu1 %v3110_v52  ;;  %v573_v52 = vcombine.high %v557_v49, %v557_v49 }
  0x92   :  { %2857 = vmatprep.subr.bf16.mxu1 %v3113_v53 }
  0x93   :  { %2836 = vmatpush3.bf16.msra.mxu0 %v3112_v54 }
  0x94   :  { %2837 = vmatprep.subr.bf16.mxu0 %v3115_v55 }
  0x95   :  { %2858 = vmatpush3.bf16.msra.mxu1 %v3114_v56 }
  0x96   :  { %2859 = vmatprep.subr.bf16.mxu1 %v3117_v57 }
  0x97   :  { %2838 = vmatpush3.bf16.msra.mxu0 %v3116_v58 }
  0x98   :  { %2839 = vmatprep.subr.bf16.mxu0 %v3119_v59 }
  0x99   :  { %2860 = vmatpush3.bf16.msra.mxu1 %v3118_v61 }
  0x9a   :  { %2861 = vmatprep.subr.bf16.mxu1 %v3121_v0 }
  0x9b   :  { %2840 = vmatpush3.bf16.msra.mxu0 %v3120_v1 }
  0x9c   :  { %2841 = vmatprep.subr.bf16.mxu0 %v3123_v4 }
  0x9d   :  { %2862 = vmatpush3.bf16.msra.mxu1 %v3122_v5 }
  0x9e   :  { %2863 = vmatprep.subr.bf16.mxu1 %v3125_v8 }
  0x9f   :  { %2842 = vmatpush3.bf16.msra.mxu0 %v3124_v9 }
  0xa0   :  { %2871 = vmatprep.subr.bf16.mxu0 %v3127_v12 }
  0xa1   :  { %2864 = vmatpush3.bf16.msra.mxu1 %v3126_v13 }
  0xa2   :  { %2147 = vmatmul.mubr.bf16.vlgmr.msra.gmra.mrb[16].mxu0 %v550_v11  ;;  %2893 = vmatprep.subr.bf16.mxu1 %v3129_v15 }
  0xa3   :  { %2872 = vmatpush3.bf16.msra.mxu0 %v3128_v16  ;;  %2226 = vmatprep.mubr.bf16.mxu0 %v571_v14 }
  0xa4   :  { %2187 = vmatmul.mubr.bf16.vlgmr.msra.gmra.mrb[16].mxu1 %v572_v17  ;;  %2873 = vmatprep.subr.bf16.mxu0 %v3131_v18 }
  0xa5   :  { %2894 = vmatpush3.bf16.msra.mxu1 %v3130_v19  ;;  %2266 = vmatprep.mubr.bf16.mxu1 %v575_v20 }
  0xa6   :  { %2895 = vmatprep.subr.bf16.mxu1 %v3133_v21 }
  0xa7   :  { %2874 = vmatpush3.bf16.msra.mxu0 %v3132_v22 }
  0xa8   :  { %2875 = vmatprep.subr.bf16.mxu0 %v3135_v23 }
  0xa9   :  { %2896 = vmatpush3.bf16.msra.mxu1 %v3134_v24 }
  0xaa   :  { %2897 = vmatprep.subr.bf16.mxu1 %v3137_v25 }
  0xab   :  { %2876 = vmatpush3.bf16.msra.mxu0 %v3136_v26 }
  0xac   :  { %2877 = vmatprep.subr.bf16.mxu0 %v3139_v27 }
  0xad   :  { %2898 = vmatpush3.bf16.msra.mxu1 %v3138_v28 }
  0xae   :  { %2899 = vmatprep.subr.bf16.mxu1 %v3141_v29 }
  0xaf   :  { %2878 = vmatpush3.bf16.msra.mxu0 %v3140_v30 }
  0xb0   :  { %2879 = vmatprep.subr.bf16.mxu0 %v3143_v31 }
  0xb1   :  { %2900 = vmatpush3.bf16.msra.mxu1 %v3142_v32 }
  0xb2   :  { %2901 = vmatprep.subr.bf16.mxu1 %v3145_v33 }
  0xb3   :  { %2880 = vmatpush3.bf16.msra.mxu0 %v3144_v34 }
  0xb4   :  { %2881 = vmatprep.subr.bf16.mxu0 %v3147_v35 }
  0xb5   :  { %2902 = vmatpush3.bf16.msra.mxu1 %v3146_v36 }
  0xb6   :  { %2903 = vmatprep.subr.bf16.mxu1 %v3149_v37 }
  0xb7   :  { %2882 = vmatpush3.bf16.msra.mxu0 %v3148_v38 }
  0xb8   :  { %2883 = vmatprep.subr.bf16.mxu0 %v3151_v39 }
  0xb9   :  { %2904 = vmatpush3.bf16.msra.mxu1 %v3150_v40 }
  0xba   :  { %2905 = vmatprep.subr.bf16.mxu1 %v3153_v42 }
  0xbb   :  { %2884 = vmatpush3.bf16.msra.mxu0 %v3152_v43 }
  0xbc   :  { %2885 = vmatprep.subr.bf16.mxu0 %v3155_v44 }
  0xbd   :  { %2906 = vmatpush3.bf16.msra.mxu1 %v3154_v45 }
  0xbe   :  { %2907 = vmatprep.subr.bf16.mxu1 %v3157_v47 }
  0xbf   :  { %2886 = vmatpush3.bf16.msra.mxu0 %v3156_v46 }
  0xc0   :  { %2929 = vmatprep.subr.bf16.mxu0 %v3197_v51 }
  0xc1   :  { %10 = vsyncpa [#allocation3], 0  ;;  %2908 = vmatpush3.bf16.msra.mxu1 %v3159_v48  ;;  %v3161_v53 = vld [vmem:[%s3923_s1 + $0x608] sm:$0xff]   ;;  %vm3198_vm0 = vmmov 0   ;;  %v3162_v54 = vld [vmem:[%s3923_s1 + $0x610] sm:$0xff]   ;;  %vm1790_vm1 = vcmask 523264  }
  0xc2   :  { %2227 = vmatmul.mubr.bf16.vlgmr.msra.gmra.mrb[20].mxu0 %v557_v49  ;;  %2941 = vmatprep.subr.bf16.mxu1 %v3197_v51  ;;  %v3163_v55 = vld [vmem:[%s3923_s1 + $0x618] sm:$0xff]   ;;  %v2443_v59 = vld [vmem:[%s3924_s2] ss:$0 sm:$0xff]  ;;  %v3165_v7 = vld [vmem:[%s3925_s3 + $0x8] sm:$0xff]   ;;  %s3199_s9 = smov [#allocation2]   ;;  %vm2427_vm2 = vcmask 74752  }
  0xc3   :  { %2930 = vmatpush3.bf16.msra.mxu0 %v3160_v50  ;;  %2937 = vmatprep.mubr.msk.bf16.mxu0 %vm3198_vm0, %v3197_v51  ;;  %v2444_v56 = vld.sshfl [vmem:[%s3922_s0 + $0x18] sm:$0x1 pattern:$0x75316420]  ;;  %v3166_v8 = vld [vmem:[%s3925_s3 + $0x10] sm:$0xff]   ;;  %v3168_v20 = vld [vmem:[%s3925_s3 + $0x20] sm:$0xff]  }
  0xc4   :  { %2267 = vmatmul.mubr.bf16.vlgmr.msra.gmra.mrb[20].mxu1 %v573_v52  ;;  %2931 = vmatprep.subr.bf16.mxu0 %v3197_v51  ;;  %v589_v57 = vrot.slane %v2444_v56, %v3335_v41  ;;  %v3164_v41 = vld [vmem:[%s3925_s3] sm:$0xff]   ;;  %v3167_v14 = vld [vmem:[%s3925_s3 + $0x18] sm:$0xff]   ;;  %v3169_v23 = vld [vmem:[%s3925_s3 + $0x28] sm:$0xff]   ;;  %s2435_s10 = sshll.u32 %s3199_s9, 4  ;;  %s2436_s10 = int_to_ptr.vmem [resolvable:$true] %s2435_s10 }
  0xc5   :  { %2957 = vmatprep.mubr.msk.bf16.mxu1 %vm3198_vm0, %v3197_v51  ;;  %2942 = vmatpush3.bf16.msra.mxu1 %v3164_v41  ;;  %v3170_v24 = vld [vmem:[%s3925_s3 + $0x30] sm:$0xff]   ;;  %v3171_v25 = vld [vmem:[%s3925_s3 + $0x38] sm:$0xff]   ;;  %s3172_s11 = scalar_lea.vmem %s2436_s10, 32  ;;  %p3177_p1 = scmp.lt.s32.totalorder %s2436_s10, %s2436_s10 }
  0xc6   :  { %2943 = vmatprep.subr.bf16.mxu1 %v3197_v51  ;;  %p3173_p0 = scmp.ne.s32.totalorder %s2436_s10, %s3172_s11  ;;  %p3178_p2 = scmp.lt.s32.totalorder %s3172_s11, %s3172_s11 }
  0xc7   :  { %2932 = vmatpush3.bf16.msra.mxu0 %v3161_v53 }
  0xc8   :  { %2933 = vmatprep.subr.bf16.mxu0 %v3197_v51  ;;  %p3179_p3 = por %p3178_p2, %p3177_p1 }
  0xc9   :  { %2944 = vmatpush3.bf16.msra.mxu1 %v3165_v7 }
  0xca   :  { %2945 = vmatprep.subr.bf16.mxu1 %v3197_v51  ;;  %p3180_p4 = pnand %p3179_p3, %p3173_p0 }
  0xcb   :  { %2934 = vmatpush3.bf16.msra.mxu0 %v3162_v54 }
  0xcc   :  { %2935 = vmatprep.subr.bf16.mxu0 %v3197_v51 }
  0xcd   :  { %2946 = vmatpush3.bf16.msra.mxu1 %v3166_v8 }
  0xce   :  { %2947 = vmatprep.subr.bf16.mxu1 %v3197_v51 }
  0xcf   :  { %2936 = vmatpush3.bf16.msra.mxu0 %v3163_v55 }
  0xd1   :  { %2948 = vmatpush3.bf16.msra.mxu1 %v3167_v14 }
  0xd2   :  { %2938 = vmatmul.mubr.msk.bf16.vlgmr.msra.gmra.mrb[24].mxu0 %vm1790_vm1, %v589_v57  ;;  %2949 = vmatprep.subr.bf16.mxu1 %v3197_v51 }
  0xd5   :  { %2950 = vmatpush3.bf16.msra.mxu1 %v3168_v20 }
  0xd6   :  { %2951 = vmatprep.subr.bf16.mxu1 %v3197_v51 }
  0xd9   :  { %2952 = vmatpush3.bf16.msra.mxu1 %v3169_v23 }
  0xda   :  { %2953 = vmatprep.subr.bf16.mxu1 %v3197_v51 }
  0xdd   :  { %2954 = vmatpush3.bf16.msra.mxu1 %v3170_v24 }
  0xde   :  { %2955 = vmatprep.subr.bf16.mxu1 %v3197_v51 }
  0xe1   :  { %2956 = vmatpush3.bf16.msra.mxu1 %v3171_v25 }
  0xf5   :  { %v2667_v58 = vpop.f32.mrb[0].mxu0 }
  0xf6   :  { %v2668_v60 = vpop.f32.mrb[1].mxu0 }
  0xf7   :  { %v2669_v61 = vadd.f32 %v2668_v60, %v2667_v58  ;;  %v2670_v62 = vpop.f32.mrb[2].mxu0  ;;  %v2689_v63 = vpop.f32.mrb[0].mxu1 }
  0xf8   :  { %v2671_v0 = vpop.f32.mrb[3].mxu0  ;;  %v2690_v1 = vpop.f32.mrb[1].mxu1 }
  0xf9   :  { %v1829_v2 = vadd.f32 %v2669_v61, %v2443_v59  ;;  %v2691_v3 = vadd.f32 %v2690_v1, %v2689_v63  ;;  %v2692_v4 = vpop.f32.mrb[2].mxu1 }
  0xfa   :  { %v2693_v5 = vpop.f32.mrb[3].mxu1 }
  0xfb   :  { %v1869_v6 = vadd.f32 %v2691_v3, %v1829_v2 }
 0x115   :  { %v2711_v9 = vpop.f32.mrb[4].mxu0 }
 0x116   :  { %v2712_v10 = vpop.f32.mrb[5].mxu0 }
 0x117   :  { %v2713_v11 = vadd.f32 %v2712_v10, %v2711_v9  ;;  %v2714_v12 = vpop.f32.mrb[6].mxu0  ;;  %v2733_v13 = vpop.f32.mrb[4].mxu1 }
 0x118   :  { %v2715_v15 = vpop.f32.mrb[7].mxu0  ;;  %v2734_v16 = vpop.f32.mrb[5].mxu1 }
 0x119   :  { %v1909_v17 = vadd.f32 %v2713_v11, %v1869_v6  ;;  %v2735_v18 = vadd.f32 %v2734_v16, %v2733_v13  ;;  %v2736_v19 = vpop.f32.mrb[6].mxu1 }
 0x11a   :  { %v2737_v21 = vpop.f32.mrb[7].mxu1 }
 0x11b   :  { %v1949_v22 = vadd.f32 %v2735_v18, %v1909_v17  ;;  %v2642_v17 = vld [vmem:[%s3926_s4] ss:$0 sm:$0xff] }
 0x135   :  { %v2755_v26 = vpop.f32.mrb[8].mxu0 }
 0x136   :  { %v2756_v27 = vpop.f32.mrb[9].mxu0 }
 0x137   :  { %v2757_v28 = vadd.f32 %v2756_v27, %v2755_v26  ;;  %v2758_v29 = vpop.f32.mrb[10].mxu0  ;;  %v2777_v30 = vpop.f32.mrb[8].mxu1 }
 0x138   :  { %v2759_v31 = vpop.f32.mrb[11].mxu0  ;;  %v2778_v32 = vpop.f32.mrb[9].mxu1 }
 0x139   :  { %v1989_v33 = vadd.f32 %v2757_v28, %v1949_v22  ;;  %v2779_v34 = vadd.f32 %v2778_v32, %v2777_v30  ;;  %v2780_v35 = vpop.f32.mrb[10].mxu1 }
 0x13a   :  { %v2781_v36 = vpop.f32.mrb[11].mxu1 }
 0x13b   :  { %v2029_v37 = vadd.f32 %v2779_v34, %v1989_v33 }
 0x155   :  { %v2799_v38 = vpop.f32.mrb[12].mxu0 }
 0x156   :  { %v2800_v39 = vpop.f32.mrb[13].mxu0 }
 0x157   :  { %v2801_v40 = vadd.f32 %v2800_v39, %v2799_v38  ;;  %v2802_v42 = vpop.f32.mrb[14].mxu0  ;;  %v2821_v43 = vpop.f32.mrb[12].mxu1 }
 0x158   :  { %v2803_v44 = vpop.f32.mrb[15].mxu0  ;;  %v2822_v45 = vpop.f32.mrb[13].mxu1 }
 0x159   :  { %v2069_v46 = vadd.f32 %v2801_v40, %v2029_v37  ;;  %v2823_v47 = vadd.f32 %v2822_v45, %v2821_v43  ;;  %v2824_v48 = vpop.f32.mrb[14].mxu1 }
 0x15a   :  { %v2825_v49 = vpop.f32.mrb[15].mxu1 }
 0x15b   :  { %v2109_v50 = vadd.f32 %v2823_v47, %v2069_v46 }
 0x175   :  { %v2843_v51 = vpop.f32.mrb[16].mxu0 }
 0x176   :  { %v2844_v52 = vpop.f32.mrb[17].mxu0 }
 0x177   :  { %v2845_v53 = vadd.f32 %v2844_v52, %v2843_v51  ;;  %v2846_v54 = vpop.f32.mrb[18].mxu0  ;;  %v2865_v55 = vpop.f32.mrb[16].mxu1 }
 0x178   :  { %v2847_v56 = vpop.f32.mrb[19].mxu0  ;;  %v2866_v57 = vpop.f32.mrb[17].mxu1 }
 0x179   :  { %v2149_v58 = vadd.f32 %v2845_v53, %v2109_v50  ;;  %v2867_v59 = vadd.f32 %v2866_v57, %v2865_v55  ;;  %v2868_v60 = vpop.f32.mrb[18].mxu1 }
 0x17a   :  { %v2869_v61 = vpop.f32.mrb[19].mxu1 }
 0x17b   :  { %v2189_v62 = vadd.f32 %v2867_v59, %v2149_v58 }
 0x195   :  { %v2887_v63 = vpop.f32.mrb[20].mxu0 }
 0x196   :  { %v2888_v0 = vpop.f32.mrb[21].mxu0 }
 0x197   :  { %v2889_v1 = vadd.f32 %v2888_v0, %v2887_v63  ;;  %v2890_v2 = vpop.f32.mrb[22].mxu0  ;;  %v2909_v3 = vpop.f32.mrb[20].mxu1 }
 0x198   :  { %v2891_v4 = vpop.f32.mrb[23].mxu0  ;;  %v2910_v5 = vpop.f32.mrb[21].mxu1 }
 0x199   :  { %v2229_v6 = vadd.f32 %v2889_v1, %v2189_v62  ;;  %v2911_v41 = vadd.f32 %v2910_v5, %v2909_v3  ;;  %v2912_v7 = vpop.f32.mrb[22].mxu1 }
 0x19a   :  { %v2913_v8 = vpop.f32.mrb[23].mxu1 }
 0x19b   :  { %v2269_v9 = vadd.f32 %v2911_v41, %v2229_v6 }
 0x1a5   :  { %v2308_v10 = vpop.f32.mrb[24].mxu0 }
 0x1a6   :  { %v2309_v11 = vadd.f32 %v2308_v10, %v2269_v9  ;;  %v2939_v12 = vpop.f32.mrb[25].mxu0 }
 0x1a7   :  { %v2311_v13 = vpop.f32.mrb[26].mxu0 }
 0x1a8   :  { %v2314_v14 = vmax.f32 %v2309_v11, 0.0  ;;  %v2940_v15 = vpop.f32.mrb[27].mxu0 }
 0x1aa   :  { %v2315_v16 = vpack.c.bf16 %v2314_v14, %v2314_v14 }
 0x1ac   :  { %2958 = vmatmul.mubr.bf16.vlgmr.msra.gmra.mrb[24].mxu1 %v2315_v16 }
 0x27f   :  { %v2421_v18 = vpop.f32.mrb[24].mxu1 }
 0x280   :  { %v2422_v19 = vadd.f32 %v2642_v17, %v2421_v18  ;;  %v2959_v20 = vpop.f32.mrb[25].mxu1 }
 0x281   :  { %v2424_v21 = vpop.f32.mrb[26].mxu1 }
 0x282   :  { %v2960_v22 = vpop.f32.mrb[27].mxu1  ;;  %2428 = vst.msk [vmem:[#allocation2] sm:$0x3] %vm2427_vm2, %v2422_v19 }
 0x283   :  { %3183 = shalt.err (!%p3180_p4)
}
 0x284   :  { %s3184_s4 = scalar_lea.hbm %s3927_s5, 32 }
 0x285   :  { %p3185_p5 = scmp.ne.s32.totalorder %s3927_s5, %s3184_s4  ;;  %p3188_p6 = scmp.lt.u32.totalorder %s3184_s4, %s3927_s5 }
 0x287   :  { %p3190_p7 = pnand %p3188_p6, %p3185_p5 }
 0x289   :  { %3193 = shalt.err (!%p3190_p7)
}
 0x28a   :  { %2438 = dma.vmem_to_hbm [thread:$0]  %s2436_s10, 32, %s3927_s5, [#allocation3]  }
 0x28b   :  { %3194 = dma.done.wait [#allocation3], 32  }
 0x28c   :  { %3195 = vsyncadd [#allocation3], 4294967264 }
 0x28d   :  { %2442 = vsyncpa [#allocation3], 1 }

// kernel: conv_net_forward.2
= control target key start
LH: loop header
LB: loop body
LE: loop exit
PB: predicated region body
PF: predicated region fallthrough
CT: control target
= control target key end

     0   :  { %s8054_s18 = smov 0   ;;  %s11453_s0 = inlined_call_operand.vmem [shape: f32[2,28,28,1], index: 0, kind: input, shape index: {}]   ;;  %s11454_s1 = inlined_call_operand.vmem [shape: f32[3,3,32], index: 1, kind: input, shape index: {}]   ;;  %s11455_s2 = inlined_call_operand.vmem [shape: f32[1,32], index: 2, kind: input, shape index: {}]   ;;  %s11456_s3 = inlined_call_operand.vmem [shape: bf16[3,3,32,64], index: 3, kind: input, shape index: {}]   ;;  %s11457_s4 = inlined_call_operand.vmem [shape: f32[1,64], index: 4, kind: input, shape index: {}]   ;;  %s11458_s5 = inlined_call_operand.vmem [shape: bf16[2,7,7,64], index: 5, kind: output, shape index: {}]  }
   0x1 LB: > { %s7068_s19 = sadd.s32 4294967295, %s8020_s18   ;;  %p7072_p0 = scmp.ge.s32.totalorder %s8020_s18, 1  ;;  %s8020_s18 = sphi %s8054_s18, %s15_s18  }
   0x2   : > { %p187_p1 = scmp.lt.s32.totalorder %s8020_s18, 3 }
   0x4   : > { %p188_p2 = pnand %p7072_p0, %p187_p1 }
   0x5   : > { %p215_p3 = scmp.lt.s32.totalorder (!%p188_p2), %s7068_s19, 1  ;;  %v8022_v0 = vmov (!%p188_p2), 0   ;;  %vm226_vm0 = vcmask (!%p188_p2), 261120   ;;  %vm230_vm1 = vcmask (!%p188_p2), 259072   ;;  %v8023_v1 = vmov (!%p188_p2), 0.0   ;;  %v7944_v62 = vld [vmem:[%s11456_s3 + $0x10] sm:$0xff] (!%p188_p2)  }
   0x6   : > { %191 = sbr.rel (%p188_p2) target bundleno = 1116 (0x45c), region = 40  ;;  %7943 = vset.pattern.permute.xlu1 (!%p188_p2), %v8022_v0  ;;  %7942 = vset.pattern.permute.xlu0 (!%p188_p2), %v8022_v0  ;;  %234 = vst.msk [vmem:[#allocation2 + $0x30] sm:$0xff] (!%p188_p2), %vm226_vm0, %v8023_v1  ;;  %227 = vst.msk [vmem:[#allocation2] sm:$0xff] (!%p188_p2), %vm226_vm0, %v8023_v1  ;;  %vm1024_vm2 = vcmask (!%p188_p2), 257024   ;;  %vm6894_vm3 = vcmask (!%p188_p2), 523264   ;;  %vm6989_vm4 = vcmask (!%p188_p2), 519168  }
   0x7   : > { %228 = vst.msk [vmem:[#allocation2 + $0x8] sm:$0xff] (!%p188_p2), %vm226_vm0, %v8023_v1  ;;  %229 = vst.msk [vmem:[#allocation2 + $0x10] sm:$0xff] (!%p188_p2), %vm226_vm0, %v8023_v1  ;;  %7414 = vmatprep.subr.bf16.mxu1 (!%p188_p2), %v7944_v62  ;;  %vm6990_vm5 = vsmask.f32 (!%p188_p2), 3328 }
   0x8   : > { %232 = vst.msk [vmem:[#allocation2 + $0x20] sm:$0xff] (!%p188_p2), %vm226_vm0, %v8023_v1  ;;  %233 = vst.msk [vmem:[#allocation2 + $0x28] sm:$0xff] (!%p188_p2), %vm226_vm0, %v8023_v1  ;;  %7415 = vmatpush3.bf16.msra.mxu1 (!%p188_p2), %v7944_v62 }
   0x9   : > { %236 = vst.msk [vmem:[#allocation2 + $0x40] sm:$0xff] (!%p188_p2), %vm226_vm0, %v8023_v1  ;;  %237 = vst.msk [vmem:[#allocation2 + $0x48] sm:$0xff] (!%p188_p2), %vm226_vm0, %v8023_v1 }
   0xa   : > { %238 = vst.msk [vmem:[#allocation2 + $0x50] sm:$0xff] (!%p188_p2), %vm226_vm0, %v8023_v1  ;;  %240 = vst.msk [vmem:[#allocation2 + $0x60] sm:$0xff] (!%p188_p2), %vm226_vm0, %v8023_v1 }
   0xb   : > { %241 = vst.msk [vmem:[#allocation2 + $0x68] sm:$0xff] (!%p188_p2), %vm226_vm0, %v8023_v1  ;;  %242 = vst.msk [vmem:[#allocation2 + $0x70] sm:$0xff] (!%p188_p2), %vm226_vm0, %v8023_v1 }
   0xc   : > { %244 = vst.msk [vmem:[#allocation2 + $0x80] sm:$0xff] (!%p188_p2), %vm226_vm0, %v8023_v1  ;;  %245 = vst.msk [vmem:[#allocation2 + $0x88] sm:$0xff] (!%p188_p2), %vm226_vm0, %v8023_v1 }
   0xd   : > { %s11462_s19 = smov (!%p215_p3, %s7068_s19), 1  ;;  %246 = vst.msk [vmem:[#allocation2 + $0x90] sm:$0xff] %vm226_vm0, %v8023_v1  ;;  %248 = vst.msk [vmem:[#allocation2 + $0xa0] sm:$0xff] %vm226_vm0, %v8023_v1 }
   0xe   : > { %s7930_s20 = smul.u32 896, %s11462_s19  ;;  %249 = vst.msk [vmem:[#allocation2 + $0xa8] sm:$0xff] %vm226_vm0, %v8023_v1  ;;  %250 = vst.msk [vmem:[#allocation2 + $0xb0] sm:$0xff] %vm226_vm0, %v8023_v1 }
   0xf   : > { %252 = vst.msk [vmem:[#allocation2 + $0xc0] sm:$0xff] %vm226_vm0, %v8023_v1  ;;  %253 = vst.msk [vmem:[#allocation2 + $0xc8] sm:$0xff] %vm226_vm0, %v8023_v1  ;;  %s7931_s24 = smul.u32 28, %s11462_s19 }
  0x10   : > { %254 = vst.msk [vmem:[#allocation2 + $0xd0] sm:$0xff] %vm226_vm0, %v8023_v1  ;;  %256 = vst.msk [vmem:[#allocation2 + $0xe0] sm:$0xff] %vm226_vm0, %v8023_v1  ;;  %s8376_s23 = scalar_lea.vmem %s11453_s0, %s7930_s20 }
  0x11   : > { %257 = vst.msk [vmem:[#allocation2 + $0xe8] sm:$0xff] %vm226_vm0, %v8023_v1  ;;  %258 = vst.msk [vmem:[#allocation2 + $0xf0] sm:$0xff] %vm226_vm0, %v8023_v1  ;;  %v350_v2 = vld [vmem:[%s8376_s23 + $0x10] sm:$0xff]  ;;  %v348_v3 = vld [vmem:[%s8376_s23] sm:$0xff]  ;;  %s11399_s28 = scalar_lea.vmem %s11458_s5, %s7931_s24 }
  0x12   : > { %260 = vst.msk [vmem:[#allocation2 + $0x100] sm:$0xff] %vm226_vm0, %v8023_v1  ;;  %261 = vst.msk [vmem:[#allocation2 + $0x108] sm:$0xff] %vm226_vm0, %v8023_v1  ;;  %472 = vperm.xlu1 %7943, %v350_v2   ;;  %462 = vperm.xlu0 %7942, %v348_v3   ;;  %v351_v4 = vld [vmem:[%s8376_s23 + $0x18] sm:$0xf]  ;;  %v349_v5 = vld [vmem:[%s8376_s23 + $0x8] sm:$0xff] }
  0x13   : > { %262 = vst.msk [vmem:[#allocation2 + $0x110] sm:$0xff] %vm226_vm0, %v8023_v1  ;;  %264 = vst.msk [vmem:[#allocation2 + $0x120] sm:$0xff] %vm226_vm0, %v8023_v1  ;;  %v353_v6 = vld [vmem:[%s8376_s23 + $0x28] sm:$0xff]  ;;  %v352_v7 = vld [vmem:[%s8376_s23 + $0x20] sm:$0xff] }
  0x14   : > { %265 = vst.msk [vmem:[#allocation2 + $0x128] sm:$0xff] %vm226_vm0, %v8023_v1  ;;  %266 = vst.msk [vmem:[#allocation2 + $0x130] sm:$0xff] %vm226_vm0, %v8023_v1  ;;  %v355_v8 = vld [vmem:[%s8376_s23 + $0x38] sm:$0xf]  ;;  %v354_v9 = vld [vmem:[%s8376_s23 + $0x30] sm:$0xff] }
  0x15   : > { %268 = vst.msk [vmem:[#allocation2 + $0x140] sm:$0xff] %vm226_vm0, %v8023_v1  ;;  %269 = vst.msk [vmem:[#allocation2 + $0x148] sm:$0xff] %vm226_vm0, %v8023_v1  ;;  %v357_v10 = vld [vmem:[%s8376_s23 + $0x48] sm:$0xff]  ;;  %v356_v11 = vld [vmem:[%s8376_s23 + $0x40] sm:$0xff] }
  0x16   : > { %270 = vst.msk [vmem:[#allocation2 + $0x150] sm:$0xff] %vm226_vm0, %v8023_v1  ;;  %272 = vst.msk [vmem:[#allocation2 + $0x160] sm:$0xff] %vm226_vm0, %v8023_v1  ;;  %477 = vperm.xlu1 %7943, %v351_v4   ;;  %467 = vperm.xlu0 %7942, %v349_v5   ;;  %v359_v12 = vld [vmem:[%s8376_s23 + $0x58] sm:$0xf]  ;;  %v358_v13 = vld [vmem:[%s8376_s23 + $0x50] sm:$0xff] }
  0x17   : > { %273 = vst.msk [vmem:[#allocation2 + $0x168] sm:$0xff] %vm226_vm0, %v8023_v1  ;;  %274 = vst.msk [vmem:[#allocation2 + $0x170] sm:$0xff] %vm226_vm0, %v8023_v1  ;;  %v361_v14 = vld [vmem:[%s8376_s23 + $0x68] sm:$0xff]  ;;  %v360_v15 = vld [vmem:[%s8376_s23 + $0x60] sm:$0xff] }
  0x18   : > { %276 = vst.msk [vmem:[#allocation2 + $0x180] sm:$0xff] %vm226_vm0, %v8023_v1  ;;  %277 = vst.msk [vmem:[#allocation2 + $0x188] sm:$0xff] %vm226_vm0, %v8023_v1  ;;  %v363_v16 = vld [vmem:[%s8376_s23 + $0x78] sm:$0xf]  ;;  %v362_v17 = vld [vmem:[%s8376_s23 + $0x70] sm:$0xff] }
  0x19   : > { %278 = vst.msk [vmem:[#allocation2 + $0x190] sm:$0xff] %vm226_vm0, %v8023_v1  ;;  %280 = vst.msk [vmem:[#allocation2 + $0x1a0] sm:$0xff] %vm226_vm0, %v8023_v1  ;;  %v365_v18 = vld [vmem:[%s8376_s23 + $0x88] sm:$0xff]  ;;  %v364_v19 = vld [vmem:[%s8376_s23 + $0x80] sm:$0xff] }
  0x1a   : > { %281 = vst.msk [vmem:[#allocation2 + $0x1a8] sm:$0xff] %vm226_vm0, %v8023_v1  ;;  %282 = vst.msk [vmem:[#allocation2 + $0x1b0] sm:$0xff] %vm226_vm0, %v8023_v1  ;;  %487 = vperm.xlu1 %7943, %v353_v6   ;;  %482 = vperm.xlu0 %7942, %v352_v7   ;;  %v367_v20 = vld [vmem:[%s8376_s23 + $0x98] sm:$0xf]  ;;  %v366_v21 = vld [vmem:[%s8376_s23 + $0x90] sm:$0xff] }
  0x1b   : > { %284 = vst.msk [vmem:[#allocation2 + $0x1c0] sm:$0xff] %vm226_vm0, %v8023_v1  ;;  %285 = vst.msk [vmem:[#allocation2 + $0x1c8] sm:$0xff] %vm226_vm0, %v8023_v1  ;;  %v369_v22 = vld [vmem:[%s8376_s23 + $0xa8] sm:$0xff]  ;;  %v368_v23 = vld [vmem:[%s8376_s23 + $0xa0] sm:$0xff] }
  0x1c   : > { %286 = vst.msk [vmem:[#allocation2 + $0x1d0] sm:$0xff] %vm226_vm0, %v8023_v1  ;;  %288 = vst.msk [vmem:[#allocation2 + $0x1e0] sm:$0xff] %vm226_vm0, %v8023_v1  ;;  %v371_v24 = vld [vmem:[%s8376_s23 + $0xb8] sm:$0xf]  ;;  %v370_v25 = vld [vmem:[%s8376_s23 + $0xb0] sm:$0xff] }
  0x1d   : > { %289 = vst.msk [vmem:[#allocation2 + $0x1e8] sm:$0xff] %vm226_vm0, %v8023_v1  ;;  %290 = vst.msk [vmem:[#allocation2 + $0x1f0] sm:$0xff] %vm226_vm0, %v8023_v1  ;;  %v373_v26 = vld [vmem:[%s8376_s23 + $0xc8] sm:$0xff]  ;;  %v372_v27 = vld [vmem:[%s8376_s23 + $0xc0] sm:$0xff] }
  0x1e   : > { %292 = vst.msk [vmem:[#allocation2 + $0x200] sm:$0xff] %vm226_vm0, %v8023_v1  ;;  %293 = vst.msk [vmem:[#allocation2 + $0x208] sm:$0xff] %vm226_vm0, %v8023_v1  ;;  %497 = vperm.xlu1 %7943, %v355_v8   ;;  %492 = vperm.xlu0 %7942, %v354_v9   ;;  %v375_v28 = vld [vmem:[%s8376_s23 + $0xd8] sm:$0xf]  ;;  %v374_v29 = vld [vmem:[%s8376_s23 + $0xd0] sm:$0xff] }
  0x1f   : > { %294 = vst.msk [vmem:[#allocation2 + $0x210] sm:$0xff] %vm226_vm0, %v8023_v1  ;;  %296 = vst.msk [vmem:[#allocation2 + $0x220] sm:$0xff] %vm226_vm0, %v8023_v1  ;;  %v377_v30 = vld [vmem:[%s8376_s23 + $0xe8] sm:$0xff]  ;;  %v376_v31 = vld [vmem:[%s8376_s23 + $0xe0] sm:$0xff] }
  0x20   : > { %297 = vst.msk [vmem:[#allocation2 + $0x228] sm:$0xff] %vm226_vm0, %v8023_v1  ;;  %298 = vst.msk [vmem:[#allocation2 + $0x230] sm:$0xff] %vm226_vm0, %v8023_v1  ;;  %v379_v32 = vld [vmem:[%s8376_s23 + $0xf8] sm:$0xf]  ;;  %v378_v33 = vld [vmem:[%s8376_s23 + $0xf0] sm:$0xff] }
  0x21   : > { %300 = vst.msk [vmem:[#allocation2 + $0x240] sm:$0xff] %vm226_vm0, %v8023_v1  ;;  %301 = vst.msk [vmem:[#allocation2 + $0x248] sm:$0xff] %vm226_vm0, %v8023_v1  ;;  %v381_v34 = vld [vmem:[%s8376_s23 + $0x108] sm:$0xff]  ;;  %v380_v35 = vld [vmem:[%s8376_s23 + $0x100] sm:$0xff] }
  0x22   : > { %302 = vst.msk [vmem:[#allocation2 + $0x250] sm:$0xff] %vm226_vm0, %v8023_v1  ;;  %304 = vst.msk [vmem:[#allocation2 + $0x260] sm:$0xff] %vm226_vm0, %v8023_v1  ;;  %507 = vperm.xlu1 %7943, %v357_v10   ;;  %502 = vperm.xlu0 %7942, %v356_v11   ;;  %v383_v36 = vld [vmem:[%s8376_s23 + $0x118] sm:$0xf]  ;;  %v382_v37 = vld [vmem:[%s8376_s23 + $0x110] sm:$0xff] }
  0x23   : > { %305 = vst.msk [vmem:[#allocation2 + $0x268] sm:$0xff] %vm226_vm0, %v8023_v1  ;;  %306 = vst.msk [vmem:[#allocation2 + $0x270] sm:$0xff] %vm226_vm0, %v8023_v1  ;;  %v385_v38 = vld [vmem:[%s8376_s23 + $0x128] sm:$0xff]  ;;  %v384_v39 = vld [vmem:[%s8376_s23 + $0x120] sm:$0xff] }
  0x24   : > { %308 = vst.msk [vmem:[#allocation2 + $0x280] sm:$0xff] %vm226_vm0, %v8023_v1  ;;  %309 = vst.msk [vmem:[#allocation2 + $0x288] sm:$0xff] %vm226_vm0, %v8023_v1  ;;  %v387_v40 = vld [vmem:[%s8376_s23 + $0x138] sm:$0xf]  ;;  %v386_v41 = vld [vmem:[%s8376_s23 + $0x130] sm:$0xff] }
  0x25   : > { %310 = vst.msk [vmem:[#allocation2 + $0x290] sm:$0xff] %vm226_vm0, %v8023_v1  ;;  %312 = vst.msk [vmem:[#allocation2 + $0x2a0] sm:$0xff] %vm226_vm0, %v8023_v1  ;;  %v389_v42 = vld [vmem:[%s8376_s23 + $0x148] sm:$0xff]  ;;  %v388_v43 = vld [vmem:[%s8376_s23 + $0x140] sm:$0xff] }
  0x26   : > { %313 = vst.msk [vmem:[#allocation2 + $0x2a8] sm:$0xff] %vm226_vm0, %v8023_v1  ;;  %314 = vst.msk [vmem:[#allocation2 + $0x2b0] sm:$0xff] %vm226_vm0, %v8023_v1  ;;  %517 = vperm.xlu1 %7943, %v359_v12   ;;  %512 = vperm.xlu0 %7942, %v358_v13   ;;  %v391_v44 = vld [vmem:[%s8376_s23 + $0x158] sm:$0xf]  ;;  %v390_v45 = vld [vmem:[%s8376_s23 + $0x150] sm:$0xff] }
  0x27   : > { %316 = vst.msk [vmem:[#allocation2 + $0x2c0] sm:$0xff] %vm226_vm0, %v8023_v1  ;;  %317 = vst.msk [vmem:[#allocation2 + $0x2c8] sm:$0xff] %vm226_vm0, %v8023_v1  ;;  %v393_v46 = vld [vmem:[%s8376_s23 + $0x168] sm:$0xff]  ;;  %v392_v47 = vld [vmem:[%s8376_s23 + $0x160] sm:$0xff] }
  0x28   : > { %318 = vst.msk [vmem:[#allocation2 + $0x2d0] sm:$0xff] %vm226_vm0, %v8023_v1  ;;  %320 = vst.msk [vmem:[#allocation2 + $0x2e0] sm:$0xff] %vm226_vm0, %v8023_v1  ;;  %v395_v48 = vld [vmem:[%s8376_s23 + $0x178] sm:$0xf]  ;;  %v394_v49 = vld [vmem:[%s8376_s23 + $0x170] sm:$0xff] }
  0x29   : > { %321 = vst.msk [vmem:[#allocation2 + $0x2e8] sm:$0xff] %vm226_vm0, %v8023_v1  ;;  %322 = vst.msk [vmem:[#allocation2 + $0x2f0] sm:$0xff] %vm226_vm0, %v8023_v1  ;;  %v397_v50 = vld [vmem:[%s8376_s23 + $0x188] sm:$0xff]  ;;  %v396_v51 = vld [vmem:[%s8376_s23 + $0x180] sm:$0xff] }
  0x2a   : > { %324 = vst.msk [vmem:[#allocation2 + $0x300] sm:$0xff] %vm226_vm0, %v8023_v1  ;;  %325 = vst.msk [vmem:[#allocation2 + $0x308] sm:$0xff] %vm226_vm0, %v8023_v1  ;;  %527 = vperm.xlu1 %7943, %v361_v14   ;;  %522 = vperm.xlu0 %7942, %v360_v15   ;;  %v399_v52 = vld [vmem:[%s8376_s23 + $0x198] sm:$0xf]  ;;  %v398_v53 = vld [vmem:[%s8376_s23 + $0x190] sm:$0xff] }
  0x2b   : > { %326 = vst.msk [vmem:[#allocation2 + $0x310] sm:$0xff] %vm226_vm0, %v8023_v1  ;;  %328 = vst.msk [vmem:[#allocation2 + $0x320] sm:$0xff] %vm226_vm0, %v8023_v1  ;;  %v401_v54 = vld [vmem:[%s8376_s23 + $0x1a8] sm:$0xff]  ;;  %v400_v55 = vld [vmem:[%s8376_s23 + $0x1a0] sm:$0xff] }
  0x2c   : > { %329 = vst.msk [vmem:[#allocation2 + $0x328] sm:$0xff] %vm226_vm0, %v8023_v1  ;;  %330 = vst.msk [vmem:[#allocation2 + $0x330] sm:$0xff] %vm226_vm0, %v8023_v1  ;;  %v403_v56 = vld [vmem:[%s8376_s23 + $0x1b8] sm:$0xf]  ;;  %v402_v57 = vld [vmem:[%s8376_s23 + $0x1b0] sm:$0xff] }
  0x2d   : > { %332 = vst.msk [vmem:[#allocation2 + $0x340] sm:$0xff] %vm226_vm0, %v8023_v1  ;;  %333 = vst.msk [vmem:[#allocation2 + $0x348] sm:$0xff] %vm226_vm0, %v8023_v1  ;;  %v405_v58 = vld [vmem:[%s8376_s23 + $0x1c8] sm:$0xff]  ;;  %v404_v59 = vld [vmem:[%s8376_s23 + $0x1c0] sm:$0xff] }
  0x2e   : > { %334 = vst.msk [vmem:[#allocation2 + $0x350] sm:$0xff] %vm226_vm0, %v8023_v1  ;;  %336 = vst.msk [vmem:[#allocation2 + $0x360] sm:$0xff] %vm226_vm0, %v8023_v1  ;;  %537 = vperm.xlu1 %7943, %v363_v16   ;;  %532 = vperm.xlu0 %7942, %v362_v17   ;;  %v407_v60 = vld [vmem:[%s8376_s23 + $0x1d8] sm:$0xf]  ;;  %v406_v61 = vld [vmem:[%s8376_s23 + $0x1d0] sm:$0xff] }
  0x2f   : > { %337 = vst.msk [vmem:[#allocation2 + $0x368] sm:$0xff] %vm226_vm0, %v8023_v1  ;;  %338 = vst.msk [vmem:[#allocation2 + $0x370] sm:$0xff] %vm226_vm0, %v8023_v1  ;;  %v409_v63 = vld [vmem:[%s8376_s23 + $0x1e8] sm:$0xff]  ;;  %v408_v0 = vld [vmem:[%s8376_s23 + $0x1e0] sm:$0xff] }
  0x30   : > { %340 = vst.msk [vmem:[#allocation2 + $0x380] sm:$0xff] %vm226_vm0, %v8023_v1  ;;  %341 = vst.msk [vmem:[#allocation2 + $0x388] sm:$0xff] %vm226_vm0, %v8023_v1  ;;  %v410_v2 = vld [vmem:[%s8376_s23 + $0x1f0] sm:$0xff]  ;;  %v7945_v3 = vld [vmem:[%s11456_s3 + $0x18] sm:$0xff]  }
  0x31   : > { %342 = vst.msk [vmem:[#allocation2 + $0x390] sm:$0xff] %vm226_vm0, %v8023_v1  ;;  %344 = vst.msk [vmem:[#allocation2 + $0x3a0] sm:$0xff] %vm226_vm0, %v8023_v1  ;;  %v8451_v4 = vld [vmem:[%s11454_s1 + $0x1] ss:$0 sm:$0xff]  ;;  %v8456_v6 = vld [vmem:[%s11454_s1] ss:$0 sm:$0xff]  ;;  %7416 = vmatprep.subr.bf16.mxu1 %v7945_v3 }
  0x32   : > { %345 = vst.msk [vmem:[#allocation2 + $0x3a8] sm:$0xff] %vm226_vm0, %v8023_v1  ;;  %346 = vst.msk [vmem:[#allocation2 + $0x3b0] sm:$0xff] %vm226_vm0, %v8023_v1  ;;  %547 = vperm.xlu1 %7943, %v365_v18   ;;  %542 = vperm.xlu0 %7942, %v364_v19   ;;  %v1134_v5 = vld [vmem:[#allocation2] sm:$0xff]  ;;  %v413_v8 = vld [vmem:[%s8376_s23 + $0x208] sm:$0xff] }
  0x33   : > { %4421 = vst.msk [vmem:[#allocation4] sm:$0xff] %vm226_vm0, %v8023_v1  ;;  %4422 = vst.msk [vmem:[#allocation4 + $0x8] sm:$0xff] %vm226_vm0, %v8023_v1  ;;  %v1363_v7 = vld [vmem:[#allocation2 + $0x1] sm:$0xff]  ;;  %7417 = vmatpush3.bf16.msra.mxu1 %v7945_v3  ;;  %v1251_v14 = vmul.f32 %v8456_v6, %v1134_v5  ;;  %v1364_v19 = vld [vmem:[#allocation2 + $0x9] sm:$0xff] }
  0x34   : > { %4423 = vst.msk [vmem:[#allocation4 + $0x10] sm:$0xff] %vm226_vm0, %v8023_v1  ;;  %4424 = vst.msk [vmem:[#allocation4 + $0x18] sm:$0xff] %vm226_vm0, %v8023_v1  ;;  %v412_v9 = vld [vmem:[%s8376_s23 + $0x200] sm:$0xff]  ;;  %v1480_v15 = vmul.f32 %v8451_v4, %v1363_v7  ;;  %v1135_v18 = vld [vmem:[#allocation2 + $0x8] sm:$0xff] }
  0x35   : > { %4425 = vst.msk [vmem:[#allocation4 + $0x20] sm:$0xff] %vm226_vm0, %v8023_v1  ;;  %4426 = vst.msk [vmem:[#allocation4 + $0x28] sm:$0xff] %vm226_vm0, %v8023_v1  ;;  %v1704_v10 = vld [vmem:[#allocation2 + $0x2] sm:$0xff] }
  0x36   : > { %4427 = vst.msk [vmem:[#allocation4 + $0x30] sm:$0xff] %vm226_vm0, %v8023_v1  ;;  %4428 = vst.msk [vmem:[#allocation4 + $0x38] sm:$0xff] %vm226_vm0, %v8023_v1  ;;  %557 = vperm.xlu1 %7943, %v367_v20   ;;  %552 = vperm.xlu0 %7942, %v366_v21   ;;  %v8463_v11 = vld [vmem:[%s11454_s1 + $0x2] ss:$0 sm:$0xff]  ;;  %v1136_v20 = vld [vmem:[#allocation2 + $0x10] sm:$0xff] }
  0x37   : > { %4429 = vst.msk [vmem:[#allocation4 + $0x40] sm:$0xff] %vm226_vm0, %v8023_v1  ;;  %4430 = vst.msk [vmem:[#allocation4 + $0x48] sm:$0xff] %vm226_vm0, %v8023_v1 }
  0x38   : > { %4431 = vst.msk [vmem:[#allocation4 + $0x50] sm:$0xff] %vm226_vm0, %v8023_v1  ;;  %4432 = vst.msk [vmem:[#allocation4 + $0x58] sm:$0xff] %vm226_vm0, %v8023_v1 }
  0x39   : > { %4433 = vst.msk [vmem:[#allocation4 + $0x60] sm:$0xff] %vm226_vm0, %v8023_v1  ;;  %4434 = vst.msk [vmem:[#allocation4 + $0x68] sm:$0xff] %vm226_vm0, %v8023_v1 }
  0x3a   : > { %4435 = vst.msk [vmem:[#allocation4 + $0x70] sm:$0xff] %vm226_vm0, %v8023_v1  ;;  %4436 = vst.msk [vmem:[#allocation4 + $0x78] sm:$0xff] %vm226_vm0, %v8023_v1  ;;  %567 = vperm.xlu1 %7943, %v369_v22   ;;  %562 = vperm.xlu0 %7942, %v368_v23   ;;  %v1821_v22 = vmul.f32 %v8463_v11, %v1704_v10  ;;  %v415_v23 = vld [vmem:[%s8376_s23 + $0x218] sm:$0xf] }
  0x3b   : > { %4437 = vst.msk [vmem:[#allocation4 + $0x80] sm:$0xff] %vm226_vm0, %v8023_v1  ;;  %4438 = vst.msk [vmem:[#allocation4 + $0x88] sm:$0xff] %vm226_vm0, %v8023_v1 }
  0x3c   : > { %4439 = vst.msk [vmem:[#allocation4 + $0x90] sm:$0xff] %vm226_vm0, %v8023_v1  ;;  %4440 = vst.msk [vmem:[#allocation4 + $0x98] sm:$0xff] %vm226_vm0, %v8023_v1 }
  0x3d   : > { %4441 = vst.msk [vmem:[#allocation4 + $0xa0] sm:$0xff] %vm226_vm0, %v8023_v1  ;;  %4442 = vst.msk [vmem:[#allocation4 + $0xa8] sm:$0xff] %vm226_vm0, %v8023_v1 }
  0x3e   : > { %4443 = vst.msk [vmem:[#allocation4 + $0xb0] sm:$0xff] %vm226_vm0, %v8023_v1  ;;  %4444 = vst.msk [vmem:[#allocation4 + $0xb8] sm:$0xff] %vm226_vm0, %v8023_v1  ;;  %577 = vperm.xlu1 %7943, %v371_v24   ;;  %572 = vperm.xlu0 %7942, %v370_v25   ;;  %v414_v24 = vld [vmem:[%s8376_s23 + $0x210] sm:$0xff] }
  0x3f   : > { %4445 = vst.msk [vmem:[#allocation4 + $0xc0] sm:$0xff] %vm226_vm0, %v8023_v1  ;;  %4446 = vst.msk [vmem:[#allocation4 + $0xc8] sm:$0xff] %vm226_vm0, %v8023_v1 }
  0x40   : > { %4447 = vst.msk [vmem:[#allocation4 + $0xd0] sm:$0xff] %vm226_vm0, %v8023_v1  ;;  %4448 = vst.msk [vmem:[#allocation4 + $0xd8] sm:$0xff] %vm226_vm0, %v8023_v1 }
  0x41   : > { %4449 = vst.msk [vmem:[#allocation4 + $0xe0] sm:$0xff] %vm226_vm0, %v8023_v1  ;;  %4450 = vst.msk [vmem:[#allocation4 + $0xe8] sm:$0xff] %vm226_vm0, %v8023_v1 }
  0x42   : > { %4451 = vst.msk [vmem:[#allocation4 + $0xf0] sm:$0xff] %vm226_vm0, %v8023_v1  ;;  %4452 = vst.msk [vmem:[#allocation4 + $0xf8] sm:$0xff] %vm226_vm0, %v8023_v1  ;;  %587 = vperm.xlu1 %7943, %v373_v26   ;;  %582 = vperm.xlu0 %7942, %v372_v27   ;;  %v1252_v27 = vmul.f32 %v8456_v6, %v1135_v18 }
  0x43   : > { %4453 = vst.msk [vmem:[#allocation4 + $0x100] sm:$0xff] %vm226_vm0, %v8023_v1  ;;  %vm11402_vm6 = vmand %vm6989_vm4, %vm6990_vm5 }
  0x44   : > { %235 = vst.msk [vmem:[#allocation2 + $0x38] sm:$0x3f] %vm230_vm1, %v8023_v1  ;;  %231 = vst.msk [vmem:[#allocation2 + $0x18] sm:$0x3f] %vm230_vm1, %v8023_v1 }
  0x45   : > { %239 = vst.msk [vmem:[#allocation2 + $0x58] sm:$0x3f] %vm230_vm1, %v8023_v1  ;;  %243 = vst.msk [vmem:[#allocation2 + $0x78] sm:$0x3f] %vm230_vm1, %v8023_v1 }
  0x46   : > { %247 = vst.msk [vmem:[#allocation2 + $0x98] sm:$0x3f] %vm230_vm1, %v8023_v1  ;;  %251 = vst.msk [vmem:[#allocation2 + $0xb8] sm:$0x3f] %vm230_vm1, %v8023_v1  ;;  %597 = vperm.xlu1 %7943, %v375_v28   ;;  %592 = vperm.xlu0 %7942, %v374_v29   ;;  %v1481_v28 = vmul.f32 %v8451_v4, %v1364_v19  ;;  %v4529_v29 = vld [vmem:[#allocation4 + $0x1] sm:$0xff] }
  0x47   : > { %255 = vst.msk [vmem:[#allocation2 + $0xd8] sm:$0x3f] %vm230_vm1, %v8023_v1  ;;  %259 = vst.msk [vmem:[#allocation2 + $0xf8] sm:$0x3f] %vm230_vm1, %v8023_v1 }
  0x48   : > { %263 = vst.msk [vmem:[#allocation2 + $0x118] sm:$0x3f] %vm230_vm1, %v8023_v1  ;;  %267 = vst.msk [vmem:[#allocation2 + $0x138] sm:$0x3f] %vm230_vm1, %v8023_v1 }
  0x49   : > { %271 = vst.msk [vmem:[#allocation2 + $0x158] sm:$0x3f] %vm230_vm1, %v8023_v1  ;;  %275 = vst.msk [vmem:[#allocation2 + $0x178] sm:$0x3f] %vm230_vm1, %v8023_v1 }
  0x4a   : > { %279 = vst.msk [vmem:[#allocation2 + $0x198] sm:$0x3f] %vm230_vm1, %v8023_v1  ;;  %283 = vst.msk [vmem:[#allocation2 + $0x1b8] sm:$0x3f] %vm230_vm1, %v8023_v1  ;;  %607 = vperm.xlu1 %7943, %v377_v30   ;;  %602 = vperm.xlu0 %7942, %v376_v31   ;;  %v4530_v30 = vld [vmem:[#allocation4 + $0x9] sm:$0xff]  ;;  %v1592_v31 = vadd.f32 %v1480_v15, %v1251_v14 }
  0x4b   : > { %287 = vst.msk [vmem:[#allocation2 + $0x1d8] sm:$0x3f] %vm230_vm1, %v8023_v1  ;;  %291 = vst.msk [vmem:[#allocation2 + $0x1f8] sm:$0x3f] %vm230_vm1, %v8023_v1  ;;  %v1137_v12 = vld [vmem:[#allocation2 + $0x18] sm:$0xf] }
  0x4c   : > { %295 = vst.msk [vmem:[#allocation2 + $0x218] sm:$0x3f] %vm230_vm1, %v8023_v1  ;;  %299 = vst.msk [vmem:[#allocation2 + $0x238] sm:$0x3f] %vm230_vm1, %v8023_v1  ;;  %v1366_v17 = vld [vmem:[#allocation2 + $0x19] sm:$0xf]  ;;  %v1254_v25 = vmul.f32 %v8456_v6, %v1137_v12 }
  0x4d   : > { %303 = vst.msk [vmem:[#allocation2 + $0x258] sm:$0x3f] %vm230_vm1, %v8023_v1  ;;  %307 = vst.msk [vmem:[#allocation2 + $0x278] sm:$0x3f] %vm230_vm1, %v8023_v1  ;;  %v1365_v21 = vld [vmem:[#allocation2 + $0x11] sm:$0xff]  ;;  %v1483_v26 = vmul.f32 %v8451_v4, %v1366_v17  ;;  %v421_v12 = vld [vmem:[%s8376_s23 + $0x248] sm:$0xff] }
  0x4e   : > { %311 = vst.msk [vmem:[#allocation2 + $0x298] sm:$0x3f] %vm230_vm1, %v8023_v1  ;;  %315 = vst.msk [vmem:[#allocation2 + $0x2b8] sm:$0x3f] %vm230_vm1, %v8023_v1  ;;  %617 = vperm.xlu1 %7943, %v379_v32   ;;  %612 = vperm.xlu0 %7942, %v378_v33   ;;  %v1707_v32 = vld [vmem:[#allocation2 + $0x1a] sm:$0xf] }
  0x4f   : > { %319 = vst.msk [vmem:[#allocation2 + $0x2d8] sm:$0x3f] %vm230_vm1, %v8023_v1  ;;  %323 = vst.msk [vmem:[#allocation2 + $0x2f8] sm:$0x3f] %vm230_vm1, %v8023_v1 }
  0x50   : > { %327 = vst.msk [vmem:[#allocation2 + $0x318] sm:$0x3f] %vm230_vm1, %v8023_v1  ;;  %331 = vst.msk [vmem:[#allocation2 + $0x338] sm:$0x3f] %vm230_vm1, %v8023_v1 }
  0x51   : > { %335 = vst.msk [vmem:[#allocation2 + $0x358] sm:$0x3f] %vm230_vm1, %v8023_v1  ;;  %339 = vst.msk [vmem:[#allocation2 + $0x378] sm:$0x3f] %vm230_vm1, %v8023_v1 }
  0x52   : > { %343 = vst.msk [vmem:[#allocation2 + $0x398] sm:$0x3f] %vm230_vm1, %v8023_v1  ;;  %347 = vst.msk [vmem:[#allocation2 + $0x3b8] sm:$0x3f] %vm230_vm1, %v8023_v1  ;;  %627 = vperm.xlu1 %7943, %v381_v34   ;;  %622 = vperm.xlu0 %7942, %v380_v35   ;;  %v411_v1 = vld [vmem:[%s8376_s23 + $0x1f8] sm:$0xf]  ;;  %v1253_v34 = vmul.f32 %v8456_v6, %v1136_v20  ;;  %v1482_v35 = vmul.f32 %v8451_v4, %v1365_v21 }
  0x53   : > { %v420_v20 = vld [vmem:[%s8376_s23 + $0x240] sm:$0xff] }
  0x56   : > { %637 = vperm.xlu1 %7943, %v383_v36   ;;  %632 = vperm.xlu0 %7942, %v382_v37   ;;  %v1705_v36 = vld [vmem:[#allocation2 + $0xa] sm:$0xff] }
  0x5a   : > { %647 = vperm.xlu1 %7943, %v385_v38   ;;  %642 = vperm.xlu0 %7942, %v384_v39   ;;  %v4557_v38 = vpack.c.bf16 %v4530_v30, %v4529_v29  ;;  %v1706_v39 = vld [vmem:[#allocation2 + $0x12] sm:$0xff] }
  0x5c   : > { %7418 = vmatprep.mubr.msk.bf16.mxu1 %vm226_vm0, %v4557_v38 }
  0x5e   : > { %657 = vperm.xlu1 %7943, %v387_v40   ;;  %652 = vperm.xlu0 %7942, %v386_v41   ;;  %v417_v40 = vld [vmem:[%s8376_s23 + $0x228] sm:$0xff]  ;;  %v8485_v41 = vld [vmem:[%s11454_s1 + $0x4] ss:$0 sm:$0xff] }
  0x62   : > { %667 = vperm.xlu1 %7943, %v389_v42   ;;  %662 = vperm.xlu0 %7942, %v388_v43   ;;  %v1595_v42 = vadd.f32 %v1483_v26, %v1254_v25  ;;  %v1824_v43 = vmul.f32 %v8463_v11, %v1707_v32 }
  0x66   : > { %677 = vperm.xlu1 %7943, %v391_v44   ;;  %672 = vperm.xlu0 %7942, %v390_v45   ;;  %v1593_v44 = vadd.f32 %v1481_v28, %v1252_v27  ;;  %v1822_v45 = vmul.f32 %v8463_v11, %v1705_v36 }
  0x68   : > { %v1934_v62 = vadd.f32 %v1822_v45, %v1593_v44 }
  0x6a   : > { %687 = vperm.xlu1 %7943, %v393_v46   ;;  %682 = vperm.xlu0 %7942, %v392_v47   ;;  %v416_v46 = vld [vmem:[%s8376_s23 + $0x220] sm:$0xff]  ;;  %v1933_v47 = vadd.f32 %v1821_v22, %v1592_v31 }
  0x6e   : > { %697 = vperm.xlu1 %7943, %v395_v48   ;;  %692 = vperm.xlu0 %7942, %v394_v49  }
  0x72   : > { %707 = vperm.xlu1 %7943, %v397_v50   ;;  %702 = vperm.xlu0 %7942, %v396_v51   ;;  %v1594_v50 = vadd.f32 %v1482_v35, %v1253_v34  ;;  %v1823_v51 = vmul.f32 %v8463_v11, %v1706_v39 }
  0x76   : > { %717 = vperm.xlu1 %7943, %v399_v52   ;;  %712 = vperm.xlu0 %7942, %v398_v53  }
  0x7a   : > { %727 = vperm.xlu1 %7943, %v401_v54   ;;  %722 = vperm.xlu0 %7942, %v400_v55   ;;  %v8494_v54 = vld [vmem:[%s11454_s1 + $0x5] ss:$0 sm:$0xff] }
  0x7e   : > { %737 = vperm.xlu1 %7943, %v403_v56   ;;  %732 = vperm.xlu0 %7942, %v402_v57  }
  0x82   : > { %747 = vperm.xlu1 %7943, %v405_v58   ;;  %742 = vperm.xlu0 %7942, %v404_v59   ;;  %v419_v59 = vld [vmem:[%s8376_s23 + $0x238] sm:$0xf] }
  0x86   : > { %757 = vperm.xlu1 %7943, %v407_v60   ;;  %752 = vperm.xlu0 %7942, %v406_v61   ;;  %v1936_v60 = vadd.f32 %v1824_v43, %v1595_v42  ;;  %v8505_v61 = vld [vmem:[%s11454_s1 + $0x6] ss:$0 sm:$0xff] }
  0x8a   : > { %767 = vperm.xlu1 %7943, %v409_v63   ;;  %762 = vperm.xlu0 %7942, %v408_v0   ;;  %v418_v63 = vld [vmem:[%s8376_s23 + $0x230] sm:$0xff] }
  0x8e   : > { %777 = vperm.xlu1 %7943, %v411_v1   ;;  %772 = vperm.xlu0 %7942, %v410_v2  }
  0x91   : > { %v473_v13 = vpop.permute.xlu1 %472  ;;  %v463_v16 = vpop.permute.xlu0 %462 }
  0x92   : > { %1023 = vst.msk [vmem:[#allocation2 + $0x31] sm:$0xff] %vm226_vm0, %v473_v13  ;;  %1021 = vst.msk [vmem:[#allocation2 + $0x21] sm:$0xff] %vm226_vm0, %v463_v16  ;;  %787 = vperm.xlu1 %7943, %v413_v8   ;;  %782 = vperm.xlu0 %7942, %v412_v9   ;;  %v1935_v8 = vadd.f32 %v1823_v51, %v1594_v50  ;;  %v423_v51 = vld [vmem:[%s8376_s23 + $0x258] sm:$0xf] }
  0x95   : > { %v478_v33 = vpop.permute.xlu1 %477  ;;  %v468_v37 = vpop.permute.xlu0 %467 }
  0x96   : > { %1025 = vst.msk [vmem:[#allocation2 + $0x39] sm:$0xf] %vm1024_vm2, %v478_v33  ;;  %797 = vperm.xlu1 %7943, %v415_v23   ;;  %792 = vperm.xlu0 %7942, %v414_v24  }
  0x97   : > { %1022 = vst.msk [vmem:[#allocation2 + $0x29] sm:$0xff] %vm226_vm0, %v468_v37 }
  0x99   : > { %v1138_v48 = vld [vmem:[#allocation2 + $0x20] sm:$0xff]  ;;  %v488_v52 = vpop.permute.xlu1 %487  ;;  %v483_v53 = vpop.permute.xlu0 %482  ;;  %v1369_v55 = vld [vmem:[#allocation2 + $0x31] sm:$0xff] }
  0x9a   : > { %v1367_v49 = vld [vmem:[#allocation2 + $0x21] sm:$0xff]  ;;  %v1255_v56 = vmul.f32 %v8456_v6, %v1138_v48  ;;  %1027 = vst.msk [vmem:[#allocation2 + $0x49] sm:$0xff] %vm226_vm0, %v488_v52  ;;  %1026 = vst.msk [vmem:[#allocation2 + $0x41] sm:$0xff] %vm226_vm0, %v483_v53  ;;  %807 = vperm.xlu1 %7943, %v417_v40   ;;  %v2163_v58 = vmul.f32 %v8485_v41, %v1138_v48  ;;  %802 = vperm.xlu0 %7942, %v416_v46   ;;  %v422_v52 = vld [vmem:[%s8376_s23 + $0x250] sm:$0xff] }
  0x9b   : > { %v1484_v57 = vmul.f32 %v8451_v4, %v1367_v49  ;;  %v1486_v0 = vmul.f32 %v8451_v4, %v1369_v55  ;;  %v2504_v2 = vmul.f32 %v8494_v54, %v1367_v49  ;;  %v2506_v13 = vmul.f32 %v8494_v54, %v1369_v55 }
  0x9c   : > { %v2275_v1 = vadd.f32 %v2163_v58, %v1933_v47 }
  0x9d   : > { %v1141_v3 = vld [vmem:[#allocation2 + $0x38] sm:$0xf]  ;;  %v498_v9 = vpop.permute.xlu1 %497  ;;  %v493_v10 = vpop.permute.xlu0 %492  ;;  %v1596_v14 = vadd.f32 %v1484_v57, %v1255_v56 }
  0x9e   : > { %v1370_v5 = vld [vmem:[#allocation2 + $0x39] sm:$0xf]  ;;  %v1258_v15 = vmul.f32 %v8456_v6, %v1141_v3  ;;  %1029 = vst.msk [vmem:[#allocation2 + $0x59] sm:$0xf] %vm1024_vm2, %v498_v9  ;;  %817 = vperm.xlu1 %7943, %v419_v59   ;;  %v2616_v21 = vadd.f32 %v2504_v2, %v2275_v1  ;;  %v1139_v26 = vld [vmem:[#allocation2 + $0x28] sm:$0xff]  ;;  %v1140_v27 = vld [vmem:[#allocation2 + $0x30] sm:$0xff]  ;;  %812 = vperm.xlu0 %7942, %v418_v63  }
  0x9f   : > { %v1710_v7 = vld [vmem:[#allocation2 + $0x32] sm:$0xff]  ;;  %v1487_v16 = vmul.f32 %v8451_v4, %v1370_v5  ;;  %v1711_v17 = vld [vmem:[#allocation2 + $0x3a] sm:$0xf]  ;;  %1028 = vst.msk [vmem:[#allocation2 + $0x51] sm:$0xff] %vm226_vm0, %v493_v10  ;;  %v1256_v30 = vmul.f32 %v8456_v6, %v1139_v26  ;;  %v1257_v31 = vmul.f32 %v8456_v6, %v1140_v27  ;;  %v1368_v32 = vld [vmem:[#allocation2 + $0x29] sm:$0xff]  ;;  %v2164_v44 = vmul.f32 %v8485_v41, %v1139_v26 }
  0xa0   : > { %v2048_v18 = vld [vmem:[#allocation2 + $0x38] sm:$0xf]  ;;  %v8518_v22 = vmul.f32 %v8463_v11, %v1710_v7  ;;  %v8522_v25 = vmul.f32 %v8505_v61, %v1710_v7  ;;  %v1828_v29 = vmul.f32 %v8463_v11, %v1711_v17  ;;  %v1708_v33 = vld [vmem:[#allocation2 + $0x22] sm:$0xff]  ;;  %v1709_v34 = vld [vmem:[#allocation2 + $0x2a] sm:$0xff]  ;;  %v1485_v37 = vmul.f32 %v8451_v4, %v1368_v32 }
  0xa1   : > { %v2390_v19 = vld [vmem:[#allocation2 + $0x39] sm:$0xf]  ;;  %v2166_v23 = vmul.f32 %v8485_v41, %v2048_v18  ;;  %v1599_v28 = vadd.f32 %v1487_v16, %v1258_v15  ;;  %v1825_v38 = vmul.f32 %v8463_v11, %v1708_v33  ;;  %v508_v39 = vpop.permute.xlu1 %507  ;;  %v503_v40 = vpop.permute.xlu0 %502  ;;  %v1826_v43 = vmul.f32 %v8463_v11, %v1709_v34  ;;  %v1372_v50 = vld [vmem:[#allocation2 + $0x49] sm:$0xff]  ;;  %v1142_v58 = vld [vmem:[#allocation2 + $0x40] sm:$0xff] }
  0xa2   : > { %v2731_v24 = vld [vmem:[#allocation2 + $0x3a] sm:$0xf]  ;;  %v2507_v36 = vmul.f32 %v8494_v54, %v2390_v19  ;;  %v2165_v45 = vmul.f32 %v8485_v41, %v1140_v27  ;;  %1031 = vst.msk [vmem:[#allocation2 + $0x69] sm:$0xff] %vm226_vm0, %v508_v39  ;;  %1030 = vst.msk [vmem:[#allocation2 + $0x61] sm:$0xff] %vm226_vm0, %v503_v40  ;;  %827 = vperm.xlu1 %7943, %v421_v12   ;;  %v1597_v48 = vadd.f32 %v1485_v37, %v1256_v30  ;;  %v1143_v59 = vld [vmem:[#allocation2 + $0x48] sm:$0xff] }
  0xa3   : > { %v2278_v35 = vadd.f32 %v2166_v23, %v1936_v60  ;;  %v2848_v42 = vmul.f32 %v8505_v61, %v2731_v24  ;;  %v8536_v46 = vadd.f32 %v1828_v29, %v1599_v28  ;;  %v8538_v49 = vadd.f32 %v1486_v0, %v1257_v31  ;;  %822 = vperm.xlu0 %7942, %v420_v20   ;;  %v1371_v60 = vld [vmem:[#allocation2 + $0x41] sm:$0xff]  ;;  %v8550_v3 = vld [vmem:[%s11454_s1 + $0x9] ss:$0 sm:$0xff] }
  0xa4   : > { %v2276_v53 = vadd.f32 %v2164_v44, %v1934_v62  ;;  %v2277_v55 = vadd.f32 %v2165_v45, %v1935_v8  ;;  %v2505_v56 = vmul.f32 %v8494_v54, %v1368_v32  ;;  %v2845_v57 = vmul.f32 %v8505_v61, %v1708_v33  ;;  %v8561_v12 = vld [vmem:[%s11454_s1 + $0x8] ss:$0 sm:$0xff]  ;;  %v424_v26 = vld [vmem:[%s8376_s23 + $0x260] sm:$0xff] }
  0xa5   : > { %v2619_v47 = vadd.f32 %v2507_v36, %v2278_v35  ;;  %v1937_v1 = vadd.f32 %v1825_v38, %v1596_v14  ;;  %v1938_v2 = vadd.f32 %v1826_v43, %v1597_v48  ;;  %v2846_v0 = vmul.f32 %v8505_v61, %v1709_v34  ;;  %v518_v62 = vpop.permute.xlu1 %517  ;;  %v513_v5 = vpop.permute.xlu0 %512  ;;  %v1712_v14 = vld [vmem:[#allocation2 + $0x42] sm:$0xff]  ;;  %v1374_v31 = vld [vmem:[#allocation2 + $0x59] sm:$0xf] }
  0xa6   : > { %v2617_v7 = vadd.f32 %v2505_v56, %v2276_v53  ;;  %v8552_v8 = vadd.f32 %v2506_v13, %v2277_v55  ;;  %v1489_v9 = vmul.f32 %v8451_v4, %v1372_v50  ;;  %v8556_v10 = vmul.f32 %v8494_v54, %v1372_v50  ;;  %1033 = vst.msk [vmem:[#allocation2 + $0x79] sm:$0xf] %vm1024_vm2, %v518_v62  ;;  %v425_v18 = vld [vmem:[%s8376_s23 + $0x268] sm:$0xff]  ;;  %v1715_v38 = vld [vmem:[#allocation2 + $0x5a] sm:$0xf]  ;;  %v1144_v56 = vld [vmem:[#allocation2 + $0x50] sm:$0xff] }
  0xa7   : > { %v8544_v63 = vadd.f32 %v2848_v42, %v2619_v47  ;;  %1032 = vst.msk [vmem:[#allocation2 + $0x71] sm:$0xff] %vm226_vm0, %v513_v5  ;;  %837 = vperm.xlu1 %7943, %v423_v51   ;;  %v2957_v15 = vadd.f32 %v2845_v57, %v2616_v21  ;;  %v1259_v13 = vmul.f32 %v8456_v6, %v1142_v58  ;;  %v8578_v21 = vld [vmem:[%s11454_s1 + $0xa] ss:$0 sm:$0xff]  ;;  %v2394_v39 = vld [vmem:[#allocation2 + $0x59] sm:$0xf] }
  0xa8   : > { %v1260_v16 = vmul.f32 %v8456_v6, %v1143_v59  ;;  %v1488_v17 = vmul.f32 %v8451_v4, %v1371_v60  ;;  %832 = vperm.xlu0 %7942, %v422_v52   ;;  %v2958_v19 = vadd.f32 %v2846_v0, %v2617_v7  ;;  %v8570_v20 = vmul.f32 %v8550_v3, %v1372_v50  ;;  %v2735_v40 = vld [vmem:[#allocation2 + $0x5a] sm:$0xf]  ;;  %v1373_v0 = vld [vmem:[#allocation2 + $0x51] sm:$0xff] }
  0xa9   : > { %v2167_v23 = vmul.f32 %v8485_v41, %v1142_v58  ;;  %v2168_v24 = vmul.f32 %v8485_v41, %v1143_v59  ;;  %v1829_v28 = vmul.f32 %v8463_v11, %v1712_v14  ;;  %v2508_v29 = vmul.f32 %v8494_v54, %v1371_v60  ;;  %v528_v32 = vpop.permute.xlu1 %527  ;;  %v523_v33 = vpop.permute.xlu0 %522  ;;  %v3415_v47 = vld [vmem:[#allocation2 + $0x59] sm:$0xf]  ;;  %v1713_v62 = vld [vmem:[#allocation2 + $0x4a] sm:$0xff] }
  0xaa   : > { %v1600_v27 = vadd.f32 %v1488_v17, %v1259_v13  ;;  %v3188_v30 = vmul.f32 %v8561_v12, %v1142_v58  ;;  %v8583_v34 = vadd.f32 %v1489_v9, %v1260_v16  ;;  %v2849_v36 = vmul.f32 %v8505_v61, %v1712_v14  ;;  %1035 = vst.msk [vmem:[#allocation2 + $0x89] sm:$0xff] %vm226_vm0, %v528_v32  ;;  %v3756_v48 = vld [vmem:[#allocation2 + $0x5a] sm:$0xf]  ;;  %v426_v58 = vld [vmem:[%s8376_s23 + $0x270] sm:$0xff] }
  0xab   : > { %v2279_v35 = vadd.f32 %v2167_v23, %v1937_v1  ;;  %v3189_v37 = vmul.f32 %v8561_v12, %v1143_v59  ;;  %1034 = vst.msk [vmem:[#allocation2 + $0x81] sm:$0xff] %vm226_vm0, %v523_v33  ;;  %847 = vperm.xlu1 %7943, %v425_v18   ;;  %v2280_v43 = vadd.f32 %v2168_v24, %v1938_v2  ;;  %v427_v50 = vld [vmem:[%s8376_s23 + $0x278] sm:$0xf] }
  0xac   : > { %v8589_v42 = vadd.f32 %v1829_v28, %v1600_v27  ;;  %v3300_v44 = vadd.f32 %v3188_v30, %v2957_v15  ;;  %v3529_v45 = vmul.f32 %v8550_v3, %v1371_v60  ;;  %842 = vperm.xlu0 %7942, %v424_v26   ;;  %v3870_v53 = vmul.f32 %v8578_v21, %v1712_v14  ;;  %v1145_v57 = vld [vmem:[#allocation2 + $0x58] sm:$0xf]  ;;  %v429_v26 = vld [vmem:[%s8376_s23 + $0x288] sm:$0xff]  ;;  %v428_v30 = vld [vmem:[%s8376_s23 + $0x280] sm:$0xff] }
  0xad   : > { %v2620_v51 = vadd.f32 %v2508_v29, %v2279_v35  ;;  %v3301_v52 = vadd.f32 %v3189_v37, %v2958_v19  ;;  %v1491_v55 = vmul.f32 %v8451_v4, %v1374_v31  ;;  %v8597_v1 = vmul.f32 %v8463_v11, %v1715_v38  ;;  %v538_v5 = vpop.permute.xlu1 %537  ;;  %v533_v7 = vpop.permute.xlu0 %532  ;;  %v1714_v16 = vld [vmem:[#allocation2 + $0x52] sm:$0xff] }
  0xae   : > { %v3641_v59 = vadd.f32 %v3529_v45, %v3300_v44  ;;  %v2511_v2 = vmul.f32 %v8494_v54, %v2394_v39  ;;  %v8601_v60 = vmul.f32 %v8505_v61, %v2735_v40  ;;  %v8606_v14 = vmul.f32 %v8550_v3, %v3415_v47  ;;  %v2052_v17 = vld [vmem:[#allocation2 + $0x58] sm:$0xf]  ;;  %1037 = vst.msk [vmem:[#allocation2 + $0x99] sm:$0xf] %vm1024_vm2, %v538_v5 }
  0xaf   : > { %v8603_v9 = vadd.f32 %v2849_v36, %v2620_v51  ;;  %v8609_v15 = vmul.f32 %v8578_v21, %v3756_v48  ;;  %v1939_v13 = vadd.f32 %v8518_v22, %v8538_v49  ;;  %1036 = vst.msk [vmem:[#allocation2 + $0x91] sm:$0xff] %vm226_vm0, %v533_v7  ;;  %857 = vperm.xlu1 %7943, %v427_v50   ;;  %v3073_v29 = vld [vmem:[#allocation2 + $0x58] sm:$0xf]  ;;  %v1376_v51 = vld [vmem:[#allocation2 + $0x69] sm:$0xff] }
  0xb0   : > { %v2621_v18 = vadd.f32 %v8556_v10, %v2280_v43  ;;  %v2959_v19 = vadd.f32 %v8522_v25, %v8552_v8  ;;  %v1261_v23 = vmul.f32 %v8456_v6, %v1144_v56  ;;  %v1262_v24 = vmul.f32 %v8456_v6, %v1145_v57  ;;  %852 = vperm.xlu0 %7942, %v426_v58   ;;  %v431_v44 = vld [vmem:[%s8376_s23 + $0x298] sm:$0xf]  ;;  %v1147_v57 = vld [vmem:[#allocation2 + $0x68] sm:$0xff] }
  0xb1   : > { %v8621_v22 = vadd.f32 %v3870_v53, %v3641_v59  ;;  %v1490_v49 = vmul.f32 %v8451_v4, %v1373_v0  ;;  %v1830_v27 = vmul.f32 %v8463_v11, %v1713_v62  ;;  %v2169_v28 = vmul.f32 %v8485_v41, %v1144_v56  ;;  %v548_v32 = vpop.permute.xlu1 %547  ;;  %v543_v33 = vpop.permute.xlu0 %542  ;;  %v430_v53 = vld [vmem:[%s8376_s23 + $0x290] sm:$0xff]  ;;  %v1375_v58 = vld [vmem:[#allocation2 + $0x61] sm:$0xff] }
  0xb2   : > { %v3642_v10 = vadd.f32 %v8570_v20, %v3301_v52  ;;  %v1831_v25 = vmul.f32 %v8463_v11, %v1714_v16  ;;  %v2170_v8 = vmul.f32 %v8485_v41, %v2052_v17  ;;  %v2850_v31 = vmul.f32 %v8505_v61, %v1713_v62  ;;  %1039 = vst.msk [vmem:[#allocation2 + $0xa9] sm:$0xff] %vm226_vm0, %v548_v32  ;;  %v1146_v52 = vld [vmem:[#allocation2 + $0x60] sm:$0xff] }
  0xb3   : > { %v1602_v35 = vadd.f32 %v1490_v49, %v1261_v23  ;;  %v8631_v36 = vadd.f32 %v1491_v55, %v1262_v24  ;;  %v2281_v37 = vadd.f32 %v2169_v28, %v1939_v13  ;;  %v2510_v38 = vmul.f32 %v8494_v54, %v1373_v0  ;;  %1038 = vst.msk [vmem:[#allocation2 + $0xa1] sm:$0xff] %vm226_vm0, %v543_v33  ;;  %v433_v23 = vld [vmem:[%s8376_s23 + $0x2a8] sm:$0xff] }
  0xb4   : > { %867 = vperm.xlu1 %7943, %v429_v26   ;;  %v8637_v20 = vadd.f32 %v1830_v27, %v8583_v34  ;;  %v2282_v39 = vadd.f32 %v2170_v8, %v8536_v46  ;;  %v3190_v40 = vmul.f32 %v8561_v12, %v1144_v56  ;;  %v3191_v43 = vmul.f32 %v8561_v12, %v3073_v29  ;;  %v432_v27 = vld [vmem:[%s8376_s23 + $0x2a0] sm:$0xff] }
  0xb5   : > { %862 = vperm.xlu0 %7942, %v428_v30   ;;  %v2622_v45 = vadd.f32 %v2510_v38, %v2281_v37  ;;  %v2851_v47 = vmul.f32 %v8505_v61, %v1714_v16  ;;  %v8644_v48 = vadd.f32 %v2850_v31, %v2621_v18  ;;  %v3871_v50 = vmul.f32 %v8578_v21, %v1713_v62  ;;  %v558_v59 = vpop.permute.xlu1 %557  ;;  %v553_v5 = vpop.permute.xlu0 %552  ;;  %v1716_v18 = vld [vmem:[#allocation2 + $0x62] sm:$0xff]  ;;  %v1719_v37 = vld [vmem:[#allocation2 + $0x7a] sm:$0xf] }
  0xb6   : > { %v8648_v34 = vadd.f32 %v1831_v25, %v1602_v35  ;;  %v3302_v55 = vadd.f32 %v3190_v40, %v2959_v19  ;;  %v3303_v46 = vadd.f32 %v3191_v43, %v8544_v63  ;;  %v3531_v56 = vmul.f32 %v8550_v3, %v1373_v0  ;;  %1041 = vst.msk [vmem:[#allocation2 + $0xb9] sm:$0xf] %vm1024_vm2, %v558_v59  ;;  %v1378_v35 = vld [vmem:[#allocation2 + $0x79] sm:$0xf] }
  0xb7   : > { %v8652_v7 = vadd.f32 %v2511_v2, %v2282_v39  ;;  %v8654_v13 = vadd.f32 %v2851_v47, %v2622_v45  ;;  %v3872_v62 = vmul.f32 %v8578_v21, %v1714_v16  ;;  %v8657_v17 = vadd.f32 %v3871_v50, %v3642_v10  ;;  %1040 = vst.msk [vmem:[#allocation2 + $0xb1] sm:$0xff] %vm226_vm0, %v553_v5  ;;  %v435_v38 = vld [vmem:[%s8376_s23 + $0x2b8] sm:$0xf]  ;;  %v7946_v45 = vld [vmem:[%s11456_s3 + $0x40] sm:$0xff]  }
  0xb8   : > { %877 = vperm.xlu1 %7943, %v431_v44   ;;  %v3643_v63 = vadd.f32 %v3531_v56, %v3302_v55  ;;  %v3644_v0 = vadd.f32 %v8606_v14, %v3303_v46  ;;  %v1493_v19 = vmul.f32 %v8451_v4, %v1376_v51  ;;  %v1263_v2 = vmul.f32 %v8456_v6, %v1146_v52  ;;  %v2739_v44 = vld [vmem:[#allocation2 + $0x7a] sm:$0xf]  ;;  %v434_v56 = vld [vmem:[%s8376_s23 + $0x2b0] sm:$0xff] }
  0xb9   : > { %872 = vperm.xlu0 %7942, %v430_v53   ;;  %v2513_v16 = vmul.f32 %v8494_v54, %v1376_v51  ;;  %v1264_v24 = vmul.f32 %v8456_v6, %v1147_v57  ;;  %v1492_v26 = vmul.f32 %v8451_v4, %v1375_v58  ;;  %v2171_v49 = vmul.f32 %v8485_v41, %v1146_v52  ;;  %v568_v10 = vpop.permute.xlu1 %567  ;;  %v563_v25 = vpop.permute.xlu0 %562  ;;  %v3419_v55 = vld [vmem:[#allocation2 + $0x79] sm:$0xf] }
  0xba   : > { %v8670_v28 = vadd.f32 %v3872_v62, %v3643_v63  ;;  %v8673_v14 = vmul.f32 %v8550_v3, %v1376_v51  ;;  %v1833_v29 = vmul.f32 %v8463_v11, %v1716_v18  ;;  %v2172_v30 = vmul.f32 %v8485_v41, %v1147_v57  ;;  %1043 = vst.msk [vmem:[#allocation2 + $0xc9] sm:$0xff] %vm226_vm0, %v568_v10  ;;  %v3760_v46 = vld [vmem:[#allocation2 + $0x7a] sm:$0xf]  ;;  %v1148_v62 = vld [vmem:[#allocation2 + $0x70] sm:$0xff] }
  0xbb   : > { %v8678_v8 = vadd.f32 %v8609_v15, %v3644_v0  ;;  %v1604_v31 = vadd.f32 %v1492_v26, %v1263_v2  ;;  %v2283_v32 = vadd.f32 %v2171_v49, %v8589_v42  ;;  %v2512_v33 = vmul.f32 %v8494_v54, %v1375_v58  ;;  %1042 = vst.msk [vmem:[#allocation2 + $0xc1] sm:$0xff] %vm226_vm0, %v563_v25  ;;  %v2398_v42 = vld [vmem:[#allocation2 + $0x79] sm:$0xf]  ;;  %v8702_v0 = vld [vmem:[#allocation2 + $0x71] sm:$0xff] }
  0xbc   : > { %887 = vperm.xlu1 %7943, %v433_v23   ;;  %v8685_v39 = vadd.f32 %v1493_v19, %v1264_v24  ;;  %v2853_v40 = vmul.f32 %v8505_v61, %v1716_v18  ;;  %v3192_v15 = vmul.f32 %v8561_v12, %v1146_v52  ;;  %v3193_v43 = vmul.f32 %v8561_v12, %v1147_v57  ;;  %v1149_v63 = vld [vmem:[#allocation2 + $0x78] sm:$0xf] }
  0xbd   : > { %882 = vperm.xlu0 %7942, %v432_v27   ;;  %v8693_v47 = vadd.f32 %v1833_v29, %v1604_v31  ;;  %v2284_v50 = vadd.f32 %v2172_v30, %v8637_v20  ;;  %v2624_v51 = vadd.f32 %v2512_v33, %v2283_v32  ;;  %v3533_v53 = vmul.f32 %v8550_v3, %v1375_v58  ;;  %v578_v19 = vpop.permute.xlu1 %577  ;;  %v573_v20 = vpop.permute.xlu0 %572  ;;  %v1718_v27 = vld [vmem:[#allocation2 + $0x72] sm:$0xff]  ;;  %v437_v30 = vld [vmem:[%s8376_s23 + $0x2c8] sm:$0xff]  ;;  %v436_v33 = vld [vmem:[%s8376_s23 + $0x2c0] sm:$0xff] }
  0xbe   : > { %v3304_v52 = vadd.f32 %v3192_v15, %v8603_v9  ;;  %v3305_v57 = vadd.f32 %v3193_v43, %v8644_v48  ;;  %v3874_v59 = vmul.f32 %v8578_v21, %v1716_v18  ;;  %v1495_v5 = vmul.f32 %v8451_v4, %v1378_v35  ;;  %7542 = vmatprep.subr.bf16.mxu0 %v7946_v45  ;;  %v1717_v18 = vld [vmem:[#allocation2 + $0x6a] sm:$0xff]  ;;  %v2056_v29 = vld [vmem:[#allocation2 + $0x78] sm:$0xf] }
  0xbf   : > { %v8704_v58 = vadd.f32 %v2853_v40, %v2624_v51  ;;  %v8707_v2 = vmul.f32 %v8463_v11, %v1719_v37  ;;  %v8710_v9 = vmul.f32 %v8494_v54, %v2398_v42  ;;  %v8713_v48 = vmul.f32 %v8505_v61, %v2739_v44  ;;  %1045 = vst.msk [vmem:[#allocation2 + $0xd9] sm:$0xf] %vm1024_vm2, %v578_v19  ;;  %v3077_v44 = vld [vmem:[#allocation2 + $0x78] sm:$0xf]  ;;  %v7947_v51 = vld [vmem:[%s11456_s3 + $0x48] sm:$0xff]   ;;  %v1150_v19 = vld [vmem:[#allocation2 + $0x80] sm:$0xff] }
  0xc0   : > { %1044 = vst.msk [vmem:[#allocation2 + $0xd1] sm:$0xff] %vm226_vm0, %v573_v20  ;;  %897 = vperm.xlu1 %7943, %v435_v38   ;;  %v3645_v23 = vadd.f32 %v3533_v53, %v3304_v52  ;;  %v8718_v24 = vmul.f32 %v8550_v3, %v3419_v55  ;;  %v8721_v26 = vmul.f32 %v8578_v21, %v3760_v46 }
  0xc1   : > { %v1944_v49 = vadd.f32 %v8597_v1, %v8631_v36  ;;  %892 = vperm.xlu0 %7942, %v434_v56   ;;  %v2625_v10 = vadd.f32 %v2513_v16, %v2284_v50  ;;  %v1265_v25 = vmul.f32 %v8456_v6, %v1148_v62  ;;  %v1266_v31 = vmul.f32 %v8456_v6, %v1149_v63  ;;  %v588_v38 = vpop.permute.xlu1 %587  ;;  %v583_v16 = vpop.permute.xlu0 %582  ;;  %v439_v50 = vld [vmem:[%s8376_s23 + $0x2d8] sm:$0xf]  ;;  %v1380_v63 = vld [vmem:[#allocation2 + $0x89] sm:$0xff] }
  0xc2   : > { %v1494_v32 = vmul.f32 %v8451_v4, %v8702_v0  ;;  %7543 = vmatpush3.bf16.msra.mxu0 %v7946_v45  ;;  %v3986_v35 = vadd.f32 %v3874_v59, %v3645_v23  ;;  %v2964_v37 = vadd.f32 %v8601_v60, %v8652_v7  ;;  %v1834_v1 = vmul.f32 %v8463_v11, %v1717_v18 }
  0xc3   : > { %v2173_v36 = vmul.f32 %v8485_v41, %v1148_v62  ;;  %v3646_v40 = vadd.f32 %v8673_v14, %v3305_v57  ;;  %v1835_v43 = vmul.f32 %v8463_v11, %v1718_v27  ;;  %v2174_v42 = vmul.f32 %v8485_v41, %v2056_v29  ;;  %1047 = vst.msk [vmem:[#allocation2 + $0xe9] sm:$0xff] %vm226_vm0, %v588_v38  ;;  %v1151_v29 = vld [vmem:[#allocation2 + $0x88] sm:$0xff] }
  0xc4   : > { %v1606_v15 = vadd.f32 %v1494_v32, %v1265_v25  ;;  %1046 = vst.msk [vmem:[#allocation2 + $0xe1] sm:$0xff] %vm226_vm0, %v583_v16  ;;  %907 = vperm.xlu1 %7943, %v437_v30   ;;  %v4094_v60 = vmax.f32 %v8621_v22, %v3986_v35  ;;  %v2514_v45 = vmul.f32 %v8494_v54, %v8702_v0  ;;  %v1379_v30 = vld [vmem:[#allocation2 + $0x81] sm:$0xff] }
  0xc5   : > { %v2285_v7 = vadd.f32 %v2173_v36, %v8648_v34  ;;  %v2854_v14 = vmul.f32 %v8505_v61, %v1717_v18  ;;  %902 = vperm.xlu0 %7942, %v436_v33   ;;  %v8749_v53 = vadd.f32 %v1495_v5, %v1266_v31  ;;  %v8752_v55 = vadd.f32 %v1834_v1, %v8685_v39  ;;  %v438_v34 = vld [vmem:[%s8376_s23 + $0x2d0] sm:$0xff]  ;;  %v598_v5 = vpop.permute.xlu1 %597  ;;  %v593_v20 = vpop.permute.xlu0 %592  ;;  %v1720_v1 = vld [vmem:[#allocation2 + $0x82] sm:$0xff] }
  0xc6   : > { %v2286_v46 = vadd.f32 %v2174_v42, %v1944_v49  ;;  %v3194_v22 = vmul.f32 %v8561_v12, %v1148_v62  ;;  %4098 = vst.msk [vmem:[#allocation3] sm:$0xff] %vm226_vm0, %v4094_v60  ;;  %v8757_v56 = vadd.f32 %v1835_v43, %v1606_v15  ;;  %v2855_v57 = vmul.f32 %v8505_v61, %v1718_v27  ;;  %v440_v36 = vld [vmem:[%s8376_s23 + $0x2e0] sm:$0xff] }
  0xc7   : > { %v2626_v52 = vadd.f32 %v2514_v45, %v2285_v7  ;;  %v3195_v59 = vmul.f32 %v8561_v12, %v3077_v44  ;;  %7544 = vmatprep.subr.bf16.mxu0 %v7947_v51  ;;  %v8761_v39 = vadd.f32 %v2854_v14, %v2625_v10  ;;  %v3535_v23 = vmul.f32 %v8550_v3, %v8702_v0  ;;  %v441_v0 = vld [vmem:[%s8376_s23 + $0x2e8] sm:$0xff] }
  0xc8   : > { %v3306_v62 = vadd.f32 %v3194_v22, %v8654_v13  ;;  %v3875_v49 = vmul.f32 %v8578_v21, %v1717_v18  ;;  %1049 = vst.msk [vmem:[#allocation2 + $0xf9] sm:$0xf] %vm1024_vm2, %v598_v5  ;;  %917 = vperm.xlu1 %7943, %v439_v50   ;;  %v8770_v25 = vadd.f32 %v8710_v9, %v2286_v46  ;;  %v1382_v22 = vld [vmem:[#allocation2 + $0x99] sm:$0xf] }
  0xc9   : > { %1048 = vst.msk [vmem:[#allocation2 + $0xf1] sm:$0xff] %vm226_vm0, %v593_v20  ;;  %v8772_v10 = vadd.f32 %v2855_v57, %v2626_v52  ;;  %v3307_v31 = vadd.f32 %v3195_v59, %v2964_v37  ;;  %v3876_v13 = vmul.f32 %v8578_v21, %v1718_v27  ;;  %912 = vperm.xlu0 %7942, %v438_v34   ;;  %v608_v16 = vpop.permute.xlu1 %607  ;;  %v603_v15 = vpop.permute.xlu0 %602  ;;  %v2743_v5 = vld [vmem:[#allocation2 + $0x9a] sm:$0xf] }
  0xca   : > { %v3647_v32 = vadd.f32 %v3535_v23, %v3306_v62  ;;  %v3987_v18 = vadd.f32 %v3875_v49, %v3646_v40  ;;  %v1497_v33 = vmul.f32 %v8451_v4, %v1380_v63  ;;  %v1267_v35 = vmul.f32 %v8456_v6, %v1150_v19  ;;  %7545 = vmatpush3.bf16.msra.mxu0 %v7947_v51 }
  0xcb   : > { %v3648_v38 = vadd.f32 %v8718_v24, %v3307_v31  ;;  %v8781_v9 = vmul.f32 %v8494_v54, %v1380_v63  ;;  %v1268_v37 = vmul.f32 %v8456_v6, %v1151_v29  ;;  %v1496_v27 = vmul.f32 %v8451_v4, %v1379_v30  ;;  %1051 = vst.msk [vmem:[#allocation2 + $0x109] sm:$0xff] %vm226_vm0, %v608_v16  ;;  %v3764_v31 = vld [vmem:[#allocation2 + $0x9a] sm:$0xf] }
  0xcc   : > { %v3988_v40 = vadd.f32 %v3876_v13, %v3647_v32  ;;  %v4095_v43 = vmax.f32 %v8657_v17, %v3987_v18  ;;  %v2175_v42 = vmul.f32 %v8485_v41, %v1150_v19  ;;  %v2176_v44 = vmul.f32 %v8485_v41, %v1151_v29  ;;  %1050 = vst.msk [vmem:[#allocation2 + $0x101] sm:$0xff] %vm226_vm0, %v603_v15  ;;  %v443_v17 = vld [vmem:[%s8376_s23 + $0x2f8] sm:$0xf] }
  0xcd   : > { %927 = vperm.xlu1 %7943, %v441_v0   ;;  %v3989_v24 = vadd.f32 %v8721_v26, %v3648_v38  ;;  %v8792_v60 = vmul.f32 %v8550_v3, %v1380_v63  ;;  %v1608_v7 = vadd.f32 %v1496_v27, %v1267_v35  ;;  %v1837_v45 = vmul.f32 %v8463_v11, %v1720_v1  ;;  %v442_v26 = vld [vmem:[%s8376_s23 + $0x2f0] sm:$0xff]  ;;  %v2402_v63 = vld [vmem:[#allocation2 + $0x99] sm:$0xf]  ;;  %v618_v20 = vpop.permute.xlu1 %617  ;;  %v613_v62 = vpop.permute.xlu0 %612 }
  0xce   : > { %922 = vperm.xlu0 %7942, %v440_v36   ;;  %v4096_v14 = vmax.f32 %v8670_v28, %v3988_v40  ;;  %4099 = vst.msk [vmem:[#allocation3 + $0x8] sm:$0xff] %vm226_vm0, %v4095_v43  ;;  %v8798_v50 = vadd.f32 %v1497_v33, %v1268_v37  ;;  %v2287_v51 = vadd.f32 %v2175_v42, %v8693_v47  ;;  %v1723_v28 = vld [vmem:[#allocation2 + $0x9a] sm:$0xf]  ;;  %1052 = vst.msk [vmem:[#allocation2 + $0x111] sm:$0xff] %vm226_vm0, %v613_v62  ;;  %v1381_v33 = vld [vmem:[#allocation2 + $0x91] sm:$0xff] }
  0xcf   : > { %v2516_v46 = vmul.f32 %v8494_v54, %v1379_v30  ;;  %v4097_v34 = vmax.f32 %v8678_v8, %v3989_v24  ;;  %v2288_v52 = vadd.f32 %v2176_v44, %v8752_v55  ;;  %v3196_v57 = vmul.f32 %v8561_v12, %v1150_v19  ;;  %v3423_v55 = vld [vmem:[#allocation2 + $0x99] sm:$0xf]  ;;  %1053 = vst.msk [vmem:[#allocation2 + $0x119] sm:$0xf] %vm1024_vm2, %v618_v20  ;;  %v445_v19 = vld [vmem:[%s8376_s23 + $0x308] sm:$0xff] }
  0xd0   : > { %v3197_v59 = vmul.f32 %v8561_v12, %v1151_v29  ;;  %4100 = vst.msk [vmem:[#allocation3 + $0x10] sm:$0xff] %vm226_vm0, %v4096_v14  ;;  %v8808_v47 = vadd.f32 %v1837_v45, %v1608_v7  ;;  %v2857_v49 = vmul.f32 %v8505_v61, %v1720_v1  ;;  %v3537_v8 = vmul.f32 %v8550_v3, %v1379_v30  ;;  %v1152_v30 = vld [vmem:[#allocation2 + $0x90] sm:$0xff]  ;;  %v1153_v18 = vld [vmem:[#allocation2 + $0x98] sm:$0xf] }
  0xd1   : > { %v2628_v23 = vadd.f32 %v2516_v46, %v2287_v51  ;;  %937 = vperm.xlu1 %7943, %v443_v17   ;;  %4101 = vst.msk [vmem:[#allocation3 + $0x18] sm:$0xf] %vm1024_vm2, %v4097_v34  ;;  %v3308_v29 = vadd.f32 %v3196_v57, %v8704_v58  ;;  %v3878_v0 = vmul.f32 %v8578_v21, %v1720_v1  ;;  %v1721_v58 = vld [vmem:[#allocation2 + $0x8a] sm:$0xff]  ;;  %v1722_v40 = vld [vmem:[#allocation2 + $0x92] sm:$0xff]  ;;  %v628_v42 = vpop.permute.xlu1 %627  ;;  %v623_v44 = vpop.permute.xlu0 %622 }
  0xd2   : > { %v3309_v13 = vadd.f32 %v3197_v59, %v8761_v39  ;;  %v1499_v32 = vmul.f32 %v8451_v4, %v1382_v22  ;;  %932 = vperm.xlu0 %7942, %v442_v26   ;;  %v8823_v36 = vmul.f32 %v8463_v11, %v1723_v28  ;;  %v2519_v38 = vmul.f32 %v8494_v54, %v2402_v63  ;;  %v444_v39 = vld [vmem:[%s8376_s23 + $0x300] sm:$0xff]  ;;  %v2060_v43 = vld [vmem:[#allocation2 + $0x98] sm:$0xf]  ;;  %v446_v34 = vld [vmem:[%s8376_s23 + $0x310] sm:$0xff] }
  0xd3   : > { %v8820_v35 = vadd.f32 %v2857_v49, %v2628_v23  ;;  %v8827_v37 = vmul.f32 %v8505_v61, %v2743_v5  ;;  %v3649_v27 = vadd.f32 %v3537_v8, %v3308_v29  ;;  %v3540_v1 = vmul.f32 %v8550_v3, %v3423_v55  ;;  %1055 = vst.msk [vmem:[#allocation2 + $0x129] sm:$0xff] %vm226_vm0, %v628_v42  ;;  %v3081_v51 = vld [vmem:[#allocation2 + $0x98] sm:$0xf]  ;;  %v1154_v49 = vld [vmem:[#allocation2 + $0xa0] sm:$0xff]  ;;  %v449_v8 = vld [vmem:[%s8376_s23 + $0x328] sm:$0xff] }
  0xd4   : > { %v8832_v16 = vmul.f32 %v8578_v21, %v3764_v31  ;;  %v1948_v15 = vadd.f32 %v8707_v2, %v8749_v53  ;;  %v2629_v24 = vadd.f32 %v8781_v9, %v2288_v52  ;;  %v1269_v7 = vmul.f32 %v8456_v6, %v1152_v30  ;;  %1054 = vst.msk [vmem:[#allocation2 + $0x121] sm:$0xff] %vm226_vm0, %v623_v44  ;;  %v8889_v44 = vld [vmem:[%s11454_s1] ss:$0 sm:$0xff] }
  0xd5   : > { %v1270_v45 = vmul.f32 %v8456_v6, %v1153_v18  ;;  %v1498_v17 = vmul.f32 %v8451_v4, %v1381_v33  ;;  %947 = vperm.xlu1 %7943, %v445_v19   ;;  %v2968_v2 = vadd.f32 %v8713_v48, %v8770_v25  ;;  %v3650_v53 = vadd.f32 %v8792_v60, %v3309_v13  ;;  %v447_v6 = vld [vmem:[%s8376_s23 + $0x318] sm:$0xf]  ;;  %v638_v57 = vpop.permute.xlu1 %637  ;;  %v633_v59 = vpop.permute.xlu0 %632  ;;  %v1155_v13 = vld [vmem:[#allocation2 + $0xa8] sm:$0xff] }
  0xd6   : > { %v1838_v14 = vmul.f32 %v8463_v11, %v1721_v58  ;;  %v2177_v9 = vmul.f32 %v8485_v41, %v1152_v30  ;;  %942 = vperm.xlu0 %7942, %v444_v39   ;;  %v8848_v46 = vadd.f32 %v3878_v0, %v3649_v27  ;;  %v1839_v22 = vmul.f32 %v8463_v11, %v1722_v40  ;;  %v1383_v0 = vld [vmem:[#allocation2 + $0xa1] sm:$0xff] }
  0xd7   : > { %v1610_v4 = vadd.f32 %v1498_v17, %v1269_v7  ;;  %v2178_v26 = vmul.f32 %v8485_v41, %v2060_v43  ;;  %v8853_v52 = vadd.f32 %v1499_v32, %v1270_v45  ;;  %v2518_v25 = vmul.f32 %v8494_v54, %v1381_v33  ;;  %1057 = vst.msk [vmem:[#allocation2 + $0x139] sm:$0xf] %vm1024_vm2, %v638_v57  ;;  %v448_v32 = vld [vmem:[%s8376_s23 + $0x320] sm:$0xff]  ;;  %v451_v17 = vld [vmem:[%s8376_s23 + $0x338] sm:$0xf] }
  0xd8   : > { %v2289_v48 = vadd.f32 %v2177_v9, %v8757_v56  ;;  %v2858_v60 = vmul.f32 %v8505_v61, %v1721_v58  ;;  %v8859_v28 = vadd.f32 %v1838_v14, %v8798_v50  ;;  %v3198_v11 = vmul.f32 %v8561_v12, %v1152_v30  ;;  %1056 = vst.msk [vmem:[#allocation2 + $0x131] sm:$0xff] %vm226_vm0, %v633_v59  ;;  %v1384_v50 = vld [vmem:[#allocation2 + $0xa9] sm:$0xff]  ;;  %v8907_v14 = vld [vmem:[%s11454_s1 + $0x2] ss:$0 sm:$0xff] }
  0xd9   : > { %v2290_v63 = vadd.f32 %v2178_v26, %v1948_v15  ;;  %v3199_v5 = vmul.f32 %v8561_v12, %v3081_v51  ;;  %957 = vperm.xlu1 %7943, %v447_v6   ;;  %v8865_v56 = vadd.f32 %v1839_v22, %v1610_v4  ;;  %v2859_v62 = vmul.f32 %v8505_v61, %v1722_v40  ;;  %v1724_v27 = vld [vmem:[#allocation2 + $0xa2] sm:$0xff]  ;;  %v648_v15 = vpop.permute.xlu1 %647  ;;  %v643_v43 = vpop.permute.xlu0 %642  ;;  %v450_v6 = vld [vmem:[%s8376_s23 + $0x330] sm:$0xff] }
  0xda   : > { %v2630_v20 = vadd.f32 %v2518_v25, %v2289_v48  ;;  %v3879_v23 = vmul.f32 %v8578_v21, %v1721_v58  ;;  %952 = vperm.xlu0 %7942, %v446_v34   ;;  %v2970_v55 = vadd.f32 %v2858_v60, %v2629_v24  ;;  %v3310_v31 = vadd.f32 %v3198_v11, %v8772_v10  ;;  %v1386_v48 = vld [vmem:[#allocation2 + $0xb9] sm:$0xf] }
  0xdb   : > { %v3311_v19 = vadd.f32 %v3199_v5, %v2968_v2  ;;  %v3539_v29 = vmul.f32 %v8550_v3, %v1381_v33  ;;  %v8873_v30 = vadd.f32 %v2519_v38, %v2290_v63  ;;  %v3880_v39 = vmul.f32 %v8578_v21, %v1722_v40  ;;  %v8883_v33 = vld [vmem:[%s11454_s1 + $0x1] ss:$0 sm:$0xff]  ;;  %1059 = vst.msk [vmem:[#allocation2 + $0x149] sm:$0xff] %vm226_vm0, %v648_v15  ;;  %v1727_v25 = vld [vmem:[#allocation2 + $0xba] sm:$0xf] }
  0xdc   : > { %v8875_v18 = vadd.f32 %v2859_v62, %v2630_v20  ;;  %v8878_v58 = vadd.f32 %v3879_v23, %v3650_v53  ;;  %v1501_v38 = vmul.f32 %v8883_v33, %v1384_v50  ;;  %v1271_v40 = vmul.f32 %v8889_v44, %v1154_v49  ;;  %1058 = vst.msk [vmem:[#allocation2 + $0x141] sm:$0xff] %vm226_vm0, %v643_v43  ;;  %v2747_v5 = vld [vmem:[#allocation2 + $0xba] sm:$0xf]  ;;  %v452_v15 = vld [vmem:[%s8376_s23 + $0x340] sm:$0xff] }
  0xdd   : > { %v3651_v42 = vadd.f32 %v3539_v29, %v3310_v31  ;;  %v3652_v10 = vadd.f32 %v3540_v1, %v3311_v19  ;;  %967 = vperm.xlu1 %7943, %v449_v8   ;;  %v2521_v1 = vmul.f32 %v8494_v54, %v1384_v50  ;;  %v1272_v24 = vmul.f32 %v8889_v44, %v1155_v13  ;;  %v658_v60 = vpop.permute.xlu1 %657  ;;  %v653_v57 = vpop.permute.xlu0 %652  ;;  %v3427_v20 = vld [vmem:[#allocation2 + $0xb9] sm:$0xf]  ;;  %v453_v8 = vld [vmem:[%s8376_s23 + $0x348] sm:$0xff] }
  0xde   : > { %v1500_v7 = vmul.f32 %v8883_v33, %v1383_v0  ;;  %v2179_v45 = vmul.f32 %v8485_v41, %v1154_v49  ;;  %962 = vperm.xlu0 %7942, %v448_v32   ;;  %v8902_v53 = vmul.f32 %v8550_v3, %v1384_v50  ;;  %v1841_v9 = vmul.f32 %v8907_v14, %v1724_v27  ;;  %v3768_v50 = vld [vmem:[#allocation2 + $0xba] sm:$0xf] }
  0xdf   : > { %v8899_v2 = vadd.f32 %v3880_v39, %v3651_v42  ;;  %v2180_v51 = vmul.f32 %v8485_v41, %v1155_v13  ;;  %v8913_v4 = vadd.f32 %v8832_v16, %v3652_v10  ;;  %v2520_v34 = vmul.f32 %v8494_v54, %v1383_v0  ;;  %v2406_v16 = vld [vmem:[#allocation2 + $0xb9] sm:$0xf]  ;;  %1061 = vst.msk [vmem:[#allocation2 + $0x159] sm:$0xf] %vm1024_vm2, %v658_v60  ;;  %v1385_v39 = vld [vmem:[#allocation2 + $0xb1] sm:$0xff] }
  0xe0   : > { %v1612_v22 = vadd.f32 %v1500_v7, %v1271_v40  ;;  %v2291_v26 = vadd.f32 %v2179_v45, %v8808_v47  ;;  %v8917_v59 = vadd.f32 %v1501_v38, %v1272_v24  ;;  %v2861_v63 = vmul.f32 %v8505_v61, %v1724_v27  ;;  %1060 = vst.msk [vmem:[#allocation2 + $0x151] sm:$0xff] %vm226_vm0, %v653_v57  ;;  %v1157_v32 = vld [vmem:[#allocation2 + $0xb8] sm:$0xf] }
  0xe1   : > { %v3200_v41 = vmul.f32 %v8561_v12, %v1154_v49  ;;  %v3201_v11 = vmul.f32 %v8561_v12, %v1155_v13  ;;  %977 = vperm.xlu1 %7943, %v451_v17   ;;  %v2292_v47 = vadd.f32 %v2180_v51, %v8859_v28  ;;  %v3541_v23 = vmul.f32 %v8550_v3, %v1383_v0  ;;  %v1156_v49 = vld [vmem:[#allocation2 + $0xb0] sm:$0xff]  ;;  %v8941_v0 = vld [vmem:[%s11454_s1 + $0x5] ss:$0 sm:$0xff]  ;;  %v668_v42 = vpop.permute.xlu1 %667  ;;  %v663_v10 = vpop.permute.xlu0 %662  ;;  %v2064_v17 = vld [vmem:[#allocation2 + $0xb8] sm:$0xf] }
  0xe2   : > { %v8924_v54 = vadd.f32 %v1841_v9, %v1612_v22  ;;  %v2632_v62 = vadd.f32 %v2520_v34, %v2291_v26  ;;  %972 = vperm.xlu0 %7942, %v450_v6   ;;  %v3882_v29 = vmul.f32 %v8578_v21, %v1724_v27  ;;  %v1503_v13 = vmul.f32 %v8883_v33, %v1386_v48  ;;  %v1725_v27 = vld [vmem:[#allocation2 + $0xaa] sm:$0xff]  ;;  %v1726_v45 = vld [vmem:[#allocation2 + $0xb2] sm:$0xff]  ;;  %v8969_v34 = vld [vmem:[%s11454_s1 + $0x4] ss:$0 sm:$0xff] }
  0xe3   : > { %v3312_v31 = vadd.f32 %v3200_v41, %v8820_v35  ;;  %v3313_v19 = vadd.f32 %v3201_v11, %v2970_v55  ;;  %v8936_v28 = vmul.f32 %v8907_v14, %v1727_v25  ;;  %v8944_v35 = vmul.f32 %v8941_v0, %v2406_v16  ;;  %1063 = vst.msk [vmem:[#allocation2 + $0x169] sm:$0xff] %vm226_vm0, %v668_v42  ;;  %v455_v22 = vld [vmem:[%s8376_s23 + $0x358] sm:$0xf]  ;;  %v454_v48 = vld [vmem:[%s8376_s23 + $0x350] sm:$0xff] }
  0xe4   : > { %v8933_v43 = vadd.f32 %v2861_v63, %v2632_v62  ;;  %v8947_v55 = vmul.f32 %v8505_v61, %v2747_v5  ;;  %v8950_v40 = vmul.f32 %v8550_v3, %v3427_v20  ;;  %v8953_v24 = vmul.f32 %v8578_v21, %v3768_v50  ;;  %1062 = vst.msk [vmem:[#allocation2 + $0x161] sm:$0xff] %vm226_vm0, %v663_v10  ;;  %v3085_v41 = vld [vmem:[#allocation2 + $0xb8] sm:$0xf]  ;;  %v8982_v20 = vld [vmem:[%s11454_s1 + $0x6] ss:$0 sm:$0xff]  ;;  %v1159_v10 = vld [vmem:[#allocation2 + $0xc8] sm:$0xff] }
  0xe5   : > { %v3653_v38 = vadd.f32 %v3541_v23, %v3312_v31  ;;  %v1952_v7 = vadd.f32 %v8823_v36, %v8853_v52  ;;  %987 = vperm.xlu1 %7943, %v453_v8   ;;  %v2633_v61 = vadd.f32 %v2521_v1, %v2292_v47  ;;  %v1273_v9 = vmul.f32 %v8889_v44, %v1156_v49  ;;  %v457_v23 = vld [vmem:[%s8376_s23 + $0x368] sm:$0xff] }
  0xe6   : > { %v1274_v51 = vmul.f32 %v8889_v44, %v1157_v32  ;;  %v1502_v6 = vmul.f32 %v8883_v33, %v1385_v39  ;;  %982 = vperm.xlu0 %7942, %v452_v15   ;;  %v2972_v36 = vadd.f32 %v8827_v37, %v8873_v30  ;;  %v1842_v52 = vmul.f32 %v8907_v14, %v1725_v27  ;;  %v678_v37 = vpop.permute.xlu1 %677  ;;  %v673_v30 = vpop.permute.xlu0 %672  ;;  %v1158_v32 = vld [vmem:[#allocation2 + $0xc0] sm:$0xff] }
  0xe7   : > { %v3994_v26 = vadd.f32 %v3882_v29, %v3653_v38  ;;  %v2181_v1 = vmul.f32 %v8969_v34, %v1156_v49  ;;  %v3654_v25 = vadd.f32 %v8902_v53, %v3313_v19  ;;  %v1843_v57 = vmul.f32 %v8907_v14, %v1726_v45  ;;  %1065 = vst.msk [vmem:[#allocation2 + $0x179] sm:$0xf] %vm1024_vm2, %v678_v37  ;;  %v1388_v29 = vld [vmem:[#allocation2 + $0xc9] sm:$0xff]  ;;  %v1387_v38 = vld [vmem:[#allocation2 + $0xc1] sm:$0xff] }
  0xe8   : > { %v1614_v60 = vadd.f32 %v1502_v6, %v1273_v9  ;;  %v2182_v63 = vmul.f32 %v8969_v34, %v2064_v17  ;;  %v2522_v5 = vmul.f32 %v8941_v0, %v1385_v39  ;;  %v2862_v53 = vmul.f32 %v8982_v20, %v1725_v27  ;;  %1064 = vst.msk [vmem:[#allocation2 + $0x171] sm:$0xff] %vm226_vm0, %v673_v30  ;;  %v1728_v6 = vld [vmem:[#allocation2 + $0xc2] sm:$0xff] }
  0xe9   : > { %v4102_v11 = vmax.f32 %v8848_v46, %v3994_v26  ;;  %v2293_v16 = vadd.f32 %v2181_v1, %v8865_v56  ;;  %997 = vperm.xlu1 %7943, %v455_v22   ;;  %v8987_v47 = vadd.f32 %v1503_v13, %v1274_v51  ;;  %v1954_v46 = vadd.f32 %v1842_v52, %v8917_v59  ;;  %v456_v13 = vld [vmem:[%s8376_s23 + $0x360] sm:$0xff] }
  0xea   : > { %v2294_v56 = vadd.f32 %v2182_v63, %v1952_v7  ;;  %v3202_v62 = vmul.f32 %v8561_v12, %v1156_v49  ;;  %992 = vperm.xlu0 %7942, %v454_v48   ;;  %v8993_v50 = vadd.f32 %v1843_v57, %v1614_v60  ;;  %v2863_v31 = vmul.f32 %v8982_v20, %v1726_v45  ;;  %v688_v7 = vpop.permute.xlu1 %687  ;;  %v683_v17 = vpop.permute.xlu0 %682 }
  0xeb   : > { %4107 = vst.msk [vmem:[#allocation3 + $0x20] sm:$0xff] %vm226_vm0, %v4102_v11  ;;  %v2634_v8 = vadd.f32 %v2522_v5, %v2293_v16  ;;  %v3203_v19 = vmul.f32 %v8561_v12, %v3085_v41  ;;  %v8998_v15 = vadd.f32 %v2862_v53, %v2633_v61  ;;  %v3543_v49 = vmul.f32 %v8550_v3, %v1385_v39  ;;  %v1390_v5 = vld [vmem:[#allocation2 + $0xd9] sm:$0xf] }
  0xec   : > { %v3314_v59 = vadd.f32 %v3202_v62, %v8875_v18  ;;  %v3883_v42 = vmul.f32 %v8578_v21, %v1725_v27  ;;  %v9004_v9 = vadd.f32 %v8944_v35, %v2294_v56  ;;  %v3884_v61 = vmul.f32 %v8578_v21, %v1726_v45  ;;  %1067 = vst.msk [vmem:[#allocation2 + $0x189] sm:$0xff] %vm226_vm0, %v688_v7  ;;  %v459_v35 = vld [vmem:[%s8376_s23 + $0x378] sm:$0xf]  ;;  %v9040_v62 = vld [vmem:[%s11454_s1 + $0x8] ss:$0 sm:$0xff] }
  0xed   : > { %v9006_v12 = vadd.f32 %v2863_v31, %v2634_v8  ;;  %v3315_v51 = vadd.f32 %v3203_v19, %v2972_v36  ;;  %1066 = vst.msk [vmem:[#allocation2 + $0x181] sm:$0xff] %vm226_vm0, %v683_v17  ;;  %1007 = vperm.xlu1 %7943, %v457_v23   ;;  %v1505_v39 = vmul.f32 %v8883_v33, %v1388_v29  ;;  %v458_v36 = vld [vmem:[%s8376_s23 + $0x370] sm:$0xff]  ;;  %v1731_v8 = vld [vmem:[#allocation2 + $0xda] sm:$0xf] }
  0xee   : > { %v3655_v3 = vadd.f32 %v3543_v49, %v3314_v59  ;;  %v3995_v18 = vadd.f32 %v3883_v42, %v3654_v25  ;;  %v1275_v27 = vmul.f32 %v8889_v44, %v1158_v32  ;;  %1002 = vperm.xlu0 %7942, %v456_v13   ;;  %v2525_v26 = vmul.f32 %v8941_v0, %v1388_v29  ;;  %v698_v60 = vpop.permute.xlu1 %697  ;;  %v693_v57 = vpop.permute.xlu0 %692  ;;  %v2410_v31 = vld [vmem:[#allocation2 + $0xd9] sm:$0xf]  ;;  %v9055_v42 = vld [vmem:[%s11454_s1 + $0xa] ss:$0 sm:$0xff]  ;;  %v1160_v17 = vld [vmem:[#allocation2 + $0xd0] sm:$0xff] }
  0xef   : > { %v3656_v22 = vadd.f32 %v8950_v40, %v3315_v51  ;;  %v1276_v21 = vmul.f32 %v8889_v44, %v1159_v10  ;;  %v1504_v45 = vmul.f32 %v8883_v33, %v1387_v38  ;;  %v2183_v48 = vmul.f32 %v8969_v34, %v1158_v32  ;;  %v9026_v40 = vld [vmem:[%s11454_s1 + $0x9] ss:$0 sm:$0xff]  ;;  %1069 = vst.msk [vmem:[#allocation2 + $0x199] sm:$0xf] %vm1024_vm2, %v698_v60  ;;  %v2751_v19 = vld [vmem:[#allocation2 + $0xda] sm:$0xf] }
  0xf0   : > { %v3996_v52 = vadd.f32 %v3884_v61, %v3655_v3  ;;  %v4103_v1 = vmax.f32 %v8878_v58, %v3995_v18  ;;  %v2184_v25 = vmul.f32 %v8969_v34, %v1159_v10  ;;  %v3546_v41 = vmul.f32 %v9026_v40, %v1388_v29  ;;  %1068 = vst.msk [vmem:[#allocation2 + $0x191] sm:$0xff] %vm226_vm0, %v693_v57  ;;  %v3431_v13 = vld [vmem:[#allocation2 + $0xd9] sm:$0xf]  ;;  %v1729_v18 = vld [vmem:[#allocation2 + $0xca] sm:$0xff] }
  0xf1   : > { %v3997_v63 = vadd.f32 %v8953_v24, %v3656_v22  ;;  %v1616_v37 = vadd.f32 %v1504_v45, %v1275_v27  ;;  %v1845_v30 = vmul.f32 %v8907_v14, %v1728_v6  ;;  %1017 = vperm.xlu1 %7943, %v459_v35   ;;  %v1617_v24 = vadd.f32 %v1505_v39, %v1276_v21  ;;  %v3772_v59 = vld [vmem:[#allocation2 + $0xda] sm:$0xf]  ;;  %v1730_v22 = vld [vmem:[#allocation2 + $0xd2] sm:$0xff] }
  0xf2   : > { %v4104_v58 = vmax.f32 %v8899_v2, %v3996_v52  ;;  %4108 = vst.msk [vmem:[#allocation3 + $0x28] sm:$0xff] %vm226_vm0, %v4103_v1  ;;  %v2295_v11 = vadd.f32 %v2183_v48, %v8924_v54  ;;  %v2524_v16 = vmul.f32 %v8941_v0, %v1387_v38  ;;  %1012 = vperm.xlu0 %7942, %v458_v36   ;;  %v1161_v51 = vld [vmem:[#allocation2 + $0xd8] sm:$0xf] }
  0xf3   : > { %v4105_v53 = vmax.f32 %v8913_v4, %v3997_v63  ;;  %v2296_v56 = vadd.f32 %v2184_v25, %v1954_v46  ;;  %v3204_v23 = vmul.f32 %v9040_v62, %v1158_v32  ;;  %v3205_v2 = vmul.f32 %v9040_v62, %v1159_v10  ;;  %v2068_v21 = vld [vmem:[#allocation2 + $0xd8] sm:$0xf] }
  0xf4   : > { %4109 = vst.msk [vmem:[#allocation3 + $0x30] sm:$0xff] %vm226_vm0, %v4104_v58  ;;  %v9045_v54 = vadd.f32 %v1845_v30, %v1616_v37  ;;  %v2636_v29 = vadd.f32 %v2524_v16, %v2295_v11  ;;  %v2865_v4 = vmul.f32 %v8982_v20, %v1728_v6  ;;  %v3545_v46 = vmul.f32 %v9026_v40, %v1387_v38  ;;  %v1389_v38 = vld [vmem:[#allocation2 + $0xd1] sm:$0xff] }
  0xf5   : > { %4110 = vst.msk [vmem:[#allocation3 + $0x38] sm:$0xf] %vm1024_vm2, %v4105_v53  ;;  %v3316_v32 = vadd.f32 %v3204_v23, %v8933_v43  ;;  %v3317_v49 = vadd.f32 %v3205_v2, %v8998_v15  ;;  %v3886_v10 = vmul.f32 %v9055_v42, %v1728_v6  ;;  %v1507_v7 = vmul.f32 %v8883_v33, %v1390_v5  ;;  %v3089_v63 = vld [vmem:[#allocation2 + $0xd8] sm:$0xf]  ;;  %v708_v53 = vpop.permute.xlu1 %707 }
  0xf6   : > { %v9059_v61 = vadd.f32 %v2865_v4, %v2636_v29  ;;  %v9062_v3 = vmul.f32 %v8907_v14, %v1731_v8  ;;  %v2527_v43 = vmul.f32 %v8941_v0, %v2410_v31  ;;  %v9066_v15 = vmul.f32 %v8982_v20, %v2751_v19  ;;  %v1162_v19 = vld [vmem:[#allocation2 + $0xe0] sm:$0xff]  ;;  %1071 = vst.msk [vmem:[#allocation2 + $0x1a9] sm:$0xff] %vm226_vm0, %v708_v53 }
  0xf7   : > { %v3657_v39 = vadd.f32 %v3545_v46, %v3316_v32  ;;  %v3548_v27 = vmul.f32 %v9026_v40, %v3431_v13  ;;  %v3889_v6 = vmul.f32 %v9055_v42, %v3772_v59  ;;  %v1956_v35 = vadd.f32 %v8936_v28, %v8987_v47  ;;  %v1163_v13 = vld [vmem:[#allocation2 + $0xe8] sm:$0xff] }
  0xf8   : > { %v2637_v45 = vadd.f32 %v2525_v26, %v2296_v56  ;;  %v1277_v36 = vmul.f32 %v8889_v44, %v1160_v17  ;;  %v1278_v52 = vmul.f32 %v8889_v44, %v1161_v51  ;;  %v1506_v1 = vmul.f32 %v8883_v33, %v1389_v38  ;;  %v703_v56 = vpop.permute.xlu0 %702  ;;  %v1391_v59 = vld [vmem:[#allocation2 + $0xe1] sm:$0xff] }
  0xf9   : > { %v2976_v48 = vadd.f32 %v8947_v55, %v9004_v9  ;;  %v3658_v25 = vadd.f32 %v3546_v41, %v3317_v49  ;;  %v1846_v60 = vmul.f32 %v8907_v14, %v1729_v18  ;;  %v2185_v57 = vmul.f32 %v8969_v34, %v1160_v17  ;;  %1070 = vst.msk [vmem:[#allocation2 + $0x1a1] sm:$0xff] %vm226_vm0, %v703_v56  ;;  %v3776_v56 = vld [vmem:[#allocation2 + $0xfa] sm:$0xf] }
  0xfa   : > { %v9079_v37 = vadd.f32 %v3886_v10, %v3657_v39  ;;  %v1618_v28 = vadd.f32 %v1506_v1, %v1277_v36  ;;  %v1847_v47 = vmul.f32 %v8907_v14, %v1730_v22  ;;  %v2186_v26 = vmul.f32 %v8969_v34, %v2068_v21 }
  0xfb   : > { %v9083_v30 = vadd.f32 %v1507_v7, %v1278_v52  ;;  %v2297_v58 = vadd.f32 %v2185_v57, %v8993_v50  ;;  %v2526_v11 = vmul.f32 %v8941_v0, %v1389_v38  ;;  %v2866_v55 = vmul.f32 %v8982_v20, %v1729_v18  ;;  %v1392_v50 = vld [vmem:[#allocation2 + $0xe9] sm:$0xff] }
  0xfc   : > { %v1958_v9 = vadd.f32 %v1846_v60, %v1617_v24  ;;  %v2298_v41 = vadd.f32 %v2186_v26, %v1956_v35  ;;  %v3206_v16 = vmul.f32 %v9040_v62, %v1160_v17  ;;  %v3207_v5 = vmul.f32 %v9040_v62, %v3089_v63  ;;  %v1732_v17 = vld [vmem:[#allocation2 + $0xe2] sm:$0xff]  ;;  %v718_v35 = vpop.permute.xlu1 %717  ;;  %v713_v21 = vpop.permute.xlu0 %712  ;;  %v1394_v63 = vld [vmem:[#allocation2 + $0xf9] sm:$0xf] }
  0xfd   : > { %v9090_v23 = vadd.f32 %v1847_v47, %v1618_v28  ;;  %v2638_v2 = vadd.f32 %v2526_v11, %v2297_v58  ;;  %v2867_v8 = vmul.f32 %v8982_v20, %v1730_v22  ;;  %v3887_v31 = vmul.f32 %v9055_v42, %v1729_v18  ;;  %1073 = vst.msk [vmem:[#allocation2 + $0x1b9] sm:$0xf] %vm1024_vm2, %v718_v35  ;;  %v1735_v11 = vld [vmem:[#allocation2 + $0xfa] sm:$0xf] }
  0xfe   : > { %v2978_v24 = vadd.f32 %v2866_v55, %v2637_v45  ;;  %v3318_v29 = vadd.f32 %v3206_v16, %v9006_v12  ;;  %v3319_v4 = vadd.f32 %v3207_v5, %v2976_v48  ;;  %v3547_v46 = vmul.f32 %v9026_v40, %v1389_v38  ;;  %1072 = vst.msk [vmem:[#allocation2 + $0x1b1] sm:$0xff] %vm226_vm0, %v713_v21  ;;  %v2414_v55 = vld [vmem:[#allocation2 + $0xf9] sm:$0xf] }
  0xff   : > { %v9098_v32 = vadd.f32 %v2527_v43, %v2298_v41  ;;  %v9100_v49 = vadd.f32 %v2867_v8, %v2638_v2  ;;  %v3888_v10 = vmul.f32 %v9055_v42, %v1730_v22  ;;  %v9103_v7 = vadd.f32 %v3887_v31, %v3658_v25  ;;  %v2755_v41 = vld [vmem:[#allocation2 + $0xfa] sm:$0xf] }
 0x100   : > { %v3659_v51 = vadd.f32 %v3547_v46, %v3318_v29  ;;  %v3660_v18 = vadd.f32 %v3548_v27, %v3319_v4  ;;  %v1509_v39 = vmul.f32 %v8883_v33, %v1392_v50  ;;  %v1279_v12 = vmul.f32 %v8889_v44, %v1162_v19  ;;  %v1165_v29 = vld [vmem:[#allocation2 + $0xf8] sm:$0xf] }
 0x101   : > { %v2529_v38 = vmul.f32 %v8941_v0, %v1392_v50  ;;  %v1280_v43 = vmul.f32 %v8889_v44, %v1163_v13  ;;  %v1508_v45 = vmul.f32 %v8883_v33, %v1391_v59  ;;  %v2187_v36 = vmul.f32 %v8969_v34, %v1162_v19  ;;  %v1393_v4 = vld [vmem:[#allocation2 + $0xf1] sm:$0xff] }
 0x102   : > { %v9113_v22 = vadd.f32 %v3888_v10, %v3659_v51  ;;  %v3550_v27 = vmul.f32 %v9026_v40, %v1392_v50  ;;  %v1849_v52 = vmul.f32 %v8907_v14, %v1732_v17  ;;  %v2188_v1 = vmul.f32 %v8969_v34, %v1163_v13  ;;  %v1733_v10 = vld [vmem:[#allocation2 + $0xea] sm:$0xff]  ;;  %v2072_v35 = vld [vmem:[#allocation2 + $0xf8] sm:$0xf] }
 0x103   : > { %v9118_v48 = vadd.f32 %v3889_v6, %v3660_v18  ;;  %v1620_v25 = vadd.f32 %v1508_v45, %v1279_v12  ;;  %v2299_v60 = vadd.f32 %v2187_v36, %v9045_v54  ;;  %v2528_v57 = vmul.f32 %v8941_v0, %v1391_v59  ;;  %v3435_v54 = vld [vmem:[#allocation2 + $0xf9] sm:$0xf] }
 0x104   : > { %v1621_v28 = vadd.f32 %v1509_v39, %v1280_v43  ;;  %v2869_v47 = vmul.f32 %v8982_v20, %v1732_v17  ;;  %v3208_v26 = vmul.f32 %v9040_v62, %v1162_v19  ;;  %v3209_v58 = vmul.f32 %v9040_v62, %v1163_v13  ;;  %v1164_v19 = vld [vmem:[#allocation2 + $0xf0] sm:$0xff] }
 0x105   : > { %v9125_v16 = vadd.f32 %v1849_v52, %v1620_v25  ;;  %v2300_v6 = vadd.f32 %v2188_v1, %v1958_v9  ;;  %v2640_v5 = vadd.f32 %v2528_v57, %v2299_v60  ;;  %v3549_v53 = vmul.f32 %v9026_v40, %v1391_v59  ;;  %v1734_v12 = vld [vmem:[#allocation2 + $0xf2] sm:$0xff] }
 0x106   : > { %v3320_v2 = vadd.f32 %v3208_v26, %v9059_v61  ;;  %v3321_v8 = vadd.f32 %v3209_v58, %v2978_v24  ;;  %v3890_v31 = vmul.f32 %v9055_v42, %v1732_v17  ;;  %v1511_v50 = vmul.f32 %v8883_v33, %v1394_v63  ;;  %v728_v61 = vpop.permute.xlu1 %727  ;;  %v723_v24 = vpop.permute.xlu0 %722  ;;  %v3093_v63 = vld [vmem:[#allocation2 + $0xf8] sm:$0xf] }
 0x107   : > { %v9131_v46 = vadd.f32 %v2869_v47, %v2640_v5  ;;  %v9134_v13 = vmul.f32 %v8907_v14, %v1735_v11  ;;  %v2531_v9 = vmul.f32 %v8941_v0, %v2414_v55  ;;  %v9138_v59 = vmul.f32 %v8982_v20, %v2755_v41  ;;  %1075 = vst.msk [vmem:[#allocation2 + $0x1c9] sm:$0xff] %vm226_vm0, %v728_v61 }
 0x108   : > { %v3661_v51 = vadd.f32 %v3549_v53, %v3320_v2  ;;  %v3552_v17 = vmul.f32 %v9026_v40, %v3435_v54  ;;  %v3893_v18 = vmul.f32 %v9055_v42, %v3776_v56  ;;  %v1960_v39 = vadd.f32 %v9062_v3, %v9083_v30  ;;  %1074 = vst.msk [vmem:[#allocation2 + $0x1c1] sm:$0xff] %vm226_vm0, %v723_v24  ;;  %v1396_v54 = vld [vmem:[#allocation2 + $0x109] sm:$0xff]  ;;  %v1166_v56 = vld [vmem:[#allocation2 + $0x100] sm:$0xff] }
 0x109   : > { %v2641_v21 = vadd.f32 %v2529_v38, %v2300_v6  ;;  %v1281_v43 = vmul.f32 %v8889_v44, %v1164_v19  ;;  %v1282_v45 = vmul.f32 %v8889_v44, %v1165_v29  ;;  %v1510_v36 = vmul.f32 %v8883_v33, %v1393_v4 }
 0x10a   : > { %v4002_v52 = vadd.f32 %v3890_v31, %v3661_v51  ;;  %v2980_v1 = vadd.f32 %v9066_v15, %v9098_v32  ;;  %v1850_v25 = vmul.f32 %v8907_v14, %v1733_v10  ;;  %v2189_v3 = vmul.f32 %v8969_v34, %v1164_v19  ;;  %v738_v47 = vpop.permute.xlu1 %737  ;;  %v733_v26 = vpop.permute.xlu0 %732 }
 0x10b   : > { %v3662_v30 = vadd.f32 %v3550_v27, %v3321_v8  ;;  %v1622_v60 = vadd.f32 %v1510_v36, %v1281_v43  ;;  %v1851_v57 = vmul.f32 %v8907_v14, %v1734_v12  ;;  %v2190_v38 = vmul.f32 %v8969_v34, %v2072_v35  ;;  %1077 = vst.msk [vmem:[#allocation2 + $0x1d9] sm:$0xf] %vm1024_vm2, %v738_v47 }
 0x10c   : > { %v4111_v58 = vmax.f32 %v9079_v37, %v4002_v52  ;;  %v2301_v11 = vadd.f32 %v2189_v3, %v9090_v23  ;;  %v2530_v55 = vmul.f32 %v8941_v0, %v1393_v4  ;;  %v2870_v15 = vmul.f32 %v8982_v20, %v1733_v10  ;;  %1076 = vst.msk [vmem:[#allocation2 + $0x1d1] sm:$0xff] %vm226_vm0, %v733_v26 }
 0x10d   : > { %v9161_v32 = vadd.f32 %v1511_v50, %v1282_v45  ;;  %v1962_v27 = vadd.f32 %v1850_v25, %v1621_v28  ;;  %v2302_v41 = vadd.f32 %v2190_v38, %v1960_v39  ;;  %v3210_v6 = vmul.f32 %v9040_v62, %v1164_v19  ;;  %v1167_v50 = vld [vmem:[#allocation2 + $0x108] sm:$0xff] }
 0x10e   : > { %4116 = vst.msk [vmem:[#allocation3 + $0x40] sm:$0xff] %vm226_vm0, %v4111_v58  ;;  %v9165_v5 = vadd.f32 %v1851_v57, %v1622_v60  ;;  %v2642_v37 = vadd.f32 %v2530_v55, %v2301_v11  ;;  %v2871_v23 = vmul.f32 %v8982_v20, %v1734_v12  ;;  %v3211_v53 = vmul.f32 %v9040_v62, %v3093_v63  ;;  %v1395_v19 = vld [vmem:[#allocation2 + $0x101] sm:$0xff]  ;;  %v1739_v11 = vld [vmem:[#allocation2 + $0x11a] sm:$0xf] }
 0x10f   : > { %v2982_v2 = vadd.f32 %v2870_v15, %v2641_v21  ;;  %v3322_v8 = vadd.f32 %v3210_v6, %v9100_v49  ;;  %v3551_v31 = vmul.f32 %v9026_v40, %v1393_v4  ;;  %v3891_v28 = vmul.f32 %v9055_v42, %v1733_v10  ;;  %v1736_v49 = vld [vmem:[#allocation2 + $0x102] sm:$0xff]  ;;  %v2418_v55 = vld [vmem:[#allocation2 + $0x119] sm:$0xf] }
 0x110   : > { %v9172_v29 = vadd.f32 %v2531_v9, %v2302_v41  ;;  %v9174_v61 = vadd.f32 %v2871_v23, %v2642_v37  ;;  %v3323_v24 = vadd.f32 %v3211_v53, %v2980_v1  ;;  %v3892_v51 = vmul.f32 %v9055_v42, %v1734_v12  ;;  %v2759_v15 = vld [vmem:[#allocation2 + $0x11a] sm:$0xf] }
 0x111   : > { %v3663_v39 = vadd.f32 %v3551_v31, %v3322_v8  ;;  %v4003_v35 = vadd.f32 %v3891_v28, %v3662_v30  ;;  %v1513_v43 = vmul.f32 %v8883_v33, %v1396_v54  ;;  %v1283_v21 = vmul.f32 %v8889_v44, %v1166_v56  ;;  %v3439_v37 = vld [vmem:[#allocation2 + $0x119] sm:$0xf]  ;;  %v1397_v31 = vld [vmem:[#allocation2 + $0x111] sm:$0xff] }
 0x112   : > { %v3664_v45 = vadd.f32 %v3552_v17, %v3323_v24  ;;  %v2533_v4 = vmul.f32 %v8941_v0, %v1396_v54  ;;  %v1284_v10 = vmul.f32 %v8889_v44, %v1167_v50  ;;  %v1512_v9 = vmul.f32 %v8883_v33, %v1395_v19  ;;  %v3780_v23 = vld [vmem:[#allocation2 + $0x11a] sm:$0xf] }
 0x113   : > { %v4004_v36 = vadd.f32 %v3892_v51, %v3663_v39  ;;  %v4112_v52 = vmax.f32 %v9103_v7, %v4003_v35  ;;  %v2191_v1 = vmul.f32 %v8969_v34, %v1166_v56  ;;  %v2192_v12 = vmul.f32 %v8969_v34, %v1167_v50  ;;  %v1398_v7 = vld [vmem:[#allocation2 + $0x119] sm:$0xf]  ;;  %v1737_v51 = vld [vmem:[#allocation2 + $0x10a] sm:$0xff] }
 0x114   : > { %v4005_v25 = vadd.f32 %v3893_v18, %v3664_v45  ;;  %v3554_v3 = vmul.f32 %v9026_v40, %v1396_v54  ;;  %v1624_v30 = vadd.f32 %v1512_v9, %v1283_v21  ;;  %v1853_v60 = vmul.f32 %v8907_v14, %v1736_v49  ;;  %v1169_v8 = vld [vmem:[#allocation2 + $0x118] sm:$0xf] }
 0x115   : > { %v4113_v17 = vmax.f32 %v9113_v22, %v4004_v36  ;;  %4117 = vst.msk [vmem:[#allocation3 + $0x48] sm:$0xff] %vm226_vm0, %v4112_v52  ;;  %v1625_v57 = vadd.f32 %v1513_v43, %v1284_v10  ;;  %v2303_v38 = vadd.f32 %v2191_v1, %v9125_v16  ;;  %v2532_v63 = vmul.f32 %v8941_v0, %v1395_v19  ;;  %v1738_v43 = vld [vmem:[#allocation2 + $0x112] sm:$0xff] }
 0x116   : > { %v4114_v47 = vmax.f32 %v9118_v48, %v4005_v25  ;;  %v2304_v26 = vadd.f32 %v2192_v12, %v1962_v27  ;;  %v3212_v18 = vmul.f32 %v9040_v62, %v1166_v56  ;;  %v3213_v58 = vmul.f32 %v9040_v62, %v1167_v50  ;;  %v1168_v56 = vld [vmem:[#allocation2 + $0x110] sm:$0xff]  ;;  %v2076_v21 = vld [vmem:[#allocation2 + $0x118] sm:$0xf] }
 0x117   : > { %4118 = vst.msk [vmem:[#allocation3 + $0x50] sm:$0xff] %vm226_vm0, %v4113_v17  ;;  %v9195_v22 = vadd.f32 %v1853_v60, %v1624_v30  ;;  %v2644_v41 = vadd.f32 %v2532_v63, %v2303_v38  ;;  %v2873_v16 = vmul.f32 %v8982_v20, %v1736_v49  ;;  %v3553_v6 = vmul.f32 %v9026_v40, %v1395_v19  ;;  %v3097_v25 = vld [vmem:[#allocation2 + $0x118] sm:$0xf] }
 0x118   : > { %4119 = vst.msk [vmem:[#allocation3 + $0x58] sm:$0xf] %vm1024_vm2, %v4114_v47  ;;  %v3324_v48 = vadd.f32 %v3212_v18, %v9131_v46  ;;  %v3325_v27 = vadd.f32 %v3213_v58, %v2982_v2  ;;  %v3894_v53 = vmul.f32 %v9055_v42, %v1736_v49  ;;  %v1515_v54 = vmul.f32 %v8883_v33, %v1398_v7  ;;  %v4221_v18 = vld [vmem:[#allocation3 + $0x10] ss:$2 sm:$0x3f] }
 0x119   : > { %v9203_v28 = vadd.f32 %v2873_v16, %v2644_v41  ;;  %v9206_v50 = vmul.f32 %v8907_v14, %v1739_v11  ;;  %v2535_v19 = vmul.f32 %v8941_v0, %v2418_v55  ;;  %v9210_v24 = vmul.f32 %v8982_v20, %v2759_v15  ;;  %v4277_v58 = vld [vmem:[#allocation3 + $0x11] ss:$2 sm:$0x3f] }
 0x11a   : > { %v3665_v46 = vadd.f32 %v3553_v6, %v3324_v48  ;;  %v3556_v2 = vmul.f32 %v9026_v40, %v3439_v37  ;;  %v9214_v39 = vmul.f32 %v9055_v42, %v3780_v23  ;;  %v1964_v35 = vadd.f32 %v9134_v13, %v9161_v32  ;;  %v9249_v37 = vld [vmem:[%s11455_s2] ss:$0 sm:$0xff]  ;;  %v1400_v23 = vld [vmem:[#allocation2 + $0x129] sm:$0xff] }
 0x11b   : > { %v2645_v49 = vadd.f32 %v2533_v4, %v2304_v26  ;;  %v1285_v45 = vmul.f32 %v8889_v44, %v1168_v56  ;;  %v1286_v10 = vmul.f32 %v8889_v44, %v1169_v8  ;;  %v1514_v9 = vmul.f32 %v8883_v33, %v1397_v31  ;;  %v1170_v48 = vld [vmem:[#allocation2 + $0x120] sm:$0xff] }
 0x11c   : > { %v2984_v36 = vadd.f32 %v9138_v59, %v9172_v29  ;;  %v3666_v52 = vadd.f32 %v3554_v3, %v3325_v27  ;;  %v1854_v1 = vmul.f32 %v8907_v14, %v1737_v51  ;;  %v2193_v12 = vmul.f32 %v8969_v34, %v1168_v56  ;;  %v4219_v29 = vld [vmem:[#allocation3] ss:$2 sm:$0xff]  ;;  %v4275_v3 = vld [vmem:[#allocation3 + $0x1] ss:$2 sm:$0xff]  ;;  %v748_v27 = vpop.permute.xlu1 %747 }
 0x11d   : > { %v9225_v30 = vadd.f32 %v3894_v53, %v3665_v46  ;;  %v1626_v13 = vadd.f32 %v1514_v9, %v1285_v45  ;;  %v1855_v32 = vmul.f32 %v8907_v14, %v1738_v43  ;;  %v2194_v4 = vmul.f32 %v8969_v34, %v2076_v21  ;;  %v743_v53 = vpop.permute.xlu0 %742  ;;  %v1171_v46 = vld [vmem:[#allocation2 + $0x128] sm:$0xff]  ;;  %1079 = vst.msk [vmem:[#allocation2 + $0x1e9] sm:$0xff] %vm226_vm0, %v748_v27 }
 0x11e   : > { %v9229_v60 = vadd.f32 %v1515_v54, %v1286_v10  ;;  %v2305_v17 = vadd.f32 %v2193_v12, %v9165_v5  ;;  %v2534_v38 = vmul.f32 %v8941_v0, %v1397_v31  ;;  %v2874_v59 = vmul.f32 %v8982_v20, %v1737_v51  ;;  %1078 = vst.msk [vmem:[#allocation2 + $0x1e1] sm:$0xff] %vm226_vm0, %v743_v53  ;;  %v1740_v9 = vld [vmem:[#allocation2 + $0x122] sm:$0xff] }
 0x11f   : > { %v9234_v63 = vadd.f32 %v1854_v1, %v1625_v57  ;;  %v2306_v7 = vadd.f32 %v2194_v4, %v1964_v35  ;;  %v3214_v47 = vmul.f32 %v9040_v62, %v1168_v56  ;;  %v3215_v26 = vmul.f32 %v9040_v62, %v3097_v25 }
 0x120   : > { %v9238_v11 = vadd.f32 %v1855_v32, %v1626_v13  ;;  %v2646_v55 = vadd.f32 %v2534_v38, %v2305_v17  ;;  %v2875_v5 = vmul.f32 %v8982_v20, %v1738_v43  ;;  %v3895_v15 = vmul.f32 %v9055_v42, %v1737_v51 }
 0x121   : > { %v9242_v41 = vadd.f32 %v2874_v59, %v2645_v49  ;;  %v3326_v16 = vadd.f32 %v3214_v47, %v9174_v61  ;;  %v3327_v57 = vadd.f32 %v3215_v26, %v2984_v36  ;;  %v3555_v6 = vmul.f32 %v9026_v40, %v1397_v31  ;;  %v1399_v61 = vld [vmem:[#allocation2 + $0x121] sm:$0xff]  ;;  %v753_v25 = vpop.permute.xlu0 %752 }
 0x122   : > { %v9251_v54 = vadd.f32 %v2535_v19, %v2306_v7  ;;  %v3896_v56 = vmul.f32 %v9055_v42, %v1738_v43  ;;  %v4330_v8 = vmax.f32 %v4219_v29, %v4275_v3  ;;  %v4331_v51 = vmax.f32 %v4221_v18, %v4277_v58  ;;  %1080 = vst.msk [vmem:[#allocation2 + $0x1f1] sm:$0xff] %vm226_vm0, %v753_v25  ;;  %v1402_v58 = vld [vmem:[#allocation2 + $0x139] sm:$0xf] }
 0x123   : > { %v9256_v31 = vadd.f32 %v2875_v5, %v2646_v55  ;;  %v3667_v35 = vadd.f32 %v3555_v6, %v3326_v16  ;;  %v3668_v21 = vadd.f32 %v3556_v2, %v3327_v57  ;;  %v9258_v49 = vadd.f32 %v3895_v15, %v3666_v52  ;;  %v758_v52 = vpop.permute.xlu1 %757  ;;  %v2422_v55 = vld [vmem:[#allocation2 + $0x139] sm:$0xf] }
 0x124   : > { %v4365_v45 = vadd.f32 %v9249_v37, %v4330_v8  ;;  %v4366_v19 = vadd.f32 %v9249_v37, %v4331_v51  ;;  %v1517_v43 = vmul.f32 %v8883_v33, %v1400_v23  ;;  %v1287_v10 = vmul.f32 %v8889_v44, %v1170_v48  ;;  %1081 = vst.msk [vmem:[#allocation2 + $0x1f9] sm:$0xf] %vm1024_vm2, %v758_v52  ;;  %v2763_v6 = vld [vmem:[#allocation2 + $0x13a] sm:$0xf]  ;;  %v1172_v8 = vld [vmem:[#allocation2 + $0x130] sm:$0xff] }
 0x125   : > { %v2537_v36 = vmul.f32 %v8941_v0, %v1400_v23  ;;  %v9266_v1 = vmul.f32 %v9026_v40, %v1400_v23  ;;  %v1288_v12 = vmul.f32 %v8889_v44, %v1171_v46  ;;  %v1516_v2 = vmul.f32 %v8883_v33, %v1399_v61  ;;  %v3443_v23 = vld [vmem:[#allocation2 + $0x139] sm:$0xf] }
 0x126   : > { %v9270_v13 = vadd.f32 %v3896_v56, %v3667_v35  ;;  %v4393_v32 = vmax.f32 %v4365_v45, 0.0  ;;  %v4394_v4 = vmax.f32 %v4366_v19, 0.0  ;;  %v2195_v17 = vmul.f32 %v8969_v34, %v1170_v48  ;;  %v3784_v56 = vld [vmem:[#allocation2 + $0x13a] sm:$0xf]  ;;  %v1401_v45 = vld [vmem:[#allocation2 + $0x131] sm:$0xff] }
 0x127   : > { %v9276_v38 = vadd.f32 %v9214_v39, %v3668_v21  ;;  %v1628_v59 = vadd.f32 %v1516_v2, %v1287_v10  ;;  %v1857_v29 = vmul.f32 %v8907_v14, %v1740_v9  ;;  %v2196_v3 = vmul.f32 %v8969_v34, %v1171_v46  ;;  %v1743_v39 = vld [vmem:[#allocation2 + $0x13a] sm:$0xf]  ;;  %v1741_v19 = vld [vmem:[#allocation2 + $0x12a] sm:$0xff] }
 0x128   : > { %4455 = vst.msk [vmem:[#allocation4 + $0x11] sm:$0xff] %vm226_vm0, %v4393_v32  ;;  %v2307_v7 = vadd.f32 %v2195_v17, %v9195_v22  ;;  %v2536_v47 = vmul.f32 %v8941_v0, %v1399_v61  ;;  %v3216_v26 = vmul.f32 %v9040_v62, %v1170_v48  ;;  %v3217_v18 = vmul.f32 %v9040_v62, %v1171_v46  ;;  %v1173_v21 = vld [vmem:[#allocation2 + $0x138] sm:$0xf] }
 0x129   : > { %4456 = vst.msk [vmem:[#allocation4 + $0x19] sm:$0x3f] %vm230_vm1, %v4394_v4  ;;  %v1629_v5 = vadd.f32 %v1517_v43, %v1288_v12  ;;  %v9286_v15 = vadd.f32 %v1857_v29, %v1628_v59  ;;  %v2308_v16 = vadd.f32 %v2196_v3, %v9234_v63  ;;  %v2877_v57 = vmul.f32 %v8982_v20, %v1740_v9  ;;  %v763_v12 = vpop.permute.xlu0 %762  ;;  %v1742_v4 = vld [vmem:[#allocation2 + $0x132] sm:$0xff] }
 0x12a   : > { %v2648_v27 = vadd.f32 %v2536_v47, %v2307_v7  ;;  %v3328_v22 = vadd.f32 %v3216_v26, %v9203_v28  ;;  %v3557_v53 = vmul.f32 %v9026_v40, %v1399_v61  ;;  %v3898_v48 = vmul.f32 %v9055_v42, %v1740_v9  ;;  %v768_v9 = vpop.permute.xlu1 %767  ;;  %1082 = vst.msk [vmem:[#allocation2 + $0x201] sm:$0xff] %vm226_vm0, %v763_v12 }
 0x12b   : > { %v3329_v51 = vadd.f32 %v3217_v18, %v9242_v41  ;;  %v1519_v46 = vmul.f32 %v8883_v33, %v1402_v58  ;;  %v9296_v35 = vmul.f32 %v8907_v14, %v1743_v39  ;;  %v2539_v63 = vmul.f32 %v8941_v0, %v2422_v55  ;;  %v2080_v41 = vld [vmem:[#allocation2 + $0x138] sm:$0xf]  ;;  %1083 = vst.msk [vmem:[#allocation2 + $0x209] sm:$0xff] %vm226_vm0, %v768_v9 }
 0x12c   : > { %v9299_v43 = vadd.f32 %v2877_v57, %v2648_v27  ;;  %v3669_v28 = vadd.f32 %v3557_v53, %v3328_v22  ;;  %v9302_v61 = vmul.f32 %v8982_v20, %v2763_v6  ;;  %v9305_v10 = vmul.f32 %v9026_v40, %v3443_v23  ;;  %v1404_v53 = vld [vmem:[#allocation2 + $0x149] sm:$0xff] }
 0x12d   : > { %v9308_v2 = vmul.f32 %v9055_v42, %v3784_v56  ;;  %v1968_v52 = vadd.f32 %v9206_v50, %v9229_v60  ;;  %v2649_v25 = vadd.f32 %v2537_v36, %v2308_v16  ;;  %v1289_v32 = vmul.f32 %v8889_v44, %v1172_v8  ;;  %v773_v16 = vpop.permute.xlu0 %772 }
 0x12e   : > { %v4010_v17 = vadd.f32 %v3898_v48, %v3669_v28  ;;  %v1290_v59 = vmul.f32 %v8889_v44, %v1173_v21  ;;  %v1518_v29 = vmul.f32 %v8883_v33, %v1401_v45  ;;  %v1858_v3 = vmul.f32 %v8907_v14, %v1741_v19  ;;  %v3101_v33 = vld [vmem:[#allocation2 + $0x138] sm:$0xf]  ;;  %v778_v55 = vpop.permute.xlu1 %777  ;;  %1084 = vst.msk [vmem:[#allocation2 + $0x211] sm:$0xff] %vm226_vm0, %v773_v16  ;;  %v1174_v48 = vld [vmem:[#allocation2 + $0x140] sm:$0xff] }
 0x12f   : > { %v4531_v7 = vld [vmem:[#allocation4 + $0x11] sm:$0xff]  ;;  %v2988_v50 = vadd.f32 %v9210_v24, %v9251_v54  ;;  %v3670_v60 = vadd.f32 %v9266_v1, %v3329_v51  ;;  %v2197_v36 = vmul.f32 %v8969_v34, %v1172_v8  ;;  %v2198_v26 = vmul.f32 %v8969_v34, %v2080_v41  ;;  %1085 = vst.msk [vmem:[#allocation2 + $0x219] sm:$0xf] %vm1024_vm2, %v778_v55  ;;  %v1403_v28 = vld [vmem:[#allocation2 + $0x141] sm:$0xff] }
 0x130   : > { %v4532_v47 = vld [vmem:[#allocation4 + $0x19] sm:$0xff]  ;;  %v4120_v58 = vmax.f32 %v9225_v30, %v4010_v17  ;;  %v1630_v39 = vadd.f32 %v1518_v29, %v1289_v32  ;;  %v1859_v44 = vmul.f32 %v8907_v14, %v1742_v4  ;;  %v2538_v24 = vmul.f32 %v8941_v0, %v1401_v45 }
 0x131   : > { %v4558_v18 = vpack.c.bf16 %v4532_v47, %v4531_v7  ;;  %v2309_v57 = vadd.f32 %v2197_v36, %v9238_v11  ;;  %v2310_v6 = vadd.f32 %v2198_v26, %v1968_v52  ;;  %v2878_v54 = vmul.f32 %v8982_v20, %v1741_v19 }
 0x132   : > { %4125 = vst.msk [vmem:[#allocation3 + $0x60] sm:$0xff] %vm226_vm0, %v4120_v58  ;;  %v9333_v14 = vadd.f32 %v1519_v46, %v1290_v59  ;;  %v1970_v30 = vadd.f32 %v1858_v3, %v1629_v5  ;;  %v3218_v11 = vmul.f32 %v9040_v62, %v1172_v8  ;;  %v9336_v1 = vadd.f32 %v1859_v44, %v1630_v39  ;;  %v1175_v5 = vld [vmem:[#allocation2 + $0x148] sm:$0xff] }
 0x133   : > { %7419 = vmatmul.mubr.msk.bf16.vlgmr.msra.gmra.mrb[0].mxu1 %vm226_vm0, %v4558_v18  ;;  %7546 = vmatprep.mubr.msk.bf16.mxu0 %vm226_vm0, %v4558_v18  ;;  %v2650_v23 = vadd.f32 %v2538_v24, %v2309_v57  ;;  %v2879_v27 = vmul.f32 %v8982_v20, %v1742_v4  ;;  %v3219_v22 = vmul.f32 %v9040_v62, %v3101_v33  ;;  %v1747_v57 = vld [vmem:[#allocation2 + $0x15a] sm:$0xf] }
 0x134   : > { %v9340_v56 = vadd.f32 %v2539_v63, %v2310_v6  ;;  %v3330_v51 = vadd.f32 %v3218_v11, %v9256_v31  ;;  %v3559_v21 = vmul.f32 %v9026_v40, %v1401_v45  ;;  %v3899_v46 = vmul.f32 %v9055_v42, %v1741_v19  ;;  %v9351_v63 = vld [vmem:[%s11454_s1 + $0x1] ss:$0 sm:$0xff]  ;;  %v9357_v45 = vld [vmem:[%s11454_s1] ss:$0 sm:$0xff]  ;;  %v2426_v6 = vld [vmem:[#allocation2 + $0x159] sm:$0xf] }
 0x135   : > { %v2990_v8 = vadd.f32 %v2878_v54, %v2649_v25  ;;  %v9345_v41 = vadd.f32 %v2879_v27, %v2650_v23  ;;  %v3331_v9 = vadd.f32 %v3219_v22, %v2988_v50  ;;  %v3900_v12 = vmul.f32 %v9055_v42, %v1742_v4  ;;  %v1744_v25 = vld [vmem:[#allocation2 + $0x142] sm:$0xff]  ;;  %v2767_v24 = vld [vmem:[#allocation2 + $0x15a] sm:$0xf] }
 0x136   : > { %v3671_v52 = vadd.f32 %v3559_v21, %v3330_v51  ;;  %v4011_v32 = vadd.f32 %v3899_v46, %v3670_v60  ;;  %v1521_v31 = vmul.f32 %v9351_v63, %v1404_v53  ;;  %v1291_v19 = vmul.f32 %v9357_v45, %v1174_v48  ;;  %v3447_v11 = vld [vmem:[#allocation2 + $0x159] sm:$0xf]  ;;  %v1405_v51 = vld [vmem:[#allocation2 + $0x151] sm:$0xff] }
 0x137   : > { %v3672_v17 = vadd.f32 %v9305_v10, %v3331_v9  ;;  %v2541_v4 = vmul.f32 %v8941_v0, %v1404_v53  ;;  %v1292_v59 = vmul.f32 %v9357_v45, %v1175_v5  ;;  %v1520_v29 = vmul.f32 %v9351_v63, %v1403_v28  ;;  %v9372_v10 = vld [vmem:[%s11454_s1 + $0x2] ss:$0 sm:$0xff]  ;;  %v3788_v23 = vld [vmem:[#allocation2 + $0x15a] sm:$0xf] }
 0x138   : > { %v4012_v3 = vadd.f32 %v3900_v12, %v3671_v52  ;;  %v4121_v7 = vmax.f32 %v9258_v49, %v4011_v32  ;;  %v2199_v47 = vmul.f32 %v8969_v34, %v1174_v48  ;;  %v2200_v50 = vmul.f32 %v8969_v34, %v1175_v5 }
 0x139   : > { %v4013_v60 = vadd.f32 %v9308_v2, %v3672_v17  ;;  %v3562_v36 = vmul.f32 %v9026_v40, %v1404_v53  ;;  %v1632_v26 = vadd.f32 %v1520_v29, %v1291_v19  ;;  %v1861_v18 = vmul.f32 %v9372_v10, %v1744_v25  ;;  %v1406_v2 = vld [vmem:[#allocation2 + $0x159] sm:$0xf]  ;;  %v1176_v53 = vld [vmem:[#allocation2 + $0x150] sm:$0xff] }
 0x13a   : > { %v4122_v58 = vmax.f32 %v9270_v13, %v4012_v3  ;;  %4126 = vst.msk [vmem:[#allocation3 + $0x68] sm:$0xff] %vm226_vm0, %v4121_v7  ;;  %v1633_v49 = vadd.f32 %v1521_v31, %v1292_v59  ;;  %v2311_v39 = vadd.f32 %v2199_v47, %v9286_v15  ;;  %v2540_v34 = vmul.f32 %v8941_v0, %v1403_v28  ;;  %v1746_v31 = vld [vmem:[#allocation2 + $0x152] sm:$0xff]  ;;  %v9420_v47 = vld [vmem:[%s11454_s1 + $0x4] ss:$0 sm:$0xff] }
 0x13b   : > { %v4123_v44 = vmax.f32 %v9276_v38, %v4013_v60  ;;  %v2312_v33 = vadd.f32 %v2200_v50, %v1970_v30  ;;  %v3220_v55 = vmul.f32 %v9040_v62, %v1174_v48  ;;  %v3221_v16 = vmul.f32 %v9040_v62, %v1175_v5  ;;  %v1177_v48 = vld [vmem:[#allocation2 + $0x158] sm:$0xf]  ;;  %v9399_v5 = vld [vmem:[%s11454_s1 + $0x5] ss:$0 sm:$0xff] }
 0x13c   : > { %4127 = vst.msk [vmem:[#allocation3 + $0x70] sm:$0xff] %vm226_vm0, %v4122_v58  ;;  %v9383_v13 = vadd.f32 %v1861_v18, %v1632_v26  ;;  %v2652_v54 = vadd.f32 %v2540_v34, %v2311_v39  ;;  %v2881_v15 = vmul.f32 %v8982_v20, %v1744_v25  ;;  %v3561_v0 = vmul.f32 %v9026_v40, %v1403_v28  ;;  %v2084_v19 = vld [vmem:[#allocation2 + $0x158] sm:$0xf]  ;;  %v4223_v39 = vld [vmem:[#allocation3 + $0x20] ss:$2 sm:$0xff] }
 0x13d   : > { %4128 = vst.msk [vmem:[#allocation3 + $0x78] sm:$0xf] %vm1024_vm2, %v4123_v44  ;;  %v3332_v38 = vadd.f32 %v3220_v55, %v9299_v43  ;;  %v3333_v30 = vadd.f32 %v3221_v16, %v2990_v8  ;;  %v3902_v27 = vmul.f32 %v9055_v42, %v1744_v25  ;;  %v1523_v22 = vmul.f32 %v9351_v63, %v1406_v2  ;;  %v1745_v8 = vld [vmem:[#allocation2 + $0x14a] sm:$0xff] }
 0x13e   : > { %v9391_v21 = vadd.f32 %v2881_v15, %v2652_v54  ;;  %v9394_v46 = vmul.f32 %v9372_v10, %v1747_v57  ;;  %v2543_v43 = vmul.f32 %v9399_v5, %v2426_v6  ;;  %v9403_v28 = vmul.f32 %v8982_v20, %v2767_v24  ;;  %v4279_v34 = vld [vmem:[#allocation3 + $0x21] ss:$2 sm:$0xff]  ;;  %v4225_v16 = vld [vmem:[#allocation3 + $0x30] ss:$2 sm:$0x3f] }
 0x13f   : > { %v3673_v9 = vadd.f32 %v3561_v0, %v3332_v38  ;;  %v3564_v12 = vmul.f32 %v9026_v40, %v3447_v11  ;;  %v9407_v52 = vmul.f32 %v9055_v42, %v3788_v23  ;;  %v1972_v32 = vadd.f32 %v9296_v35, %v9333_v14  ;;  %v3105_v14 = vld [vmem:[#allocation2 + $0x158] sm:$0xf]  ;;  %v1408_v23 = vld [vmem:[#allocation2 + $0x169] sm:$0xff]  ;;  %v1178_v38 = vld [vmem:[#allocation2 + $0x160] sm:$0xff] }
 0x140   : > { %v2653_v25 = vadd.f32 %v2541_v4, %v2312_v33  ;;  %v1293_v17 = vmul.f32 %v9357_v45, %v1176_v53  ;;  %v1294_v59 = vmul.f32 %v9357_v45, %v1177_v48  ;;  %v1522_v20 = vmul.f32 %v9351_v63, %v1405_v51 }
 0x141   : > { %v2992_v29 = vadd.f32 %v9302_v61, %v9340_v56  ;;  %v3674_v3 = vadd.f32 %v3562_v36, %v3333_v30  ;;  %v1862_v7 = vmul.f32 %v9372_v10, %v1745_v8  ;;  %v2201_v35 = vmul.f32 %v9420_v47, %v1176_v53  ;;  %v9434_v36 = vld [vmem:[%s11454_s1 + $0x6] ss:$0 sm:$0xff]  ;;  %v788_v30 = vpop.permute.xlu1 %787 }
 0x142   : > { %v9423_v4 = vadd.f32 %v3902_v27, %v3673_v9  ;;  %v1634_v50 = vadd.f32 %v1522_v20, %v1293_v17  ;;  %v1863_v60 = vmul.f32 %v9372_v10, %v1746_v31  ;;  %v2202_v26 = vmul.f32 %v9420_v47, %v2084_v19  ;;  %v1179_v9 = vld [vmem:[#allocation2 + $0x168] sm:$0xff]  ;;  %1087 = vst.msk [vmem:[#allocation2 + $0x229] sm:$0xff] %vm226_vm0, %v788_v30 }
 0x143   : > { %v9427_v18 = vadd.f32 %v1523_v22, %v1294_v59  ;;  %v2313_v61 = vadd.f32 %v2201_v35, %v9336_v1  ;;  %v2542_v56 = vmul.f32 %v9399_v5, %v1405_v51  ;;  %v2882_v58 = vmul.f32 %v9434_v36, %v1745_v8  ;;  %v4281_v1 = vld [vmem:[#allocation3 + $0x31] ss:$2 sm:$0x3f]  ;;  %v1748_v17 = vld [vmem:[#allocation2 + $0x162] sm:$0xff]  ;;  %v9503_v30 = vld [vmem:[%s11454_s1 + $0xa] ss:$0 sm:$0xff] }
 0x144   : > { %v9437_v2 = vadd.f32 %v1862_v7, %v1633_v49  ;;  %v2314_v44 = vadd.f32 %v2202_v26, %v1972_v32  ;;  %v3222_v33 = vmul.f32 %v9040_v62, %v1176_v53  ;;  %v3223_v55 = vmul.f32 %v9040_v62, %v3105_v14  ;;  %v783_v62 = vpop.permute.xlu0 %782  ;;  %v1407_v32 = vld [vmem:[#allocation2 + $0x161] sm:$0xff] }
 0x145   : > { %v9441_v57 = vadd.f32 %v1863_v60, %v1634_v50  ;;  %v2654_v6 = vadd.f32 %v2542_v56, %v2313_v61  ;;  %v2883_v24 = vmul.f32 %v9434_v36, %v1746_v31  ;;  %v3903_v54 = vmul.f32 %v9055_v42, %v1745_v8  ;;  %1086 = vst.msk [vmem:[#allocation2 + $0x221] sm:$0xff] %vm226_vm0, %v783_v62  ;;  %v3792_v62 = vld [vmem:[#allocation2 + $0x17a] sm:$0xf] }
 0x146   : > { %v9445_v15 = vadd.f32 %v2882_v58, %v2653_v25  ;;  %v3334_v0 = vadd.f32 %v3222_v33, %v9345_v41  ;;  %v3335_v49 = vadd.f32 %v3223_v55, %v2992_v29  ;;  %v3563_v11 = vmul.f32 %v9026_v40, %v1405_v51  ;;  %v1410_v33 = vld [vmem:[#allocation2 + $0x179] sm:$0xf] }
 0x147   : > { %v9449_v27 = vadd.f32 %v2543_v43, %v2314_v44  ;;  %v3904_v22 = vmul.f32 %v9055_v42, %v1746_v31  ;;  %v4332_v53 = vmax.f32 %v4223_v39, %v4279_v34  ;;  %v4333_v48 = vmax.f32 %v4225_v16, %v4281_v1  ;;  %v9485_v34 = vld [vmem:[%s11454_s1 + $0x8] ss:$0 sm:$0xff]  ;;  %v1751_v55 = vld [vmem:[#allocation2 + $0x17a] sm:$0xf] }
 0x148   : > { %v9454_v41 = vadd.f32 %v2883_v24, %v2654_v6  ;;  %v3675_v8 = vadd.f32 %v3563_v11, %v3334_v0  ;;  %v3676_v51 = vadd.f32 %v3564_v12, %v3335_v49  ;;  %v9456_v19 = vadd.f32 %v3903_v54, %v3674_v3  ;;  %v798_v3 = vpop.permute.xlu1 %797  ;;  %v793_v7 = vpop.permute.xlu0 %792  ;;  %v2430_v16 = vld [vmem:[#allocation2 + $0x179] sm:$0xf] }
 0x149   : > { %v4367_v25 = vadd.f32 %v9249_v37, %v4332_v53  ;;  %v4368_v43 = vadd.f32 %v9249_v37, %v4333_v48  ;;  %v1525_v42 = vmul.f32 %v9351_v63, %v1408_v23  ;;  %v1295_v31 = vmul.f32 %v9357_v45, %v1178_v38  ;;  %1089 = vst.msk [vmem:[#allocation2 + $0x239] sm:$0xf] %vm1024_vm2, %v798_v3  ;;  %v2771_v54 = vld [vmem:[#allocation2 + $0x17a] sm:$0xf] }
 0x14a   : > { %v2545_v59 = vmul.f32 %v9399_v5, %v1408_v23  ;;  %v9464_v20 = vmul.f32 %v9026_v40, %v1408_v23  ;;  %v1296_v29 = vmul.f32 %v9357_v45, %v1179_v9  ;;  %v1524_v12 = vmul.f32 %v9351_v63, %v1407_v32  ;;  %1088 = vst.msk [vmem:[#allocation2 + $0x231] sm:$0xff] %vm226_vm0, %v793_v7  ;;  %v3451_v0 = vld [vmem:[#allocation2 + $0x179] sm:$0xf]  ;;  %v9497_v23 = vld [vmem:[%s11454_s1 + $0x9] ss:$0 sm:$0xff] }
 0x14b   : > { %v9468_v35 = vadd.f32 %v3904_v22, %v3675_v8  ;;  %v4395_v14 = vmax.f32 %v4367_v25, 0.0  ;;  %v4396_v50 = vmax.f32 %v4368_v43, 0.0  ;;  %v2203_v60 = vmul.f32 %v9420_v47, %v1178_v38  ;;  %v1180_v22 = vld [vmem:[#allocation2 + $0x170] sm:$0xff]  ;;  %v1181_v8 = vld [vmem:[#allocation2 + $0x178] sm:$0xf] }
 0x14c   : > { %v9474_v26 = vadd.f32 %v9407_v52, %v3676_v51  ;;  %v1636_v40 = vadd.f32 %v1524_v12, %v1295_v31  ;;  %v1865_v61 = vmul.f32 %v9372_v10, %v1748_v17  ;;  %v2204_v56 = vmul.f32 %v9420_v47, %v1179_v9  ;;  %v1749_v51 = vld [vmem:[#allocation2 + $0x16a] sm:$0xff] }
 0x14d   : > { %4457 = vst.msk [vmem:[#allocation4 + $0x21] sm:$0xff] %vm226_vm0, %v4395_v14  ;;  %v2315_v58 = vadd.f32 %v2203_v60, %v9383_v13  ;;  %v2544_v39 = vmul.f32 %v9399_v5, %v1407_v32  ;;  %v3224_v52 = vmul.f32 %v9485_v34, %v1178_v38  ;;  %v3225_v44 = vmul.f32 %v9485_v34, %v1179_v9 }
 0x14e   : > { %4458 = vst.msk [vmem:[#allocation4 + $0x29] sm:$0x3f] %vm230_vm1, %v4396_v50  ;;  %v1637_v1 = vadd.f32 %v1525_v42, %v1296_v29  ;;  %v9489_v6 = vadd.f32 %v1865_v61, %v1636_v40  ;;  %v2316_v24 = vadd.f32 %v2204_v56, %v9437_v2  ;;  %v2885_v13 = vmul.f32 %v9434_v36, %v1748_v17  ;;  %v803_v29 = vpop.permute.xlu0 %802  ;;  %v1750_v50 = vld [vmem:[#allocation2 + $0x172] sm:$0xff] }
 0x14f   : > { %v2656_v49 = vadd.f32 %v2544_v39, %v2315_v58  ;;  %v3336_v11 = vadd.f32 %v3224_v52, %v9391_v21  ;;  %v3565_v38 = vmul.f32 %v9497_v23, %v1407_v32  ;;  %v3906_v2 = vmul.f32 %v9503_v30, %v1748_v17  ;;  %v1409_v32 = vld [vmem:[#allocation2 + $0x171] sm:$0xff]  ;;  %1090 = vst.msk [vmem:[#allocation2 + $0x241] sm:$0xff] %vm226_vm0, %v803_v29  ;;  %v1411_v29 = vld [vmem:[#allocation2 + $0x181] sm:$0xff] }
 0x150   : > { %v3337_v53 = vadd.f32 %v3225_v44, %v9445_v15  ;;  %v1527_v21 = vmul.f32 %v9351_v63, %v1410_v33  ;;  %v9509_v48 = vmul.f32 %v9372_v10, %v1751_v55  ;;  %v2547_v9 = vmul.f32 %v9399_v5, %v2430_v16  ;;  %v2088_v17 = vld [vmem:[#allocation2 + $0x178] sm:$0xf]  ;;  %v808_v15 = vpop.permute.xlu1 %807 }
 0x151   : > { %v9512_v25 = vadd.f32 %v2885_v13, %v2656_v49  ;;  %v3677_v43 = vadd.f32 %v3565_v38, %v3336_v11  ;;  %v9515_v42 = vmul.f32 %v9434_v36, %v2771_v54  ;;  %v3568_v31 = vmul.f32 %v9497_v23, %v3451_v0  ;;  %1091 = vst.msk [vmem:[#allocation2 + $0x249] sm:$0xff] %vm226_vm0, %v808_v15 }
 0x152   : > { %v9519_v12 = vmul.f32 %v9503_v30, %v3792_v62  ;;  %v1976_v3 = vadd.f32 %v9394_v46, %v9427_v18  ;;  %v2657_v7 = vadd.f32 %v2545_v59, %v2316_v24  ;;  %v1297_v14 = vmul.f32 %v9357_v45, %v1180_v22  ;;  %v3109_v24 = vld [vmem:[#allocation2 + $0x178] sm:$0xf]  ;;  %v813_v54 = vpop.permute.xlu0 %812 }
 0x153   : > { %v4018_v60 = vadd.f32 %v3906_v2, %v3677_v43  ;;  %v1298_v40 = vmul.f32 %v9357_v45, %v1181_v8  ;;  %v1526_v61 = vmul.f32 %v9351_v63, %v1409_v32  ;;  %v1866_v56 = vmul.f32 %v9372_v10, %v1749_v51  ;;  %1092 = vst.msk [vmem:[#allocation2 + $0x251] sm:$0xff] %vm226_vm0, %v813_v54  ;;  %v1182_v8 = vld [vmem:[#allocation2 + $0x180] sm:$0xff] }
 0x154   : > { %v4533_v58 = vld [vmem:[#allocation4 + $0x21] sm:$0xff]  ;;  %v2996_v46 = vadd.f32 %v9403_v28, %v9449_v27  ;;  %v3678_v18 = vadd.f32 %v9464_v20, %v3337_v53  ;;  %v2205_v59 = vmul.f32 %v9420_v47, %v1180_v22  ;;  %v2206_v52 = vmul.f32 %v9420_v47, %v2088_v17  ;;  %v818_v13 = vpop.permute.xlu1 %817  ;;  %v1412_v53 = vld [vmem:[#allocation2 + $0x189] sm:$0xff] }
 0x155   : > { %v4534_v39 = vld [vmem:[#allocation4 + $0x29] sm:$0xff]  ;;  %v4129_v33 = vmax.f32 %v9423_v4, %v4018_v60  ;;  %v1638_v55 = vadd.f32 %v1526_v61, %v1297_v14  ;;  %v1867_v16 = vmul.f32 %v9372_v10, %v1750_v50  ;;  %v2546_v28 = vmul.f32 %v9399_v5, %v1409_v32  ;;  %1093 = vst.msk [vmem:[#allocation2 + $0x259] sm:$0xf] %vm1024_vm2, %v818_v13 }
 0x156   : > { %v4559_v44 = vpack.c.bf16 %v4534_v39, %v4533_v58  ;;  %v2317_v0 = vadd.f32 %v2205_v59, %v9441_v57  ;;  %v2318_v49 = vadd.f32 %v2206_v52, %v1976_v3  ;;  %v2886_v27 = vmul.f32 %v9434_v36, %v1749_v51  ;;  %v1752_v58 = vld [vmem:[#allocation2 + $0x182] sm:$0xff] }
 0x157   : > { %4134 = vst.msk [vmem:[#allocation3 + $0x80] sm:$0xff] %vm226_vm0, %v4129_v33  ;;  %v9544_v4 = vadd.f32 %v1527_v21, %v1298_v40  ;;  %v1978_v20 = vadd.f32 %v1866_v56, %v1637_v1  ;;  %v3226_v57 = vmul.f32 %v9485_v34, %v1180_v22  ;;  %v9547_v11 = vadd.f32 %v1867_v16, %v1638_v55  ;;  %v1183_v1 = vld [vmem:[#allocation2 + $0x188] sm:$0xff] }
 0x158   : > { %7422 = vmatprep.mubr.msk.bf16.mxu1 %vm226_vm0, %v4559_v44  ;;  %7547 = vmatmul.mubr.msk.bf16.vlgmr.msra.gmra.mrb[0].mxu0 %vm226_vm0, %v4559_v44  ;;  %v2658_v38 = vadd.f32 %v2546_v28, %v2317_v0  ;;  %v2887_v2 = vmul.f32 %v9434_v36, %v1750_v50  ;;  %v3227_v62 = vmul.f32 %v9485_v34, %v3109_v24  ;;  %v1414_v24 = vld [vmem:[#allocation2 + $0x199] sm:$0xf] }
 0x159   : > { %v9551_v43 = vadd.f32 %v2547_v9, %v2318_v49  ;;  %v3338_v17 = vadd.f32 %v3226_v57, %v9454_v41  ;;  %v3567_v15 = vmul.f32 %v9497_v23, %v1409_v32  ;;  %v3907_v21 = vmul.f32 %v9503_v30, %v1749_v51  ;;  %v1755_v49 = vld [vmem:[#allocation2 + $0x19a] sm:$0xf] }
 0x15a   : > { %v2998_v22 = vadd.f32 %v2886_v27, %v2657_v7  ;;  %v9556_v3 = vadd.f32 %v2887_v2, %v2658_v38  ;;  %v3339_v14 = vadd.f32 %v3227_v62, %v2996_v46  ;;  %v3908_v60 = vmul.f32 %v9503_v30, %v1750_v50  ;;  %v2434_v28 = vld [vmem:[#allocation2 + $0x199] sm:$0xf] }
 0x15b   : > { %v3679_v40 = vadd.f32 %v3567_v15, %v3338_v17  ;;  %v4019_v61 = vadd.f32 %v3907_v21, %v3678_v18  ;;  %v1529_v56 = vmul.f32 %v9351_v63, %v1412_v53  ;;  %v1299_v9 = vmul.f32 %v9357_v45, %v1182_v8  ;;  %v2775_v27 = vld [vmem:[#allocation2 + $0x19a] sm:$0xf]  ;;  %v1184_v17 = vld [vmem:[#allocation2 + $0x190] sm:$0xff] }
 0x15c   : > { %v3680_v41 = vadd.f32 %v3568_v31, %v3339_v14  ;;  %v2549_v32 = vmul.f32 %v9399_v5, %v1412_v53  ;;  %v1300_v51 = vmul.f32 %v9357_v45, %v1183_v1  ;;  %v1528_v39 = vmul.f32 %v9351_v63, %v1411_v29  ;;  %v3455_v2 = vld [vmem:[#allocation2 + $0x199] sm:$0xf]  ;;  %v1413_v21 = vld [vmem:[#allocation2 + $0x191] sm:$0xff] }
 0x15d   : > { %v4020_v7 = vadd.f32 %v3908_v60, %v3679_v40  ;;  %v4130_v59 = vmax.f32 %v9456_v19, %v4019_v61  ;;  %v2207_v46 = vmul.f32 %v9420_v47, %v1182_v8  ;;  %v2208_v50 = vmul.f32 %v9420_v47, %v1183_v1  ;;  %v3796_v62 = vld [vmem:[#allocation2 + $0x19a] sm:$0xf]  ;;  %v1753_v40 = vld [vmem:[#allocation2 + $0x18a] sm:$0xff] }
 0x15e   : > { %v4021_v18 = vadd.f32 %v9519_v12, %v3680_v41  ;;  %v3570_v52 = vmul.f32 %v9497_v23, %v1412_v53  ;;  %v1640_v44 = vadd.f32 %v1528_v39, %v1299_v9  ;;  %v1869_v31 = vmul.f32 %v9372_v10, %v1752_v58  ;;  %v1185_v15 = vld [vmem:[#allocation2 + $0x198] sm:$0xf] }
 0x15f   : > { %v4131_v33 = vmax.f32 %v9468_v35, %v4020_v7  ;;  %4135 = vst.msk [vmem:[#allocation3 + $0x88] sm:$0xff] %vm226_vm0, %v4130_v59  ;;  %v1641_v55 = vadd.f32 %v1529_v56, %v1300_v51  ;;  %v2319_v16 = vadd.f32 %v2207_v46, %v9489_v6  ;;  %v2548_v19 = vmul.f32 %v9399_v5, %v1411_v29  ;;  %v1754_v9 = vld [vmem:[#allocation2 + $0x192] sm:$0xff] }
 0x160   : > { %v4132_v13 = vmax.f32 %v9474_v26, %v4021_v18  ;;  %v2320_v54 = vadd.f32 %v2208_v50, %v1978_v20  ;;  %v3228_v12 = vmul.f32 %v9485_v34, %v1182_v8  ;;  %v3229_v0 = vmul.f32 %v9485_v34, %v1183_v1 }
 0x161   : > { %4136 = vst.msk [vmem:[#allocation3 + $0x90] sm:$0xff] %vm226_vm0, %v4131_v33  ;;  %v9578_v35 = vadd.f32 %v1869_v31, %v1640_v44  ;;  %v2660_v57 = vadd.f32 %v2548_v19, %v2319_v16  ;;  %v2889_v6 = vmul.f32 %v9434_v36, %v1752_v58  ;;  %v3569_v38 = vmul.f32 %v9497_v23, %v1411_v29  ;;  %v3113_v44 = vld [vmem:[#allocation2 + $0x198] sm:$0xf] }
 0x162   : > { %4137 = vst.msk [vmem:[#allocation3 + $0x98] sm:$0xf] %vm1024_vm2, %v4132_v13  ;;  %v3340_v26 = vadd.f32 %v3228_v12, %v9512_v25  ;;  %v3341_v20 = vadd.f32 %v3229_v0, %v2998_v22  ;;  %v3910_v53 = vmul.f32 %v9503_v30, %v1752_v58  ;;  %v1531_v8 = vmul.f32 %v9351_v63, %v1414_v24  ;;  %v2092_v58 = vld [vmem:[#allocation2 + $0x198] sm:$0xf] }
 0x163   : > { %v9586_v1 = vadd.f32 %v2889_v6, %v2660_v57  ;;  %v9589_v14 = vmul.f32 %v9372_v10, %v1755_v49  ;;  %v2551_v29 = vmul.f32 %v9399_v5, %v2434_v28  ;;  %v9593_v60 = vmul.f32 %v9434_v36, %v2775_v27  ;;  %v4229_v0 = vld [vmem:[#allocation3 + $0x50] ss:$2 sm:$0x3f]  ;;  %v4285_v49 = vld [vmem:[#allocation3 + $0x51] ss:$2 sm:$0x3f] }
 0x164   : > { %v3681_v25 = vadd.f32 %v3569_v38, %v3340_v26  ;;  %v3572_v22 = vmul.f32 %v9497_v23, %v3455_v2  ;;  %v9597_v61 = vmul.f32 %v9503_v30, %v3796_v62  ;;  %v1980_v56 = vadd.f32 %v9509_v48, %v9544_v4  ;;  %v1416_v62 = vld [vmem:[#allocation2 + $0x1a9] sm:$0xff]  ;;  %v1186_v26 = vld [vmem:[#allocation2 + $0x1a0] sm:$0xff] }
 0x165   : > { %v2661_v41 = vadd.f32 %v2549_v32, %v2320_v54  ;;  %v1301_v51 = vmul.f32 %v9357_v45, %v1184_v17  ;;  %v1302_v39 = vmul.f32 %v9357_v45, %v1185_v15  ;;  %v1530_v7 = vmul.f32 %v9351_v63, %v1413_v21 }
 0x166   : > { %v3000_v59 = vadd.f32 %v9515_v42, %v9551_v43  ;;  %v3682_v46 = vadd.f32 %v3570_v52, %v3341_v20  ;;  %v1870_v50 = vmul.f32 %v9372_v10, %v1753_v40  ;;  %v2209_v18 = vmul.f32 %v9420_v47, %v1184_v17  ;;  %v4227_v43 = vld [vmem:[#allocation3 + $0x40] ss:$2 sm:$0xff]  ;;  %v4283_v52 = vld [vmem:[#allocation3 + $0x41] ss:$2 sm:$0xff]  ;;  %v828_v20 = vpop.permute.xlu1 %827 }
 0x167   : > { %v9608_v31 = vadd.f32 %v3910_v53, %v3681_v25  ;;  %v1642_v48 = vadd.f32 %v1530_v7, %v1301_v51  ;;  %v1871_v4 = vmul.f32 %v9372_v10, %v1754_v9  ;;  %v2210_v32 = vmul.f32 %v9420_v47, %v2092_v58  ;;  %v823_v53 = vpop.permute.xlu0 %822  ;;  %v1415_v58 = vld [vmem:[#allocation2 + $0x1a1] sm:$0xff]  ;;  %1095 = vst.msk [vmem:[#allocation2 + $0x269] sm:$0xff] %vm226_vm0, %v828_v20 }
 0x168   : > { %v9612_v33 = vadd.f32 %v1531_v8, %v1302_v39  ;;  %v2321_v16 = vadd.f32 %v2209_v18, %v9547_v11  ;;  %v2550_v19 = vmul.f32 %v9399_v5, %v1413_v21  ;;  %v2890_v42 = vmul.f32 %v9434_v36, %v1753_v40  ;;  %1094 = vst.msk [vmem:[#allocation2 + $0x261] sm:$0xff] %vm226_vm0, %v823_v53  ;;  %v1756_v7 = vld [vmem:[#allocation2 + $0x1a2] sm:$0xff]  ;;  %v3800_v53 = vld [vmem:[#allocation2 + $0x1ba] sm:$0xf] }
 0x169   : > { %v1982_v24 = vadd.f32 %v1870_v50, %v1641_v55  ;;  %v2322_v13 = vadd.f32 %v2210_v32, %v1980_v56  ;;  %v3230_v54 = vmul.f32 %v9485_v34, %v1184_v17  ;;  %v3231_v12 = vmul.f32 %v9485_v34, %v3113_v44  ;;  %v1187_v56 = vld [vmem:[#allocation2 + $0x1a8] sm:$0xff] }
 0x16a   : > { %v9619_v28 = vadd.f32 %v1871_v4, %v1642_v48  ;;  %v2662_v27 = vadd.f32 %v2550_v19, %v2321_v16  ;;  %v2891_v57 = vmul.f32 %v9434_v36, %v1754_v9  ;;  %v3911_v11 = vmul.f32 %v9503_v30, %v1753_v40 }
 0x16b   : > { %v3002_v6 = vadd.f32 %v2890_v42, %v2661_v41  ;;  %v3342_v38 = vadd.f32 %v3230_v54, %v9556_v3  ;;  %v3343_v2 = vadd.f32 %v3231_v12, %v3000_v59  ;;  %v3571_v55 = vmul.f32 %v9497_v23, %v1413_v21  ;;  %v833_v44 = vpop.permute.xlu0 %832 }
 0x16c   : > { %v9625_v8 = vadd.f32 %v2551_v29, %v2322_v13  ;;  %v3912_v17 = vmul.f32 %v9503_v30, %v1754_v9  ;;  %v4334_v15 = vmax.f32 %v4227_v43, %v4283_v52  ;;  %v4335_v25 = vmax.f32 %v4229_v0, %v4285_v49  ;;  %1096 = vst.msk [vmem:[#allocation2 + $0x271] sm:$0xff] %vm226_vm0, %v833_v44  ;;  %v1418_v0 = vld [vmem:[#allocation2 + $0x1b9] sm:$0xf] }
 0x16d   : > { %v9630_v3 = vadd.f32 %v2891_v57, %v2662_v27  ;;  %v3683_v40 = vadd.f32 %v3571_v55, %v3342_v38  ;;  %v3684_v21 = vadd.f32 %v3572_v22, %v3343_v2  ;;  %v9632_v41 = vadd.f32 %v3911_v11, %v3682_v46  ;;  %v838_v46 = vpop.permute.xlu1 %837  ;;  %v2438_v49 = vld [vmem:[#allocation2 + $0x1b9] sm:$0xf] }
 0x16e   : > { %v4369_v51 = vadd.f32 %v9249_v37, %v4334_v15  ;;  %v4370_v29 = vadd.f32 %v9249_v37, %v4335_v25  ;;  %v1533_v9 = vmul.f32 %v9351_v63, %v1416_v62  ;;  %v1303_v39 = vmul.f32 %v9357_v45, %v1186_v26  ;;  %1097 = vst.msk [vmem:[#allocation2 + $0x279] sm:$0xf] %vm1024_vm2, %v838_v46  ;;  %v2779_v2 = vld [vmem:[#allocation2 + $0x1ba] sm:$0xf] }
 0x16f   : > { %v2553_v59 = vmul.f32 %v9399_v5, %v1416_v62  ;;  %v9640_v50 = vmul.f32 %v9497_v23, %v1416_v62  ;;  %v1304_v18 = vmul.f32 %v9357_v45, %v1187_v56  ;;  %v1532_v22 = vmul.f32 %v9351_v63, %v1415_v58  ;;  %v3459_v55 = vld [vmem:[#allocation2 + $0x1b9] sm:$0xf] }
 0x170   : > { %v9644_v48 = vadd.f32 %v3912_v17, %v3683_v40  ;;  %v4397_v4 = vmax.f32 %v4369_v51, 0.0  ;;  %v4398_v37 = vmax.f32 %v4370_v29, 0.0  ;;  %v2211_v32 = vmul.f32 %v9420_v47, %v1186_v26  ;;  %v1188_v17 = vld [vmem:[#allocation2 + $0x1b0] sm:$0xff]  ;;  %v1189_v40 = vld [vmem:[#allocation2 + $0x1b8] sm:$0xf] }
 0x171   : > { %v9650_v16 = vadd.f32 %v9597_v61, %v3684_v21  ;;  %v1644_v19 = vadd.f32 %v1532_v22, %v1303_v39  ;;  %v1873_v42 = vmul.f32 %v9372_v10, %v1756_v7  ;;  %v2212_v43 = vmul.f32 %v9420_v47, %v1187_v56  ;;  %v1759_v61 = vld [vmem:[#allocation2 + $0x1ba] sm:$0xf]  ;;  %v1417_v21 = vld [vmem:[#allocation2 + $0x1b1] sm:$0xff] }
 0x172   : > { %4459 = vst.msk [vmem:[#allocation4 + $0x31] sm:$0xff] %vm226_vm0, %v4397_v4  ;;  %v2323_v52 = vadd.f32 %v2211_v32, %v9578_v35  ;;  %v2552_v13 = vmul.f32 %v9399_v5, %v1415_v58  ;;  %v3232_v54 = vmul.f32 %v9485_v34, %v1186_v26  ;;  %v3233_v12 = vmul.f32 %v9485_v34, %v1187_v56  ;;  %v1757_v51 = vld [vmem:[#allocation2 + $0x1aa] sm:$0xff]  ;;  %v2096_v39 = vld [vmem:[#allocation2 + $0x1b8] sm:$0xf] }
 0x173   : > { %4460 = vst.msk [vmem:[#allocation4 + $0x39] sm:$0x3f] %vm230_vm1, %v4398_v37  ;;  %v1645_v27 = vadd.f32 %v1533_v9, %v1304_v18  ;;  %v9660_v57 = vadd.f32 %v1873_v42, %v1644_v19  ;;  %v2324_v11 = vadd.f32 %v2212_v43, %v1982_v24  ;;  %v2893_v38 = vmul.f32 %v9434_v36, %v1756_v7  ;;  %v1758_v4 = vld [vmem:[#allocation2 + $0x1b2] sm:$0xff] }
 0x174   : > { %v2664_v62 = vadd.f32 %v2552_v13, %v2323_v52  ;;  %v3344_v35 = vadd.f32 %v3232_v54, %v9586_v1  ;;  %v3573_v20 = vmul.f32 %v9497_v23, %v1415_v58  ;;  %v3914_v26 = vmul.f32 %v9503_v30, %v1756_v7  ;;  %v843_v7 = vpop.permute.xlu0 %842 }
 0x175   : > { %v3345_v15 = vadd.f32 %v3233_v12, %v3002_v6  ;;  %v1535_v25 = vmul.f32 %v9351_v63, %v1418_v0  ;;  %v9668_v56 = vmul.f32 %v9372_v10, %v1759_v61  ;;  %v2555_v24 = vmul.f32 %v9399_v5, %v2438_v49  ;;  %v848_v6 = vpop.permute.xlu1 %847  ;;  %1098 = vst.msk [vmem:[#allocation2 + $0x281] sm:$0xff] %vm226_vm0, %v843_v7  ;;  %v3117_v49 = vld [vmem:[#allocation2 + $0x1b8] sm:$0xf] }
 0x176   : > { %v9671_v29 = vadd.f32 %v2893_v38, %v2664_v62  ;;  %v3685_v1 = vadd.f32 %v3573_v20, %v3344_v35  ;;  %v9674_v58 = vmul.f32 %v9434_v36, %v2779_v2  ;;  %v3576_v9 = vmul.f32 %v9497_v23, %v3459_v55  ;;  %1099 = vst.msk [vmem:[#allocation2 + $0x289] sm:$0xff] %vm226_vm0, %v848_v6  ;;  %v1419_v6 = vld [vmem:[#allocation2 + $0x1c1] sm:$0xff] }
 0x177   : > { %v9678_v18 = vmul.f32 %v9503_v30, %v3800_v53  ;;  %v1984_v22 = vadd.f32 %v9589_v14, %v9612_v33  ;;  %v2665_v46 = vadd.f32 %v2553_v59, %v2324_v11  ;;  %v1305_v44 = vmul.f32 %v9357_v45, %v1188_v17  ;;  %v1420_v53 = vld [vmem:[#allocation2 + $0x1c9] sm:$0xff] }
 0x178   : > { %v4026_v37 = vadd.f32 %v3914_v26, %v3685_v1  ;;  %v1306_v32 = vmul.f32 %v9357_v45, %v1189_v40  ;;  %v1534_v19 = vmul.f32 %v9351_v63, %v1417_v21  ;;  %v1874_v42 = vmul.f32 %v9372_v10, %v1757_v51  ;;  %v853_v38 = vpop.permute.xlu0 %852 }
 0x179   : > { %v4535_v43 = vld [vmem:[#allocation4 + $0x31] sm:$0xff]  ;;  %v3004_v14 = vadd.f32 %v9593_v60, %v9625_v8  ;;  %v3686_v33 = vadd.f32 %v9640_v50, %v3345_v15  ;;  %v2213_v59 = vmul.f32 %v9420_v47, %v1188_v17  ;;  %v2214_v13 = vmul.f32 %v9420_v47, %v2096_v39  ;;  %v858_v11 = vpop.permute.xlu1 %857  ;;  %1100 = vst.msk [vmem:[#allocation2 + $0x291] sm:$0xff] %vm226_vm0, %v853_v38  ;;  %v1190_v15 = vld [vmem:[#allocation2 + $0x1c0] sm:$0xff] }
 0x17a   : > { %v4536_v52 = vld [vmem:[#allocation4 + $0x39] sm:$0xff]  ;;  %v4138_v12 = vmax.f32 %v9608_v31, %v4026_v37  ;;  %v1646_v0 = vadd.f32 %v1534_v19, %v1305_v44  ;;  %v1875_v61 = vmul.f32 %v9372_v10, %v1758_v4  ;;  %v2554_v60 = vmul.f32 %v9399_v5, %v1417_v21  ;;  %1101 = vst.msk [vmem:[#allocation2 + $0x299] sm:$0xf] %vm1024_vm2, %v858_v11 }
 0x17b   : > { %v4560_v54 = vpack.c.bf16 %v4536_v52, %v4535_v43  ;;  %v2325_v2 = vadd.f32 %v2213_v59, %v9619_v28  ;;  %v2326_v55 = vadd.f32 %v2214_v13, %v1984_v22  ;;  %v2894_v8 = vmul.f32 %v9434_v36, %v1757_v51 }
 0x17c   : > { %4143 = vst.msk [vmem:[#allocation3 + $0xa0] sm:$0xff] %vm226_vm0, %v4138_v12  ;;  %v9703_v31 = vadd.f32 %v1535_v25, %v1306_v32  ;;  %v1986_v50 = vadd.f32 %v1874_v42, %v1645_v27  ;;  %v3234_v28 = vmul.f32 %v9485_v34, %v1188_v17  ;;  %v9706_v62 = vadd.f32 %v1875_v61, %v1646_v0  ;;  %v1191_v27 = vld [vmem:[#allocation2 + $0x1c8] sm:$0xff]  ;;  %v1422_v61 = vld [vmem:[#allocation2 + $0x1d9] sm:$0xf] }
 0x17d   : > { %7423 = vmatmul.mubr.msk.bf16.gmra.mrb[4].mxu1 %vm226_vm0, %v4560_v54  ;;  %7550 = vmatprep.mubr.msk.bf16.mxu0 %vm226_vm0, %v4560_v54  ;;  %v2666_v35 = vadd.f32 %v2554_v60, %v2325_v2  ;;  %v2895_v20 = vmul.f32 %v9434_v36, %v1758_v4  ;;  %v3235_v26 = vmul.f32 %v9485_v34, %v3117_v49  ;;  %v1760_v42 = vld [vmem:[#allocation2 + $0x1c2] sm:$0xff]  ;;  %v1763_v2 = vld [vmem:[#allocation2 + $0x1da] sm:$0xf] }
 0x17e   : > { %v9710_v40 = vadd.f32 %v2555_v24, %v2326_v55  ;;  %v3346_v1 = vadd.f32 %v3234_v28, %v9630_v3  ;;  %v3575_v39 = vmul.f32 %v9497_v23, %v1417_v21  ;;  %v3915_v25 = vmul.f32 %v9503_v30, %v1757_v51  ;;  %v2442_v55 = vld [vmem:[#allocation2 + $0x1d9] sm:$0xf] }
 0x17f   : > { %v3006_v17 = vadd.f32 %v2894_v8, %v2665_v46  ;;  %v9715_v7 = vadd.f32 %v2895_v20, %v2666_v35  ;;  %v3347_v22 = vadd.f32 %v3235_v26, %v3004_v14  ;;  %v3916_v44 = vmul.f32 %v9503_v30, %v1758_v4  ;;  %v2783_v60 = vld [vmem:[#allocation2 + $0x1da] sm:$0xf] }
 0x180   : > { %v3687_v37 = vadd.f32 %v3575_v39, %v3346_v1  ;;  %v4027_v32 = vadd.f32 %v3915_v25, %v3686_v33  ;;  %v1537_v19 = vmul.f32 %v9351_v63, %v1420_v53  ;;  %v1307_v24 = vmul.f32 %v9357_v45, %v1190_v15  ;;  %v3463_v35 = vld [vmem:[#allocation2 + $0x1d9] sm:$0xf]  ;;  %v1421_v39 = vld [vmem:[#allocation2 + $0x1d1] sm:$0xff] }
 0x181   : > { %v3688_v3 = vadd.f32 %v3576_v9, %v3347_v22  ;;  %v2557_v21 = vmul.f32 %v9399_v5, %v1420_v53  ;;  %v1308_v51 = vmul.f32 %v9357_v45, %v1191_v27  ;;  %v1536_v43 = vmul.f32 %v9351_v63, %v1419_v6  ;;  %v3804_v20 = vld [vmem:[#allocation2 + $0x1da] sm:$0xf] }
 0x182   : > { %v4028_v46 = vadd.f32 %v3916_v44, %v3687_v37  ;;  %v4139_v52 = vmax.f32 %v9632_v41, %v4027_v32  ;;  %v2215_v14 = vmul.f32 %v9420_v47, %v1190_v15  ;;  %v2216_v4 = vmul.f32 %v9420_v47, %v1191_v27  ;;  %v1193_v1 = vld [vmem:[#allocation2 + $0x1d8] sm:$0xf]  ;;  %v1761_v44 = vld [vmem:[#allocation2 + $0x1ca] sm:$0xff] }
 0x183   : > { %v4029_v33 = vadd.f32 %v9678_v18, %v3688_v3  ;;  %v3578_v59 = vmul.f32 %v9497_v23, %v1420_v53  ;;  %v1648_v13 = vadd.f32 %v1536_v43, %v1307_v24  ;;  %v1877_v9 = vmul.f32 %v9372_v10, %v1760_v42  ;;  %v2100_v24 = vld [vmem:[#allocation2 + $0x1d8] sm:$0xf] }
 0x184   : > { %v4140_v54 = vmax.f32 %v9644_v48, %v4028_v46  ;;  %4144 = vst.msk [vmem:[#allocation3 + $0xa8] sm:$0xff] %vm226_vm0, %v4139_v52  ;;  %v1649_v12 = vadd.f32 %v1537_v19, %v1308_v51  ;;  %v2327_v0 = vadd.f32 %v2215_v14, %v9660_v57  ;;  %v2556_v41 = vmul.f32 %v9399_v5, %v1419_v6  ;;  %v1762_v19 = vld [vmem:[#allocation2 + $0x1d2] sm:$0xff] }
 0x185   : > { %v4141_v49 = vmax.f32 %v9650_v16, %v4029_v33  ;;  %v2328_v11 = vadd.f32 %v2216_v4, %v1986_v50  ;;  %v3236_v18 = vmul.f32 %v9485_v34, %v1190_v15  ;;  %v3237_v38 = vmul.f32 %v9485_v34, %v1191_v27  ;;  %v1192_v15 = vld [vmem:[#allocation2 + $0x1d0] sm:$0xff]  ;;  %v3121_v33 = vld [vmem:[#allocation2 + $0x1d8] sm:$0xf] }
 0x186   : > { %4145 = vst.msk [vmem:[#allocation3 + $0xb0] sm:$0xff] %vm226_vm0, %v4140_v54  ;;  %v9737_v48 = vadd.f32 %v1877_v9, %v1648_v13  ;;  %v2668_v8 = vadd.f32 %v2556_v41, %v2327_v0  ;;  %v2897_v57 = vmul.f32 %v9434_v36, %v1760_v42  ;;  %v3577_v28 = vmul.f32 %v9497_v23, %v1419_v6 }
 0x187   : > { %4146 = vst.msk [vmem:[#allocation3 + $0xb8] sm:$0xf] %vm1024_vm2, %v4141_v49  ;;  %v3348_v16 = vadd.f32 %v3236_v18, %v9671_v29  ;;  %v3349_v50 = vadd.f32 %v3237_v38, %v3006_v17  ;;  %v3918_v26 = vmul.f32 %v9503_v30, %v1760_v42  ;;  %v1539_v53 = vmul.f32 %v9351_v63, %v1422_v61  ;;  %v4289_v49 = vld [vmem:[#allocation3 + $0x71] ss:$2 sm:$0x3f] }
 0x188   : > { %v9745_v25 = vadd.f32 %v2897_v57, %v2668_v8  ;;  %v9748_v27 = vmul.f32 %v9372_v10, %v1763_v2  ;;  %v2559_v6 = vmul.f32 %v9399_v5, %v2442_v55  ;;  %v9752_v22 = vmul.f32 %v9434_v36, %v2783_v60  ;;  %v1424_v8 = vld [vmem:[#allocation2 + $0x1e9] sm:$0xff]  ;;  %v1194_v57 = vld [vmem:[#allocation2 + $0x1e0] sm:$0xff] }
 0x189   : > { %v3689_v29 = vadd.f32 %v3577_v28, %v3348_v16  ;;  %v3580_v17 = vmul.f32 %v9497_v23, %v3463_v35  ;;  %v9756_v37 = vmul.f32 %v9503_v30, %v3804_v20  ;;  %v1988_v32 = vadd.f32 %v9668_v56, %v9703_v31  ;;  %v868_v28 = vpop.permute.xlu1 %867  ;;  %v863_v35 = vpop.permute.xlu0 %862 }
 0x18a   : > { %v2669_v42 = vadd.f32 %v2557_v21, %v2328_v11  ;;  %v1309_v3 = vmul.f32 %v9357_v45, %v1192_v15  ;;  %v1310_v51 = vmul.f32 %v9357_v45, %v1193_v1  ;;  %v1538_v43 = vmul.f32 %v9351_v63, %v1421_v39  ;;  %1103 = vst.msk [vmem:[#allocation2 + $0x2a9] sm:$0xff] %vm226_vm0, %v868_v28  ;;  %v3808_v28 = vld [vmem:[#allocation2 + $0x1fa] sm:$0xf] }
 0x18b   : > { %v3008_v46 = vadd.f32 %v9674_v58, %v9710_v40  ;;  %v3690_v52 = vadd.f32 %v3578_v59, %v3349_v50  ;;  %v1878_v14 = vmul.f32 %v9372_v10, %v1761_v44  ;;  %v2217_v4 = vmul.f32 %v9420_v47, %v1192_v15  ;;  %v4231_v40 = vld [vmem:[#allocation3 + $0x60] ss:$2 sm:$0xff]  ;;  %v4287_v59 = vld [vmem:[#allocation3 + $0x61] ss:$2 sm:$0xff]  ;;  %1102 = vst.msk [vmem:[#allocation2 + $0x2a1] sm:$0xff] %vm226_vm0, %v863_v35  ;;  %v1196_v35 = vld [vmem:[#allocation2 + $0x1f0] sm:$0xff] }
 0x18c   : > { %v9767_v13 = vadd.f32 %v3918_v26, %v3689_v29  ;;  %v1650_v56 = vadd.f32 %v1538_v43, %v1309_v3  ;;  %v1879_v31 = vmul.f32 %v9372_v10, %v1762_v19  ;;  %v2218_v21 = vmul.f32 %v9420_v47, %v2100_v24  ;;  %v4233_v10 = vld [vmem:[#allocation3 + $0x70] ss:$2 sm:$0x3f]  ;;  %v1764_v3 = vld [vmem:[#allocation2 + $0x1e2] sm:$0xff] }
 0x18d   : > { %v9771_v9 = vadd.f32 %v1539_v53, %v1310_v51  ;;  %v2329_v63 = vadd.f32 %v2217_v4, %v9706_v62  ;;  %v2558_v45 = vmul.f32 %v9399_v5, %v1421_v39  ;;  %v2898_v58 = vmul.f32 %v9434_v36, %v1761_v44  ;;  %v1195_v53 = vld [vmem:[#allocation2 + $0x1e8] sm:$0xff]  ;;  %v873_v4 = vpop.permute.xlu0 %872 }
 0x18e   : > { %v9776_v54 = vadd.f32 %v1878_v14, %v1649_v12  ;;  %v2330_v0 = vadd.f32 %v2218_v21, %v1988_v32  ;;  %v3238_v41 = vmul.f32 %v9485_v34, %v1192_v15  ;;  %v3239_v61 = vmul.f32 %v9485_v34, %v3121_v33  ;;  %v1423_v15 = vld [vmem:[#allocation2 + $0x1e1] sm:$0xff]  ;;  %v878_v14 = vpop.permute.xlu1 %877  ;;  %1104 = vst.msk [vmem:[#allocation2 + $0x2b1] sm:$0xff] %vm226_vm0, %v873_v4 }
 0x18f   : > { %v9780_v11 = vadd.f32 %v1879_v31, %v1650_v56  ;;  %v2670_v18 = vadd.f32 %v2558_v45, %v2329_v63  ;;  %v2899_v62 = vmul.f32 %v9434_v36, %v1762_v19  ;;  %v3919_v38 = vmul.f32 %v9503_v30, %v1761_v44  ;;  %1105 = vst.msk [vmem:[#allocation2 + $0x2b9] sm:$0xf] %vm1024_vm2, %v878_v14 }
 0x190   : > { %v9784_v2 = vadd.f32 %v2898_v58, %v2669_v42  ;;  %v3350_v55 = vadd.f32 %v3238_v41, %v9715_v7  ;;  %v3351_v12 = vadd.f32 %v3239_v61, %v3008_v46  ;;  %v3579_v60 = vmul.f32 %v9497_v23, %v1421_v39  ;;  %v9833_v58 = vld [vmem:[%s11454_s1 + $0x2] ss:$0 sm:$0xff] }
 0x191   : > { %v9788_v20 = vadd.f32 %v2559_v6, %v2330_v0  ;;  %v3920_v16 = vmul.f32 %v9503_v30, %v1762_v19  ;;  %v4336_v50 = vmax.f32 %v4231_v40, %v4287_v59  ;;  %v4337_v26 = vmax.f32 %v4233_v10, %v4289_v49  ;;  %v9800_v6 = vld [vmem:[%s11455_s2] ss:$0 sm:$0xff]  ;;  %v9807_v19 = vld [vmem:[%s11454_s1 + $0x1] ss:$0 sm:$0xff]  ;;  %v1426_v10 = vld [vmem:[#allocation2 + $0x1f9] sm:$0xf] }
 0x192   : > { %v9793_v7 = vadd.f32 %v2899_v62, %v2670_v18  ;;  %v3691_v1 = vadd.f32 %v3579_v60, %v3350_v55  ;;  %v3692_v39 = vadd.f32 %v3580_v17, %v3351_v12  ;;  %v9795_v44 = vadd.f32 %v3919_v38, %v3690_v52  ;;  %v9813_v17 = vld [vmem:[%s11454_s1] ss:$0 sm:$0xff]  ;;  %v1767_v49 = vld [vmem:[#allocation2 + $0x1fa] sm:$0xf] }
 0x193   : > { %v4371_v29 = vadd.f32 %v9800_v6, %v4336_v50  ;;  %v4372_v32 = vadd.f32 %v9800_v6, %v4337_v26  ;;  %v1541_v24 = vmul.f32 %v9807_v19, %v1424_v8  ;;  %v1311_v42 = vmul.f32 %v9813_v17, %v1194_v57  ;;  %v2446_v18 = vld [vmem:[#allocation2 + $0x1f9] sm:$0xf] }
 0x194   : > { %v2561_v51 = vmul.f32 %v9399_v5, %v1424_v8  ;;  %v9818_v43 = vmul.f32 %v9497_v23, %v1424_v8  ;;  %v1312_v46 = vmul.f32 %v9813_v17, %v1195_v53  ;;  %v1540_v52 = vmul.f32 %v9807_v19, %v1423_v15  ;;  %v2787_v12 = vld [vmem:[#allocation2 + $0x1fa] sm:$0xf] }
 0x195   : > { %v9822_v33 = vadd.f32 %v3920_v16, %v3691_v1  ;;  %v4399_v56 = vmax.f32 %v4371_v29, 0.0  ;;  %v4400_v31 = vmax.f32 %v4372_v32, 0.0  ;;  %v2219_v21 = vmul.f32 %v9420_v47, %v1194_v57  ;;  %v3467_v60 = vld [vmem:[#allocation2 + $0x1f9] sm:$0xf]  ;;  %v1765_v1 = vld [vmem:[#allocation2 + $0x1ea] sm:$0xff] }
 0x196   : > { %v9828_v63 = vadd.f32 %v9756_v37, %v3692_v39  ;;  %v1652_v45 = vadd.f32 %v1540_v52, %v1311_v42  ;;  %v1881_v40 = vmul.f32 %v9833_v58, %v1764_v3  ;;  %v2220_v59 = vmul.f32 %v9420_v47, %v1195_v53  ;;  %v888_v42 = vpop.permute.xlu1 %887 }
 0x197   : > { %4461 = vst.msk [vmem:[#allocation4 + $0x41] sm:$0xff] %vm226_vm0, %v4399_v56  ;;  %v2331_v0 = vadd.f32 %v2219_v21, %v9737_v48  ;;  %v2560_v41 = vmul.f32 %v9399_v5, %v1423_v15  ;;  %v3240_v37 = vmul.f32 %v9485_v34, %v1194_v57  ;;  %v3241_v61 = vmul.f32 %v9485_v34, %v1195_v53  ;;  %v1197_v53 = vld [vmem:[#allocation2 + $0x1f8] sm:$0xf] }
 0x198   : > { %4462 = vst.msk [vmem:[#allocation4 + $0x49] sm:$0x3f] %vm230_vm1, %v4400_v31  ;;  %v9843_v62 = vadd.f32 %v1541_v24, %v1312_v46  ;;  %v9845_v38 = vadd.f32 %v1881_v40, %v1652_v45  ;;  %v2332_v47 = vadd.f32 %v2220_v59, %v9776_v54  ;;  %v2901_v55 = vmul.f32 %v9434_v36, %v1764_v3  ;;  %v9860_v54 = vld [vmem:[%s11454_s1 + $0x5] ss:$0 sm:$0xff]  ;;  %v2104_v24 = vld [vmem:[#allocation2 + $0x1f8] sm:$0xf] }
 0x199   : > { %v2672_v48 = vadd.f32 %v2560_v41, %v2331_v0  ;;  %v3352_v5 = vadd.f32 %v3240_v37, %v9745_v25  ;;  %v3581_v8 = vmul.f32 %v9497_v23, %v1423_v15  ;;  %v3922_v57 = vmul.f32 %v9503_v30, %v1764_v3  ;;  %v1425_v15 = vld [vmem:[#allocation2 + $0x1f1] sm:$0xff]  ;;  %v883_v3 = vpop.permute.xlu0 %882  ;;  %1107 = vst.msk [vmem:[#allocation2 + $0x2c9] sm:$0xff] %vm226_vm0, %v888_v42 }
 0x19a   : > { %v3353_v16 = vadd.f32 %v3241_v61, %v9784_v2  ;;  %v1543_v50 = vmul.f32 %v9807_v19, %v1426_v10  ;;  %v9855_v26 = vmul.f32 %v9833_v58, %v1767_v49  ;;  %v2563_v25 = vmul.f32 %v9860_v54, %v2446_v18  ;;  %v1766_v56 = vld [vmem:[#allocation2 + $0x1f2] sm:$0xff]  ;;  %1106 = vst.msk [vmem:[#allocation2 + $0x2c1] sm:$0xff] %vm226_vm0, %v883_v3  ;;  %v1427_v3 = vld [vmem:[#allocation2 + $0x201] sm:$0xff] }
 0x19b   : > { %v9863_v39 = vadd.f32 %v2901_v55, %v2672_v48  ;;  %v3693_v29 = vadd.f32 %v3581_v8, %v3352_v5  ;;  %v9866_v2 = vmul.f32 %v9434_v36, %v2787_v12  ;;  %v9869_v32 = vmul.f32 %v9497_v23, %v3467_v60  ;;  %v3125_v18 = vld [vmem:[#allocation2 + $0x1f8] sm:$0xf]  ;;  %v9899_v12 = vld [vmem:[%s11454_s1 + $0x6] ss:$0 sm:$0xff] }
 0x19c   : > { %v9872_v46 = vmul.f32 %v9503_v30, %v3808_v28  ;;  %v1992_v52 = vadd.f32 %v9748_v27, %v9771_v9  ;;  %v2673_v14 = vadd.f32 %v2561_v51, %v2332_v47  ;;  %v1313_v4 = vmul.f32 %v9813_v17, %v1196_v35  ;;  %v9888_v51 = vld [vmem:[%s11454_s1 + $0x4] ss:$0 sm:$0xff]  ;;  %v898_v47 = vpop.permute.xlu1 %897 }
 0x19d   : > { %v4034_v36 = vadd.f32 %v3922_v57, %v3693_v29  ;;  %v1314_v31 = vmul.f32 %v9813_v17, %v1197_v53  ;;  %v1542_v21 = vmul.f32 %v9807_v19, %v1425_v15  ;;  %v1882_v45 = vmul.f32 %v9833_v58, %v1765_v1  ;;  %1109 = vst.msk [vmem:[#allocation2 + $0x2d9] sm:$0xf] %vm1024_vm2, %v898_v47  ;;  %v1198_v53 = vld [vmem:[#allocation2 + $0x200] sm:$0xff]  ;;  %v1771_v47 = vld [vmem:[#allocation2 + $0x21a] sm:$0xf] }
 0x19e   : > { %v4537_v40 = vld [vmem:[#allocation4 + $0x41] sm:$0xff]  ;;  %v3012_v27 = vadd.f32 %v9752_v22, %v9788_v20  ;;  %v3694_v9 = vadd.f32 %v9818_v43, %v3353_v16  ;;  %v2221_v0 = vmul.f32 %v9888_v51, %v1196_v35  ;;  %v2222_v41 = vmul.f32 %v9888_v51, %v2104_v24  ;;  %v893_v22 = vpop.permute.xlu0 %892  ;;  %v1428_v16 = vld [vmem:[#allocation2 + $0x209] sm:$0xff] }
 0x19f   : > { %v4538_v59 = vld [vmem:[#allocation4 + $0x49] sm:$0xff]  ;;  %v4147_v61 = vmax.f32 %v9767_v13, %v4034_v36  ;;  %v1654_v10 = vadd.f32 %v1542_v21, %v1313_v4  ;;  %v1883_v49 = vmul.f32 %v9833_v58, %v1766_v56  ;;  %v2562_v55 = vmul.f32 %v9860_v54, %v1425_v15  ;;  %1108 = vst.msk [vmem:[#allocation2 + $0x2d1] sm:$0xff] %vm226_vm0, %v893_v22  ;;  %v2450_v22 = vld [vmem:[#allocation2 + $0x219] sm:$0xf] }
 0x1a0   : > { %v4561_v37 = vpack.c.bf16 %v4538_v59, %v4537_v40  ;;  %v2333_v20 = vadd.f32 %v2221_v0, %v9780_v11  ;;  %v2334_v43 = vadd.f32 %v2222_v41, %v1992_v52  ;;  %v2902_v60 = vmul.f32 %v9899_v12, %v1765_v1 }
 0x1a1   : > { %4152 = vst.msk [vmem:[#allocation3 + $0xc0] sm:$0xff] %vm226_vm0, %v4147_v61  ;;  %v9907_v13 = vadd.f32 %v1543_v50, %v1314_v31  ;;  %v1994_v11 = vadd.f32 %v1882_v45, %v9843_v62  ;;  %v3242_v48 = vmul.f32 %v9485_v34, %v1196_v35  ;;  %v9911_v5 = vadd.f32 %v1883_v49, %v1654_v10  ;;  %v1199_v62 = vld [vmem:[#allocation2 + $0x208] sm:$0xff]  ;;  %v1430_v10 = vld [vmem:[#allocation2 + $0x219] sm:$0xf] }
 0x1a2   : > { %7426 = vmatprep.mubr.msk.bf16.mxu1 %vm226_vm0, %v4561_v37  ;;  %7551 = vmatmul.mubr.msk.bf16.gmra.mrb[4].mxu0 %vm226_vm0, %v4561_v37  ;;  %v2674_v8 = vadd.f32 %v2562_v55, %v2333_v20  ;;  %v2903_v57 = vmul.f32 %v9899_v12, %v1766_v56  ;;  %v3243_v28 = vmul.f32 %v9485_v34, %v3125_v18  ;;  %v1768_v45 = vld [vmem:[#allocation2 + $0x202] sm:$0xff]  ;;  %v2791_v20 = vld [vmem:[#allocation2 + $0x21a] sm:$0xf] }
 0x1a3   : > { %v9915_v29 = vadd.f32 %v2563_v25, %v2334_v43  ;;  %v3354_v24 = vadd.f32 %v3242_v48, %v9793_v7  ;;  %v3583_v50 = vmul.f32 %v9497_v23, %v1425_v15  ;;  %v3923_v42 = vmul.f32 %v9503_v30, %v1765_v1  ;;  %v9954_v55 = vld [vmem:[%s11454_s1 + $0x9] ss:$0 sm:$0xff]  ;;  %v3812_v48 = vld [vmem:[#allocation2 + $0x21a] sm:$0xf] }
 0x1a4   : > { %v3014_v35 = vadd.f32 %v2902_v60, %v2673_v14  ;;  %v9920_v52 = vadd.f32 %v2903_v57, %v2674_v8  ;;  %v3355_v4 = vadd.f32 %v3243_v28, %v3012_v27  ;;  %v3924_v36 = vmul.f32 %v9503_v30, %v1766_v56  ;;  %v9962_v28 = vld [vmem:[%s11454_s1 + $0xa] ss:$0 sm:$0xff] }
 0x1a5   : > { %v3695_v31 = vadd.f32 %v3583_v50, %v3354_v24  ;;  %v4035_v34 = vadd.f32 %v3923_v42, %v3694_v9  ;;  %v1545_v21 = vmul.f32 %v9807_v19, %v1428_v16  ;;  %v1315_v25 = vmul.f32 %v9813_v17, %v1198_v53  ;;  %v1200_v24 = vld [vmem:[#allocation2 + $0x210] sm:$0xff]  ;;  %v1201_v50 = vld [vmem:[#allocation2 + $0x218] sm:$0xf] }
 0x1a6   : > { %v3696_v7 = vadd.f32 %v9869_v32, %v3355_v4  ;;  %v2565_v15 = vmul.f32 %v9860_v54, %v1428_v16  ;;  %v1316_v1 = vmul.f32 %v9813_v17, %v1199_v62  ;;  %v1544_v14 = vmul.f32 %v9807_v19, %v1427_v3  ;;  %v1429_v42 = vld [vmem:[#allocation2 + $0x211] sm:$0xff] }
 0x1a7   : > { %v4036_v40 = vadd.f32 %v3924_v36, %v3695_v31  ;;  %v4148_v59 = vmax.f32 %v9795_v44, %v4035_v34  ;;  %v2223_v30 = vmul.f32 %v9888_v51, %v1198_v53  ;;  %v2224_v56 = vmul.f32 %v9888_v51, %v1199_v62  ;;  %v1769_v4 = vld [vmem:[#allocation2 + $0x20a] sm:$0xff] }
 0x1a8   : > { %v4037_v27 = vadd.f32 %v9872_v46, %v3696_v7  ;;  %v3586_v9 = vmul.f32 %v9497_v23, %v1428_v16  ;;  %v1656_v0 = vadd.f32 %v1544_v14, %v1315_v25  ;;  %v1885_v32 = vmul.f32 %v9833_v58, %v1768_v45  ;;  %v9943_v23 = vld [vmem:[%s11454_s1 + $0x8] ss:$0 sm:$0xff]  ;;  %v1770_v25 = vld [vmem:[#allocation2 + $0x212] sm:$0xff] }
 0x1a9   : > { %v4149_v41 = vmax.f32 %v9822_v33, %v4036_v40  ;;  %4153 = vst.msk [vmem:[#allocation3 + $0xc8] sm:$0xff] %vm226_vm0, %v4148_v59  ;;  %v1657_v37 = vadd.f32 %v1545_v21, %v1316_v1  ;;  %v2335_v61 = vadd.f32 %v2223_v30, %v9845_v38  ;;  %v2564_v44 = vmul.f32 %v9860_v54, %v1427_v3 }
 0x1aa   : > { %v4150_v49 = vmax.f32 %v9828_v63, %v4037_v27  ;;  %v2336_v18 = vadd.f32 %v2224_v56, %v1994_v11  ;;  %v3244_v46 = vmul.f32 %v9943_v23, %v1198_v53  ;;  %v3245_v33 = vmul.f32 %v9943_v23, %v1199_v62  ;;  %v3471_v11 = vld [vmem:[#allocation2 + $0x219] sm:$0xf] }
 0x1ab   : > { %4154 = vst.msk [vmem:[#allocation3 + $0xd0] sm:$0xff] %vm226_vm0, %v4149_v41  ;;  %v9948_v38 = vadd.f32 %v1885_v32, %v1656_v0  ;;  %v2676_v43 = vadd.f32 %v2564_v44, %v2335_v61  ;;  %v2905_v63 = vmul.f32 %v9899_v12, %v1768_v45  ;;  %v3585_v60 = vmul.f32 %v9954_v55, %v1427_v3  ;;  %v3129_v0 = vld [vmem:[#allocation2 + $0x218] sm:$0xf] }
 0x1ac   : > { %4155 = vst.msk [vmem:[#allocation3 + $0xd8] sm:$0xf] %vm1024_vm2, %v4150_v49  ;;  %v3356_v8 = vadd.f32 %v3244_v46, %v9863_v39  ;;  %v3357_v57 = vadd.f32 %v3245_v33, %v3014_v35  ;;  %v3926_v16 = vmul.f32 %v9962_v28, %v1768_v45  ;;  %v1547_v53 = vmul.f32 %v9807_v19, %v1430_v10  ;;  %v2108_v45 = vld [vmem:[#allocation2 + $0x218] sm:$0xf] }
 0x1ad   : > { %v9966_v62 = vadd.f32 %v2905_v63, %v2676_v43  ;;  %v9969_v3 = vmul.f32 %v9833_v58, %v1771_v47  ;;  %v2567_v39 = vmul.f32 %v9860_v54, %v2450_v22  ;;  %v9973_v35 = vmul.f32 %v9899_v12, %v2791_v20  ;;  %v4237_v33 = vld [vmem:[#allocation3 + $0x90] ss:$2 sm:$0x3f]  ;;  %v4293_v47 = vld [vmem:[#allocation3 + $0x91] ss:$2 sm:$0x3f] }
 0x1ae   : > { %v3697_v36 = vadd.f32 %v3585_v60, %v3356_v8  ;;  %v3588_v31 = vmul.f32 %v9954_v55, %v3471_v11  ;;  %v9977_v34 = vmul.f32 %v9962_v28, %v3812_v48  ;;  %v1996_v21 = vadd.f32 %v9855_v26, %v9907_v13  ;;  %v1432_v48 = vld [vmem:[#allocation2 + $0x229] sm:$0xff]  ;;  %v1202_v8 = vld [vmem:[#allocation2 + $0x220] sm:$0xff] }
 0x1af   : > { %v2677_v7 = vadd.f32 %v2565_v15, %v2336_v18  ;;  %v1317_v1 = vmul.f32 %v9813_v17, %v1200_v24  ;;  %v1318_v14 = vmul.f32 %v9813_v17, %v1201_v50  ;;  %v1546_v40 = vmul.f32 %v9807_v19, %v1429_v42 }
 0x1b0   : > { %v3016_v59 = vadd.f32 %v9866_v2, %v9915_v29  ;;  %v3698_v30 = vadd.f32 %v3586_v9, %v3357_v57  ;;  %v1886_v56 = vmul.f32 %v9833_v58, %v1769_v4  ;;  %v2225_v27 = vmul.f32 %v9888_v51, %v1200_v24  ;;  %v4235_v29 = vld [vmem:[#allocation3 + $0x80] ss:$2 sm:$0xff]  ;;  %v4291_v9 = vld [vmem:[#allocation3 + $0x81] ss:$2 sm:$0xff]  ;;  %v7948_v57 = vld [vmem:[%s11456_s3 + $0x50] sm:$0xff]  }
 0x1b1   : > { %v9988_v32 = vadd.f32 %v3926_v16, %v3697_v36  ;;  %v1658_v26 = vadd.f32 %v1546_v40, %v1317_v1  ;;  %v1887_v13 = vmul.f32 %v9833_v58, %v1770_v25  ;;  %v2226_v15 = vmul.f32 %v9888_v51, %v2108_v45  ;;  %v908_v16 = vpop.permute.xlu1 %907  ;;  %v1203_v36 = vld [vmem:[#allocation2 + $0x228] sm:$0xff]  ;;  %7574 = vmatprep.subr.bf16.mxu0 %v7948_v57 }
 0x1b2   : > { %v9992_v41 = vadd.f32 %v1547_v53, %v1318_v14  ;;  %v2337_v61 = vadd.f32 %v2225_v27, %v9911_v5  ;;  %v2566_v44 = vmul.f32 %v9860_v54, %v1429_v42  ;;  %v2906_v2 = vmul.f32 %v9899_v12, %v1769_v4  ;;  %1111 = vst.msk [vmem:[#allocation2 + $0x2e9] sm:$0xff] %vm226_vm0, %v908_v16  ;;  %v3475_v16 = vld [vmem:[#allocation2 + $0x239] sm:$0xf] }
 0x1b3   : > { %v9997_v10 = vadd.f32 %v1886_v56, %v1657_v37  ;;  %v2338_v49 = vadd.f32 %v2226_v15, %v1996_v21  ;;  %v3246_v18 = vmul.f32 %v9943_v23, %v1200_v24  ;;  %v3247_v46 = vmul.f32 %v9943_v23, %v3129_v0  ;;  %v1431_v21 = vld [vmem:[#allocation2 + $0x221] sm:$0xff]  ;;  %7575 = vmatpush3.bf16.msra.mxu0 %v7948_v57  ;;  %v2795_v57 = vld [vmem:[#allocation2 + $0x23a] sm:$0xf] }
 0x1b4   : > { %v10001_v22 = vadd.f32 %v1887_v13, %v1658_v26  ;;  %v2678_v20 = vadd.f32 %v2566_v44, %v2337_v61  ;;  %v2907_v5 = vmul.f32 %v9899_v12, %v1770_v25  ;;  %v3927_v43 = vmul.f32 %v9962_v28, %v1769_v4  ;;  %v1772_v56 = vld [vmem:[#allocation2 + $0x222] sm:$0xff] }
 0x1b5   : > { %v10005_v63 = vadd.f32 %v2906_v2, %v2677_v7  ;;  %v3358_v60 = vadd.f32 %v3246_v18, %v9920_v52  ;;  %v3359_v37 = vadd.f32 %v3247_v46, %v3016_v59  ;;  %v3587_v11 = vmul.f32 %v9954_v55, %v1429_v42  ;;  %v903_v52 = vpop.permute.xlu0 %902  ;;  %v7949_v42 = vld [vmem:[%s11456_s3 + $0x58] sm:$0xff]   ;;  %v918_v26 = vpop.permute.xlu1 %917 }
 0x1b6   : > { %v10012_v53 = vadd.f32 %v2567_v39, %v2338_v49  ;;  %v3928_v24 = vmul.f32 %v9962_v28, %v1770_v25  ;;  %v4338_v50 = vmax.f32 %v4235_v29, %v4291_v9  ;;  %v4339_v4 = vmax.f32 %v4237_v33, %v4293_v47  ;;  %1110 = vst.msk [vmem:[#allocation2 + $0x2e1] sm:$0xff] %vm226_vm0, %v903_v52 }
 0x1b7   : > { %v10019_v45 = vadd.f32 %v2907_v5, %v2678_v20  ;;  %v3699_v7 = vadd.f32 %v3587_v11, %v3358_v60  ;;  %v3700_v1 = vadd.f32 %v3588_v31, %v3359_v37  ;;  %v10021_v14 = vadd.f32 %v3927_v43, %v3698_v30  ;;  %7576 = vmatprep.subr.bf16.mxu0 %v7949_v42  ;;  %v1434_v20 = vld [vmem:[#allocation2 + $0x239] sm:$0xf] }
 0x1b8   : > { %v4373_v39 = vadd.f32 %v9800_v6, %v4338_v50  ;;  %v4374_v25 = vadd.f32 %v9800_v6, %v4339_v4  ;;  %v1549_v40 = vmul.f32 %v9807_v19, %v1432_v48  ;;  %v1319_v59 = vmul.f32 %v9813_v17, %v1202_v8  ;;  %1113 = vst.msk [vmem:[#allocation2 + $0x2f9] sm:$0xf] %vm1024_vm2, %v918_v26  ;;  %v1775_v5 = vld [vmem:[#allocation2 + $0x23a] sm:$0xf] }
 0x1b9   : > { %v2569_v27 = vmul.f32 %v9860_v54, %v1432_v48  ;;  %v10030_v0 = vmul.f32 %v9954_v55, %v1432_v48  ;;  %v1320_v31 = vmul.f32 %v9813_v17, %v1203_v36  ;;  %v1548_v30 = vmul.f32 %v9807_v19, %v1431_v21  ;;  %v913_v2 = vpop.permute.xlu0 %912  ;;  %v2454_v43 = vld [vmem:[#allocation2 + $0x239] sm:$0xf]  ;;  %7577 = vmatpush3.bf16.msra.mxu0 %v7949_v42 }
 0x1ba   : > { %v10034_v13 = vadd.f32 %v3928_v24, %v3699_v7  ;;  %v4401_v15 = vmax.f32 %v4373_v39, 0.0  ;;  %v4402_v61 = vmax.f32 %v4374_v25, 0.0  ;;  %v2227_v44 = vmul.f32 %v9888_v51, %v1202_v8  ;;  %1112 = vst.msk [vmem:[#allocation2 + $0x2f1] sm:$0xff] %vm226_vm0, %v913_v2  ;;  %v3816_v4 = vld [vmem:[#allocation2 + $0x23a] sm:$0xf]  ;;  %v1433_v39 = vld [vmem:[#allocation2 + $0x231] sm:$0xff] }
 0x1bb   : > { %v10039_v29 = vadd.f32 %v9977_v34, %v3700_v1  ;;  %v1660_v9 = vadd.f32 %v1548_v30, %v1319_v59  ;;  %v1889_v49 = vmul.f32 %v9833_v58, %v1772_v56  ;;  %v2228_v18 = vmul.f32 %v9888_v51, %v1203_v36  ;;  %v1205_v1 = vld [vmem:[#allocation2 + $0x238] sm:$0xf]  ;;  %v1773_v25 = vld [vmem:[#allocation2 + $0x22a] sm:$0xff] }
 0x1bc   : > { %4463 = vst.msk [vmem:[#allocation4 + $0x51] sm:$0xff] %vm226_vm0, %v4401_v15  ;;  %v2339_v46 = vadd.f32 %v2227_v44, %v9948_v38  ;;  %v2568_v33 = vmul.f32 %v9860_v54, %v1431_v21  ;;  %v3248_v47 = vmul.f32 %v9943_v23, %v1202_v8  ;;  %v3249_v34 = vmul.f32 %v9943_v23, %v1203_v36  ;;  %v1204_v36 = vld [vmem:[#allocation2 + $0x230] sm:$0xff] }
 0x1bd   : > { %4464 = vst.msk [vmem:[#allocation4 + $0x59] sm:$0x3f] %vm230_vm1, %v4402_v61  ;;  %v1661_v60 = vadd.f32 %v1549_v40, %v1320_v31  ;;  %v10050_v37 = vadd.f32 %v1889_v49, %v1660_v9  ;;  %v2340_v11 = vadd.f32 %v2228_v18, %v9997_v10  ;;  %v2909_v48 = vmul.f32 %v9899_v12, %v1772_v56  ;;  %v923_v31 = vpop.permute.xlu0 %922  ;;  %v1774_v44 = vld [vmem:[#allocation2 + $0x232] sm:$0xff] }
 0x1be   : > { %v2680_v38 = vadd.f32 %v2568_v33, %v2339_v46  ;;  %v3360_v24 = vadd.f32 %v3248_v47, %v9966_v62  ;;  %v3589_v8 = vmul.f32 %v9954_v55, %v1431_v21  ;;  %v3930_v50 = vmul.f32 %v9962_v28, %v1772_v56  ;;  %v2112_v56 = vld [vmem:[#allocation2 + $0x238] sm:$0xf]  ;;  %1114 = vst.msk [vmem:[#allocation2 + $0x301] sm:$0xff] %vm226_vm0, %v923_v31 }
 0x1bf   : > { %v3361_v52 = vadd.f32 %v3249_v34, %v10005_v63  ;;  %v1551_v42 = vmul.f32 %v9807_v19, %v1434_v20  ;;  %v10060_v7 = vmul.f32 %v9833_v58, %v1775_v5  ;;  %v2571_v10 = vmul.f32 %v9860_v54, %v2454_v43  ;;  %v928_v63 = vpop.permute.xlu1 %927 }
 0x1c0   : > { %v10063_v40 = vadd.f32 %v2909_v48, %v2680_v38  ;;  %v3701_v62 = vadd.f32 %v3589_v8, %v3360_v24  ;;  %v10066_v21 = vmul.f32 %v9899_v12, %v2795_v57  ;;  %v3592_v59 = vmul.f32 %v9954_v55, %v3475_v16  ;;  %1115 = vst.msk [vmem:[#allocation2 + $0x309] sm:$0xff] %vm226_vm0, %v928_v63  ;;  %v1435_v63 = vld [vmem:[#allocation2 + $0x241] sm:$0xff] }
 0x1c1   : > { %v10070_v30 = vmul.f32 %v9962_v28, %v3816_v4  ;;  %v2000_v26 = vadd.f32 %v9969_v3, %v9992_v41  ;;  %v2681_v15 = vadd.f32 %v2569_v27, %v2340_v11  ;;  %v1321_v61 = vmul.f32 %v9813_v17, %v1204_v36  ;;  %v3133_v11 = vld [vmem:[#allocation2 + $0x238] sm:$0xf] }
 0x1c2   : > { %v4042_v2 = vadd.f32 %v3930_v50, %v3701_v62  ;;  %v1322_v9 = vmul.f32 %v9813_v17, %v1205_v1  ;;  %v1550_v49 = vmul.f32 %v9807_v19, %v1433_v39  ;;  %v1890_v18 = vmul.f32 %v9833_v58, %v1773_v25  ;;  %v1206_v1 = vld [vmem:[#allocation2 + $0x240] sm:$0xff] }
 0x1c3   : > { %v4539_v46 = vld [vmem:[#allocation4 + $0x51] sm:$0xff]  ;;  %v3020_v3 = vadd.f32 %v9973_v35, %v10012_v53  ;;  %v3702_v41 = vadd.f32 %v10030_v0, %v3361_v52  ;;  %v2229_v27 = vmul.f32 %v9888_v51, %v1204_v36  ;;  %v2230_v47 = vmul.f32 %v9888_v51, %v2112_v56  ;;  %v938_v53 = vpop.permute.xlu1 %937  ;;  %v933_v0 = vpop.permute.xlu0 %932  ;;  %v1436_v52 = vld [vmem:[#allocation2 + $0x249] sm:$0xff] }
 0x1c4   : > { %v4540_v33 = vld [vmem:[#allocation4 + $0x59] sm:$0xff]  ;;  %v4156_v20 = vmax.f32 %v9988_v32, %v4042_v2  ;;  %v1662_v5 = vadd.f32 %v1550_v49, %v1321_v61  ;;  %v1891_v43 = vmul.f32 %v9833_v58, %v1774_v44  ;;  %v2570_v16 = vmul.f32 %v9860_v54, %v1433_v39  ;;  %1117 = vst.msk [vmem:[#allocation2 + $0x319] sm:$0xf] %vm1024_vm2, %v938_v53  ;;  %v1207_v56 = vld [vmem:[#allocation2 + $0x248] sm:$0xff] }
 0x1c5   : > { %v4562_v34 = vpack.c.bf16 %v4540_v33, %v4539_v46  ;;  %v2341_v48 = vadd.f32 %v2229_v27, %v10001_v22  ;;  %v2342_v57 = vadd.f32 %v2230_v47, %v2000_v26  ;;  %v2910_v35 = vmul.f32 %v9899_v12, %v1773_v25  ;;  %1116 = vst.msk [vmem:[#allocation2 + $0x311] sm:$0xff] %vm226_vm0, %v933_v0  ;;  %v1776_v46 = vld [vmem:[#allocation2 + $0x242] sm:$0xff]  ;;  %v2458_v53 = vld [vmem:[#allocation2 + $0x259] sm:$0xf] }
 0x1c6   : > { %4161 = vst.msk [vmem:[#allocation3 + $0xe0] sm:$0xff] %vm226_vm0, %v4156_v20  ;;  %v10093_v32 = vadd.f32 %v1551_v42, %v1322_v9  ;;  %v2002_v38 = vadd.f32 %v1890_v18, %v1661_v60  ;;  %v3250_v24 = vmul.f32 %v9943_v23, %v1204_v36  ;;  %v10098_v22 = vadd.f32 %v1891_v43, %v1662_v5  ;;  %v2799_v0 = vld [vmem:[#allocation2 + $0x25a] sm:$0xf] }
 0x1c7   : > { %7427 = vmatmul.mubr.msk.bf16.gmra.mrb[8].mxu1 %vm226_vm0, %v4562_v34  ;;  %7554 = vmatprep.mubr.msk.bf16.mxu0 %vm226_vm0, %v4562_v34  ;;  %v2682_v8 = vadd.f32 %v2570_v16, %v2341_v48  ;;  %v2911_v50 = vmul.f32 %v9899_v12, %v1774_v44  ;;  %v3251_v4 = vmul.f32 %v9943_v23, %v3133_v11  ;;  %v1438_v11 = vld [vmem:[#allocation2 + $0x259] sm:$0xf] }
 0x1c8   : > { %v10102_v62 = vadd.f32 %v2571_v10, %v2342_v57  ;;  %v3362_v42 = vadd.f32 %v3250_v24, %v10019_v45  ;;  %v3591_v60 = vmul.f32 %v9954_v55, %v1433_v39  ;;  %v3931_v36 = vmul.f32 %v9962_v28, %v1773_v25 }
 0x1c9   : > { %v3022_v31 = vadd.f32 %v2910_v35, %v2681_v15  ;;  %v10107_v26 = vadd.f32 %v2911_v50, %v2682_v8  ;;  %v3363_v61 = vadd.f32 %v3251_v4, %v3020_v3  ;;  %v3932_v2 = vmul.f32 %v9962_v28, %v1774_v44  ;;  %v1779_v35 = vld [vmem:[#allocation2 + $0x25a] sm:$0xf] }
 0x1ca   : > { %v3703_v9 = vadd.f32 %v3591_v60, %v3362_v42  ;;  %v4043_v49 = vadd.f32 %v3931_v36, %v3702_v41  ;;  %v1553_v18 = vmul.f32 %v9807_v19, %v1436_v52  ;;  %v1323_v10 = vmul.f32 %v9813_v17, %v1206_v1  ;;  %v3479_v50 = vld [vmem:[#allocation2 + $0x259] sm:$0xf]  ;;  %v1208_v42 = vld [vmem:[#allocation2 + $0x250] sm:$0xff] }
 0x1cb   : > { %v3704_v45 = vadd.f32 %v3592_v59, %v3363_v61  ;;  %v2573_v39 = vmul.f32 %v9860_v54, %v1436_v52  ;;  %v1324_v25 = vmul.f32 %v9813_v17, %v1207_v56  ;;  %v1552_v33 = vmul.f32 %v9807_v19, %v1435_v63  ;;  %v3820_v4 = vld [vmem:[#allocation2 + $0x25a] sm:$0xf]  ;;  %v1437_v36 = vld [vmem:[#allocation2 + $0x251] sm:$0xff] }
 0x1cc   : > { %v4044_v15 = vadd.f32 %v3932_v2, %v3703_v9  ;;  %v4157_v27 = vmax.f32 %v10021_v14, %v4043_v49  ;;  %v2231_v3 = vmul.f32 %v9888_v51, %v1206_v1  ;;  %v2232_v44 = vmul.f32 %v9888_v51, %v1207_v56  ;;  %v1209_v60 = vld [vmem:[#allocation2 + $0x258] sm:$0xf]  ;;  %v1777_v9 = vld [vmem:[#allocation2 + $0x24a] sm:$0xff] }
 0x1cd   : > { %v4045_v41 = vadd.f32 %v10070_v30, %v3704_v45  ;;  %v3594_v47 = vmul.f32 %v9954_v55, %v1436_v52  ;;  %v1664_v34 = vadd.f32 %v1552_v33, %v1323_v10  ;;  %v1893_v59 = vmul.f32 %v9833_v58, %v1776_v46  ;;  %v1778_v10 = vld [vmem:[#allocation2 + $0x252] sm:$0xff] }
 0x1ce   : > { %v4158_v20 = vmax.f32 %v10034_v13, %v4044_v15  ;;  %4162 = vst.msk [vmem:[#allocation3 + $0xe8] sm:$0xff] %vm226_vm0, %v4157_v27  ;;  %v1665_v5 = vadd.f32 %v1553_v18, %v1324_v25  ;;  %v2343_v43 = vadd.f32 %v2231_v3, %v10050_v37  ;;  %v2572_v14 = vmul.f32 %v9860_v54, %v1435_v63 }
 0x1cf   : > { %v4159_v48 = vmax.f32 %v10039_v29, %v4045_v41  ;;  %v2344_v57 = vadd.f32 %v2232_v44, %v2002_v38  ;;  %v3252_v30 = vmul.f32 %v9943_v23, %v1206_v1  ;;  %v3253_v16 = vmul.f32 %v9943_v23, %v1207_v56 }
 0x1d0   : > { %4163 = vst.msk [vmem:[#allocation3 + $0xf0] sm:$0xff] %vm226_vm0, %v4158_v20  ;;  %v10129_v13 = vadd.f32 %v1893_v59, %v1664_v34  ;;  %v2684_v24 = vadd.f32 %v2572_v14, %v2343_v43  ;;  %v2913_v37 = vmul.f32 %v9899_v12, %v1776_v46  ;;  %v3593_v8 = vmul.f32 %v9954_v55, %v1435_v63  ;;  %v3137_v34 = vld [vmem:[#allocation2 + $0x258] sm:$0xf] }
 0x1d1   : > { %4164 = vst.msk [vmem:[#allocation3 + $0xf8] sm:$0xf] %vm1024_vm2, %v4159_v48  ;;  %v3364_v29 = vadd.f32 %v3252_v30, %v10063_v40  ;;  %v3365_v38 = vadd.f32 %v3253_v16, %v3022_v31  ;;  %v3934_v52 = vmul.f32 %v9962_v28, %v1776_v46  ;;  %v1555_v1 = vmul.f32 %v9807_v19, %v1438_v11  ;;  %v2116_v46 = vld [vmem:[#allocation2 + $0x258] sm:$0xf] }
 0x1d2   : > { %v10137_v56 = vadd.f32 %v2913_v37, %v2684_v24  ;;  %v10140_v61 = vmul.f32 %v9833_v58, %v1779_v35  ;;  %v2575_v63 = vmul.f32 %v9860_v54, %v2458_v53  ;;  %v10144_v2 = vmul.f32 %v9899_v12, %v2799_v0  ;;  %v4241_v16 = vld [vmem:[#allocation3 + $0xb0] ss:$2 sm:$0x3f]  ;;  %v4297_v35 = vld [vmem:[#allocation3 + $0xb1] ss:$2 sm:$0x3f] }
 0x1d3   : > { %v3705_v40 = vadd.f32 %v3593_v8, %v3364_v29  ;;  %v3596_v31 = vmul.f32 %v9954_v55, %v3479_v50  ;;  %v10148_v49 = vmul.f32 %v9962_v28, %v3820_v4  ;;  %v2004_v18 = vadd.f32 %v10060_v7, %v10093_v32  ;;  %v1440_v4 = vld [vmem:[#allocation2 + $0x269] sm:$0xff]  ;;  %v1210_v29 = vld [vmem:[#allocation2 + $0x260] sm:$0xff] }
 0x1d4   : > { %v2685_v45 = vadd.f32 %v2573_v39, %v2344_v57  ;;  %v1325_v25 = vmul.f32 %v9813_v17, %v1208_v42  ;;  %v1326_v33 = vmul.f32 %v9813_v17, %v1209_v60  ;;  %v1554_v15 = vmul.f32 %v9807_v19, %v1437_v36  ;;  %v1211_v60 = vld [vmem:[#allocation2 + $0x268] sm:$0xff] }
 0x1d5   : > { %v3024_v27 = vadd.f32 %v10066_v21, %v10102_v62  ;;  %v3706_v3 = vadd.f32 %v3594_v47, %v3365_v38  ;;  %v1894_v44 = vmul.f32 %v9833_v58, %v1777_v9  ;;  %v2233_v41 = vmul.f32 %v9888_v51, %v1208_v42  ;;  %v4239_v62 = vld [vmem:[#allocation3 + $0xa0] ss:$2 sm:$0xff]  ;;  %v4295_v47 = vld [vmem:[#allocation3 + $0xa1] ss:$2 sm:$0xff] }
 0x1d6   : > { %v10159_v59 = vadd.f32 %v3934_v52, %v3705_v40  ;;  %v1666_v7 = vadd.f32 %v1554_v15, %v1325_v25  ;;  %v1895_v32 = vmul.f32 %v9833_v58, %v1778_v10  ;;  %v2234_v39 = vmul.f32 %v9888_v51, %v2116_v46  ;;  %v1439_v40 = vld [vmem:[#allocation2 + $0x261] sm:$0xff]  ;;  %v943_v46 = vpop.permute.xlu0 %942 }
 0x1d7   : > { %v10163_v20 = vadd.f32 %v1555_v1, %v1326_v33  ;;  %v2345_v43 = vadd.f32 %v2233_v41, %v10098_v22  ;;  %v2574_v14 = vmul.f32 %v9860_v54, %v1437_v36  ;;  %v2914_v21 = vmul.f32 %v9899_v12, %v1777_v9  ;;  %1118 = vst.msk [vmem:[#allocation2 + $0x321] sm:$0xff] %vm226_vm0, %v943_v46  ;;  %v1780_v15 = vld [vmem:[#allocation2 + $0x262] sm:$0xff] }
 0x1d8   : > { %v2006_v11 = vadd.f32 %v1894_v44, %v1665_v5  ;;  %v2346_v48 = vadd.f32 %v2234_v39, %v2004_v18  ;;  %v3254_v57 = vmul.f32 %v9943_v23, %v1208_v42  ;;  %v3255_v30 = vmul.f32 %v9943_v23, %v3137_v34  ;;  %v948_v18 = vpop.permute.xlu1 %947 }
 0x1d9   : > { %v10170_v53 = vadd.f32 %v1895_v32, %v1666_v7  ;;  %v2686_v0 = vadd.f32 %v2574_v14, %v2345_v43  ;;  %v2915_v24 = vmul.f32 %v9899_v12, %v1778_v10  ;;  %v3935_v22 = vmul.f32 %v9962_v28, %v1777_v9  ;;  %1119 = vst.msk [vmem:[#allocation2 + $0x329] sm:$0xff] %vm226_vm0, %v948_v18 }
 0x1da   : > { %v3026_v37 = vadd.f32 %v2914_v21, %v2685_v45  ;;  %v3366_v8 = vadd.f32 %v3254_v57, %v10107_v26  ;;  %v3367_v50 = vadd.f32 %v3255_v30, %v3024_v27  ;;  %v3595_v5 = vmul.f32 %v9954_v55, %v1437_v36  ;;  %v953_v39 = vpop.permute.xlu0 %952  ;;  %v1442_v30 = vld [vmem:[#allocation2 + $0x279] sm:$0xf] }
 0x1db   : > { %v10176_v38 = vadd.f32 %v2575_v63, %v2346_v48  ;;  %v3936_v52 = vmul.f32 %v9962_v28, %v1778_v10  ;;  %v4340_v1 = vmax.f32 %v4239_v62, %v4295_v47  ;;  %v4341_v42 = vmax.f32 %v4241_v16, %v4297_v35  ;;  %1120 = vst.msk [vmem:[#allocation2 + $0x331] sm:$0xff] %vm226_vm0, %v953_v39  ;;  %v1783_v16 = vld [vmem:[#allocation2 + $0x27a] sm:$0xf] }
 0x1dc   : > { %v10179_v25 = vadd.f32 %v2915_v24, %v2686_v0  ;;  %v3707_v9 = vadd.f32 %v3595_v5, %v3366_v8  ;;  %v3708_v45 = vadd.f32 %v3596_v31, %v3367_v50  ;;  %v10181_v26 = vadd.f32 %v3935_v22, %v3706_v3  ;;  %v958_v32 = vpop.permute.xlu1 %957  ;;  %v2462_v35 = vld [vmem:[#allocation2 + $0x279] sm:$0xf] }
 0x1dd   : > { %v4375_v36 = vadd.f32 %v9800_v6, %v4340_v1  ;;  %v4376_v63 = vadd.f32 %v9800_v6, %v4341_v42  ;;  %v1557_v10 = vmul.f32 %v9807_v19, %v1440_v4  ;;  %v1327_v33 = vmul.f32 %v9813_v17, %v1210_v29  ;;  %1121 = vst.msk [vmem:[#allocation2 + $0x339] sm:$0xf] %vm1024_vm2, %v958_v32  ;;  %v2803_v50 = vld [vmem:[#allocation2 + $0x27a] sm:$0xf]  ;;  %v1212_v42 = vld [vmem:[#allocation2 + $0x270] sm:$0xff] }
 0x1de   : > { %v2577_v27 = vmul.f32 %v9860_v54, %v1440_v4  ;;  %v10191_v44 = vmul.f32 %v9954_v55, %v1440_v4  ;;  %v1328_v31 = vmul.f32 %v9813_v17, %v1211_v60  ;;  %v1556_v3 = vmul.f32 %v9807_v19, %v1439_v40  ;;  %v3483_v5 = vld [vmem:[#allocation2 + $0x279] sm:$0xf] }
 0x1df   : > { %v10195_v41 = vadd.f32 %v3936_v52, %v3707_v9  ;;  %v4403_v34 = vmax.f32 %v4375_v36, 0.0  ;;  %v4404_v7 = vmax.f32 %v4376_v63, 0.0  ;;  %v2235_v6 = vmul.f32 %v9888_v51, %v1210_v29  ;;  %v3824_v1 = vld [vmem:[#allocation2 + $0x27a] sm:$0xf]  ;;  %v1781_v36 = vld [vmem:[#allocation2 + $0x26a] sm:$0xff] }
 0x1e0   : > { %v10199_v43 = vadd.f32 %v10148_v49, %v3708_v45  ;;  %v1668_v14 = vadd.f32 %v1556_v3, %v1327_v33  ;;  %v1897_v21 = vmul.f32 %v9833_v58, %v1780_v15  ;;  %v2236_v62 = vmul.f32 %v9888_v51, %v1211_v60  ;;  %v1213_v9 = vld [vmem:[#allocation2 + $0x278] sm:$0xf] }
 0x1e1   : > { %4465 = vst.msk [vmem:[#allocation4 + $0x61] sm:$0xff] %vm226_vm0, %v4403_v34  ;;  %v2347_v47 = vadd.f32 %v2235_v6, %v10129_v13  ;;  %v2576_v48 = vmul.f32 %v9860_v54, %v1439_v40  ;;  %v3256_v49 = vmul.f32 %v9943_v23, %v1210_v29  ;;  %v3257_v57 = vmul.f32 %v9943_v23, %v1211_v60  ;;  %v1441_v45 = vld [vmem:[#allocation2 + $0x271] sm:$0xff]  ;;  %v963_v6 = vpop.permute.xlu0 %962 }
 0x1e2   : > { %4466 = vst.msk [vmem:[#allocation4 + $0x69] sm:$0x3f] %vm230_vm1, %v4404_v7  ;;  %v1669_v0 = vadd.f32 %v1557_v10, %v1328_v31  ;;  %v10211_v24 = vadd.f32 %v1897_v21, %v1668_v14  ;;  %v2348_v22 = vadd.f32 %v2236_v62, %v2006_v11  ;;  %v2917_v8 = vmul.f32 %v9899_v12, %v1780_v15  ;;  %v1782_v34 = vld [vmem:[#allocation2 + $0x272] sm:$0xff]  ;;  %v968_v7 = vpop.permute.xlu1 %967 }
 0x1e3   : > { %v2688_v4 = vadd.f32 %v2576_v48, %v2347_v47  ;;  %v3368_v13 = vadd.f32 %v3256_v49, %v10137_v56  ;;  %v3597_v52 = vmul.f32 %v9954_v55, %v1439_v40  ;;  %v3938_v29 = vmul.f32 %v9962_v28, %v1780_v15  ;;  %1123 = vst.msk [vmem:[#allocation2 + $0x349] sm:$0xff] %vm226_vm0, %v968_v7 }
 0x1e4   : > { %v3369_v60 = vadd.f32 %v3257_v57, %v3026_v37  ;;  %v1559_v18 = vmul.f32 %v9807_v19, %v1442_v30  ;;  %v10219_v46 = vmul.f32 %v9833_v58, %v1783_v16  ;;  %v2579_v11 = vmul.f32 %v9860_v54, %v2462_v35  ;;  %v2120_v37 = vld [vmem:[#allocation2 + $0x278] sm:$0xf]  ;;  %1122 = vst.msk [vmem:[#allocation2 + $0x341] sm:$0xff] %vm226_vm0, %v963_v6 }
 0x1e5   : > { %v10222_v63 = vadd.f32 %v2917_v8, %v2688_v4  ;;  %v3709_v56 = vadd.f32 %v3597_v52, %v3368_v13  ;;  %v10225_v40 = vmul.f32 %v9899_v12, %v2803_v50  ;;  %v10228_v10 = vmul.f32 %v9954_v55, %v3483_v5  ;;  %v3141_v30 = vld [vmem:[#allocation2 + $0x278] sm:$0xf]  ;;  %v1444_v13 = vld [vmem:[#allocation2 + $0x289] sm:$0xff]  ;;  %v1214_v52 = vld [vmem:[#allocation2 + $0x280] sm:$0xff] }
 0x1e6   : > { %v10231_v33 = vmul.f32 %v9962_v28, %v3824_v1  ;;  %v2008_v15 = vadd.f32 %v10140_v61, %v10163_v20  ;;  %v2689_v31 = vadd.f32 %v2577_v27, %v2348_v22  ;;  %v1329_v3 = vmul.f32 %v9813_v17, %v1212_v42 }
 0x1e7   : > { %v4050_v32 = vadd.f32 %v3938_v29, %v3709_v56  ;;  %v1330_v39 = vmul.f32 %v9813_v17, %v1213_v9  ;;  %v1558_v14 = vmul.f32 %v9807_v19, %v1441_v45  ;;  %v1898_v21 = vmul.f32 %v9833_v58, %v1781_v36 }
 0x1e8   : > { %v4541_v62 = vld [vmem:[#allocation4 + $0x61] sm:$0xff]  ;;  %v3028_v61 = vadd.f32 %v10144_v2, %v10176_v38  ;;  %v3710_v20 = vadd.f32 %v10191_v44, %v3369_v60  ;;  %v2237_v27 = vmul.f32 %v9888_v51, %v1212_v42  ;;  %v2238_v48 = vmul.f32 %v9888_v51, %v2120_v37  ;;  %v978_v38 = vpop.permute.xlu1 %977  ;;  %v973_v44 = vpop.permute.xlu0 %972 }
 0x1e9   : > { %v4542_v47 = vld [vmem:[#allocation4 + $0x69] sm:$0xff]  ;;  %v4165_v19 = vmax.f32 %v10159_v59, %v4050_v32  ;;  %v1670_v49 = vadd.f32 %v1558_v14, %v1329_v3  ;;  %v1899_v57 = vmul.f32 %v9833_v58, %v1782_v34  ;;  %v2578_v22 = vmul.f32 %v9860_v54, %v1441_v45  ;;  %1125 = vst.msk [vmem:[#allocation2 + $0x359] sm:$0xf] %vm1024_vm2, %v978_v38 }
 0x1ea   : > { %v4563_v17 = vpack.c.bf16 %v4542_v47, %v4541_v62  ;;  %v2349_v16 = vadd.f32 %v2237_v27, %v10170_v53  ;;  %v2350_v35 = vadd.f32 %v2238_v48, %v2008_v15  ;;  %v2918_v2 = vmul.f32 %v9899_v12, %v1781_v36  ;;  %1124 = vst.msk [vmem:[#allocation2 + $0x351] sm:$0xff] %vm226_vm0, %v973_v44  ;;  %v1215_v60 = vld [vmem:[#allocation2 + $0x288] sm:$0xff] }
 0x1eb   : > { %4170 = vst.msk [vmem:[#allocation3 + $0x100] sm:$0xff] %vm226_vm0, %v4165_v19  ;;  %v10254_v59 = vadd.f32 %v1559_v18, %v1330_v39  ;;  %v2010_v8 = vadd.f32 %v1898_v21, %v1669_v0  ;;  %v3258_v58 = vmul.f32 %v9943_v23, %v1212_v42  ;;  %v10259_v53 = vadd.f32 %v1899_v57, %v1670_v49  ;;  %v1443_v18 = vld [vmem:[#allocation2 + $0x281] sm:$0xff]  ;;  %v1446_v19 = vld [vmem:[#allocation2 + $0x299] sm:$0xf] }
 0x1ec   : > { %7430 = vmatprep.mubr.msk.bf16.mxu1 %vm226_vm0, %v4563_v17  ;;  %7555 = vmatmul.mubr.msk.bf16.gmra.mrb[8].mxu0 %vm226_vm0, %v4563_v17  ;;  %v2690_v50 = vadd.f32 %v2578_v22, %v2349_v16  ;;  %v2919_v5 = vmul.f32 %v9899_v12, %v1782_v34  ;;  %v3259_v4 = vmul.f32 %v9943_v23, %v3141_v30  ;;  %v1787_v16 = vld [vmem:[#allocation2 + $0x29a] sm:$0xf] }
 0x1ed   : > { %v10263_v29 = vadd.f32 %v2579_v11, %v2350_v35  ;;  %v3370_v1 = vadd.f32 %v3258_v58, %v10179_v25  ;;  %v3599_v0 = vmul.f32 %v9954_v55, %v1441_v45  ;;  %v3939_v42 = vmul.f32 %v9962_v28, %v1781_v36  ;;  %v10274_v11 = vld [vmem:[%s11454_s1 + $0x1] ss:$0 sm:$0xff]  ;;  %v10280_v45 = vld [vmem:[%s11454_s1] ss:$0 sm:$0xff]  ;;  %v2466_v35 = vld [vmem:[#allocation2 + $0x299] sm:$0xf] }
 0x1ee   : > { %v3030_v9 = vadd.f32 %v2918_v2, %v2689_v31  ;;  %v10268_v56 = vadd.f32 %v2919_v5, %v2690_v50  ;;  %v3371_v37 = vadd.f32 %v3259_v4, %v3028_v61  ;;  %v3940_v15 = vmul.f32 %v9962_v28, %v1782_v34  ;;  %v1784_v31 = vld [vmem:[#allocation2 + $0x282] sm:$0xff]  ;;  %v2807_v22 = vld [vmem:[#allocation2 + $0x29a] sm:$0xf] }
 0x1ef   : > { %v3711_v3 = vadd.f32 %v3599_v0, %v3370_v1  ;;  %v4051_v7 = vadd.f32 %v3939_v42, %v3710_v20  ;;  %v1561_v25 = vmul.f32 %v10274_v11, %v1444_v13  ;;  %v1331_v36 = vmul.f32 %v10280_v45, %v1214_v52  ;;  %v3487_v58 = vld [vmem:[#allocation2 + $0x299] sm:$0xf]  ;;  %v1445_v1 = vld [vmem:[#allocation2 + $0x291] sm:$0xff]  ;;  %v7950_v0 = vld [vmem:[%s11456_s3] sm:$0xff]  }
 0x1f0   : > { %v3712_v6 = vadd.f32 %v10228_v10, %v3371_v37  ;;  %v2581_v34 = vmul.f32 %v9860_v54, %v1444_v13  ;;  %v1332_v32 = vmul.f32 %v10280_v45, %v1215_v60  ;;  %v1560_v39 = vmul.f32 %v10274_v11, %v1443_v18  ;;  %v10295_v54 = vld [vmem:[%s11454_s1 + $0x2] ss:$0 sm:$0xff]  ;;  %v3828_v50 = vld [vmem:[#allocation2 + $0x29a] sm:$0xf]  ;;  %7446 = vmatprep.subr.bf16.mxu1 %v7950_v0 }
 0x1f1   : > { %v4052_v14 = vadd.f32 %v3940_v15, %v3711_v3  ;;  %v4166_v21 = vmax.f32 %v10181_v26, %v4051_v7  ;;  %v2239_v62 = vmul.f32 %v9888_v51, %v1214_v52  ;;  %v2240_v47 = vmul.f32 %v9888_v51, %v1215_v60  ;;  %v10304_v51 = vld [vmem:[%s11454_s1 + $0x5] ss:$0 sm:$0xff]  ;;  %7447 = vmatpush3.bf16.msra.mxu1 %v7950_v0  ;;  %v988_v0 = vpop.permute.xlu1 %987 }
 0x1f2   : > { %v4053_v61 = vadd.f32 %v10231_v33, %v3712_v6  ;;  %v3602_v20 = vmul.f32 %v9954_v55, %v1444_v13  ;;  %v1672_v27 = vadd.f32 %v1560_v39, %v1331_v36  ;;  %v1901_v10 = vmul.f32 %v10295_v54, %v1784_v31  ;;  %v2124_v36 = vld [vmem:[#allocation2 + $0x298] sm:$0xf]  ;;  %1127 = vst.msk [vmem:[#allocation2 + $0x369] sm:$0xff] %vm226_vm0, %v988_v0 }
 0x1f3   : > { %v4167_v48 = vmax.f32 %v10195_v41, %v4052_v14  ;;  %4171 = vst.msk [vmem:[#allocation3 + $0x108] sm:$0xff] %vm226_vm0, %v4166_v21  ;;  %v1673_v26 = vadd.f32 %v1561_v25, %v1332_v32  ;;  %v2351_v17 = vadd.f32 %v2239_v62, %v10211_v24  ;;  %v2580_v33 = vmul.f32 %v10304_v51, %v1443_v18  ;;  %v1786_v25 = vld [vmem:[#allocation2 + $0x292] sm:$0xff] }
 0x1f4   : > { %v4168_v49 = vmax.f32 %v10199_v43, %v4053_v61  ;;  %v2352_v57 = vadd.f32 %v2240_v47, %v2010_v8  ;;  %v3260_v30 = vmul.f32 %v9943_v23, %v1214_v52  ;;  %v3261_v41 = vmul.f32 %v9943_v23, %v1215_v60  ;;  %v1216_v43 = vld [vmem:[#allocation2 + $0x290] sm:$0xff]  ;;  %v1217_v52 = vld [vmem:[#allocation2 + $0x298] sm:$0xf] }
 0x1f5   : > { %4172 = vst.msk [vmem:[#allocation3 + $0x110] sm:$0xff] %vm226_vm0, %v4167_v48  ;;  %v10311_v24 = vadd.f32 %v1901_v10, %v1672_v27  ;;  %v2692_v2 = vadd.f32 %v2580_v33, %v2351_v17  ;;  %v2921_v38 = vmul.f32 %v9899_v12, %v1784_v31  ;;  %v3601_v44 = vmul.f32 %v9954_v55, %v1443_v18  ;;  %v4243_v17 = vld [vmem:[#allocation3 + $0xc0] ss:$2 sm:$0xff]  ;;  %v4299_v33 = vld [vmem:[#allocation3 + $0xc1] ss:$2 sm:$0xff] }
 0x1f6   : > { %4173 = vst.msk [vmem:[#allocation3 + $0x118] sm:$0xf] %vm1024_vm2, %v4168_v49  ;;  %v3372_v8 = vadd.f32 %v3260_v30, %v10222_v63  ;;  %v3373_v5 = vadd.f32 %v3261_v41, %v3030_v9  ;;  %v3942_v4 = vmul.f32 %v9962_v28, %v1784_v31  ;;  %v1563_v13 = vmul.f32 %v10274_v11, %v1446_v19  ;;  %v1785_v9 = vld [vmem:[#allocation2 + $0x28a] sm:$0xff] }
 0x1f7   : > { %v10322_v42 = vadd.f32 %v2921_v38, %v2692_v2  ;;  %v10325_v60 = vmul.f32 %v10295_v54, %v1787_v16  ;;  %v2583_v18 = vmul.f32 %v10304_v51, %v2466_v35  ;;  %v10329_v63 = vmul.f32 %v9899_v12, %v2807_v22  ;;  %v4245_v41 = vld [vmem:[#allocation3 + $0xd0] ss:$2 sm:$0x3f] }
 0x1f8   : > { %v3713_v37 = vadd.f32 %v3601_v44, %v3372_v8  ;;  %v3604_v15 = vmul.f32 %v9954_v55, %v3487_v58  ;;  %v10333_v3 = vmul.f32 %v9962_v28, %v3828_v50  ;;  %v2012_v7 = vadd.f32 %v10219_v46, %v10254_v59  ;;  %v10346_v46 = vld [vmem:[%s11454_s1 + $0x4] ss:$0 sm:$0xff]  ;;  %v1448_v50 = vld [vmem:[#allocation2 + $0x2a9] sm:$0xff] }
 0x1f9   : > { %v2693_v31 = vadd.f32 %v2581_v34, %v2352_v57  ;;  %v1333_v6 = vmul.f32 %v10280_v45, %v1216_v43  ;;  %v1334_v32 = vmul.f32 %v10280_v45, %v1217_v52  ;;  %v1562_v12 = vmul.f32 %v10274_v11, %v1445_v1  ;;  %v3145_v34 = vld [vmem:[#allocation2 + $0x298] sm:$0xf]  ;;  %v1447_v52 = vld [vmem:[#allocation2 + $0x2a1] sm:$0xff] }
 0x1fa   : > { %v3032_v39 = vadd.f32 %v10225_v40, %v10263_v29  ;;  %v3714_v14 = vadd.f32 %v3602_v20, %v3373_v5  ;;  %v1902_v21 = vmul.f32 %v10295_v54, %v1785_v9  ;;  %v2241_v59 = vmul.f32 %v10346_v46, %v1216_v43  ;;  %v10360_v20 = vld [vmem:[%s11454_s1 + $0x6] ss:$0 sm:$0xff] }
 0x1fb   : > { %v10349_v62 = vadd.f32 %v3942_v4, %v3713_v37  ;;  %v1674_v47 = vadd.f32 %v1562_v12, %v1333_v6  ;;  %v1903_v61 = vmul.f32 %v10295_v54, %v1786_v25  ;;  %v2242_v27 = vmul.f32 %v10346_v46, %v2124_v36  ;;  %v983_v37 = vpop.permute.xlu0 %982  ;;  %v10397_v6 = vld [vmem:[%s11454_s1 + $0x9] ss:$0 sm:$0xff] }
 0x1fc   : > { %v10353_v10 = vadd.f32 %v1563_v13, %v1334_v32  ;;  %v2353_v40 = vadd.f32 %v2241_v59, %v10259_v53  ;;  %v2582_v29 = vmul.f32 %v10304_v51, %v1445_v1  ;;  %v2922_v48 = vmul.f32 %v10360_v20, %v1785_v9  ;;  %v4301_v53 = vld [vmem:[#allocation3 + $0xd1] ss:$2 sm:$0x3f]  ;;  %v1219_v13 = vld [vmem:[#allocation2 + $0x2a8] sm:$0xff]  ;;  %1126 = vst.msk [vmem:[#allocation2 + $0x361] sm:$0xff] %vm226_vm0, %v983_v37 }
 0x1fd   : > { %v10363_v19 = vadd.f32 %v1902_v21, %v1673_v26  ;;  %v2354_v49 = vadd.f32 %v2242_v27, %v2012_v7  ;;  %v3262_v57 = vmul.f32 %v9943_v23, %v1216_v43  ;;  %v3263_v30 = vmul.f32 %v9943_v23, %v3145_v34  ;;  %v1218_v43 = vld [vmem:[#allocation2 + $0x2a0] sm:$0xff] }
 0x1fe   : > { %v10367_v16 = vadd.f32 %v1903_v61, %v1674_v47  ;;  %v2694_v35 = vadd.f32 %v2582_v29, %v2353_v40  ;;  %v2923_v22 = vmul.f32 %v10360_v20, %v1786_v25  ;;  %v3943_v2 = vmul.f32 %v9962_v28, %v1785_v9  ;;  %v998_v47 = vpop.permute.xlu1 %997 }
 0x1ff   : > { %v10371_v38 = vadd.f32 %v2922_v48, %v2693_v31  ;;  %v3374_v44 = vadd.f32 %v3262_v57, %v10268_v56  ;;  %v3375_v26 = vadd.f32 %v3263_v30, %v3032_v39  ;;  %v3603_v58 = vmul.f32 %v9954_v55, %v1445_v1  ;;  %v10387_v55 = vld [vmem:[%s11455_s2] ss:$0 sm:$0xff]  ;;  %v993_v61 = vpop.permute.xlu0 %992  ;;  %1129 = vst.msk [vmem:[#allocation2 + $0x379] sm:$0xf] %vm1024_vm2, %v998_v47  ;;  %v1450_v30 = vld [vmem:[#allocation2 + $0x2b9] sm:$0xf] }
 0x200   : > { %v10375_v8 = vadd.f32 %v2583_v18, %v2354_v49  ;;  %v3944_v23 = vmul.f32 %v9962_v28, %v1786_v25  ;;  %v4342_v5 = vmax.f32 %v4243_v17, %v4299_v33  ;;  %v4343_v4 = vmax.f32 %v4245_v41, %v4301_v53  ;;  %1128 = vst.msk [vmem:[#allocation2 + $0x371] sm:$0xff] %vm226_vm0, %v993_v61  ;;  %v1791_v41 = vld [vmem:[#allocation2 + $0x2ba] sm:$0xf] }
 0x201   : > { %v10378_v9 = vadd.f32 %v2923_v22, %v2694_v35  ;;  %v3715_v7 = vadd.f32 %v3603_v58, %v3374_v44  ;;  %v3716_v36 = vadd.f32 %v3604_v15, %v3375_v26  ;;  %v10380_v56 = vadd.f32 %v3943_v2, %v3714_v14  ;;  %v1788_v15 = vld [vmem:[#allocation2 + $0x2a2] sm:$0xff]  ;;  %v2470_v53 = vld [vmem:[#allocation2 + $0x2b9] sm:$0xf] }
 0x202   : > { %v4377_v28 = vadd.f32 %v10387_v55, %v4342_v5  ;;  %v4378_v1 = vadd.f32 %v10387_v55, %v4343_v4  ;;  %v1565_v18 = vmul.f32 %v10274_v11, %v1448_v50  ;;  %v1335_v25 = vmul.f32 %v10280_v45, %v1218_v43  ;;  %v2811_v44 = vld [vmem:[#allocation2 + $0x2ba] sm:$0xf] }
 0x203   : > { %v2585_v31 = vmul.f32 %v10304_v51, %v1448_v50  ;;  %v10400_v32 = vmul.f32 %v10397_v6, %v1448_v50  ;;  %v1336_v12 = vmul.f32 %v10280_v45, %v1219_v13  ;;  %v1564_v39 = vmul.f32 %v10274_v11, %v1447_v52  ;;  %v3491_v26 = vld [vmem:[#allocation2 + $0x2b9] sm:$0xf] }
 0x204   : > { %v10404_v14 = vadd.f32 %v3944_v23, %v3715_v7  ;;  %v4405_v21 = vmax.f32 %v4377_v28, 0.0  ;;  %v4406_v59 = vmax.f32 %v4378_v1, 0.0  ;;  %v2243_v34 = vmul.f32 %v10346_v46, %v1218_v43  ;;  %v3832_v4 = vld [vmem:[#allocation2 + $0x2ba] sm:$0xf] }
 0x205   : > { %v10408_v27 = vadd.f32 %v10333_v3, %v3716_v36  ;;  %v1676_v40 = vadd.f32 %v1564_v39, %v1335_v25  ;;  %v1905_v29 = vmul.f32 %v10295_v54, %v1788_v15  ;;  %v2244_v48 = vmul.f32 %v10346_v46, %v1219_v13  ;;  %v10421_v3 = vld [vmem:[%s11454_s1 + $0x8] ss:$0 sm:$0xff]  ;;  %v1221_v7 = vld [vmem:[#allocation2 + $0x2b8] sm:$0xf]  ;;  %v1789_v36 = vld [vmem:[#allocation2 + $0x2aa] sm:$0xff] }
 0x206   : > { %4467 = vst.msk [vmem:[#allocation4 + $0x71] sm:$0xff] %vm226_vm0, %v4405_v21  ;;  %v2355_v17 = vadd.f32 %v2243_v34, %v10311_v24  ;;  %v2584_v33 = vmul.f32 %v10304_v51, %v1447_v52  ;;  %v3264_v49 = vmul.f32 %v10421_v3, %v1218_v43  ;;  %v3265_v57 = vmul.f32 %v10421_v3, %v1219_v13  ;;  %v10434_v43 = vld [vmem:[%s11454_s1 + $0xa] ss:$0 sm:$0xff]  ;;  %v1220_v13 = vld [vmem:[#allocation2 + $0x2b0] sm:$0xff] }
 0x207   : > { %4468 = vst.msk [vmem:[#allocation4 + $0x79] sm:$0x3f] %vm230_vm1, %v4406_v59  ;;  %v1677_v35 = vadd.f32 %v1565_v18, %v1336_v12  ;;  %v10425_v22 = vadd.f32 %v1905_v29, %v1676_v40  ;;  %v2356_v2 = vadd.f32 %v2244_v48, %v10363_v19  ;;  %v2925_v24 = vmul.f32 %v10360_v20, %v1788_v15  ;;  %v1790_v59 = vld [vmem:[#allocation2 + $0x2b2] sm:$0xff]  ;;  %v1008_v29 = vpop.permute.xlu1 %1007  ;;  %v1003_v48 = vpop.permute.xlu0 %1002 }
 0x208   : > { %v2696_v58 = vadd.f32 %v2584_v33, %v2355_v17  ;;  %v3376_v50 = vadd.f32 %v3264_v49, %v10322_v42  ;;  %v3605_v23 = vmul.f32 %v10397_v6, %v1447_v52  ;;  %v3946_v5 = vmul.f32 %v10434_v43, %v1788_v15  ;;  %v1449_v52 = vld [vmem:[#allocation2 + $0x2b1] sm:$0xff]  ;;  %1131 = vst.msk [vmem:[#allocation2 + $0x389] sm:$0xff] %vm226_vm0, %v1008_v29  ;;  %v1792_v29 = vld [vmem:[#allocation2 + $0x2c2] sm:$0xff] }
 0x209   : > { %v3377_v19 = vadd.f32 %v3265_v57, %v10371_v38  ;;  %v1567_v0 = vmul.f32 %v10274_v11, %v1450_v30  ;;  %v10440_v37 = vmul.f32 %v10295_v54, %v1791_v41  ;;  %v2587_v42 = vmul.f32 %v10304_v51, %v2470_v53  ;;  %v2128_v15 = vld [vmem:[#allocation2 + $0x2b8] sm:$0xf]  ;;  %1130 = vst.msk [vmem:[#allocation2 + $0x381] sm:$0xff] %vm226_vm0, %v1003_v48 }
 0x20a   : > { %v10443_v28 = vadd.f32 %v2925_v24, %v2696_v58  ;;  %v3717_v1 = vadd.f32 %v3605_v23, %v3376_v50  ;;  %v10446_v18 = vmul.f32 %v10360_v20, %v2811_v44  ;;  %v3608_v25 = vmul.f32 %v10397_v6, %v3491_v26 }
 0x20b   : > { %v10450_v38 = vmul.f32 %v10434_v43, %v3832_v4  ;;  %v2016_v12 = vadd.f32 %v10325_v60, %v10353_v10  ;;  %v2697_v39 = vadd.f32 %v2585_v31, %v2356_v2  ;;  %v1337_v21 = vmul.f32 %v10280_v45, %v1220_v13  ;;  %v3149_v2 = vld [vmem:[#allocation2 + $0x2b8] sm:$0xf]  ;;  %v1222_v4 = vld [vmem:[#allocation2 + $0x2c0] sm:$0xff] }
 0x20c   : > { %v4058_v34 = vadd.f32 %v3946_v5, %v3717_v1  ;;  %v1338_v47 = vmul.f32 %v10280_v45, %v1221_v7  ;;  %v1566_v61 = vmul.f32 %v10274_v11, %v1449_v52  ;;  %v1906_v40 = vmul.f32 %v10295_v54, %v1789_v36  ;;  %v1452_v5 = vld [vmem:[#allocation2 + $0x2c9] sm:$0xff] }
 0x20d   : > { %v4543_v17 = vld [vmem:[#allocation4 + $0x71] sm:$0xff]  ;;  %v3036_v49 = vadd.f32 %v10329_v63, %v10375_v8  ;;  %v3718_v60 = vadd.f32 %v10400_v32, %v3377_v19  ;;  %v2245_v10 = vmul.f32 %v10346_v46, %v1220_v13  ;;  %v2246_v31 = vmul.f32 %v10346_v46, %v2128_v15  ;;  %v1451_v15 = vld [vmem:[#allocation2 + $0x2c1] sm:$0xff] }
 0x20e   : > { %v4544_v33 = vld [vmem:[#allocation4 + $0x79] sm:$0xff]  ;;  %v4174_v30 = vmax.f32 %v10349_v62, %v4058_v34  ;;  %v1678_v41 = vadd.f32 %v1566_v61, %v1337_v21  ;;  %v1907_v53 = vmul.f32 %v10295_v54, %v1790_v59  ;;  %v2586_v8 = vmul.f32 %v10304_v51, %v1449_v52 }
 0x20f   : > { %v4564_v57 = vpack.c.bf16 %v4544_v33, %v4543_v17  ;;  %v2357_v24 = vadd.f32 %v2245_v10, %v10367_v16  ;;  %v2358_v63 = vadd.f32 %v2246_v31, %v2016_v12  ;;  %v2926_v32 = vmul.f32 %v10360_v20, %v1789_v36 }
 0x210   : > { %4179 = vst.msk [vmem:[#allocation3 + $0x120] sm:$0xff] %vm226_vm0, %v4174_v30  ;;  %v10473_v44 = vadd.f32 %v1567_v0, %v1338_v47  ;;  %v2018_v62 = vadd.f32 %v1906_v40, %v1677_v35  ;;  %v3266_v26 = vmul.f32 %v10421_v3, %v1220_v13  ;;  %v10476_v58 = vadd.f32 %v1907_v53, %v1678_v41  ;;  %v1223_v35 = vld [vmem:[#allocation2 + $0x2c8] sm:$0xff]  ;;  %v1454_v41 = vld [vmem:[#allocation2 + $0x2d9] sm:$0xf] }
 0x211   : > { %7431 = vmatmul.mubr.msk.bf16.gmra.mrb[12].mxu1 %vm226_vm0, %v4564_v57  ;;  %7558 = vmatprep.mubr.msk.bf16.mxu0 %vm226_vm0, %v4564_v57  ;;  %v2698_v50 = vadd.f32 %v2586_v8, %v2357_v24  ;;  %v2927_v16 = vmul.f32 %v10360_v20, %v1790_v59  ;;  %v3267_v23 = vmul.f32 %v10421_v3, %v3149_v2  ;;  %v2474_v8 = vld [vmem:[#allocation2 + $0x2d9] sm:$0xf] }
 0x212   : > { %v10480_v19 = vadd.f32 %v2587_v42, %v2358_v63  ;;  %v3378_v7 = vadd.f32 %v3266_v26, %v10378_v9  ;;  %v3607_v1 = vmul.f32 %v10397_v6, %v1449_v52  ;;  %v3947_v0 = vmul.f32 %v10434_v43, %v1789_v36  ;;  %v1795_v63 = vld [vmem:[#allocation2 + $0x2da] sm:$0xf] }
 0x213   : > { %v3038_v13 = vadd.f32 %v2926_v32, %v2697_v39  ;;  %v10485_v12 = vadd.f32 %v2927_v16, %v2698_v50  ;;  %v3379_v21 = vadd.f32 %v3267_v23, %v3036_v49  ;;  %v3948_v34 = vmul.f32 %v10434_v43, %v1790_v59  ;;  %v2815_v32 = vld [vmem:[#allocation2 + $0x2da] sm:$0xf] }
 0x214   : > { %v3719_v47 = vadd.f32 %v3607_v1, %v3378_v7  ;;  %v4059_v61 = vadd.f32 %v3947_v0, %v3718_v60  ;;  %v1569_v40 = vmul.f32 %v10274_v11, %v1452_v5  ;;  %v1339_v42 = vmul.f32 %v10280_v45, %v1222_v4  ;;  %v3495_v16 = vld [vmem:[#allocation2 + $0x2d9] sm:$0xf]  ;;  %v1224_v0 = vld [vmem:[#allocation2 + $0x2d0] sm:$0xff] }
 0x215   : > { %v3720_v9 = vadd.f32 %v3608_v25, %v3379_v21  ;;  %v2589_v52 = vmul.f32 %v10304_v51, %v1452_v5  ;;  %v1340_v36 = vmul.f32 %v10280_v45, %v1223_v35  ;;  %v1568_v48 = vmul.f32 %v10274_v11, %v1451_v15  ;;  %v3836_v23 = vld [vmem:[#allocation2 + $0x2da] sm:$0xf]  ;;  %v1453_v21 = vld [vmem:[#allocation2 + $0x2d1] sm:$0xff] }
 0x216   : > { %v4060_v39 = vadd.f32 %v3948_v34, %v3719_v47  ;;  %v4175_v17 = vmax.f32 %v10380_v56, %v4059_v61  ;;  %v2247_v33 = vmul.f32 %v10346_v46, %v1222_v4  ;;  %v2248_v59 = vmul.f32 %v10346_v46, %v1223_v35 }
 0x217   : > { %v4061_v49 = vadd.f32 %v10450_v38, %v3720_v9  ;;  %v3610_v60 = vmul.f32 %v10397_v6, %v1452_v5  ;;  %v1680_v10 = vadd.f32 %v1568_v48, %v1339_v42  ;;  %v1909_v25 = vmul.f32 %v10295_v54, %v1792_v29  ;;  %v1794_v9 = vld [vmem:[#allocation2 + $0x2d2] sm:$0xff] }
 0x218   : > { %v4176_v31 = vmax.f32 %v10404_v14, %v4060_v39  ;;  %4180 = vst.msk [vmem:[#allocation3 + $0x128] sm:$0xff] %vm226_vm0, %v4175_v17  ;;  %v1681_v57 = vadd.f32 %v1569_v40, %v1340_v36  ;;  %v2359_v30 = vadd.f32 %v2247_v33, %v10425_v22  ;;  %v2588_v56 = vmul.f32 %v10304_v51, %v1451_v15  ;;  %v2132_v36 = vld [vmem:[#allocation2 + $0x2d8] sm:$0xf] }
 0x219   : > { %v4177_v53 = vmax.f32 %v10408_v27, %v4061_v49  ;;  %v2360_v2 = vadd.f32 %v2248_v59, %v2018_v62  ;;  %v3268_v38 = vmul.f32 %v10421_v3, %v1222_v4  ;;  %v3269_v24 = vmul.f32 %v10421_v3, %v1223_v35  ;;  %v1018_v27 = vpop.permute.xlu1 %1017  ;;  %v1013_v62 = vpop.permute.xlu0 %1012  ;;  %v1225_v35 = vld [vmem:[#allocation2 + $0x2d8] sm:$0xf] }
 0x21a   : > { %4181 = vst.msk [vmem:[#allocation3 + $0x130] sm:$0xff] %vm226_vm0, %v4176_v31  ;;  %v10507_v14 = vadd.f32 %v1909_v25, %v1680_v10  ;;  %v2700_v26 = vadd.f32 %v2588_v56, %v2359_v30  ;;  %v2929_v22 = vmul.f32 %v10360_v20, %v1792_v29  ;;  %v3609_v50 = vmul.f32 %v10397_v6, %v1451_v15  ;;  %v3153_v31 = vld [vmem:[#allocation2 + $0x2d8] sm:$0xf] }
 0x21b   : > { %4182 = vst.msk [vmem:[#allocation3 + $0x138] sm:$0xf] %vm1024_vm2, %v4177_v53  ;;  %v3380_v5 = vadd.f32 %v3268_v38, %v10443_v28  ;;  %v3381_v4 = vadd.f32 %v3269_v24, %v3038_v13  ;;  %v3950_v7 = vmul.f32 %v10434_v43, %v1792_v29  ;;  %v1571_v1 = vmul.f32 %v10274_v11, %v1454_v41  ;;  %v1793_v13 = vld [vmem:[#allocation2 + $0x2ca] sm:$0xff] }
 0x21c   : > { %1133 = vst.msk [vmem:[#allocation2 + $0x399] sm:$0xf] %vm1024_vm2, %v1018_v27  ;;  %v10517_v15 = vadd.f32 %v2929_v22, %v2700_v26  ;;  %v10520_v34 = vmul.f32 %v10295_v54, %v1795_v63  ;;  %v2591_v47 = vmul.f32 %v10304_v51, %v2474_v8  ;;  %v10524_v28 = vmul.f32 %v10360_v20, %v2815_v32  ;;  %v4249_v8 = vld [vmem:[#allocation3 + $0xf0] ss:$2 sm:$0x3f] }
 0x21d   : > { %1132 = vst.msk [vmem:[#allocation2 + $0x391] sm:$0xff] %vm226_vm0, %v1013_v62  ;;  %v3721_v61 = vadd.f32 %v3609_v50, %v3380_v5  ;;  %v3612_v40 = vmul.f32 %v10397_v6, %v3495_v16  ;;  %v10528_v42 = vmul.f32 %v10434_v43, %v3836_v23  ;;  %v2020_v29 = vadd.f32 %v10440_v37, %v10473_v44  ;;  %v4305_v32 = vld [vmem:[#allocation3 + $0xf1] ss:$2 sm:$0x3f]  ;;  %v1456_v62 = vld [vmem:[#allocation2 + $0x2e9] sm:$0xff] }
 0x21e   : > { %v2701_v48 = vadd.f32 %v2589_v52, %v2360_v2  ;;  %v1341_v39 = vmul.f32 %v10280_v45, %v1224_v0  ;;  %v1342_v17 = vmul.f32 %v10280_v45, %v1225_v35  ;;  %v1570_v33 = vmul.f32 %v10274_v11, %v1453_v21  ;;  %v1226_v35 = vld [vmem:[#allocation2 + $0x2e0] sm:$0xff] }
 0x21f   : > { %v3040_v59 = vadd.f32 %v10446_v18, %v10480_v19  ;;  %v3722_v49 = vadd.f32 %v3610_v60, %v3381_v4  ;;  %v1910_v10 = vmul.f32 %v10295_v54, %v1793_v13  ;;  %v2249_v25 = vmul.f32 %v10346_v46, %v1224_v0  ;;  %v4247_v19 = vld [vmem:[#allocation3 + $0xe0] ss:$2 sm:$0xff]  ;;  %v4303_v60 = vld [vmem:[#allocation3 + $0xe1] ss:$2 sm:$0xff] }
 0x220   : > { %v10539_v30 = vadd.f32 %v3950_v7, %v3721_v61  ;;  %v1682_v37 = vadd.f32 %v1570_v33, %v1341_v39  ;;  %v1911_v44 = vmul.f32 %v10295_v54, %v1794_v9  ;;  %v2250_v52 = vmul.f32 %v10346_v46, %v2132_v36  ;;  %v1227_v61 = vld [vmem:[#allocation2 + $0x2e8] sm:$0xff]  ;;  %v10577_v33 = vld [vmem:[#allocation4 + $0x12] sm:$0xff] }
 0x221   : > { %v10543_v56 = vadd.f32 %v1571_v1, %v1342_v17  ;;  %v2361_v41 = vadd.f32 %v2249_v25, %v10476_v58  ;;  %v2590_v53 = vmul.f32 %v10304_v51, %v1453_v21  ;;  %v2930_v18 = vmul.f32 %v10360_v20, %v1793_v13 }
 0x222   : > { %v2022_v2 = vadd.f32 %v1910_v10, %v1681_v57  ;;  %v2362_v38 = vadd.f32 %v2250_v52, %v2020_v29  ;;  %v3270_v24 = vmul.f32 %v10421_v3, %v1224_v0  ;;  %v3271_v63 = vmul.f32 %v10421_v3, %v3153_v31  ;;  %v10559_v0 = vld [vmem:[#allocation4 + $0x1a] sm:$0xff] }
 0x223   : > { %v10550_v26 = vadd.f32 %v1911_v44, %v1682_v37  ;;  %v2702_v22 = vadd.f32 %v2590_v53, %v2361_v41  ;;  %v2931_v50 = vmul.f32 %v10360_v20, %v1794_v9  ;;  %v3951_v58 = vmul.f32 %v10434_v43, %v1793_v13 }
 0x224   : > { %v3042_v16 = vadd.f32 %v2930_v18, %v2701_v48  ;;  %v3382_v23 = vadd.f32 %v3270_v24, %v10485_v12  ;;  %v3383_v27 = vadd.f32 %v3271_v63, %v3040_v59  ;;  %v3611_v57 = vmul.f32 %v10397_v6, %v1453_v21  ;;  %v1455_v12 = vld [vmem:[#allocation2 + $0x2e1] sm:$0xff] }
 0x225   : > { %v10556_v5 = vadd.f32 %v2591_v47, %v2362_v38  ;;  %v3952_v4 = vmul.f32 %v10434_v43, %v1794_v9  ;;  %v4344_v7 = vmax.f32 %v4247_v19, %v4303_v60  ;;  %v4345_v1 = vmax.f32 %v4249_v8, %v4305_v32  ;;  %v10568_v21 = vld [vmem:[%s11456_s3 + $0x60] sm:$0xff]   ;;  %v7952_v47 = vld [vmem:[%s11456_s3 + $0x8] sm:$0xff]   ;;  %v1458_v32 = vld [vmem:[#allocation2 + $0x2f9] sm:$0xf] }
 0x226   : > { %v10561_v29 = vadd.f32 %v2931_v50, %v2702_v22  ;;  %v3723_v13 = vadd.f32 %v3611_v57, %v3382_v23  ;;  %v3724_v36 = vadd.f32 %v3612_v40, %v3383_v27  ;;  %v10563_v48 = vadd.f32 %v3951_v58, %v3722_v49  ;;  %v1796_v59 = vld [vmem:[#allocation2 + $0x2e2] sm:$0xff]  ;;  %7606 = vmatprep.subr.bf16.mxu0 %v10568_v21  ;;  %v2478_v27 = vld [vmem:[#allocation2 + $0x2f9] sm:$0xf] }
 0x227   : > { %v4379_v9 = vadd.f32 %v10387_v55, %v4344_v7  ;;  %v4380_v39 = vadd.f32 %v10387_v55, %v4345_v1  ;;  %v1573_v17 = vmul.f32 %v10274_v11, %v1456_v62  ;;  %v2593_v40 = vmul.f32 %v10304_v51, %v1456_v62  ;;  %7448 = vmatprep.subr.bf16.mxu1 %v7952_v47  ;;  %v2819_v57 = vld [vmem:[#allocation2 + $0x2fa] sm:$0xf] }
 0x228   : > { %v10580_v49 = vmul.f32 %v10397_v6, %v1456_v62  ;;  %v5824_v10 = vpack.c.bf16 %v10559_v0, %v10577_v33  ;;  %v1343_v25 = vmul.f32 %v10280_v45, %v1226_v35  ;;  %v1344_v31 = vmul.f32 %v10280_v45, %v1227_v61  ;;  %7449 = vmatpush3.bf16.msra.mxu1 %v7952_v47  ;;  %v3499_v62 = vld [vmem:[#allocation2 + $0x2f9] sm:$0xf]  ;;  %v1228_v47 = vld [vmem:[#allocation2 + $0x2f0] sm:$0xff]  ;;  %v1230_v0 = vld [vmem:[#allocation2 + $0x300] sm:$0xff] }
 0x229   : > { %v10587_v37 = vadd.f32 %v3952_v4, %v3723_v13  ;;  %v4407_v44 = vmax.f32 %v4379_v9, 0.0  ;;  %v4408_v52 = vmax.f32 %v4380_v39, 0.0  ;;  %v1572_v41 = vmul.f32 %v10274_v11, %v1455_v12  ;;  %v1229_v9 = vld [vmem:[#allocation2 + $0x2f8] sm:$0xf] }
 0x22a   : > { %v10591_v53 = vadd.f32 %v10528_v42, %v3724_v36  ;;  %v1913_v18 = vmul.f32 %v10295_v54, %v1796_v59  ;;  %v2251_v19 = vmul.f32 %v10346_v46, %v1226_v35  ;;  %v2252_v60 = vmul.f32 %v10346_v46, %v1227_v61  ;;  %v1799_v42 = vld [vmem:[#allocation2 + $0x2fa] sm:$0xf]  ;;  %v1457_v39 = vld [vmem:[#allocation2 + $0x2f1] sm:$0xff] }
 0x22b   : > { %4469 = vst.msk [vmem:[#allocation4 + $0x81] sm:$0xff] %vm226_vm0, %v4407_v44  ;;  %v1684_v38 = vadd.f32 %v1572_v41, %v1343_v25  ;;  %v1685_v24 = vadd.f32 %v1573_v17, %v1344_v31  ;;  %v3272_v63 = vmul.f32 %v10421_v3, %v1226_v35  ;;  %v3273_v8 = vmul.f32 %v10421_v3, %v1227_v61  ;;  %v3840_v61 = vld [vmem:[#allocation2 + $0x2fa] sm:$0xf] }
 0x22c   : > { %4470 = vst.msk [vmem:[#allocation4 + $0x89] sm:$0x3f] %vm230_vm1, %v4408_v52  ;;  %v2363_v22 = vadd.f32 %v2251_v19, %v10507_v14  ;;  %v2364_v50 = vadd.f32 %v2252_v60, %v2022_v2  ;;  %v2592_v58 = vmul.f32 %v10304_v51, %v1455_v12  ;;  %v2933_v23 = vmul.f32 %v10360_v20, %v1796_v59  ;;  %v2136_v31 = vld [vmem:[#allocation2 + $0x2f8] sm:$0xf] }
 0x22d   : > { %v10603_v4 = vadd.f32 %v1913_v18, %v1684_v38  ;;  %v3384_v7 = vadd.f32 %v3272_v63, %v10517_v15  ;;  %v3613_v1 = vmul.f32 %v10397_v6, %v1455_v12  ;;  %v3954_v35 = vmul.f32 %v10434_v43, %v1796_v59  ;;  %v1797_v59 = vld [vmem:[#allocation2 + $0x2ea] sm:$0xff] }
 0x22e   : > { %v2704_v13 = vadd.f32 %v2592_v58, %v2363_v22  ;;  %v3385_v36 = vadd.f32 %v3273_v8, %v3042_v16  ;;  %v1575_v14 = vmul.f32 %v10274_v11, %v1458_v32  ;;  %v10610_v2 = vmul.f32 %v10295_v54, %v1799_v42  ;;  %v7954_v16 = vld [vmem:[%s11456_s3 + $0x20] sm:$0xff]   ;;  %v1798_v8 = vld [vmem:[#allocation2 + $0x2f2] sm:$0xff] }
 0x22f   : > { %v3725_v17 = vadd.f32 %v3613_v1, %v3384_v7  ;;  %v2595_v25 = vmul.f32 %v10304_v51, %v2478_v27  ;;  %v10614_v15 = vmul.f32 %v10360_v20, %v2819_v57  ;;  %v3616_v12 = vmul.f32 %v10397_v6, %v3499_v62  ;;  %7478 = vmatprep.subr.bf16.mxu1 %v7954_v16  ;;  %v3157_v57 = vld [vmem:[#allocation2 + $0x2f8] sm:$0xf]  ;;  %v5798_v16 = vld [vmem:[#allocation4 + $0x22] sm:$0xff] }
 0x230   : > { %v10620_v44 = vadd.f32 %v2933_v23, %v2704_v13  ;;  %v10623_v52 = vmul.f32 %v10434_v43, %v3840_v61  ;;  %v2024_v41 = vadd.f32 %v10520_v34, %v10543_v56  ;;  %v2705_v18 = vadd.f32 %v2593_v40, %v2364_v50 }
 0x231   : > { %v4066_v19 = vadd.f32 %v3954_v35, %v3725_v17  ;;  %v1345_v60 = vmul.f32 %v10280_v45, %v1228_v47  ;;  %v1346_v38 = vmul.f32 %v10280_v45, %v1229_v9  ;;  %v1574_v63 = vmul.f32 %v10274_v11, %v1457_v39  ;;  %v1460_v9 = vld [vmem:[#allocation2 + $0x309] sm:$0xff] }
 0x232   : > { %v4545_v32 = vld [vmem:[#allocation4 + $0x81] sm:$0xff]  ;;  %v3044_v22 = vadd.f32 %v10524_v28, %v10556_v5  ;;  %v1914_v58 = vmul.f32 %v10295_v54, %v1797_v59  ;;  %v2253_v23 = vmul.f32 %v10346_v46, %v1228_v47  ;;  %v2254_v34 = vmul.f32 %v10346_v46, %v2136_v31 }
 0x233   : > { %v4546_v42 = vld [vmem:[#allocation4 + $0x89] sm:$0xff]  ;;  %v4183_v40 = vmax.f32 %v10539_v30, %v4066_v19  ;;  %v3726_v50 = vadd.f32 %v10580_v49, %v3385_v36  ;;  %v1686_v27 = vadd.f32 %v1574_v63, %v1345_v60  ;;  %v1915_v62 = vmul.f32 %v10295_v54, %v1798_v8  ;;  %v5801_v19 = vld [vmem:[#allocation4 + $0x3a] sm:$0xff] }
 0x234   : > { %v4565_v56 = vpack.c.bf16 %v4546_v42, %v4545_v32  ;;  %v2365_v7 = vadd.f32 %v2253_v23, %v10550_v26  ;;  %v2366_v1 = vadd.f32 %v2254_v34, %v2024_v41  ;;  %v2594_v28 = vmul.f32 %v10304_v51, %v1457_v39  ;;  %v5799_v36 = vld [vmem:[#allocation4 + $0x2a] sm:$0xff]  ;;  %v5800_v23 = vld [vmem:[#allocation4 + $0x32] sm:$0xff] }
 0x235   : > { %4188 = vst.msk [vmem:[#allocation3 + $0x140] sm:$0xff] %vm226_vm0, %v4183_v40  ;;  %v10643_v5 = vadd.f32 %v1575_v14, %v1346_v38  ;;  %v2026_v30 = vadd.f32 %v1914_v58, %v1685_v24  ;;  %v2934_v49 = vmul.f32 %v10360_v20, %v1797_v59  ;;  %v10650_v26 = vadd.f32 %v1915_v62, %v1686_v27  ;;  %v1231_v60 = vld [vmem:[#allocation2 + $0x308] sm:$0xff] }
 0x236   : > { %7434 = vmatprep.mubr.msk.bf16.mxu1 %vm226_vm0, %v4565_v56  ;;  %7559 = vmatmul.mubr.msk.bf16.gmra.mrb[12].mxu0 %vm226_vm0, %v4565_v56  ;;  %v2706_v35 = vadd.f32 %v2594_v28, %v2365_v7  ;;  %v3274_v61 = vmul.f32 %v10421_v3, %v1228_v47  ;;  %v3275_v13 = vmul.f32 %v10421_v3, %v3157_v57  ;;  %v1459_v38 = vld [vmem:[#allocation2 + $0x301] sm:$0xff] }
 0x237   : > { %7578 = vmatprep.mubr.msk.bf16.mxu0 %vm226_vm0, %v5824_v10  ;;  %v10654_v17 = vadd.f32 %v2595_v25, %v2366_v1  ;;  %v2935_v24 = vmul.f32 %v10360_v20, %v1798_v8  ;;  %v3046_v14 = vadd.f32 %v2934_v49, %v2705_v18  ;;  %v3955_v31 = vmul.f32 %v10434_v43, %v1797_v59  ;;  %v7953_v57 = vld [vmem:[%s11456_s3 + $0x68] sm:$0xff]  }
 0x238   : > { %v3386_v33 = vadd.f32 %v3274_v61, %v10561_v29  ;;  %v3387_v10 = vadd.f32 %v3275_v13, %v3044_v22  ;;  %v3615_v41 = vmul.f32 %v10397_v6, %v1457_v39  ;;  %v3956_v47 = vmul.f32 %v10434_v43, %v1798_v8  ;;  %v1800_v22 = vld [vmem:[#allocation2 + $0x302] sm:$0xff]  ;;  %v1462_v61 = vld [vmem:[#allocation2 + $0x319] sm:$0xf] }
 0x239   : > { %v10661_v63 = vadd.f32 %v2935_v24, %v2706_v35  ;;  %v4067_v25 = vadd.f32 %v3955_v31, %v3726_v50  ;;  %v5825_v32 = vpack.c.bf16 %v5799_v36, %v5798_v16  ;;  %v1577_v18 = vmul.f32 %v10274_v11, %v1460_v9  ;;  %v1803_v13 = vld [vmem:[#allocation2 + $0x31a] sm:$0xf] }
 0x23a   : > { %v3727_v42 = vadd.f32 %v3615_v41, %v3386_v33  ;;  %v3728_v59 = vadd.f32 %v3616_v12, %v3387_v10  ;;  %v2597_v58 = vmul.f32 %v10304_v51, %v1460_v9  ;;  %v1347_v29 = vmul.f32 %v10280_v45, %v1230_v0  ;;  %v2482_v16 = vld [vmem:[#allocation2 + $0x319] sm:$0xf] }
 0x23b   : > { %v4184_v39 = vmax.f32 %v10563_v48, %v4067_v25  ;;  %v5826_v8 = vpack.c.bf16 %v5801_v19, %v5800_v23  ;;  %v1348_v34 = vmul.f32 %v10280_v45, %v1231_v60  ;;  %v1576_v56 = vmul.f32 %v10274_v11, %v1459_v38  ;;  %v2823_v33 = vld [vmem:[#allocation2 + $0x31a] sm:$0xf] }
 0x23c   : > { %v4068_v40 = vadd.f32 %v3956_v47, %v3727_v42  ;;  %v4069_v50 = vadd.f32 %v10623_v52, %v3728_v59  ;;  %v2255_v27 = vmul.f32 %v10346_v46, %v1230_v0  ;;  %v2256_v12 = vmul.f32 %v10346_v46, %v1231_v60  ;;  %v3844_v41 = vld [vmem:[#allocation2 + $0x31a] sm:$0xf] }
 0x23d   : > { %4189 = vst.msk [vmem:[#allocation3 + $0x148] sm:$0xff] %vm226_vm0, %v4184_v39  ;;  %v3618_v48 = vmul.f32 %v10397_v6, %v1460_v9  ;;  %v1688_v62 = vadd.f32 %v1576_v56, %v1347_v29  ;;  %v10678_v7 = vadd.f32 %v1577_v18, %v1348_v34  ;;  %v1917_v1 = vmul.f32 %v10295_v54, %v1800_v22  ;;  %v1233_v25 = vld [vmem:[#allocation2 + $0x318] sm:$0xf]  ;;  %v1801_v18 = vld [vmem:[#allocation2 + $0x30a] sm:$0xff] }
 0x23e   : > { %7579 = vmatmul.mubr.msk.bf16.vlgmr.msra.gmra.mrb[0].mxu0 %vm226_vm0, %v5825_v32  ;;  %v4185_v52 = vmax.f32 %v10587_v37, %v4068_v40  ;;  %v4186_v28 = vmax.f32 %v10591_v53, %v4069_v50  ;;  %v2367_v49 = vadd.f32 %v2255_v27, %v10603_v4  ;;  %v2596_v35 = vmul.f32 %v10304_v51, %v1459_v38  ;;  %v3503_v37 = vld [vmem:[#allocation2 + $0x319] sm:$0xf]  ;;  %v1461_v32 = vld [vmem:[#allocation2 + $0x311] sm:$0xff] }
 0x23f   : > { %7582 = vmatprep.mubr.msk.bf16.mxu0 %vm226_vm0, %v5826_v8  ;;  %v2368_v36 = vadd.f32 %v2256_v12, %v2026_v30  ;;  %v2937_v9 = vmul.f32 %v10360_v20, %v1800_v22  ;;  %v3276_v24 = vmul.f32 %v10421_v3, %v1230_v0  ;;  %v3277_v31 = vmul.f32 %v10421_v3, %v1231_v60  ;;  %v1232_v0 = vld [vmem:[#allocation2 + $0x310] sm:$0xff]  ;;  %v2140_v29 = vld [vmem:[#allocation2 + $0x318] sm:$0xf] }
 0x240   : > { %7607 = vmatpush3.bf16.msra.mxu0 %v10568_v21  ;;  %4190 = vst.msk [vmem:[#allocation3 + $0x150] sm:$0xff] %vm226_vm0, %v4185_v52  ;;  %v10692_v53 = vadd.f32 %v1917_v1, %v1688_v62  ;;  %v2708_v4 = vadd.f32 %v2596_v35, %v2367_v49  ;;  %v3617_v30 = vmul.f32 %v10397_v6, %v1459_v38  ;;  %v1802_v8 = vld [vmem:[#allocation2 + $0x312] sm:$0xff]  ;;  %v5803_v49 = vld [vmem:[#allocation4 + $0x4a] sm:$0xff] }
 0x241   : > { %4191 = vst.msk [vmem:[#allocation3 + $0x158] sm:$0xf] %vm1024_vm2, %v4186_v28  ;;  %v3958_v10 = vmul.f32 %v10434_v43, %v1800_v22  ;;  %7608 = vmatprep.subr.bf16.mxu0 %v7953_v57  ;;  %v3388_v47 = vadd.f32 %v3276_v24, %v10620_v44  ;;  %v3389_v19 = vadd.f32 %v3277_v31, %v3046_v14 }
 0x242   : > { %v1579_v60 = vmul.f32 %v10274_v11, %v1462_v61  ;;  %v10699_v21 = vmul.f32 %v10295_v54, %v1803_v13  ;;  %v10701_v42 = vadd.f32 %v2937_v9, %v2708_v4  ;;  %v2599_v38 = vmul.f32 %v10304_v51, %v2482_v16  ;;  %v4309_v9 = vld [vmem:[#allocation3 + $0x111] ss:$2 sm:$0x3f]  ;;  %v5802_v4 = vld [vmem:[#allocation4 + $0x42] sm:$0xff] }
 0x243   : > { %v10705_v59 = vmul.f32 %v10360_v20, %v2823_v33  ;;  %v3620_v23 = vmul.f32 %v10397_v6, %v3503_v37  ;;  %v3729_v44 = vadd.f32 %v3617_v30, %v3388_v47  ;;  %v10709_v14 = vmul.f32 %v10434_v43, %v3844_v41  ;;  %v1464_v30 = vld [vmem:[#allocation2 + $0x329] sm:$0xff] }
 0x244   : > { %v2028_v22 = vadd.f32 %v10610_v2, %v10643_v5  ;;  %v2709_v39 = vadd.f32 %v2597_v58, %v2368_v36  ;;  %7609 = vmatpush3.bf16.msra.mxu0 %v7953_v57  ;;  %v1349_v34 = vmul.f32 %v10280_v45, %v1232_v0  ;;  %v1350_v56 = vmul.f32 %v10280_v45, %v1233_v25  ;;  %v3161_v2 = vld [vmem:[#allocation2 + $0x318] sm:$0xf]  ;;  %v7955_v25 = vld [vmem:[%s11456_s3 + $0x70] sm:$0xff]  }
 0x245   : > { %v1578_v40 = vmul.f32 %v10274_v11, %v1461_v32  ;;  %v1918_v50 = vmul.f32 %v10295_v54, %v1801_v18  ;;  %v3048_v27 = vadd.f32 %v10614_v15, %v10654_v17  ;;  %v3730_v12 = vadd.f32 %v3618_v48, %v3389_v19  ;;  %v4251_v17 = vld [vmem:[#allocation3 + $0x100] ss:$2 sm:$0xff]  ;;  %v4307_v48 = vld [vmem:[#allocation3 + $0x101] ss:$2 sm:$0xff]  ;;  %7638 = vmatprep.subr.bf16.mxu0 %v7955_v25  ;;  %v1465_v25 = vld [vmem:[#allocation2 + $0x331] sm:$0xff] }
 0x246   : > { %v2257_v62 = vmul.f32 %v10346_v46, %v1232_v0  ;;  %v2258_v1 = vmul.f32 %v10346_v46, %v2140_v29  ;;  %v10721_v5 = vadd.f32 %v3958_v10, %v3729_v44  ;;  %v10723_v57 = vadd.f32 %v1579_v60, %v1350_v56  ;;  %v5805_v10 = vld [vmem:[#allocation4 + $0x5a] sm:$0xff]  ;;  %v5804_v29 = vld [vmem:[#allocation4 + $0x52] sm:$0xff]  ;;  %v1235_v44 = vld [vmem:[#allocation2 + $0x328] sm:$0xff] }
 0x247   : > { %v1690_v58 = vadd.f32 %v1578_v40, %v1349_v34  ;;  %v1919_v45 = vmul.f32 %v10295_v54, %v1802_v8  ;;  %v2598_v28 = vmul.f32 %v10304_v51, %v1461_v32  ;;  %v2938_v15 = vmul.f32 %v10360_v20, %v1801_v18  ;;  %v4253_v54 = vld [vmem:[#allocation3 + $0x110] ss:$2 sm:$0x3f]  ;;  %v1234_v60 = vld [vmem:[#allocation2 + $0x320] sm:$0xff] }
 0x248   : > { %v2369_v11 = vadd.f32 %v2257_v62, %v10650_v26  ;;  %v2370_v52 = vadd.f32 %v2258_v1, %v2028_v22  ;;  %v10730_v35 = vadd.f32 %v1918_v50, %v10678_v7  ;;  %v2939_v61 = vmul.f32 %v10360_v20, %v1802_v8  ;;  %v1463_v22 = vld [vmem:[#allocation2 + $0x321] sm:$0xff]  ;;  %v10771_v62 = vld [vmem:[%s11454_s1] ss:$0 sm:$0xff] }
 0x249   : > { %v3278_v13 = vmul.f32 %v10421_v3, %v1232_v0  ;;  %v3279_v36 = vmul.f32 %v10421_v3, %v3161_v2  ;;  %v10735_v26 = vadd.f32 %v1919_v45, %v1690_v58  ;;  %v3619_v51 = vmul.f32 %v10397_v6, %v1461_v32 }
 0x24a   : > { %v2710_v24 = vadd.f32 %v2598_v28, %v2369_v11  ;;  %v3959_v31 = vmul.f32 %v10434_v43, %v1801_v18  ;;  %v10739_v16 = vadd.f32 %v2599_v38, %v2370_v52  ;;  %v4346_v37 = vmax.f32 %v4251_v17, %v4307_v48  ;;  %v10786_v28 = vld [vmem:[%s11454_s1 + $0x2] ss:$0 sm:$0xff] }
 0x24b   : > { %v3390_v7 = vadd.f32 %v3278_v13, %v10661_v63  ;;  %v3391_v33 = vadd.f32 %v3279_v36, %v3048_v27  ;;  %v3050_v41 = vadd.f32 %v2938_v15, %v2709_v39  ;;  %v3960_v0 = vmul.f32 %v10434_v43, %v1802_v8  ;;  %v10756_v8 = vld [vmem:[%s11454_s1 + $0x1] ss:$0 sm:$0xff]  ;;  %v10762_v27 = vld [vmem:[%s11454_s1 + $0x5] ss:$0 sm:$0xff]  ;;  %v1466_v36 = vld [vmem:[#allocation2 + $0x339] sm:$0xf] }
 0x24c   : > { %v4347_v47 = vmax.f32 %v4253_v54, %v4309_v9  ;;  %v5827_v19 = vpack.c.bf16 %v5803_v49, %v5802_v4  ;;  %v10746_v32 = vadd.f32 %v2939_v61, %v2710_v24  ;;  %v4381_v63 = vadd.f32 %v10387_v55, %v4346_v37  ;;  %v1807_v54 = vld [vmem:[#allocation2 + $0x33a] sm:$0xf] }
 0x24d   : > { %v3731_v18 = vadd.f32 %v3619_v51, %v3390_v7  ;;  %v3732_v38 = vadd.f32 %v3620_v23, %v3391_v33  ;;  %v10749_v34 = vadd.f32 %v3959_v31, %v3730_v12  ;;  %v1581_v56 = vmul.f32 %v10756_v8, %v1464_v30  ;;  %v1804_v23 = vld [vmem:[#allocation2 + $0x322] sm:$0xff]  ;;  %v2486_v7 = vld [vmem:[#allocation2 + $0x339] sm:$0xf] }
 0x24e   : > { %v4382_v39 = vadd.f32 %v10387_v55, %v4347_v47  ;;  %7583 = vmatmul.mubr.msk.bf16.gmra.mrb[4].mxu0 %vm226_vm0, %v5827_v19  ;;  %v5828_v40 = vpack.c.bf16 %v5805_v10, %v5804_v29  ;;  %v4409_v50 = vmax.f32 %v4381_v63, 0.0  ;;  %v2601_v12 = vmul.f32 %v10762_v27, %v1464_v30  ;;  %v3507_v33 = vld [vmem:[#allocation2 + $0x339] sm:$0xf]  ;;  %v1805_v29 = vld [vmem:[#allocation2 + $0x32a] sm:$0xff] }
 0x24f   : > { %v10766_v55 = vmul.f32 %v10397_v6, %v1464_v30  ;;  %v1351_v1 = vmul.f32 %v10771_v62, %v1234_v60  ;;  %v10774_v2 = vadd.f32 %v3960_v0, %v3731_v18  ;;  %v1352_v45 = vmul.f32 %v10771_v62, %v1235_v44  ;;  %v3848_v0 = vld [vmem:[#allocation2 + $0x33a] sm:$0xf] }
 0x250   : > { %v4410_v58 = vmax.f32 %v4382_v39, 0.0  ;;  %7586 = vmatprep.mubr.msk.bf16.mxu0 %vm226_vm0, %v5828_v40  ;;  %v1580_v11 = vmul.f32 %v10756_v8, %v1463_v22  ;;  %v10780_v52 = vadd.f32 %v10709_v14, %v3732_v38  ;;  %4471 = vst.msk [vmem:[#allocation4 + $0x91] sm:$0xff] %vm226_vm0, %v4409_v50  ;;  %v1921_v15 = vmul.f32 %v10786_v28, %v1804_v23 }
 0x251   : > { %v2259_v17 = vmul.f32 %v10346_v46, %v1234_v60  ;;  %v2260_v48 = vmul.f32 %v10346_v46, %v1235_v44  ;;  %v2600_v61 = vmul.f32 %v10762_v27, %v1463_v22  ;;  %v3280_v14 = vmul.f32 %v10421_v3, %v1234_v60  ;;  %v2827_v46 = vld [vmem:[#allocation2 + $0x33a] sm:$0xf] }
 0x252   : > { %4472 = vst.msk [vmem:[#allocation4 + $0x99] sm:$0x3f] %vm230_vm1, %v4410_v58  ;;  %v1692_v49 = vadd.f32 %v1580_v11, %v1351_v1  ;;  %v3281_v13 = vmul.f32 %v10421_v3, %v1235_v44  ;;  %v1693_v9 = vadd.f32 %v1581_v56, %v1352_v45  ;;  %v2941_v31 = vmul.f32 %v10360_v20, %v1804_v23  ;;  %v1236_v20 = vld [vmem:[#allocation2 + $0x330] sm:$0xff]  ;;  %v1237_v60 = vld [vmem:[#allocation2 + $0x338] sm:$0xf] }
 0x253   : > { %v2371_v24 = vadd.f32 %v2259_v17, %v10692_v53  ;;  %v2372_v51 = vadd.f32 %v2260_v48, %v10730_v35  ;;  %v3392_v4 = vadd.f32 %v3280_v14, %v10701_v42  ;;  %v3621_v30 = vmul.f32 %v10397_v6, %v1463_v22  ;;  %v10811_v42 = vld [vmem:[%s11454_s1 + $0x6] ss:$0 sm:$0xff]  ;;  %v2144_v44 = vld [vmem:[#allocation2 + $0x338] sm:$0xf] }
 0x254   : > { %v10798_v37 = vadd.f32 %v1921_v15, %v1692_v49  ;;  %v3962_v10 = vmul.f32 %v10434_v43, %v1804_v23  ;;  %v3393_v19 = vadd.f32 %v3281_v13, %v3050_v41  ;;  %v1583_v53 = vmul.f32 %v10756_v8, %v1466_v36  ;;  %v1806_v45 = vld [vmem:[#allocation2 + $0x332] sm:$0xff] }
 0x255   : > { %v2712_v47 = vadd.f32 %v2600_v61, %v2371_v24  ;;  %v10805_v35 = vmul.f32 %v10786_v28, %v1807_v54  ;;  %v3733_v18 = vadd.f32 %v3621_v30, %v3392_v4  ;;  %v2603_v38 = vmul.f32 %v10762_v27, %v2486_v7  ;;  %v3165_v13 = vld [vmem:[#allocation2 + $0x338] sm:$0xf]  ;;  %v5806_v4 = vld [vmem:[#allocation4 + $0x62] sm:$0xff] }
 0x256   : > { %v10814_v63 = vmul.f32 %v10811_v42, %v2827_v46  ;;  %v3624_v41 = vmul.f32 %v10397_v6, %v3507_v33  ;;  %v10820_v39 = vmul.f32 %v10434_v43, %v3848_v0  ;;  %v2032_v56 = vadd.f32 %v10699_v21, %v10723_v57  ;;  %v10833_v21 = vld [vmem:[%s11454_s1 + $0x4] ss:$0 sm:$0xff]  ;;  %v1468_v30 = vld [vmem:[#allocation2 + $0x349] sm:$0xff] }
 0x257   : > { %v10817_v22 = vadd.f32 %v2941_v31, %v2712_v47  ;;  %v2713_v40 = vadd.f32 %v2601_v12, %v2372_v51  ;;  %v4074_v23 = vadd.f32 %v3962_v10, %v3733_v18  ;;  %v1353_v50 = vmul.f32 %v10771_v62, %v1236_v20  ;;  %v4547_v6 = vld [vmem:[#allocation4 + $0x91] sm:$0xff] }
 0x258   : > { %v1354_v1 = vmul.f32 %v10771_v62, %v1237_v60  ;;  %v1582_v58 = vmul.f32 %v10756_v8, %v1465_v25  ;;  %v3052_v15 = vadd.f32 %v10705_v59, %v10739_v16  ;;  %v1922_v17 = vmul.f32 %v10786_v28, %v1805_v29  ;;  %v5807_v31 = vld [vmem:[#allocation4 + $0x6a] sm:$0xff] }
 0x259   : > { %v4548_v11 = vld [vmem:[#allocation4 + $0x99] sm:$0xff]  ;;  %v2261_v57 = vmul.f32 %v10833_v21, %v1236_v20  ;;  %v2262_v12 = vmul.f32 %v10833_v21, %v2144_v44  ;;  %v4192_v49 = vmax.f32 %v10721_v5, %v4074_v23  ;;  %v3734_v61 = vadd.f32 %v10766_v55, %v3393_v19  ;;  %v1239_v60 = vld [vmem:[#allocation2 + $0x348] sm:$0xff] }
 0x25a   : > { %v4566_v48 = vpack.c.bf16 %v4548_v11, %v4547_v6  ;;  %v1694_v14 = vadd.f32 %v1582_v58, %v1353_v50  ;;  %v1923_v59 = vmul.f32 %v10786_v28, %v1806_v45  ;;  %v2602_v54 = vmul.f32 %v10762_v27, %v1465_v25  ;;  %v5808_v58 = vld [vmem:[#allocation4 + $0x72] sm:$0xff]  ;;  %v1808_v11 = vld [vmem:[#allocation2 + $0x342] sm:$0xff] }
 0x25b   : > { %v2373_v16 = vadd.f32 %v2261_v57, %v10735_v26  ;;  %v2374_v36 = vadd.f32 %v2262_v12, %v2032_v56  ;;  %4197 = vst.msk [vmem:[#allocation3 + $0x160] sm:$0xff] %vm226_vm0, %v4192_v49  ;;  %v10844_v24 = vadd.f32 %v1583_v53, %v1354_v1  ;;  %v2034_v51 = vadd.f32 %v1922_v17, %v1693_v9  ;;  %v10858_v9 = vld [vmem:[%s11454_s1 + $0x9] ss:$0 sm:$0xff]  ;;  %v5809_v53 = vld [vmem:[#allocation4 + $0x7a] sm:$0xff] }
 0x25c   : > { %7435 = vmatmul.mubr.msk.bf16.gmra.mrb[16].mxu1 %vm226_vm0, %v4566_v48  ;;  %v2942_v5 = vmul.f32 %v10811_v42, %v1805_v29  ;;  %v3282_v55 = vmul.f32 %v10421_v3, %v1236_v20  ;;  %v10848_v7 = vadd.f32 %v1923_v59, %v1694_v14  ;;  %v2943_v26 = vmul.f32 %v10811_v42, %v1806_v45  ;;  %v1238_v20 = vld [vmem:[#allocation2 + $0x340] sm:$0xff] }
 0x25d   : > { %v2714_v46 = vadd.f32 %v2602_v54, %v2373_v16  ;;  %v3283_v33 = vmul.f32 %v10421_v3, %v3165_v13  ;;  %v10852_v10 = vadd.f32 %v2603_v38, %v2374_v36  ;;  %v3623_v47 = vmul.f32 %v10858_v9, %v1465_v25  ;;  %v1467_v56 = vld [vmem:[#allocation2 + $0x341] sm:$0xff]  ;;  %v1470_v36 = vld [vmem:[#allocation2 + $0x359] sm:$0xf] }
 0x25e   : > { %v3394_v0 = vadd.f32 %v3282_v55, %v10746_v32  ;;  %v3963_v19 = vmul.f32 %v10434_v43, %v1805_v29  ;;  %v3054_v18 = vadd.f32 %v2942_v5, %v2713_v40  ;;  %v3964_v44 = vmul.f32 %v10434_v43, %v1806_v45  ;;  %v10888_v16 = vld [vmem:[%s11454_s1 + $0x8] ss:$0 sm:$0xff]  ;;  %v1811_v54 = vld [vmem:[#allocation2 + $0x35a] sm:$0xf] }
 0x25f   : > { %v3395_v3 = vadd.f32 %v3283_v33, %v3052_v15  ;;  %v5829_v38 = vpack.c.bf16 %v5807_v31, %v5806_v4  ;;  %v10863_v23 = vadd.f32 %v2943_v26, %v2714_v46  ;;  %v1585_v1 = vmul.f32 %v10756_v8, %v1468_v30  ;;  %v2490_v5 = vld [vmem:[#allocation2 + $0x359] sm:$0xf] }
 0x260   : > { %v3735_v32 = vadd.f32 %v3623_v47, %v3394_v0  ;;  %v4075_v50 = vadd.f32 %v3963_v19, %v3734_v61  ;;  %v5830_v25 = vpack.c.bf16 %v5809_v53, %v5808_v58  ;;  %v1355_v29 = vmul.f32 %v10771_v62, %v1238_v20  ;;  %v2831_v46 = vld [vmem:[#allocation2 + $0x35a] sm:$0xf]  ;;  %v10902_v0 = vld [vmem:[%s11454_s1 + $0xa] ss:$0 sm:$0xff]  ;;  %v1240_v19 = vld [vmem:[#allocation2 + $0x350] sm:$0xff] }
 0x261   : > { %v3736_v6 = vadd.f32 %v3624_v41, %v3395_v3  ;;  %7587 = vmatmul.mubr.msk.bf16.gmra.mrb[8].mxu0 %vm226_vm0, %v5829_v38  ;;  %v1356_v40 = vmul.f32 %v10771_v62, %v1239_v60  ;;  %v2605_v45 = vmul.f32 %v10762_v27, %v1468_v30  ;;  %v1584_v17 = vmul.f32 %v10756_v8, %v1467_v56  ;;  %v3511_v26 = vld [vmem:[#allocation2 + $0x359] sm:$0xf]  ;;  %v1809_v38 = vld [vmem:[#allocation2 + $0x34a] sm:$0xff] }
 0x262   : > { %v4076_v15 = vadd.f32 %v3964_v44, %v3735_v32  ;;  %v4193_v43 = vmax.f32 %v10749_v34, %v4075_v50  ;;  %v3626_v12 = vmul.f32 %v10858_v9, %v1468_v30  ;;  %7590 = vmatprep.mubr.msk.bf16.mxu0 %vm226_vm0, %v5830_v25  ;;  %v2263_v41 = vmul.f32 %v10833_v21, %v1238_v20  ;;  %v3852_v47 = vld [vmem:[#allocation2 + $0x35a] sm:$0xf]  ;;  %v1469_v44 = vld [vmem:[#allocation2 + $0x351] sm:$0xff] }
 0x263   : > { %v4077_v57 = vadd.f32 %v10820_v39, %v3736_v6  ;;  %v2264_v48 = vmul.f32 %v10833_v21, %v1239_v60  ;;  %v1696_v61 = vadd.f32 %v1584_v17, %v1355_v29  ;;  %v10879_v34 = vadd.f32 %v1585_v1, %v1356_v40  ;;  %v2148_v58 = vld [vmem:[#allocation2 + $0x358] sm:$0xf] }
 0x264   : > { %v4194_v49 = vmax.f32 %v10774_v2, %v4076_v15  ;;  %4198 = vst.msk [vmem:[#allocation3 + $0x168] sm:$0xff] %vm226_vm0, %v4193_v43  ;;  %v1925_v14 = vmul.f32 %v10786_v28, %v1808_v11  ;;  %v2375_v39 = vadd.f32 %v2263_v41, %v10798_v37  ;;  %v2604_v59 = vmul.f32 %v10762_v27, %v1467_v56  ;;  %v1810_v40 = vld [vmem:[#allocation2 + $0x352] sm:$0xff] }
 0x265   : > { %v4195_v13 = vmax.f32 %v10780_v52, %v4077_v57  ;;  %v3284_v2 = vmul.f32 %v10888_v16, %v1238_v20  ;;  %v2376_v31 = vadd.f32 %v2264_v48, %v2034_v51  ;;  %v2945_v52 = vmul.f32 %v10811_v42, %v1808_v11 }
 0x266   : > { %4199 = vst.msk [vmem:[#allocation3 + $0x170] sm:$0xff] %vm226_vm0, %v4194_v49  ;;  %v10892_v55 = vadd.f32 %v1925_v14, %v1696_v61  ;;  %v3285_v37 = vmul.f32 %v10888_v16, %v1239_v60  ;;  %v2716_v33 = vadd.f32 %v2604_v59, %v2375_v39  ;;  %v3625_v30 = vmul.f32 %v10858_v9, %v1467_v56  ;;  %v4311_v14 = vld [vmem:[#allocation3 + $0x121] ss:$2 sm:$0xff] }
 0x267   : > { %4200 = vst.msk [vmem:[#allocation3 + $0x178] sm:$0xf] %vm1024_vm2, %v4195_v13  ;;  %v3396_v4 = vadd.f32 %v3284_v2, %v10817_v22  ;;  %v3966_v51 = vmul.f32 %v10902_v0, %v1808_v11  ;;  %v1587_v20 = vmul.f32 %v10756_v8, %v1470_v36  ;;  %v10907_v60 = vmul.f32 %v10786_v28, %v1811_v54  ;;  %v1241_v22 = vld [vmem:[#allocation2 + $0x358] sm:$0xf] }
 0x268   : > { %v3397_v53 = vadd.f32 %v3285_v37, %v3054_v18  ;;  %v2607_v3 = vmul.f32 %v10762_v27, %v2490_v5  ;;  %v10910_v56 = vadd.f32 %v2945_v52, %v2716_v33  ;;  %v10913_v50 = vmul.f32 %v10811_v42, %v2831_v46  ;;  %v4257_v2 = vld [vmem:[#allocation3 + $0x130] ss:$2 sm:$0x3f]  ;;  %v4313_v36 = vld [vmem:[#allocation3 + $0x131] ss:$2 sm:$0x3f] }
 0x269   : > { %v3737_v32 = vadd.f32 %v3625_v30, %v3396_v4  ;;  %v3628_v1 = vmul.f32 %v10858_v9, %v3511_v26  ;;  %v10917_v18 = vmul.f32 %v10902_v0, %v3852_v47  ;;  %v2036_v6 = vadd.f32 %v10805_v35, %v10844_v24  ;;  %v3169_v24 = vld [vmem:[#allocation2 + $0x358] sm:$0xf]  ;;  %v5811_v37 = vld [vmem:[#allocation4 + $0x8a] sm:$0xff] }
 0x26a   : > { %v2717_v25 = vadd.f32 %v2605_v45, %v2376_v31  ;;  %v1357_v29 = vmul.f32 %v10771_v62, %v1240_v19  ;;  %v3056_v11 = vadd.f32 %v10814_v63, %v10852_v10  ;;  %v1358_v15 = vmul.f32 %v10771_v62, %v1241_v22  ;;  %v4255_v10 = vld [vmem:[#allocation3 + $0x120] ss:$2 sm:$0xff] }
 0x26b   : > { %v1586_v43 = vmul.f32 %v10756_v8, %v1469_v44  ;;  %v1926_v17 = vmul.f32 %v10786_v28, %v1809_v38  ;;  %v10927_v57 = vadd.f32 %v3966_v51, %v3737_v32  ;;  %v3738_v41 = vadd.f32 %v3626_v12, %v3397_v53  ;;  %v1472_v4 = vld [vmem:[#allocation2 + $0x369] sm:$0xff]  ;;  %v1242_v53 = vld [vmem:[#allocation2 + $0x360] sm:$0xff] }
 0x26c   : > { %v2265_v48 = vmul.f32 %v10833_v21, %v1240_v19  ;;  %v2266_v35 = vmul.f32 %v10833_v21, %v2148_v58  ;;  %v1927_v49 = vmul.f32 %v10786_v28, %v1810_v40  ;;  %v2606_v61 = vmul.f32 %v10762_v27, %v1469_v44 }
 0x26d   : > { %v1698_v45 = vadd.f32 %v1586_v43, %v1357_v29  ;;  %v2946_v63 = vmul.f32 %v10811_v42, %v1809_v38  ;;  %v10934_v13 = vadd.f32 %v1587_v20, %v1358_v15  ;;  %v3286_v12 = vmul.f32 %v10888_v16, %v1240_v19  ;;  %v1812_v43 = vld [vmem:[#allocation2 + $0x362] sm:$0xff] }
 0x26e   : > { %v2377_v39 = vadd.f32 %v2265_v48, %v10848_v7  ;;  %v2378_v59 = vadd.f32 %v2266_v35, %v2036_v6  ;;  %v2038_v54 = vadd.f32 %v1926_v17, %v10879_v34  ;;  %v2947_v31 = vmul.f32 %v10811_v42, %v1810_v40  ;;  %v5810_v34 = vld [vmem:[#allocation4 + $0x82] sm:$0xff] }
 0x26f   : > { %v10939_v5 = vadd.f32 %v1927_v49, %v1698_v45  ;;  %v3287_v52 = vmul.f32 %v10888_v16, %v3169_v24  ;;  %v3398_v26 = vadd.f32 %v3286_v12, %v10863_v23  ;;  %v3627_v33 = vmul.f32 %v10858_v9, %v1469_v44  ;;  %v1243_v6 = vld [vmem:[#allocation2 + $0x368] sm:$0xff]  ;;  %v10952_v23 = vld [vmem:[%s11455_s2] ss:$0 sm:$0xff] }
 0x270   : > { %v2718_v46 = vadd.f32 %v2606_v61, %v2377_v39  ;;  %v3967_v7 = vmul.f32 %v10902_v0, %v1809_v38  ;;  %v3058_v30 = vadd.f32 %v2946_v63, %v2717_v25  ;;  %v4348_v47 = vmax.f32 %v4255_v10, %v4311_v14 }
 0x271   : > { %v3399_v51 = vadd.f32 %v3287_v52, %v3056_v11  ;;  %v4349_v19 = vmax.f32 %v4257_v2, %v4313_v36  ;;  %v10946_v20 = vadd.f32 %v2607_v3, %v2378_v59  ;;  %v3739_v22 = vadd.f32 %v3627_v33, %v3398_v26  ;;  %v1471_v11 = vld [vmem:[#allocation2 + $0x361] sm:$0xff]  ;;  %v1474_v59 = vld [vmem:[#allocation2 + $0x379] sm:$0xf] }
 0x272   : > { %v3968_v32 = vmul.f32 %v10902_v0, %v1810_v40  ;;  %v5831_v58 = vpack.c.bf16 %v5811_v37, %v5810_v34  ;;  %v4383_v44 = vadd.f32 %v10952_v23, %v4348_v47  ;;  %v1589_v25 = vmul.f32 %v10756_v8, %v1472_v4  ;;  %v2494_v52 = vld [vmem:[#allocation2 + $0x379] sm:$0xf] }
 0x273   : > { %v3740_v29 = vadd.f32 %v3628_v1, %v3399_v51  ;;  %v4384_v38 = vadd.f32 %v10952_v23, %v4349_v19  ;;  %v10957_v3 = vadd.f32 %v2947_v31, %v2718_v46  ;;  %v10959_v15 = vadd.f32 %v3967_v7, %v3738_v41  ;;  %v2835_v7 = vld [vmem:[#allocation2 + $0x37a] sm:$0xf] }
 0x274   : > { %v10961_v40 = vadd.f32 %v3968_v32, %v3739_v22  ;;  %7591 = vmatmul.mubr.msk.bf16.gmra.mrb[12].mxu0 %vm226_vm0, %v5831_v58  ;;  %v1359_v1 = vmul.f32 %v10771_v62, %v1242_v53  ;;  %v4411_v17 = vmax.f32 %v4383_v44, 0.0  ;;  %v2609_v35 = vmul.f32 %v10762_v27, %v1472_v4  ;;  %v3856_v51 = vld [vmem:[#allocation2 + $0x37a] sm:$0xf] }
 0x275   : > { %v4412_v48 = vmax.f32 %v4384_v38, 0.0  ;;  %v1360_v24 = vmul.f32 %v10771_v62, %v1243_v6  ;;  %v3630_v45 = vmul.f32 %v10858_v9, %v1472_v4  ;;  %v1588_v49 = vmul.f32 %v10756_v8, %v1471_v11  ;;  %v3515_v4 = vld [vmem:[#allocation2 + $0x379] sm:$0xf] }
 0x276   : > { %v2267_v41 = vmul.f32 %v10833_v21, %v1242_v53  ;;  %v2268_v61 = vmul.f32 %v10833_v21, %v1243_v6  ;;  %v10972_v63 = vadd.f32 %v10917_v18, %v3740_v29  ;;  %4473 = vst.msk [vmem:[#allocation4 + $0xa1] sm:$0xff] %vm226_vm0, %v4411_v17  ;;  %v1929_v14 = vmul.f32 %v10786_v28, %v1812_v43  ;;  %v1815_v18 = vld [vmem:[#allocation2 + $0x37a] sm:$0xf]  ;;  %v1813_v29 = vld [vmem:[#allocation2 + $0x36a] sm:$0xff] }
 0x277   : > { %4474 = vst.msk [vmem:[#allocation4 + $0xa9] sm:$0x3f] %vm230_vm1, %v4412_v48  ;;  %v10976_v10 = vadd.f32 %v1589_v25, %v1360_v24  ;;  %v3288_v39 = vmul.f32 %v10888_v16, %v1242_v53  ;;  %v1700_v12 = vadd.f32 %v1588_v49, %v1359_v1  ;;  %v2608_v36 = vmul.f32 %v10762_v27, %v1471_v11  ;;  %v1244_v53 = vld [vmem:[#allocation2 + $0x370] sm:$0xff]  ;;  %v1245_v58 = vld [vmem:[#allocation2 + $0x378] sm:$0xf] }
 0x278   : > { %v2379_v2 = vadd.f32 %v2267_v41, %v10892_v55  ;;  %v3289_v31 = vmul.f32 %v10888_v16, %v1243_v6  ;;  %v2380_v37 = vadd.f32 %v2268_v61, %v2038_v54  ;;  %v2949_v46 = vmul.f32 %v10811_v42, %v1812_v43  ;;  %v1473_v6 = vld [vmem:[#allocation2 + $0x371] sm:$0xff] }
 0x279   : > { %v3400_v26 = vadd.f32 %v3288_v39, %v10910_v56  ;;  %v3629_v33 = vmul.f32 %v10858_v9, %v1471_v11  ;;  %v10986_v47 = vadd.f32 %v1929_v14, %v1700_v12  ;;  %v3970_v55 = vmul.f32 %v10902_v0, %v1812_v43  ;;  %v1814_v24 = vld [vmem:[#allocation2 + $0x372] sm:$0xff] }
 0x27a   : > { %v2720_v19 = vadd.f32 %v2608_v36, %v2379_v2  ;;  %v1591_v34 = vmul.f32 %v10756_v8, %v1474_v59  ;;  %v3401_v22 = vadd.f32 %v3289_v31, %v3058_v30  ;;  %v10991_v54 = vmul.f32 %v10786_v28, %v1815_v18  ;;  %v5812_v30 = vld [vmem:[#allocation4 + $0x92] sm:$0xff] }
 0x27b   : > { %v3741_v32 = vadd.f32 %v3629_v33, %v3400_v26  ;;  %v2611_v56 = vmul.f32 %v10762_v27, %v2494_v52  ;;  %v10997_v38 = vmul.f32 %v10811_v42, %v2835_v7  ;;  %v3632_v25 = vmul.f32 %v10858_v9, %v3515_v4  ;;  %v2152_v49 = vld [vmem:[#allocation2 + $0x378] sm:$0xf] }
 0x27c   : > { %v10994_v44 = vadd.f32 %v2949_v46, %v2720_v19  ;;  %v11001_v11 = vmul.f32 %v10902_v0, %v3856_v51  ;;  %v2040_v43 = vadd.f32 %v10907_v60, %v10934_v13  ;;  %v2721_v17 = vadd.f32 %v2609_v35, %v2380_v37  ;;  %v3173_v46 = vld [vmem:[#allocation2 + $0x378] sm:$0xf]  ;;  %v2496_v51 = vld [vmem:[#allocation2 + $0x389] sm:$0xff] }
 0x27d   : > { %v4082_v1 = vadd.f32 %v3970_v55, %v3741_v32  ;;  %v1361_v48 = vmul.f32 %v10771_v62, %v1244_v53  ;;  %v4549_v41 = vld [vmem:[#allocation4 + $0xa1] sm:$0xff]  ;;  %v3060_v39 = vadd.f32 %v10913_v50, %v10946_v20  ;;  %v1362_v59 = vmul.f32 %v10771_v62, %v1245_v58 }
 0x27e   : > { %v4550_v61 = vld [vmem:[#allocation4 + $0xa9] sm:$0xff]  ;;  %v5813_v14 = vld [vmem:[#allocation4 + $0x9a] sm:$0xff]  ;;  %v1590_v12 = vmul.f32 %v10756_v8, %v1473_v6  ;;  %v1930_v2 = vmul.f32 %v10786_v28, %v1813_v29  ;;  %v2269_v13 = vmul.f32 %v10833_v21, %v1244_v53  ;;  %v3742_v35 = vadd.f32 %v3630_v45, %v3401_v22 }
 0x27f   : > { %v4567_v36 = vpack.c.bf16 %v4550_v61, %v4549_v41  ;;  %v5832_v31 = vpack.c.bf16 %v5813_v14, %v5812_v30  ;;  %v4201_v60 = vmax.f32 %v10927_v57, %v4082_v1  ;;  %v1931_v52 = vmul.f32 %v10786_v28, %v1814_v24  ;;  %v3178_v22 = vld [vmem:[#allocation2 + $0x3a0] sm:$0xff]  ;;  %v2154_v32 = vld [vmem:[#allocation2 + $0x388] sm:$0xff] }
 0x280   : > { %v1702_v18 = vadd.f32 %v1590_v12, %v1361_v48  ;;  %v2270_v37 = vmul.f32 %v10833_v21, %v2152_v49  ;;  %v2381_v8 = vadd.f32 %v2269_v13, %v10939_v5  ;;  %v2610_v62 = vmul.f32 %v10762_v27, %v1473_v6  ;;  %v2495_v48 = vld [vmem:[#allocation2 + $0x381] sm:$0xff] }
 0x281   : > { %7438 = vmatprep.mubr.msk.bf16.mxu1 %vm226_vm0, %v4567_v36  ;;  %7594 = vmatprep.mubr.msk.bf16.mxu0 %vm226_vm0, %v5832_v31  ;;  %4206 = vst.msk [vmem:[#allocation3 + $0x180] sm:$0xff] %vm226_vm0, %v4201_v60  ;;  %v2950_v50 = vmul.f32 %v10811_v42, %v1813_v29  ;;  %v11021_v57 = vadd.f32 %v1591_v34, %v1362_v59  ;;  %v4315_v36 = vld [vmem:[#allocation3 + $0x141] ss:$2 sm:$0xff] }
 0x282   : > { %v2042_v20 = vadd.f32 %v1930_v2, %v10976_v10  ;;  %v2382_v28 = vadd.f32 %v2270_v37, %v2040_v43  ;;  %v3290_v45 = vmul.f32 %v10888_v16, %v1244_v53  ;;  %v11025_v26 = vadd.f32 %v1931_v52, %v1702_v18  ;;  %v2153_v10 = vld [vmem:[#allocation2 + $0x380] sm:$0xff]  ;;  %v2498_v18 = vld [vmem:[#allocation2 + $0x399] sm:$0xf] }
 0x283   : > { %v2722_v33 = vadd.f32 %v2610_v62, %v2381_v8  ;;  %v2951_v7 = vmul.f32 %v10811_v42, %v1814_v24  ;;  %v3291_v4 = vmul.f32 %v10888_v16, %v3173_v46  ;;  %v3062_v5 = vadd.f32 %v2950_v50, %v2721_v17  ;;  %v3520_v43 = vld [vmem:[#allocation2 + $0x3a1] sm:$0xff]  ;;  %v2839_v8 = vld [vmem:[#allocation2 + $0x39a] sm:$0xf] }
 0x284   : > { %v3402_v19 = vadd.f32 %v3290_v45, %v10957_v3  ;;  %v3631_v55 = vmul.f32 %v10858_v9, %v1473_v6  ;;  %v3971_v34 = vmul.f32 %v10902_v0, %v1813_v29  ;;  %v2723_v58 = vadd.f32 %v2611_v56, %v2382_v28  ;;  %v2836_v6 = vld [vmem:[#allocation2 + $0x382] sm:$0xff]  ;;  %v3519_v28 = vld [vmem:[#allocation2 + $0x399] sm:$0xf] }
 0x285   : > { %v11032_v53 = vadd.f32 %v2951_v7, %v2722_v33  ;;  %v3403_v30 = vadd.f32 %v3291_v4, %v3060_v39  ;;  %v3972_v1 = vmul.f32 %v10902_v0, %v1814_v24  ;;  %v2613_v17 = vmul.f32 %v10762_v27, %v2496_v51  ;;  %v4259_v2 = vld [vmem:[#allocation3 + $0x140] ss:$2 sm:$0xff]  ;;  %v3860_v45 = vld [vmem:[#allocation2 + $0x39a] sm:$0xf] }
 0x286   : > { %v3743_v49 = vadd.f32 %v3631_v55, %v3402_v19  ;;  %v4083_v41 = vadd.f32 %v3971_v34, %v3742_v35  ;;  %v11037_v3 = vmul.f32 %v10858_v9, %v2496_v51  ;;  %v3296_v61 = vmul.f32 %v10888_v16, %v3178_v22  ;;  %v3861_v60 = vld [vmem:[#allocation2 + $0x3a2] sm:$0xff]  ;;  %v3180_v55 = vld [vmem:[#allocation2 + $0x3b0] sm:$0xff]  ;;  %v3181_v34 = vld [vmem:[#allocation2 + $0x3b8] sm:$0xf] }
 0x287   : > { %v3744_v29 = vadd.f32 %v3632_v25, %v3403_v30  ;;  %v2271_v56 = vmul.f32 %v10833_v21, %v2153_v10  ;;  %v2272_v14 = vmul.f32 %v10833_v21, %v2154_v32  ;;  %v3637_v59 = vmul.f32 %v10858_v9, %v3520_v43  ;;  %v3179_v4 = vld [vmem:[#allocation2 + $0x3a8] sm:$0xff]  ;;  %v3523_v43 = vld [vmem:[#allocation2 + $0x3b9] sm:$0xf] }
 0x288   : > { %v4084_v39 = vadd.f32 %v3972_v1, %v3743_v49  ;;  %v4202_v24 = vmax.f32 %v10959_v15, %v4083_v41  ;;  %v2612_v12 = vmul.f32 %v10762_v27, %v2495_v48  ;;  %v2953_v13 = vmul.f32 %v10811_v42, %v2836_v6  ;;  %v3521_v22 = vld [vmem:[#allocation2 + $0x3a9] sm:$0xff]  ;;  %v3522_v1 = vld [vmem:[#allocation2 + $0x3b1] sm:$0xff] }
 0x289   : > { %v4085_v31 = vadd.f32 %v11001_v11, %v3744_v29  ;;  %v2383_v25 = vadd.f32 %v2271_v56, %v10986_v47  ;;  %v3292_v35 = vmul.f32 %v10888_v16, %v2153_v10  ;;  %v2384_v15 = vadd.f32 %v2272_v14, %v2042_v20  ;;  %v3863_v56 = vld [vmem:[#allocation2 + $0x3b2] sm:$0xff] }
 0x28a   : > { %v4203_v52 = vmax.f32 %v10961_v40, %v4084_v39  ;;  %4207 = vst.msk [vmem:[#allocation3 + $0x188] sm:$0xff] %vm226_vm0, %v4202_v24  ;;  %v3293_v37 = vmul.f32 %v10888_v16, %v2154_v32  ;;  %v3633_v46 = vmul.f32 %v10858_v9, %v2495_v48  ;;  %v4350_v50 = vmax.f32 %v4259_v2, %v4315_v36  ;;  %v3862_v48 = vld [vmem:[#allocation2 + $0x3aa] sm:$0xff]  ;;  %v2156_v39 = vld [vmem:[#allocation2 + $0x398] sm:$0xf] }
 0x28b   : > { %v4204_v11 = vmax.f32 %v10972_v63, %v4085_v31  ;;  %v2724_v62 = vadd.f32 %v2612_v12, %v2383_v25  ;;  %v3404_v47 = vadd.f32 %v3292_v35, %v10994_v44  ;;  %v3978_v40 = vmul.f32 %v10902_v0, %v3861_v60  ;;  %v2155_v14 = vld [vmem:[#allocation2 + $0x390] sm:$0xff]  ;;  %v3177_v60 = vld [vmem:[#allocation2 + $0x398] sm:$0xf] }
 0x28c   : > { %4208 = vst.msk [vmem:[#allocation3 + $0x190] sm:$0xff] %vm226_vm0, %v4203_v52  ;;  %v3405_v33 = vadd.f32 %v3293_v37, %v3062_v5  ;;  %v3974_v20 = vmul.f32 %v10902_v0, %v2836_v6  ;;  %v2615_v7 = vmul.f32 %v10762_v27, %v2498_v18  ;;  %v4385_v19 = vadd.f32 %v10952_v23, %v4350_v50  ;;  %v2838_v31 = vld [vmem:[#allocation2 + $0x392] sm:$0xff]  ;;  %v3864_v52 = vld [vmem:[#allocation2 + $0x3ba] sm:$0xf] }
 0x28d   : > { %4209 = vst.msk [vmem:[#allocation3 + $0x198] sm:$0xf] %vm1024_vm2, %v4204_v11  ;;  %v3065_v51 = vadd.f32 %v2953_v13, %v2724_v62  ;;  %v3745_v63 = vadd.f32 %v3633_v46, %v3404_v47  ;;  %v11062_v44 = vmul.f32 %v10811_v42, %v2839_v8  ;;  %v11065_v10 = vmul.f32 %v10858_v9, %v3519_v28  ;;  %v4261_v47 = vld [vmem:[#allocation3 + $0x150] ss:$2 sm:$0x3f] }
 0x28e   : > { %v11068_v5 = vmul.f32 %v10902_v0, %v3860_v45  ;;  %v2044_v32 = vadd.f32 %v10991_v54, %v11021_v57  ;;  %v2725_v30 = vadd.f32 %v2613_v17, %v2384_v15  ;;  %v4413_v41 = vmax.f32 %v4385_v19, 0.0  ;;  %v2497_v57 = vld [vmem:[#allocation2 + $0x391] sm:$0xff] }
 0x28f   : > { %v3408_v49 = vadd.f32 %v3296_v61, %v3065_v51  ;;  %v3064_v6 = vadd.f32 %v10997_v38, %v2723_v58  ;;  %v3297_v29 = vmul.f32 %v10888_v16, %v3179_v4  ;;  %v4086_v24 = vadd.f32 %v3974_v20, %v3745_v63  ;;  %v2837_v17 = vld [vmem:[#allocation2 + $0x38a] sm:$0xff] }
 0x290   : > { %v3298_v12 = vmul.f32 %v10888_v16, %v3180_v55  ;;  %v3299_v2 = vmul.f32 %v10888_v16, %v3181_v34  ;;  %v3638_v54 = vmul.f32 %v10858_v9, %v3521_v22  ;;  %4475 = vst.msk [vmem:[#allocation4 + $0xb1] sm:$0xff] %vm226_vm0, %v4413_v41  ;;  %v3639_v61 = vmul.f32 %v10858_v9, %v3522_v1  ;;  %v4317_v50 = vld [vmem:[#allocation3 + $0x151] ss:$2 sm:$0x3f] }
 0x291   : > { %v3749_v36 = vadd.f32 %v3637_v59, %v3408_v49  ;;  %v3640_v38 = vmul.f32 %v10858_v9, %v3523_v43  ;;  %v3746_v58 = vadd.f32 %v11037_v3, %v3405_v33  ;;  %v3979_v25 = vmul.f32 %v10902_v0, %v3862_v48  ;;  %v4319_v33 = vld [vmem:[#allocation3 + $0x161] ss:$2 sm:$0xff]  ;;  %v4265_v63 = vld [vmem:[#allocation3 + $0x170] ss:$2 sm:$0x3f] }
 0x292   : > { %v11083_v13 = vmul.f32 %v10902_v0, %v3863_v56  ;;  %v2273_v35 = vmul.f32 %v10833_v21, %v2155_v14  ;;  %v2274_v18 = vmul.f32 %v10833_v21, %v2156_v39  ;;  %v2614_v15 = vmul.f32 %v10762_v27, %v2497_v57  ;;  %v4263_v27 = vld [vmem:[#allocation3 + $0x160] ss:$2 sm:$0xff]  ;;  %v4323_v48 = vld [vmem:[#allocation3 + $0x181] ss:$2 sm:$0xff] }
 0x293   : > { %v4090_v59 = vadd.f32 %v3978_v40, %v3749_v36  ;;  %v2954_v37 = vmul.f32 %v10811_v42, %v2837_v17  ;;  %v3294_v46 = vmul.f32 %v10888_v16, %v2155_v14  ;;  %v2955_v11 = vmul.f32 %v10811_v42, %v2838_v31  ;;  %v5814_v42 = vld [vmem:[#allocation4 + $0xa2] sm:$0xff] }
 0x294   : > { %v2385_v3 = vadd.f32 %v2273_v35, %v11025_v26  ;;  %v2386_v8 = vadd.f32 %v2274_v18, %v2044_v32  ;;  %v3295_v62 = vmul.f32 %v10888_v16, %v3177_v60  ;;  %v3975_v40 = vmul.f32 %v10902_v0, %v2837_v17  ;;  %v4267_v43 = vld [vmem:[#allocation3 + $0x180] ss:$2 sm:$0xff]  ;;  %v4269_v56 = vld [vmem:[#allocation3 + $0x190] ss:$2 sm:$0x3f] }
 0x295   : > { %v4210_v28 = vmax.f32 %v4086_v24, %v4090_v59  ;;  %v3066_v45 = vadd.f32 %v2954_v37, %v2725_v30  ;;  %v3406_v21 = vadd.f32 %v3294_v46, %v11032_v53  ;;  %v3635_v26 = vmul.f32 %v10858_v9, %v2497_v57  ;;  %v4321_v53 = vld [vmem:[#allocation3 + $0x171] ss:$2 sm:$0x3f] }
 0x296   : > { %v2726_v20 = vadd.f32 %v2614_v15, %v2385_v3  ;;  %v2727_v4 = vadd.f32 %v2615_v7, %v2386_v8  ;;  %v3407_v51 = vadd.f32 %v3295_v62, %v3064_v6  ;;  %v3981_v16 = vmul.f32 %v10902_v0, %v3864_v52 }
 0x297   : > { %4215 = vst.msk [vmem:[#allocation3 + $0x1a0] sm:$0xff] %vm226_vm0, %v4210_v28  ;;  %v3409_v19 = vadd.f32 %v3297_v29, %v3066_v45  ;;  %v3976_v55 = vmul.f32 %v10902_v0, %v2838_v31  ;;  %v4351_v34 = vmax.f32 %v4261_v47, %v4317_v50  ;;  %v5815_v22 = vld [vmem:[#allocation4 + $0xaa] sm:$0xff]  ;;  %v3747_v1 = vadd.f32 %v3635_v26, %v3406_v21  ;;  %v4483_v45 = vld [vmem:[#allocation4] sm:$0xff] }
 0x298   : > { %v3067_v32 = vadd.f32 %v2955_v11, %v2726_v20  ;;  %v3068_v30 = vadd.f32 %v11062_v44, %v2727_v4  ;;  %v4352_v7 = vmax.f32 %v4263_v27, %v4319_v33  ;;  %v11100_v9 = vpack.c.bf16 %v5815_v22, %v5814_v42  ;;  %v4325_v29 = vld [vmem:[#allocation3 + $0x191] ss:$2 sm:$0x3f] }
 0x299   : > { %v3750_v49 = vadd.f32 %v3638_v54, %v3409_v19  ;;  %v4087_v41 = vadd.f32 %v3975_v40, %v3746_v58  ;;  %v4386_v6 = vadd.f32 %v10952_v23, %v4351_v34  ;;  %v3748_v39 = vadd.f32 %v11065_v10, %v3407_v51 }
 0x29a   : > { %v3410_v14 = vadd.f32 %v3298_v12, %v3067_v32  ;;  %v3411_v0 = vadd.f32 %v3299_v2, %v3068_v30  ;;  %v4387_v24 = vadd.f32 %v10952_v23, %v4352_v7  ;;  %7595 = vmatmul.mubr.msk.bf16.gmra.mrb[16].mxu0 %vm226_vm0, %v11100_v9  ;;  %v4353_v17 = vmax.f32 %v4265_v63, %v4321_v53  ;;  %v4484_v63 = vld [vmem:[#allocation4 + $0x8] sm:$0xff] }
 0x29b   : > { %v4091_v44 = vadd.f32 %v3979_v25, %v3750_v49  ;;  %v4414_v57 = vmax.f32 %v4386_v6, 0.0  ;;  %v4354_v36 = vmax.f32 %v4267_v43, %v4323_v48  ;;  %v4355_v60 = vmax.f32 %v4269_v56, %v4325_v29  ;;  %v4488_v7 = vld [vmem:[#allocation4 + $0x28] sm:$0xff]  ;;  %v4485_v43 = vld [vmem:[#allocation4 + $0x10] sm:$0xff]  ;;  %v4487_v6 = vld [vmem:[#allocation4 + $0x20] sm:$0xff] }
 0x29c   : > { %v3751_v31 = vadd.f32 %v3639_v61, %v3410_v14  ;;  %v3752_v54 = vadd.f32 %v3640_v38, %v3411_v0  ;;  %v4415_v58 = vmax.f32 %v4387_v24, 0.0  ;;  %v4088_v35 = vadd.f32 %v3976_v55, %v3747_v1  ;;  %v4486_v1 = vld [vmem:[#allocation4 + $0x18] sm:$0xff]  ;;  %v8010_v14 = vld [vmem:[%s11456_s3 + $0x20] sm:$0xff]  }
 0x29d   : > { %v4211_v18 = vmax.f32 %v4087_v41, %v4091_v44  ;;  %4476 = vst.msk [vmem:[#allocation4 + $0xb9] sm:$0x3f] %vm230_vm1, %v4414_v57  ;;  %v4388_v12 = vadd.f32 %v10952_v23, %v4353_v17  ;;  %v4389_v10 = vadd.f32 %v10952_v23, %v4354_v36  ;;  %v4089_v2 = vadd.f32 %v11068_v5, %v3748_v39  ;;  %v4551_v5 = vld [vmem:[#allocation4 + $0xb1] sm:$0xff]  ;;  %v4492_v17 = vld [vmem:[#allocation4 + $0x48] sm:$0xff] }
 0x29e   : > { %v4092_v59 = vadd.f32 %v11083_v13, %v3751_v31  ;;  %v4093_v25 = vadd.f32 %v3981_v16, %v3752_v54  ;;  %4477 = vst.msk [vmem:[#allocation4 + $0xc1] sm:$0xff] %vm226_vm0, %v4415_v58  ;;  %v4390_v61 = vadd.f32 %v10952_v23, %v4355_v60  ;;  %v4511_v22 = vpack.c.bf16 %v4484_v63, %v4483_v45  ;;  %v11168_v44 = vld [vmem:[%s11456_s3 + $0x30] sm:$0xff]   ;;  %v4490_v57 = vld [vmem:[#allocation4 + $0x38] sm:$0xff]  ;;  %v4491_v54 = vld [vmem:[#allocation4 + $0x40] sm:$0xff] }
 0x29f   : > { %4216 = vst.msk [vmem:[#allocation3 + $0x1a8] sm:$0xff] %vm226_vm0, %v4211_v18  ;;  %v4416_v38 = vmax.f32 %v4388_v12, 0.0  ;;  %v4417_v52 = vmax.f32 %v4389_v10, 0.0  ;;  %v11145_v41 = vpack.c.bf16 %v4486_v1, %v4485_v43  ;;  %v11152_v29 = vpack.c.bf16 %v4488_v7, %v4487_v6  ;;  %v4489_v36 = vld [vmem:[#allocation4 + $0x30] sm:$0xff]  ;;  %v7957_v60 = vld [vmem:[%s11456_s3 + $0x78] sm:$0xff]   ;;  %v4496_v18 = vld [vmem:[#allocation4 + $0x68] sm:$0xff] }
 0x2a0   : > { %v4212_v15 = vmax.f32 %v4088_v35, %v4092_v59  ;;  %v4213_v37 = vmax.f32 %v4089_v2, %v4093_v25  ;;  %v4418_v46 = vmax.f32 %v4390_v61, 0.0  ;;  %v11174_v31 = vpack.c.bf16 %v4490_v57, %v4489_v36  ;;  %v4494_v35 = vld [vmem:[#allocation4 + $0x58] sm:$0xff]  ;;  %v4493_v12 = vld [vmem:[#allocation4 + $0x50] sm:$0xff]  ;;  %v4495_v59 = vld [vmem:[#allocation4 + $0x60] sm:$0xff] }
 0x2a1   : > { %4478 = vst.msk [vmem:[#allocation4 + $0xc9] sm:$0x3f] %vm230_vm1, %v4416_v38  ;;  %v11177_v58 = vpack.c.bf16 %v4492_v17, %v4491_v54  ;;  %v8011_v10 = vld [vmem:[%s11456_s3 + $0x70] sm:$0xff]   ;;  %v11193_v2 = vpack.c.bf16 %v4494_v35, %v4493_v12  ;;  %v11198_v25 = vld [vmem:[%s11456_s3 + $0x80] sm:$0xff]   ;;  %v11200_v61 = vpack.c.bf16 %v4496_v18, %v4495_v59  ;;  %v4498_v38 = vld [vmem:[#allocation4 + $0x78] sm:$0xff] }
 0x2a2   : > { %4479 = vst.msk [vmem:[#allocation4 + $0xd1] sm:$0xff] %vm226_vm0, %v4417_v52  ;;  %4217 = vst.msk [vmem:[#allocation3 + $0x1b0] sm:$0xff] %vm226_vm0, %v4212_v15  ;;  %v4500_v52 = vld [vmem:[#allocation4 + $0x88] sm:$0xff]  ;;  %v4497_v15 = vld [vmem:[#allocation4 + $0x70] sm:$0xff] }
 0x2a3   : > { %4218 = vst.msk [vmem:[#allocation3 + $0x1b8] sm:$0xf] %vm1024_vm2, %v4213_v37  ;;  %v11211_v37 = vpack.c.bf16 %v4498_v38, %v4497_v15  ;;  %v4974_v63 = vld [vmem:[#allocation4 + $0x2] sm:$0xff]  ;;  %v4979_v1 = vld [vmem:[#allocation4 + $0x2a] sm:$0xff]  ;;  %v4976_v7 = vld [vmem:[#allocation4 + $0x12] sm:$0xff] }
 0x2a4   : > { %4480 = vst.msk [vmem:[#allocation4 + $0xd9] sm:$0x3f] %vm230_vm1, %v4418_v46  ;;  %v4552_v13 = vld [vmem:[#allocation4 + $0xb9] sm:$0xff]  ;;  %v6096_v43 = vld [vmem:[#allocation4 + $0xf0] sm:$0xff]  ;;  %v4978_v6 = vld [vmem:[#allocation4 + $0x22] sm:$0xff] }
 0x2a5   : > { %v11120_v3 = vpack.c.bf16 %v4552_v13, %v4551_v5  ;;  %v5816_v8 = vld [vmem:[#allocation4 + $0xb2] sm:$0xff]  ;;  %v5817_v11 = vld [vmem:[#allocation4 + $0xba] sm:$0xff]  ;;  %v4983_v54 = vld [vmem:[#allocation4 + $0x4a] sm:$0xff] }
 0x2a6   : > { %v11122_v62 = vpack.c.bf16 %v5817_v11, %v5816_v8  ;;  %v4271_v47 = vld [vmem:[#allocation3 + $0x1a0] ss:$2 sm:$0xff]  ;;  %v4327_v50 = vld [vmem:[#allocation3 + $0x1a1] ss:$2 sm:$0xff]  ;;  %v4502_v13 = vld [vmem:[#allocation4 + $0x98] sm:$0xff] }
 0x2a7   : > { %7439 = vmatmul.mubr.msk.bf16.gmra.mrb[20].mxu1 %vm226_vm0, %v11120_v3  ;;  %v4553_v28 = vld [vmem:[#allocation4 + $0xc1] sm:$0xff]  ;;  %v4356_v21 = vmax.f32 %v4271_v47, %v4327_v50  ;;  %v4501_v11 = vld [vmem:[#allocation4 + $0x90] sm:$0xff]  ;;  %v4506_v45 = vld [vmem:[#allocation4 + $0xb8] sm:$0xff] }
 0x2a8   : > { %7598 = vmatprep.mubr.msk.bf16.mxu0 %vm226_vm0, %v11122_v62  ;;  %v4554_v40 = vld [vmem:[#allocation4 + $0xc9] sm:$0xff]  ;;  %v4499_v46 = vld [vmem:[#allocation4 + $0x80] sm:$0xff]  ;;  %v11223_v47 = vpack.c.bf16 %v4502_v13, %v4501_v11  ;;  %v6346_v38 = vld [vmem:[#allocation4 + $0x31] sm:$0xff] }
 0x2a9   : > { %v5818_v27 = vld [vmem:[#allocation4 + $0xc2] sm:$0xff]  ;;  %v5819_v33 = vld [vmem:[#allocation4 + $0xca] sm:$0xff]  ;;  %v11128_v20 = vpack.c.bf16 %v4554_v40, %v4553_v28  ;;  %v4391_v42 = vadd.f32 %v10952_v23, %v4356_v21  ;;  %v11213_v5 = vpack.c.bf16 %v4500_v52, %v4499_v46  ;;  %v4981_v36 = vld [vmem:[#allocation4 + $0x3a] sm:$0xff] }
 0x2aa   : > { %v11130_v4 = vpack.c.bf16 %v5819_v33, %v5818_v27  ;;  %v4555_v51 = vld [vmem:[#allocation4 + $0xd1] sm:$0xff]  ;;  %v4504_v8 = vld [vmem:[#allocation4 + $0xa8] sm:$0xff]  ;;  %v4503_v50 = vld [vmem:[#allocation4 + $0xa0] sm:$0xff] }
 0x2ab   : > { %v4556_v26 = vld [vmem:[#allocation4 + $0xd9] sm:$0xff]  ;;  %7442 = vmatprep.mubr.msk.bf16.mxu1 %vm226_vm0, %v11128_v20  ;;  %v4419_v34 = vmax.f32 %v4391_v42, 0.0  ;;  %v11225_v28 = vpack.c.bf16 %v4504_v8, %v4503_v50  ;;  %v4508_v21 = vld [vmem:[#allocation4 + $0xc8] sm:$0xff]  ;;  %v4505_v40 = vld [vmem:[#allocation4 + $0xb0] sm:$0xff] }
 0x2ac   : > { %v4273_v16 = vld [vmem:[#allocation3 + $0x1b0] ss:$2 sm:$0x3f]  ;;  %v4329_v19 = vld [vmem:[#allocation3 + $0x1b1] ss:$2 sm:$0x3f]  ;;  %7599 = vmatmul.mubr.msk.bf16.gmra.mrb[20].mxu0 %vm226_vm0, %v11130_v4  ;;  %v11137_v55 = vpack.c.bf16 %v4556_v26, %v4555_v51  ;;  %v11235_v27 = vpack.c.bf16 %v4506_v45, %v4505_v40 }
 0x2ad   : > { %v4357_v53 = vmax.f32 %v4273_v16, %v4329_v19  ;;  %4481 = vst.msk [vmem:[#allocation4 + $0xe1] sm:$0xff] %vm226_vm0, %v4419_v34  ;;  %v5820_v48 = vld [vmem:[#allocation4 + $0xd2] sm:$0xff]  ;;  %v4507_v33 = vld [vmem:[#allocation4 + $0xc0] sm:$0xff]  ;;  %v4975_v42 = vld [vmem:[#allocation4 + $0xa] sm:$0xff] }
 0x2ae   : > { %v11237_v51 = vpack.c.bf16 %v4508_v21, %v4507_v33  ;;  %v4510_v26 = vld [vmem:[#allocation4 + $0xd8] sm:$0xff]  ;;  %v4509_v16 = vld [vmem:[#allocation4 + $0xd0] sm:$0xff]  ;;  %v5002_v34 = vpack.c.bf16 %v4975_v42, %v4974_v63  ;;  %v6344_v57 = vld [vmem:[#allocation4 + $0x21] sm:$0xff] }
 0x2af   : > { %v4392_v32 = vadd.f32 %v10952_v23, %v4357_v53  ;;  %7443 = vmatmul.mubr.msk.bf16.gmra.mrb[24].mxu1 %vm226_vm0, %v11137_v55  ;;  %v7956_v23 = vld [vmem:[%s11456_s3 + $0x28] sm:$0xff]   ;;  %v11247_v19 = vpack.c.bf16 %v4510_v26, %v4509_v16  ;;  %v4985_v8 = vld [vmem:[#allocation4 + $0x5a] sm:$0xff]  ;;  %v4984_v50 = vld [vmem:[#allocation4 + $0x52] sm:$0xff] }
 0x2b0   : > { %7450 = vmatprep.mubr.msk.bf16.mxu1 %vm226_vm0, %v4511_v22  ;;  %v4982_v18 = vld [vmem:[#allocation4 + $0x42] sm:$0xff]  ;;  %v4987_v11 = vld [vmem:[#allocation4 + $0x6a] sm:$0xff]  ;;  %v11289_v45 = vpack.c.bf16 %v4985_v8, %v4984_v50  ;;  %v6351_v33 = vld [vmem:[#allocation4 + $0x59] sm:$0xff] }
 0x2b1   : > { %v4420_v30 = vmax.f32 %v4392_v32, 0.0  ;;  %v11277_v12 = vpack.c.bf16 %v4983_v54, %v4982_v18  ;;  %v6349_v59 = vld [vmem:[#allocation4 + $0x49] sm:$0xff]  ;;  %v6348_v15 = vld [vmem:[#allocation4 + $0x41] sm:$0xff]  ;;  %v6350_v63 = vld [vmem:[#allocation4 + $0x51] sm:$0xff] }
 0x2b2   : > { %v7961_v46 = vld [vmem:[%s11456_s3 + $0x88] sm:$0xff]   ;;  %v6374_v13 = vpack.c.bf16 %v6349_v59, %v6348_v15  ;;  %v6375_v42 = vpack.c.bf16 %v6351_v33, %v6350_v63  ;;  %v6370_v15 = vld [vmem:[#allocation4 + $0xf1] sm:$0xff] }
 0x2b3   : > { %4482 = vst.msk [vmem:[#allocation4 + $0xe9] sm:$0x3f] %vm230_vm1, %v4420_v30  ;;  %v4977_v30 = vld [vmem:[#allocation4 + $0x1a] sm:$0xff]  ;;  %v4986_v21 = vld [vmem:[#allocation4 + $0x62] sm:$0xff] }
 0x2b4   : > { %v5821_v49 = vld [vmem:[#allocation4 + $0xda] sm:$0xff]  ;;  %v11291_v40 = vpack.c.bf16 %v4987_v11, %v4986_v21  ;;  %v6353_v26 = vld [vmem:[#allocation4 + $0x69] sm:$0xff] }
 0x2b5   : > { %v11147_v56 = vpack.c.bf16 %v5821_v49, %v5820_v48  ;;  %v6094_v22 = vld [vmem:[#allocation4 + $0xe0] sm:$0xff]  ;;  %v6097_v48 = vld [vmem:[#allocation4 + $0xf8] sm:$0xff]  ;;  %v5003_v49 = vpack.c.bf16 %v4977_v30, %v4976_v7  ;;  %v6361_v54 = vld [vmem:[#allocation4 + $0xa9] sm:$0xff] }
 0x2b6   : > { %v6352_v16 = vld [vmem:[#allocation4 + $0x61] sm:$0xff] }
 0x2b7   : > { %7451 = vmatmul.mubr.msk.bf16.vlgmr.msra.gmra.mrb[0].mxu1 %vm226_vm0, %v11145_v41  ;;  %7602 = vmatprep.mubr.msk.bf16.mxu0 %vm226_vm0, %v11147_v56 }
 0x2b8   : > { %7479 = vmatpush3.bf16.msra.mxu1 %v8010_v14  ;;  %7454 = vmatprep.mubr.msk.bf16.mxu1 %vm226_vm0, %v11152_v29  ;;  %v11261_v14 = vpack.c.bf16 %v4979_v1, %v4978_v6  ;;  %v4990_v1 = vld [vmem:[#allocation4 + $0x82] sm:$0xff] }
 0x2b9   : > { %7480 = vmatprep.subr.bf16.mxu1 %v7956_v23 }
 0x2ba   : > { %v5822_v0 = vld [vmem:[#allocation4 + $0xe2] sm:$0xff]  ;;  %v5823_v39 = vld [vmem:[#allocation4 + $0xea] sm:$0xff] }
 0x2bb   : > { %v11163_v24 = vpack.c.bf16 %v5823_v39, %v5822_v0  ;;  %v6095_v53 = vld [vmem:[#allocation4 + $0xe8] sm:$0xff]  ;;  %v6111_v0 = vpack.c.bf16 %v6097_v48, %v6096_v43  ;;  %v6355_v43 = vld [vmem:[#allocation4 + $0x79] sm:$0xff] }
 0x2bc   : > { %7481 = vmatpush3.bf16.msra.mxu1 %v7956_v23  ;;  %v11252_v32 = vpack.c.bf16 %v6095_v53, %v6094_v22  ;;  %v7960_v23 = vld [vmem:[%s11456_s3 + $0x38] sm:$0xff]   ;;  %v6345_v39 = vld [vmem:[#allocation4 + $0x29] sm:$0xff] }
 0x2bd   : > { %7603 = vmatmul.mubr.msk.bf16.gmra.mrb[24].mxu0 %vm226_vm0, %v11163_v24  ;;  %7510 = vmatprep.subr.bf16.mxu1 %v11168_v44  ;;  %v6372_v17 = vpack.c.bf16 %v6345_v39, %v6344_v57  ;;  %v4991_v53 = vld [vmem:[#allocation4 + $0x8a] sm:$0xff]  ;;  %v4988_v22 = vld [vmem:[#allocation4 + $0x72] sm:$0xff]  ;;  %v4993_v39 = vld [vmem:[#allocation4 + $0x9a] sm:$0xff] }
 0x2be   : > { %7610 = vmatprep.mubr.msk.bf16.mxu0 %vm226_vm0, %v11152_v29  ;;  %v5010_v7 = vpack.c.bf16 %v4991_v53, %v4990_v1  ;;  %v6357_v48 = vld [vmem:[#allocation4 + $0x89] sm:$0xff]  ;;  %v4992_v57 = vld [vmem:[#allocation4 + $0x92] sm:$0xff] }
 0x2bf   : > { %7455 = vmatmul.mubr.msk.bf16.gmra.mrb[4].mxu1 %vm226_vm0, %v11174_v31 }
 0x2c0   : > { %7458 = vmatprep.mubr.msk.bf16.mxu1 %vm226_vm0, %v11177_v58 }
 0x2c5   : > { %7611 = vmatmul.mubr.msk.bf16.vlgmr.msra.gmra.mrb[0].mxu0 %vm226_vm0, %v11174_v31 }
 0x2c6   : > { %7614 = vmatprep.mubr.msk.bf16.mxu0 %vm226_vm0, %v11177_v58  ;;  %7639 = vmatpush3.bf16.msra.mxu0 %v8011_v10  ;;  %v6347_v10 = vld [vmem:[#allocation4 + $0x39] sm:$0xff] }
 0x2c7   : > { %7640 = vmatprep.subr.bf16.mxu0 %v7957_v60  ;;  %7459 = vmatmul.mubr.msk.bf16.gmra.mrb[8].mxu1 %vm226_vm0, %v11193_v2  ;;  %v6373_v52 = vpack.c.bf16 %v6347_v10, %v6346_v38  ;;  %v6360_v10 = vld [vmem:[#allocation4 + $0xa1] sm:$0xff] }
 0x2c8   : > { %7462 = vmatprep.mubr.msk.bf16.mxu1 %vm226_vm0, %v11200_v61  ;;  %v6380_v59 = vpack.c.bf16 %v6361_v54, %v6360_v10  ;;  %v6368_v38 = vld [vmem:[#allocation4 + $0xe1] sm:$0xff] }
 0x2ca   : > { %7641 = vmatpush3.bf16.msra.mxu0 %v7957_v60  ;;  %v4980_v60 = vld [vmem:[#allocation4 + $0x32] sm:$0xff] }
 0x2cb   : > { %7670 = vmatprep.subr.bf16.mxu0 %v11198_v25  ;;  %v11269_v35 = vpack.c.bf16 %v4981_v36, %v4980_v60  ;;  %v6359_v36 = vld [vmem:[#allocation4 + $0x99] sm:$0xff]  ;;  %v6358_v60 = vld [vmem:[#allocation4 + $0x91] sm:$0xff] }
 0x2cc   : > { %v6379_v18 = vpack.c.bf16 %v6359_v36, %v6358_v60 }
 0x2cd   : > { %7615 = vmatmul.mubr.msk.bf16.gmra.mrb[4].mxu0 %vm226_vm0, %v11193_v2 }
 0x2ce   : > { %7618 = vmatprep.mubr.msk.bf16.mxu0 %vm226_vm0, %v11200_v61 }
 0x2cf   : > { %7463 = vmatmul.mubr.msk.bf16.gmra.mrb[12].mxu1 %vm226_vm0, %v11211_v37 }
 0x2d0   : > { %7466 = vmatprep.mubr.msk.bf16.mxu1 %vm226_vm0, %v11213_v5 }
 0x2d5   : > { %7619 = vmatmul.mubr.msk.bf16.gmra.mrb[8].mxu0 %vm226_vm0, %v11211_v37 }
 0x2d6   : > { %7622 = vmatprep.mubr.msk.bf16.mxu0 %vm226_vm0, %v11213_v5 }
 0x2d7   : > { %7467 = vmatmul.mubr.msk.bf16.gmra.mrb[16].mxu1 %vm226_vm0, %v11223_v47 }
 0x2d8   : > { %7470 = vmatprep.mubr.msk.bf16.mxu1 %vm226_vm0, %v11225_v28 }
 0x2dd   : > { %7623 = vmatmul.mubr.msk.bf16.gmra.mrb[12].mxu0 %vm226_vm0, %v11223_v47 }
 0x2de   : > { %7626 = vmatprep.mubr.msk.bf16.mxu0 %vm226_vm0, %v11225_v28 }
 0x2df   : > { %7471 = vmatmul.mubr.msk.bf16.gmra.mrb[20].mxu1 %vm226_vm0, %v11235_v27 }
 0x2e0   : > { %7474 = vmatprep.mubr.msk.bf16.mxu1 %vm226_vm0, %v11237_v51 }
 0x2e5   : > { %7627 = vmatmul.mubr.msk.bf16.gmra.mrb[16].mxu0 %vm226_vm0, %v11235_v27 }
 0x2e6   : > { %7630 = vmatprep.mubr.msk.bf16.mxu0 %vm226_vm0, %v11237_v51 }
 0x2e7   : > { %7475 = vmatmul.mubr.msk.bf16.gmra.mrb[24].mxu1 %vm226_vm0, %v11247_v19 }
 0x2e8   : > { %7482 = vmatprep.mubr.msk.bf16.mxu1 %vm226_vm0, %v5002_v34  ;;  %v6376_v34 = vpack.c.bf16 %v6353_v26, %v6352_v16 }
 0x2ed   : > { %7631 = vmatmul.mubr.msk.bf16.gmra.mrb[20].mxu0 %vm226_vm0, %v11247_v19 }
 0x2ee   : > { %7634 = vmatprep.mubr.msk.bf16.mxu0 %vm226_vm0, %v11252_v32 }
 0x2ef   : > { %7483 = vmatmul.mubr.msk.bf16.vlgmr.msra.gmra.mrb[0].mxu1 %vm226_vm0, %v5003_v49  ;;  %v6354_v49 = vld [vmem:[#allocation4 + $0x71] sm:$0xff] }
 0x2f0   : > { %7511 = vmatpush3.bf16.msra.mxu1 %v11168_v44  ;;  %7486 = vmatprep.mubr.msk.bf16.mxu1 %vm226_vm0, %v11261_v14  ;;  %v11274_v44 = vld [vmem:[%s11456_s3 + $0x40] sm:$0xff]   ;;  %v6377_v6 = vpack.c.bf16 %v6355_v43, %v6354_v49 }
 0x2f1   : > { %7512 = vmatprep.subr.bf16.mxu1 %v7960_v23 }
 0x2f4   : > { %7513 = vmatpush3.bf16.msra.mxu1 %v7960_v23  ;;  %v6356_v23 = vld [vmem:[#allocation4 + $0x81] sm:$0xff] }
 0x2f5   : > { %7635 = vmatmul.mubr.msk.bf16.gmra.mrb[24].mxu0 %vm226_vm0, %v6111_v0  ;;  %7702 = vmatprep.subr.bf16.mxu1 %v11274_v44  ;;  %v6378_v0 = vpack.c.bf16 %v6357_v48, %v6356_v23 }
 0x2f6   : > { %7642 = vmatprep.mubr.msk.bf16.mxu0 %vm226_vm0, %v6372_v17  ;;  %v5011_v17 = vpack.c.bf16 %v4993_v39, %v4992_v57 }
 0x2f7   : > { %7487 = vmatmul.mubr.msk.bf16.gmra.mrb[4].mxu1 %vm226_vm0, %v11269_v35 }
 0x2f8   : > { %7490 = vmatprep.mubr.msk.bf16.mxu1 %vm226_vm0, %v11277_v12 }
 0x2fd   : > { %7643 = vmatmul.mubr.msk.bf16.vlgmr.msra.gmra.mrb[0].mxu0 %vm226_vm0, %v6373_v52 }
 0x2fe   : > { %7646 = vmatprep.mubr.msk.bf16.mxu0 %vm226_vm0, %v6374_v13  ;;  %7671 = vmatpush3.bf16.msra.mxu0 %v11198_v25  ;;  %v4989_v25 = vld [vmem:[#allocation4 + $0x7a] sm:$0xff] }
 0x2ff   : > { %7672 = vmatprep.subr.bf16.mxu0 %v7961_v46  ;;  %7491 = vmatmul.mubr.msk.bf16.gmra.mrb[8].mxu1 %vm226_vm0, %v11289_v45  ;;  %v5009_v30 = vpack.c.bf16 %v4989_v25, %v4988_v22 }
 0x300   : > { %7494 = vmatprep.mubr.msk.bf16.mxu1 %vm226_vm0, %v11291_v40 }
 0x302   : > { %7673 = vmatpush3.bf16.msra.mxu0 %v7961_v46  ;;  %v6371_v46 = vld [vmem:[#allocation4 + $0xf9] sm:$0xff] }
 0x303   : > { %v6385_v13 = vpack.c.bf16 %v6371_v46, %v6370_v15 }
 0x305   : > { %7647 = vmatmul.mubr.msk.bf16.gmra.mrb[4].mxu0 %vm226_vm0, %v6375_v42 }
 0x306   : > { %7650 = vmatprep.mubr.msk.bf16.mxu0 %vm226_vm0, %v6376_v34 }
 0x307   : > { %7495 = vmatmul.mubr.msk.bf16.gmra.mrb[12].mxu1 %vm226_vm0, %v5009_v30 }
 0x308   : > { %7498 = vmatprep.mubr.msk.bf16.mxu1 %vm226_vm0, %v5010_v7 }
 0x30d   : > { %7651 = vmatmul.mubr.msk.bf16.gmra.mrb[8].mxu0 %vm226_vm0, %v6377_v6 }
 0x30e   : > { %7654 = vmatprep.mubr.msk.bf16.mxu0 %vm226_vm0, %v6378_v0 }
 0x30f   : > { %7499 = vmatmul.mubr.msk.bf16.gmra.mrb[16].mxu1 %vm226_vm0, %v5011_v17 }
 0x310   : > { %7502 = vmatprep.mubr.msk.bf16.mxu1 %vm226_vm0, %v11100_v9  ;;  %v6369_v9 = vld [vmem:[#allocation4 + $0xe9] sm:$0xff] }
 0x311   : > { %v6384_v52 = vpack.c.bf16 %v6369_v9, %v6368_v38  ;;  %v6992_v38 = vld [vmem:[%s11399_s28] sm:$0xf] }
 0x315   : > { %7655 = vmatmul.mubr.msk.bf16.gmra.mrb[12].mxu0 %vm226_vm0, %v6379_v18 }
 0x316   : > { %7658 = vmatprep.mubr.msk.bf16.mxu0 %vm226_vm0, %v6380_v59 }
 0x317   : > { %7503 = vmatmul.mubr.msk.bf16.gmra.mrb[20].mxu1 %vm226_vm0, %v11122_v62 }
 0x318   : > { %7506 = vmatprep.mubr.msk.bf16.mxu1 %vm226_vm0, %v11130_v4 }
 0x31d   : > { %7659 = vmatmul.mubr.msk.bf16.gmra.mrb[16].mxu0 %vm226_vm0, %v11120_v3 }
 0x31e   : > { %7662 = vmatprep.mubr.msk.bf16.mxu0 %vm226_vm0, %v11128_v20 }
 0x31f   : > { %7507 = vmatmul.mubr.msk.bf16.gmra.mrb[24].mxu1 %vm226_vm0, %v11147_v56 }
 0x320   : > { %7514 = vmatprep.mubr.msk.bf16.mxu1 %vm226_vm0, %v11145_v41  ;;  %v8013_v41 = vld [vmem:[%s11456_s3 + $0x48] sm:$0xff]  }
 0x325   : > { %7663 = vmatmul.mubr.msk.bf16.gmra.mrb[20].mxu0 %vm226_vm0, %v11137_v55 }
 0x326   : > { %7666 = vmatprep.mubr.msk.bf16.mxu0 %vm226_vm0, %v6384_v52 }
 0x327   : > { %7515 = vmatmul.mubr.msk.bf16.vlgmr.msra.gmra.mrb[0].mxu1 %vm226_vm0, %v11152_v29  ;;  %v6635_v29 = vld [vmem:[#allocation4 + $0xaa] sm:$0xff] }
 0x328   : > { %7704 = vmatpush3.bf16.msra.mxu1 %v11274_v44  ;;  %7518 = vmatprep.mubr.msk.bf16.mxu1 %vm226_vm0, %v11174_v31  ;;  %v6634_v31 = vld [vmem:[#allocation4 + $0xa2] sm:$0xff] }
 0x329   : > { %7703 = vmatprep.subr.bf16.mxu1 %v8013_v41 }
 0x32c   : > { %7705 = vmatpush3.bf16.msra.mxu1 %v8013_v41 }
 0x32d   : > { %7667 = vmatmul.mubr.msk.bf16.gmra.mrb[24].mxu0 %vm226_vm0, %v6385_v13 }
 0x32e   : > { %7674 = vmatprep.mubr.msk.bf16.mxu0 %vm226_vm0, %v11261_v14 }
 0x32f   : > { %7519 = vmatmul.mubr.msk.bf16.gmra.mrb[4].mxu1 %vm226_vm0, %v11177_v58  ;;  %v6654_v58 = vpack.c.bf16 %v6635_v29, %v6634_v31 }
 0x330   : > { %7522 = vmatprep.mubr.msk.bf16.mxu1 %vm226_vm0, %v11193_v2  ;;  %v6644_v2 = vld [vmem:[#allocation4 + $0xf2] sm:$0xff] }
 0x335   : > { %7675 = vmatmul.mubr.msk.bf16.vlgmr.msra.gmra.mrb[0].mxu0 %vm226_vm0, %v11269_v35 }
 0x336   : > { %7678 = vmatprep.mubr.msk.bf16.mxu0 %vm226_vm0, %v11277_v12 }
 0x337   : > { %7523 = vmatmul.mubr.msk.bf16.gmra.mrb[8].mxu1 %vm226_vm0, %v11200_v61  ;;  %v6645_v61 = vld [vmem:[#allocation4 + $0xfa] sm:$0xff] }
 0x338   : > { %7526 = vmatprep.mubr.msk.bf16.mxu1 %vm226_vm0, %v11211_v37  ;;  %v6659_v37 = vpack.c.bf16 %v6645_v61, %v6644_v2 }
 0x33d   : > { %7679 = vmatmul.mubr.msk.bf16.gmra.mrb[4].mxu0 %vm226_vm0, %v11289_v45 }
 0x33e   : > { %7682 = vmatprep.mubr.msk.bf16.mxu0 %vm226_vm0, %v11291_v40 }
 0x33f   : > { %7527 = vmatmul.mubr.msk.bf16.gmra.mrb[12].mxu1 %vm226_vm0, %v11213_v5 }
 0x340   : > { %7530 = vmatprep.mubr.msk.bf16.mxu1 %vm226_vm0, %v11223_v47 }
 0x345   : > { %7683 = vmatmul.mubr.msk.bf16.gmra.mrb[8].mxu0 %vm226_vm0, %v5009_v30  ;;  %v11392_v30 = vld [vmem:[%s11457_s4] ss:$0 sm:$0xff] }
 0x346   : > { %7686 = vmatprep.mubr.msk.bf16.mxu0 %vm226_vm0, %v5010_v7 }
 0x347   : > { %7531 = vmatmul.mubr.msk.bf16.gmra.mrb[16].mxu1 %vm226_vm0, %v11225_v28 }
 0x348   : > { %7534 = vmatprep.mubr.msk.bf16.mxu1 %vm226_vm0, %v11235_v27 }
 0x34d   : > { %7687 = vmatmul.mubr.msk.bf16.gmra.mrb[12].mxu0 %vm226_vm0, %v5011_v17 }
 0x34e   : > { %7690 = vmatprep.mubr.msk.bf16.mxu0 %vm226_vm0, %v6654_v58 }
 0x34f   : > { %7535 = vmatmul.mubr.msk.bf16.gmra.mrb[20].mxu1 %vm226_vm0, %v11237_v51 }
 0x350   : > { %7538 = vmatprep.mubr.msk.bf16.mxu1 %vm226_vm0, %v11247_v19 }
 0x355   : > { %7691 = vmatmul.mubr.msk.bf16.gmra.mrb[16].mxu0 %vm226_vm0, %v11122_v62 }
 0x356   : > { %7694 = vmatprep.mubr.msk.bf16.mxu0 %vm226_vm0, %v11130_v4 }
 0x357   : > { %7539 = vmatmul.mubr.msk.bf16.gmra.mrb[24].mxu1 %vm226_vm0, %v11252_v32 }
 0x358   : > { %7562 = vmatprep.mubr.msk.bf16.mxu1 %vm226_vm0, %v6379_v18 }
 0x35d   : > { %7695 = vmatmul.mubr.msk.bf16.gmra.mrb[20].mxu0 %vm226_vm0, %v11147_v56 }
 0x35e   : > { %7698 = vmatprep.mubr.msk.bf16.mxu0 %vm226_vm0, %v11163_v24 }
 0x35f   : > { %7563 = vmatmul.mubr.msk.bf16.vlgmr.msra.gmra.mrb[16].mxu1 %vm226_vm0, %v6380_v59 }
 0x360   : > { %7566 = vmatprep.mubr.msk.bf16.mxu1 %vm226_vm0, %v11120_v3 }
 0x365   : > { %7699 = vmatmul.mubr.msk.bf16.gmra.mrb[24].mxu0 %vm226_vm0, %v6659_v37 }
 0x367   : > { %7567 = vmatmul.mubr.msk.bf16.gmra.mrb[20].mxu1 %vm226_vm0, %v11128_v20 }
 0x368   : > { %7570 = vmatprep.mubr.msk.bf16.mxu1 %vm226_vm0, %v11137_v55 }
 0x36f   : > { %7571 = vmatmul.mubr.msk.bf16.gmra.mrb[24].mxu1 %vm226_vm0, %v6384_v52 }
 0x3fa   : > { %v7516_v62 = vpop.f32.mrb[0].mxu1 }
 0x3fb   : > { %v5383_v4 = vpop.f32.mrb[1].mxu1 }
 0x3fc   : > { %v7517_v56 = vpop.f32.mrb[2].mxu1 }
 0x3fd   : > { %v5386_v24 = vpop.f32.mrb[3].mxu1 }
 0x402   : > { %v7520_v5 = vpop.f32.mrb[4].mxu1 }
 0x403   : > { %v5399_v47 = vpop.f32.mrb[5].mxu1 }
 0x404   : > { %v7521_v28 = vpop.f32.mrb[6].mxu1 }
 0x405   : > { %v5402_v27 = vpop.f32.mrb[7].mxu1 }
 0x408   : > { %v7676_v51 = vpop.f32.mrb[0].mxu0 }
 0x409   : > { %v7706_v3 = vadd.f32 %v7676_v51, %v7516_v62  ;;  %v6753_v19 = vpop.f32.mrb[1].mxu0 }
 0x40a   : > { %v7707_v32 = vadd.f32 %v6753_v19, %v5383_v4  ;;  %v7677_v14 = vpop.f32.mrb[2].mxu0  ;;  %v7524_v55 = vpop.f32.mrb[8].mxu1 }
 0x40b   : > { %v7708_v20 = vadd.f32 %v7677_v14, %v7517_v56  ;;  %v6756_v35 = vpop.f32.mrb[3].mxu0  ;;  %v5415_v8 = vpop.f32.mrb[9].mxu1 }
 0x40c   : > { %v6892_v44 = vmax.f32 %v7707_v32, %v7706_v3  ;;  %v7709_v12 = vadd.f32 %v6756_v35, %v5386_v24  ;;  %v7525_v50 = vpop.f32.mrb[10].mxu1 }
 0x40d   : > { %v5418_v45 = vpop.f32.mrb[11].mxu1 }
 0x40e   : > { %6895 = vst.msk [vmem:[#allocation5] sm:$0xff] %vm6894_vm3, %v6892_v44  ;;  %v6893_v11 = vmax.f32 %v7709_v12, %v7708_v20 }
 0x410   : > { %6896 = vst.msk [vmem:[#allocation5 + $0x8] sm:$0xff] %vm6894_vm3, %v6893_v11  ;;  %v7680_v21 = vpop.f32.mrb[4].mxu0  ;;  %v6998_v11 = vld [vmem:[%s11399_s28 + $0x8] sm:$0xf] }
 0x411   : > { %v7710_v40 = vadd.f32 %v7680_v21, %v7520_v5  ;;  %v6769_v33 = vpop.f32.mrb[5].mxu0 }
 0x412   : > { %v7711_v26 = vadd.f32 %v6769_v33, %v5399_v47  ;;  %v7681_v63 = vpop.f32.mrb[6].mxu0  ;;  %v7528_v25 = vpop.f32.mrb[12].mxu1 }
 0x413   : > { %v7712_v42 = vadd.f32 %v7681_v63, %v7521_v28  ;;  %v6772_v16 = vpop.f32.mrb[7].mxu0  ;;  %v5431_v22 = vpop.f32.mrb[13].mxu1  ;;  %v6995_v28 = vld [vmem:[%s11399_s28 + $0x4] sm:$0xf] }
 0x414   : > { %v6897_v34 = vmax.f32 %v7711_v26, %v7710_v40  ;;  %v7713_v53 = vadd.f32 %v6772_v16, %v5402_v27  ;;  %v7529_v7 = vpop.f32.mrb[14].mxu1 }
 0x415   : > { %v5434_v6 = vpop.f32.mrb[15].mxu1 }
 0x416   : > { %6900 = vst.msk [vmem:[#allocation5 + $0x10] sm:$0xff] %vm6894_vm3, %v6897_v34  ;;  %v6898_v1 = vmax.f32 %v7713_v53, %v7712_v42 }
 0x417   : > { %v6927_v43 = vld [vmem:[#allocation5] ss:$2 sm:$0x7f]  ;;  %v6941_v48 = vld [vmem:[#allocation5 + $0x1] ss:$2 sm:$0x7f] }
 0x418   : > { %v6954_v49 = vmax.f32 %v6927_v43, %v6941_v48  ;;  %6901 = vst.msk [vmem:[#allocation5 + $0x18] sm:$0xff] %vm6894_vm3, %v6898_v1  ;;  %v7684_v23 = vpop.f32.mrb[8].mxu0 }
 0x419   : > { %v7714_v0 = vadd.f32 %v7684_v23, %v7524_v55  ;;  %v6785_v39 = vpop.f32.mrb[9].mxu0 }
 0x41a   : > { %v6968_v57 = vadd.f32 %v11392_v30, %v6954_v49  ;;  %v7715_v17 = vadd.f32 %v6785_v39, %v5415_v8  ;;  %v7685_v36 = vpop.f32.mrb[10].mxu0 }
 0x41b   : > { %v7716_v54 = vadd.f32 %v7685_v36, %v7525_v50  ;;  %v6788_v60 = vpop.f32.mrb[11].mxu0 }
 0x41c   : > { %v6975_v18 = vmax.f32 %v6968_v57, 0.0  ;;  %v6902_v10 = vmax.f32 %v7715_v17, %v7714_v0  ;;  %v7717_v59 = vadd.f32 %v6788_v60, %v5418_v45 }
 0x41e   : > { %v6982_v52 = vpack.c.bf16 %v6975_v18, %v6975_v18  ;;  %6905 = vst.msk [vmem:[#allocation5 + $0x20] sm:$0xff] %vm6894_vm3, %v6902_v10  ;;  %v6903_v15 = vmax.f32 %v7717_v59, %v7716_v54 }
 0x41f   : > { %v6929_v46 = vld [vmem:[#allocation5 + $0x10] ss:$2 sm:$0x7f]  ;;  %v6943_v13 = vld [vmem:[#allocation5 + $0x11] ss:$2 sm:$0x7f] }
 0x420   : > { %v6993_v41 = vsel %vm11402_vm6, %v6982_v52, %v6992_v38  ;;  %v6955_v29 = vmax.f32 %v6929_v46, %v6943_v13  ;;  %6906 = vst.msk [vmem:[#allocation5 + $0x28] sm:$0xff] %vm6894_vm3, %v6903_v15  ;;  %v7688_v31 = vpop.f32.mrb[12].mxu0 }
 0x421   : > { %6994 = vst [vmem:[%s11399_s28] sm:$0xf] %v6993_v41  ;;  %v7718_v58 = vadd.f32 %v7688_v31, %v7528_v25  ;;  %v6801_v2 = vpop.f32.mrb[13].mxu0 }
 0x422   : > { %v6969_v61 = vadd.f32 %v11392_v30, %v6955_v29  ;;  %v7719_v37 = vadd.f32 %v6801_v2, %v5431_v22  ;;  %v7689_v62 = vpop.f32.mrb[14].mxu0  ;;  %v7001_v22 = vld [vmem:[%s11399_s28 + $0xc] sm:$0xf] }
 0x423   : > { %v7720_v4 = vadd.f32 %v7689_v62, %v7529_v7  ;;  %v6804_v56 = vpop.f32.mrb[15].mxu0 }
 0x424   : > { %v6976_v24 = vmax.f32 %v6969_v61, 0.0  ;;  %v6907_v5 = vmax.f32 %v7719_v37, %v7718_v58  ;;  %v7721_v47 = vadd.f32 %v6804_v56, %v5434_v6 }
 0x426   : > { %v6983_v27 = vpack.c.bf16 %v6976_v24, %v6976_v24  ;;  %6910 = vst.msk [vmem:[#allocation5 + $0x30] sm:$0xff] %vm6894_vm3, %v6907_v5  ;;  %v6908_v51 = vmax.f32 %v7721_v47, %v7720_v4 }
 0x427   : > { %v6931_v3 = vld [vmem:[#allocation5 + $0x20] ss:$2 sm:$0x7f]  ;;  %v6945_v19 = vld [vmem:[#allocation5 + $0x21] ss:$2 sm:$0x7f] }
 0x428   : > { %v6996_v32 = vsel %vm11402_vm6, %v6983_v27, %v6995_v28  ;;  %v6956_v14 = vmax.f32 %v6931_v3, %v6945_v19  ;;  %6911 = vst.msk [vmem:[#allocation5 + $0x38] sm:$0xff] %vm6894_vm3, %v6908_v51  ;;  %v7692_v20 = vpop.f32.mrb[16].mxu0  ;;  %v7004_v19 = vld [vmem:[%s11399_s28 + $0x10] sm:$0xf] }
 0x429   : > { %6997 = vst [vmem:[%s11399_s28 + $0x4] sm:$0xf] %v6996_v32  ;;  %v6817_v35 = vpop.f32.mrb[17].mxu0 }
 0x42a   : > { %v6970_v44 = vadd.f32 %v11392_v30, %v6956_v14  ;;  %v7693_v55 = vpop.f32.mrb[18].mxu0 }
 0x42b   : > { %v6820_v12 = vpop.f32.mrb[19].mxu0 }
 0x42c   : > { %v6977_v8 = vmax.f32 %v6970_v44, 0.0 }
 0x42e   : > { %v6984_v50 = vpack.c.bf16 %v6977_v8, %v6977_v8 }
 0x42f   : > { %v6933_v45 = vld [vmem:[#allocation5 + $0x30] ss:$2 sm:$0x7f]  ;;  %v6947_v21 = vld [vmem:[#allocation5 + $0x31] ss:$2 sm:$0x7f] }
 0x430   : > { %v6999_v40 = vsel %vm11402_vm6, %v6984_v50, %v6998_v11  ;;  %v6957_v33 = vmax.f32 %v6933_v45, %v6947_v21  ;;  %v7696_v26 = vpop.f32.mrb[20].mxu0  ;;  %v7007_v11 = vld [vmem:[%s11399_s28 + $0x14] sm:$0xf] }
 0x431   : > { %7000 = vst [vmem:[%s11399_s28 + $0x8] sm:$0xf] %v6999_v40  ;;  %v6833_v63 = vpop.f32.mrb[21].mxu0 }
 0x432   : > { %v6971_v42 = vadd.f32 %v11392_v30, %v6957_v33  ;;  %v7697_v16 = vpop.f32.mrb[22].mxu0  ;;  %v7564_v53 = vpop.f32.mrb[16].mxu1 }
 0x433   : > { %v6836_v34 = vpop.f32.mrb[23].mxu0  ;;  %v7722_v1 = vadd.f32 %v7692_v20, %v7564_v53  ;;  %v5721_v7 = vpop.f32.mrb[17].mxu1 }
 0x434   : > { %v6978_v25 = vmax.f32 %v6971_v42, 0.0  ;;  %v7723_v48 = vadd.f32 %v6817_v35, %v5721_v7  ;;  %v7565_v49 = vpop.f32.mrb[18].mxu1  ;;  %v7010_v42 = vld [vmem:[%s11399_s28 + $0x18] sm:$0xf] }
 0x435   : > { %v7724_v6 = vadd.f32 %v7693_v55, %v7565_v49  ;;  %v5724_v23 = vpop.f32.mrb[19].mxu1 }
 0x436   : > { %v6985_v43 = vpack.c.bf16 %v6978_v25, %v6978_v25  ;;  %v6912_v39 = vmax.f32 %v7723_v48, %v7722_v1  ;;  %v7725_v57 = vadd.f32 %v6820_v12, %v5724_v23 }
 0x438   : > { %v7002_v0 = vsel %vm11402_vm6, %v6985_v43, %v7001_v22  ;;  %v7700_v17 = vpop.f32.mrb[24].mxu0  ;;  %6915 = vst.msk [vmem:[#allocation5 + $0x40] sm:$0xff] %vm6894_vm3, %v6912_v39  ;;  %v6913_v54 = vmax.f32 %v7725_v57, %v7724_v6 }
 0x439   : > { %7003 = vst [vmem:[%s11399_s28 + $0xc] sm:$0xf] %v7002_v0  ;;  %v6849_v36 = vpop.f32.mrb[25].mxu0 }
 0x43a   : > { %v7701_v60 = vpop.f32.mrb[26].mxu0  ;;  %6916 = vst.msk [vmem:[#allocation5 + $0x48] sm:$0xff] %vm6894_vm3, %v6913_v54  ;;  %v7568_v10 = vpop.f32.mrb[20].mxu1 }
 0x43b   : > { %v6852_v18 = vpop.f32.mrb[27].mxu0  ;;  %v7726_v59 = vadd.f32 %v7696_v26, %v7568_v10  ;;  %v5737_v38 = vpop.f32.mrb[21].mxu1 }
 0x43c   : > { %v7727_v52 = vadd.f32 %v6833_v63, %v5737_v38  ;;  %v7569_v15 = vpop.f32.mrb[22].mxu1 }
 0x43d   : > { %v7728_v46 = vadd.f32 %v7697_v16, %v7569_v15  ;;  %v5740_v13 = vpop.f32.mrb[23].mxu1 }
 0x43e   : > { %v6917_v41 = vmax.f32 %v7727_v52, %v7726_v59  ;;  %v7729_v29 = vadd.f32 %v6836_v34, %v5740_v13 }
 0x440   : > { %6920 = vst.msk [vmem:[#allocation5 + $0x50] sm:$0xff] %vm6894_vm3, %v6917_v41  ;;  %v6918_v31 = vmax.f32 %v7729_v29, %v7728_v46 }
 0x441   : > { %v6935_v58 = vld [vmem:[#allocation5 + $0x40] ss:$2 sm:$0x7f]  ;;  %v6949_v2 = vld [vmem:[#allocation5 + $0x41] ss:$2 sm:$0x7f] }
 0x442   : > { %v6958_v61 = vmax.f32 %v6935_v58, %v6949_v2  ;;  %6921 = vst.msk [vmem:[#allocation5 + $0x58] sm:$0xff] %vm6894_vm3, %v6918_v31  ;;  %v7572_v37 = vpop.f32.mrb[24].mxu1 }
 0x443   : > { %v7730_v62 = vadd.f32 %v7700_v17, %v7572_v37  ;;  %v5753_v4 = vpop.f32.mrb[25].mxu1 }
 0x444   : > { %v6972_v56 = vadd.f32 %v11392_v30, %v6958_v61  ;;  %v7731_v24 = vadd.f32 %v6849_v36, %v5753_v4  ;;  %v7573_v5 = vpop.f32.mrb[26].mxu1 }
 0x445   : > { %v7732_v47 = vadd.f32 %v7701_v60, %v7573_v5  ;;  %v5756_v28 = vpop.f32.mrb[27].mxu1 }
 0x446   : > { %v6979_v27 = vmax.f32 %v6972_v56, 0.0  ;;  %v6922_v51 = vmax.f32 %v7731_v24, %v7730_v62  ;;  %v7733_v3 = vadd.f32 %v6852_v18, %v5756_v28 }
 0x448   : > { %v6986_v32 = vpack.c.bf16 %v6979_v27, %v6979_v27  ;;  %6925 = vst.msk [vmem:[#allocation5 + $0x60] sm:$0xff] %vm6894_vm3, %v6922_v51  ;;  %v6923_v14 = vmax.f32 %v7733_v3, %v7732_v47 }
 0x449   : > { %v6937_v20 = vld [vmem:[#allocation5 + $0x50] ss:$2 sm:$0x7f]  ;;  %v6951_v35 = vld [vmem:[#allocation5 + $0x51] ss:$2 sm:$0x7f] }
 0x44a   : > { %v7005_v44 = vsel %vm11402_vm6, %v6986_v32, %v7004_v19  ;;  %v6959_v55 = vmax.f32 %v6937_v20, %v6951_v35  ;;  %6926 = vst.msk [vmem:[#allocation5 + $0x68] sm:$0xff] %vm6894_vm3, %v6923_v14 }
 0x44b   : > { %7006 = vst [vmem:[%s11399_s28 + $0x10] sm:$0xf] %v7005_v44 }
 0x44c   : > { %v6973_v12 = vadd.f32 %v11392_v30, %v6959_v55 }
 0x44e   : > { %v6980_v8 = vmax.f32 %v6973_v12, 0.0 }
 0x450   : > { %v6987_v50 = vpack.c.bf16 %v6980_v8, %v6980_v8 }
 0x451   : > { %v6939_v45 = vld [vmem:[#allocation5 + $0x60] ss:$2 sm:$0x7f]  ;;  %v6953_v21 = vld [vmem:[#allocation5 + $0x61] ss:$2 sm:$0x7f] }
 0x452   : > { %v7008_v40 = vsel %vm11402_vm6, %v6987_v50, %v7007_v11  ;;  %v6960_v33 = vmax.f32 %v6939_v45, %v6953_v21 }
 0x453   : > { %7009 = vst [vmem:[%s11399_s28 + $0x14] sm:$0xf] %v7008_v40 }
 0x454   : > { %v6974_v26 = vadd.f32 %v11392_v30, %v6960_v33 }
 0x456   : > { %v6981_v63 = vmax.f32 %v6974_v26, 0.0 }
 0x458   : > { %v6988_v16 = vpack.c.bf16 %v6981_v63, %v6981_v63 }
 0x45a   : > { %v7011_v34 = vsel %vm11402_vm6, %v6988_v16, %v7010_v42 }
 0x45b   : > { %7012 = vst [vmem:[%s11399_s28 + $0x18] sm:$0xf] %v7011_v34 }
 0x45c PF: > { %s15_s18 = sadd.s32 1, %s8020_s18  }
 0x45d   : > { %p12_p4 = scmp.ge.s32.totalorder %s15_s18, 4  }
 0x45f   :  { %14 = sbr.rel (!%p12_p4) target bundleno = 1 (0x1), region = 169 }

</bundles_post_ra>
